<compile_context>
chip_gen: v7x
topology: tpu7x:2x2x1
jax: 0.10.0
libtpu: 0.0.40
codegen_flags: <defaults>
</compile_context>

<pallas_src>
import functools

import jax
import jax.numpy as jnp
import numpy as np
from jax.experimental import pallas as pl
from jax.experimental.pallas import tpu as pltpu

H = W = 16
N = 2
C_IN, C1, C2, C_OUT = 3, 128, 64, 3
C_PAD = 8                      # conv3 output rows padded 3 -> 8 (unmasked vst)
K1 = 5 * 5 * C_IN              # 75   (conv1 contraction depth)
K1_PAD = 128                   # zero-padded lane-dense contraction depth
K2 = 9 * C1                    # 1152 (conv2 contraction depth)
EPS = 1e-5

assert W & (W - 1) == 0 and H & (H - 1) == 0, "kernel assumes H, W powers of two"
W_SHIFT = W.bit_length() - 1


def cnn_kernel(p1_ref, w1_ref, b1_ref, w2_ref, b2_ref, w3t_ref, b3_ref,
               res_ref, out_ref):
    M = p1_ref.shape[0]        # rows in this grid step (H*W or N*H*W)

    # ---- conv1 (5x5, pad 2) as one im2col matmul; BN1 folded into w1 --------
    acc1 = jnp.dot(p1_ref[...], w1_ref[...],
                   preferred_element_type=jnp.float32)          # (M, C1) f32
    y1 = jnp.maximum(acc1 + b1_ref[...], 0.0)                   # (M, C1) f32

    # ---- border masks, computed once -----------------------------------------
    # Row m is pixel (h, w) = ((m >> W_SHIFT) & (H-1), m & (W-1)) of its image,
    # so the same math covers the per-image and fused-batch grids; rows that
    # wrap across an image boundary under a roll land only on masked positions.
    m_idx = jax.lax.broadcasted_iota(jnp.int32, (M, 1), 0)
    h_idx = (m_idx >> W_SHIFT) & (H - 1)
    w_idx = m_idx & (W - 1)
    top = h_idx >= 1           # valid rows for oy = -1
    bot = h_idx <= H - 2       # valid rows for oy = +1
    left = w_idx >= 1          # valid cols for ox = -1
    right = w_idx <= W - 2     # valid cols for ox = +1
    row_m = {-1: top, 0: None, 1: bot}
    col_m = {-1: left, 0: None, 1: right}

    # ---- conv2 (3x3, pad 1): accumulate 9 tap matmuls (no p2 materialization) -
    acc2 = jnp.zeros((M, C2), jnp.float32)
    for t in range(9):
        oy, ox = t // 3 - 1, t % 3 - 1
        off = oy * W + ox
        tap = y1 if off == 0 else pltpu.roll(y1, (-off) % M, 0)  # tap[m]=y1[m+off]
        rm, cm = row_m[oy], col_m[ox]
        if rm is None:
            mask = cm
        elif cm is None:
            mask = rm
        else:
            mask = jnp.logical_and(rm, cm)
        if mask is not None:
            tap = jnp.where(mask, tap, 0.0)
        acc2 = acc2 + jnp.dot(tap.astype(jnp.bfloat16),
                              w2_ref[pl.ds(t * C1, C1), :],
                              preferred_element_type=jnp.float32)
    y2 = jnp.maximum(acc2 + b2_ref[...], 0.0)                    # (M, C2) f32

    # ---- conv3 (1x1), transposed for a lane-dense (C_PAD, M) output ----------
    # y3t[c, m] = sum_k w3t[c, k] * y2[m, k]
    y3t = jax.lax.dot_general(w3t_ref[...], y2, (((1,), (1,)), ((), ())),
                              preferred_element_type=jnp.float32)
    out_ref[...] = y3t + b3_ref[...] + res_ref[...]


def _on_multi_tc_chip():
    """True on chips with >1 TensorCore per chip (v7x): keep batch-parallel grid."""
    try:
        kind = jax.devices()[0].device_kind.lower()
    except Exception:
        return False
    return ("v7" in kind) or ("7x" in kind)


@functools.partial(jax.jit, static_argnames=("batch_parallel",))
def _cnn_forward(x_nchw, kparams, batch_parallel):
    """x_nchw: (N, 3, H, W) float32. Returns (N, 3, H, W) float32."""
    w1, b1, w2, b2, w3t, b3 = kparams
    n = x_nchw.shape[0]
    m_total = n * H * W

    # conv1 im2col built in the wrapper (raw input is tiny), lane-dense bf16.
    x_nhwc = jnp.transpose(x_nchw, (0, 2, 3, 1)).astype(jnp.float32)
    xp = jnp.pad(x_nhwc, ((0, 0), (2, 2), (2, 2), (0, 0)))
    t1 = [xp[:, dy:dy + H, dx:dx + W, :] for dy in range(5) for dx in range(5)]
    p1 = jnp.concatenate(t1, axis=-1).reshape(m_total, K1)
    p1 = jnp.pad(p1, ((0, 0), (0, K1_PAD - K1))).astype(jnp.bfloat16)

    # Residual straight from NCHW, padded to C_PAD sublane rows: (C_PAD, N*H*W).
    res = jnp.transpose(x_nchw, (1, 0, 2, 3)).reshape(C_IN, m_total)
    res = jnp.pad(res.astype(jnp.float32), ((0, C_PAD - C_IN), (0, 0)))

    if batch_parallel:                      # v7x: one image per step -> 2 TCs
        grid, m_blk = (n,), H * W
    else:                                   # v5e/v6e: fuse batch into one step
        grid, m_blk = (1,), m_total

    out_flat = pl.pallas_call(
        cnn_kernel,
        out_shape=jax.ShapeDtypeStruct((C_PAD, m_total), jnp.float32),
        grid_spec=pltpu.PrefetchScalarGridSpec(
            num_scalar_prefetch=0,
            grid=grid,
            in_specs=[
                pl.BlockSpec((m_blk, K1_PAD), lambda i: (i, 0)),   # p1 (im2col)
                pl.BlockSpec((K1_PAD, C1), lambda i: (0, 0)),      # w1 (BN folded)
                pl.BlockSpec((1, C1), lambda i: (0, 0)),           # b1
                pl.BlockSpec((K2, C2), lambda i: (0, 0)),          # w2 (BN folded)
                pl.BlockSpec((1, C2), lambda i: (0, 0)),           # b2
                pl.BlockSpec((C_PAD, C2), lambda i: (0, 0)),       # w3 (T, padded)
                pl.BlockSpec((C_PAD, 1), lambda i: (0, 0)),        # b3 (padded)
                pl.BlockSpec((C_PAD, m_blk), lambda i: (0, i)),    # residual
            ],
            out_specs=pl.BlockSpec((C_PAD, m_blk), lambda i: (0, i)),
        ),
        compiler_params=pltpu.CompilerParams(
            dimension_semantics=("parallel",)),
    )(p1, w1, b1, w2, b2, w3t, b3, res)

    # (C_PAD, N*H*W) -> drop pad rows -> (N, C_OUT, H, W); tiny XLA rearrange.
    return out_flat[:C_OUT].reshape(C_OUT, n, H, W).transpose(1, 0, 2, 3)


def cnn_forward(x_nchw, kparams):
    return _cnn_forward(x_nchw, kparams, _on_multi_tc_chip())


def make_params():
    """Deterministic synthetic parameters (HWIO conv weights, BN params)."""
    keys = jax.random.split(jax.random.PRNGKey(0), 16)
    f32 = jnp.float32

    w1 = 0.05 * jax.random.normal(keys[0], (5, 5, C_IN, C1), f32)
    cb1 = 0.05 * jax.random.normal(keys[1], (C1,), f32)
    g1 = 1.0 + 0.1 * jax.random.normal(keys[2], (C1,), f32)
    be1 = 0.1 * jax.random.normal(keys[3], (C1,), f32)
    rm1 = 0.1 * jax.random.normal(keys[4], (C1,), f32)
    rv1 = 1.0 + 0.1 * jnp.abs(jax.random.normal(keys[5], (C1,), f32))

    w2 = 0.05 * jax.random.normal(keys[6], (3, 3, C1, C2), f32)
    cb2 = 0.05 * jax.random.normal(keys[7], (C2,), f32)
    g2 = 1.0 + 0.1 * jax.random.normal(keys[8], (C2,), f32)
    be2 = 0.1 * jax.random.normal(keys[9], (C2,), f32)
    rm2 = 0.1 * jax.random.normal(keys[10], (C2,), f32)
    rv2 = 1.0 + 0.1 * jnp.abs(jax.random.normal(keys[11], (C2,), f32))

    w3 = 0.05 * jax.random.normal(keys[12], (1, 1, C2, C_OUT), f32)
    cb3 = 0.05 * jax.random.normal(keys[13], (C_OUT,), f32)

    raw = (w1, cb1, g1, be1, rm1, rv1, w2, cb2, g2, be2, rm2, rv2, w3, cb3)

    # Fold eval-mode BN: scale goes into the matmul weights (f32 fold, then
    # bf16 cast); bias stays as a per-channel in-kernel add.
    scale1 = g1 / jnp.sqrt(rv1 + EPS)
    bias1 = be1 + scale1 * (cb1 - rm1)
    scale2 = g2 / jnp.sqrt(rv2 + EPS)
    bias2 = be2 + scale2 * (cb2 - rm2)

    w1_k = w1.reshape(K1, C1) * scale1[None, :]
    w1_k = jnp.pad(w1_k, ((0, K1_PAD - K1), (0, 0))).astype(jnp.bfloat16)   # (128,128)
    w2_k = (w2.reshape(K2, C2) * scale2[None, :]).astype(jnp.bfloat16)      # (1152,64)

    w3_t = jnp.transpose(w3.reshape(C2, C_OUT)).astype(f32)                 # (3,64)
    w3_t = jnp.pad(w3_t, ((0, C_PAD - C_OUT), (0, 0)))                      # (8,64)
    b3_k = jnp.pad(cb3.reshape(C_OUT, 1).astype(f32),
                   ((0, C_PAD - C_OUT), (0, 0)))                            # (8,1)

    kparams = (w1_k, bias1.reshape(1, C1), w2_k, bias2.reshape(1, C2), w3_t, b3_k)
    return raw, kparams


def ref_forward(x_nchw, raw):
    """Pure-JAX reference matching the PyTorch forward (BN in eval mode)."""
    w1, cb1, g1, be1, rm1, rv1, w2, cb2, g2, be2, rm2, rv2, w3, cb3 = raw
    x = jnp.transpose(x_nchw, (0, 2, 3, 1))

    def conv(x, w, pad):
        return jax.lax.conv_general_dilated(
            x, w, (1, 1), [(pad, pad), (pad, pad)],
            dimension_numbers=('NHWC', 'HWIO', 'NHWC'))

    def bn(x, g, b, m, v):
        return (x - m) / jnp.sqrt(v + EPS) * g + b

    y = jax.nn.relu(bn(conv(x, w1, 2) + cb1, g1, be1, rm1, rv1))
    y = jax.nn.relu(bn(conv(y, w2, 1) + cb2, g2, be2, rm2, rv2))
    y = conv(y, w3, 0) + cb3
    y = y + x
    return jnp.transpose(y, (0, 3, 1, 2))


if __name__ == "__main__":
    raw, kparams = make_params()
    x = jax.random.normal(jax.random.PRNGKey(0), (N, C_IN, H, W), jnp.float32)

    out = jax.block_until_ready(cnn_forward(x, kparams))
    ref = jax.block_until_ready(ref_forward(x, raw))

    assert out.shape == (N, C_IN, H, W)
    np.testing.assert_allclose(np.asarray(out), np.asarray(ref),
                               rtol=5e-2, atol=5e-2)
    print("KERNEL_OK")
</pallas_src>

<mosaic_0001>
module attributes {stable_mosaic.version = 11 : i64} {
  func.func @cnn_kernel(%arg0: i32, %arg1: memref<512x128xbf16, #tpu.memory_space<vmem>>, %arg2: memref<128x128xbf16, #tpu.memory_space<vmem>>, %arg3: memref<1x128xf32, #tpu.memory_space<vmem>>, %arg4: memref<1152x64xbf16, #tpu.memory_space<vmem>>, %arg5: memref<1x64xf32, #tpu.memory_space<vmem>>, %arg6: memref<8x64xf32, #tpu.memory_space<vmem>>, %arg7: memref<8x1xf32, #tpu.memory_space<vmem>>, %arg8: memref<8x512xf32, #tpu.memory_space<vmem>>, %arg9: memref<8x512xf32, #tpu.memory_space<vmem>>) attributes {dimension_semantics = [#tpu.dimension_semantics<parallel>], iteration_bounds = array<i64: 1>, scalar_prefetch = 0 : i64, scratch_operands = 0 : i64, tpu.core_type = #tpu.core_type<tc>, window_params = [{transform_indices = @transform_0, window_bounds = array<i64: 512, 128>}, {pipeline_mode = #tpu.pipeline_mode<synchronous>, transform_indices = @transform_1, window_bounds = array<i64: 128, 128>}, {pipeline_mode = #tpu.pipeline_mode<synchronous>, transform_indices = @transform_2, window_bounds = array<i64: 1, 128>}, {pipeline_mode = #tpu.pipeline_mode<synchronous>, transform_indices = @transform_3, window_bounds = array<i64: 1152, 64>}, {pipeline_mode = #tpu.pipeline_mode<synchronous>, transform_indices = @transform_4, window_bounds = array<i64: 1, 64>}, {pipeline_mode = #tpu.pipeline_mode<synchronous>, transform_indices = @transform_5, window_bounds = array<i64: 8, 64>}, {pipeline_mode = #tpu.pipeline_mode<synchronous>, transform_indices = @transform_6, window_bounds = array<i64: 8, 1>}, {transform_indices = @transform_7, window_bounds = array<i64: 8, 512>}, {transform_indices = @transform_8, window_bounds = array<i64: 8, 512>}]} {
    %c0 = arith.constant 0 : index
    %c0_0 = arith.constant 0 : index
    %0 = vector.load %arg1[%c0, %c0_0] : memref<512x128xbf16, #tpu.memory_space<vmem>>, vector<512x128xbf16>
    %c0_1 = arith.constant 0 : index
    %c0_2 = arith.constant 0 : index
    %1 = vector.load %arg2[%c0_1, %c0_2] : memref<128x128xbf16, #tpu.memory_space<vmem>>, vector<128x128xbf16>
    %cst = arith.constant dense<0.000000e+00> : vector<512x128xf32>
    %2 = tpu.matmul %0, %1, %cst {dimension_numbers = #tpu.dot_dimension_numbers<[1], [0], [0], [1], [0, 0, 1, 1], [], []>} : vector<512x128xbf16>, vector<128x128xbf16>, vector<512x128xf32> -> vector<512x128xf32>
    %c0_3 = arith.constant 0 : index
    %c0_4 = arith.constant 0 : index
    %3 = vector.load %arg3[%c0_3, %c0_4] : memref<1x128xf32, #tpu.memory_space<vmem>>, vector<1x128xf32>
    %4 = vector.broadcast %3 : vector<1x128xf32> to vector<512x128xf32>
    %5 = arith.addf %2, %4 : vector<512x128xf32>
    %cst_5 = arith.constant 0.000000e+00 : f32
    %6 = vector.broadcast %cst_5 : f32 to vector<512x128xf32>
    %7 = arith.maximumf %5, %6 : vector<512x128xf32>
    %8 = tpu.iota {dimensions = array<i32: 0>} : vector<512x1xi32>
    %c4_i32 = arith.constant 4 : i32
    %9 = vector.broadcast %c4_i32 : i32 to vector<512x1xi32>
    %10 = arith.shrsi %8, %9 : vector<512x1xi32>
    %c15_i32 = arith.constant 15 : i32
    %11 = vector.broadcast %c15_i32 : i32 to vector<512x1xi32>
    %12 = arith.andi %10, %11 : vector<512x1xi32>
    %c15_i32_6 = arith.constant 15 : i32
    %13 = vector.broadcast %c15_i32_6 : i32 to vector<512x1xi32>
    %14 = arith.andi %8, %13 : vector<512x1xi32>
    %c1_i32 = arith.constant 1 : i32
    %15 = vector.broadcast %c1_i32 : i32 to vector<512x1xi32>
    %16 = arith.cmpi sge, %12, %15 : vector<512x1xi32>
    %c14_i32 = arith.constant 14 : i32
    %17 = vector.broadcast %c14_i32 : i32 to vector<512x1xi32>
    %18 = arith.cmpi sle, %12, %17 : vector<512x1xi32>
    %c1_i32_7 = arith.constant 1 : i32
    %19 = vector.broadcast %c1_i32_7 : i32 to vector<512x1xi32>
    %20 = arith.cmpi sge, %14, %19 : vector<512x1xi32>
    %c14_i32_8 = arith.constant 14 : i32
    %21 = vector.broadcast %c14_i32_8 : i32 to vector<512x1xi32>
    %22 = arith.cmpi sle, %14, %21 : vector<512x1xi32>
    %cst_9 = arith.constant 0.000000e+00 : f32
    %23 = vector.broadcast %cst_9 : f32 to vector<512x64xf32>
    %c17_i32 = arith.constant 17 : i32
    %24 = tpu.dynamic_rotate %7 by %c17_i32 dim 0 : vector<512x128xf32>, i32 -> vector<512x128xf32>
    %25 = arith.andi %16, %20 : vector<512x1xi1>
    %cst_10 = arith.constant 0.000000e+00 : f32
    %26 = vector.shape_cast %25 : vector<512x1xi1> to vector<512x1xi1>
    %27 = vector.broadcast %26 : vector<512x1xi1> to vector<512x128xi1>
    %28 = vector.broadcast %cst_10 : f32 to vector<512x128xf32>
    %29 = arith.select %27, %24, %28 : vector<512x128xi1>, vector<512x128xf32>
    %30 = arith.truncf %29 : vector<512x128xf32> to vector<512x128xbf16>
    %c0_11 = arith.constant 0 : index
    %c0_12 = arith.constant 0 : index
    %31 = vector.load %arg4[%c0_11, %c0_12] : memref<1152x64xbf16, #tpu.memory_space<vmem>>, vector<128x64xbf16>
    %cst_13 = arith.constant dense<0.000000e+00> : vector<512x64xf32>
    %32 = tpu.matmul %30, %31, %cst_13 {dimension_numbers = #tpu.dot_dimension_numbers<[1], [0], [0], [1], [0, 0, 1, 1], [], []>} : vector<512x128xbf16>, vector<128x64xbf16>, vector<512x64xf32> -> vector<512x64xf32>
    %33 = arith.addf %23, %32 : vector<512x64xf32>
    %c16_i32 = arith.constant 16 : i32
    %34 = tpu.dynamic_rotate %7 by %c16_i32 dim 0 : vector<512x128xf32>, i32 -> vector<512x128xf32>
    %cst_14 = arith.constant 0.000000e+00 : f32
    %35 = vector.shape_cast %16 : vector<512x1xi1> to vector<512x1xi1>
    %36 = vector.broadcast %35 : vector<512x1xi1> to vector<512x128xi1>
    %37 = vector.broadcast %cst_14 : f32 to vector<512x128xf32>
    %38 = arith.select %36, %34, %37 : vector<512x128xi1>, vector<512x128xf32>
    %39 = arith.truncf %38 : vector<512x128xf32> to vector<512x128xbf16>
    %c128 = arith.constant 128 : index
    %c0_15 = arith.constant 0 : index
    %40 = vector.load %arg4[%c128, %c0_15] : memref<1152x64xbf16, #tpu.memory_space<vmem>>, vector<128x64xbf16>
    %cst_16 = arith.constant dense<0.000000e+00> : vector<512x64xf32>
    %41 = tpu.matmul %39, %40, %cst_16 {dimension_numbers = #tpu.dot_dimension_numbers<[1], [0], [0], [1], [0, 0, 1, 1], [], []>} : vector<512x128xbf16>, vector<128x64xbf16>, vector<512x64xf32> -> vector<512x64xf32>
    %42 = arith.addf %33, %41 : vector<512x64xf32>
    %c15_i32_17 = arith.constant 15 : i32
    %43 = tpu.dynamic_rotate %7 by %c15_i32_17 dim 0 : vector<512x128xf32>, i32 -> vector<512x128xf32>
    %44 = arith.andi %16, %22 : vector<512x1xi1>
    %cst_18 = arith.constant 0.000000e+00 : f32
    %45 = vector.shape_cast %44 : vector<512x1xi1> to vector<512x1xi1>
    %46 = vector.broadcast %45 : vector<512x1xi1> to vector<512x128xi1>
    %47 = vector.broadcast %cst_18 : f32 to vector<512x128xf32>
    %48 = arith.select %46, %43, %47 : vector<512x128xi1>, vector<512x128xf32>
    %49 = arith.truncf %48 : vector<512x128xf32> to vector<512x128xbf16>
    %c256 = arith.constant 256 : index
    %c0_19 = arith.constant 0 : index
    %50 = vector.load %arg4[%c256, %c0_19] : memref<1152x64xbf16, #tpu.memory_space<vmem>>, vector<128x64xbf16>
    %cst_20 = arith.constant dense<0.000000e+00> : vector<512x64xf32>
    %51 = tpu.matmul %49, %50, %cst_20 {dimension_numbers = #tpu.dot_dimension_numbers<[1], [0], [0], [1], [0, 0, 1, 1], [], []>} : vector<512x128xbf16>, vector<128x64xbf16>, vector<512x64xf32> -> vector<512x64xf32>
    %52 = arith.addf %42, %51 : vector<512x64xf32>
    %c1_i32_21 = arith.constant 1 : i32
    %53 = tpu.dynamic_rotate %7 by %c1_i32_21 dim 0 : vector<512x128xf32>, i32 -> vector<512x128xf32>
    %cst_22 = arith.constant 0.000000e+00 : f32
    %54 = vector.shape_cast %20 : vector<512x1xi1> to vector<512x1xi1>
    %55 = vector.broadcast %54 : vector<512x1xi1> to vector<512x128xi1>
    %56 = vector.broadcast %cst_22 : f32 to vector<512x128xf32>
    %57 = arith.select %55, %53, %56 : vector<512x128xi1>, vector<512x128xf32>
    %58 = arith.truncf %57 : vector<512x128xf32> to vector<512x128xbf16>
    %c384 = arith.constant 384 : index
    %c0_23 = arith.constant 0 : index
    %59 = vector.load %arg4[%c384, %c0_23] : memref<1152x64xbf16, #tpu.memory_space<vmem>>, vector<128x64xbf16>
    %cst_24 = arith.constant dense<0.000000e+00> : vector<512x64xf32>
    %60 = tpu.matmul %58, %59, %cst_24 {dimension_numbers = #tpu.dot_dimension_numbers<[1], [0], [0], [1], [0, 0, 1, 1], [], []>} : vector<512x128xbf16>, vector<128x64xbf16>, vector<512x64xf32> -> vector<512x64xf32>
    %61 = arith.addf %52, %60 : vector<512x64xf32>
    %62 = arith.truncf %7 : vector<512x128xf32> to vector<512x128xbf16>
    %c512 = arith.constant 512 : index
    %c0_25 = arith.constant 0 : index
    %63 = vector.load %arg4[%c512, %c0_25] : memref<1152x64xbf16, #tpu.memory_space<vmem>>, vector<128x64xbf16>
    %cst_26 = arith.constant dense<0.000000e+00> : vector<512x64xf32>
    %64 = tpu.matmul %62, %63, %cst_26 {dimension_numbers = #tpu.dot_dimension_numbers<[1], [0], [0], [1], [0, 0, 1, 1], [], []>} : vector<512x128xbf16>, vector<128x64xbf16>, vector<512x64xf32> -> vector<512x64xf32>
    %65 = arith.addf %61, %64 : vector<512x64xf32>
    %c511_i32 = arith.constant 511 : i32
    %66 = tpu.dynamic_rotate %7 by %c511_i32 dim 0 : vector<512x128xf32>, i32 -> vector<512x128xf32>
    %cst_27 = arith.constant 0.000000e+00 : f32
    %67 = vector.shape_cast %22 : vector<512x1xi1> to vector<512x1xi1>
    %68 = vector.broadcast %67 : vector<512x1xi1> to vector<512x128xi1>
    %69 = vector.broadcast %cst_27 : f32 to vector<512x128xf32>
    %70 = arith.select %68, %66, %69 : vector<512x128xi1>, vector<512x128xf32>
    %71 = arith.truncf %70 : vector<512x128xf32> to vector<512x128xbf16>
    %c640 = arith.constant 640 : index
    %c0_28 = arith.constant 0 : index
    %72 = vector.load %arg4[%c640, %c0_28] : memref<1152x64xbf16, #tpu.memory_space<vmem>>, vector<128x64xbf16>
    %cst_29 = arith.constant dense<0.000000e+00> : vector<512x64xf32>
    %73 = tpu.matmul %71, %72, %cst_29 {dimension_numbers = #tpu.dot_dimension_numbers<[1], [0], [0], [1], [0, 0, 1, 1], [], []>} : vector<512x128xbf16>, vector<128x64xbf16>, vector<512x64xf32> -> vector<512x64xf32>
    %74 = arith.addf %65, %73 : vector<512x64xf32>
    %c497_i32 = arith.constant 497 : i32
    %75 = tpu.dynamic_rotate %7 by %c497_i32 dim 0 : vector<512x128xf32>, i32 -> vector<512x128xf32>
    %76 = arith.andi %18, %20 : vector<512x1xi1>
    %cst_30 = arith.constant 0.000000e+00 : f32
    %77 = vector.shape_cast %76 : vector<512x1xi1> to vector<512x1xi1>
    %78 = vector.broadcast %77 : vector<512x1xi1> to vector<512x128xi1>
    %79 = vector.broadcast %cst_30 : f32 to vector<512x128xf32>
    %80 = arith.select %78, %75, %79 : vector<512x128xi1>, vector<512x128xf32>
    %81 = arith.truncf %80 : vector<512x128xf32> to vector<512x128xbf16>
    %c768 = arith.constant 768 : index
    %c0_31 = arith.constant 0 : index
    %82 = vector.load %arg4[%c768, %c0_31] : memref<1152x64xbf16, #tpu.memory_space<vmem>>, vector<128x64xbf16>
    %cst_32 = arith.constant dense<0.000000e+00> : vector<512x64xf32>
    %83 = tpu.matmul %81, %82, %cst_32 {dimension_numbers = #tpu.dot_dimension_numbers<[1], [0], [0], [1], [0, 0, 1, 1], [], []>} : vector<512x128xbf16>, vector<128x64xbf16>, vector<512x64xf32> -> vector<512x64xf32>
    %84 = arith.addf %74, %83 : vector<512x64xf32>
    %c496_i32 = arith.constant 496 : i32
    %85 = tpu.dynamic_rotate %7 by %c496_i32 dim 0 : vector<512x128xf32>, i32 -> vector<512x128xf32>
    %cst_33 = arith.constant 0.000000e+00 : f32
    %86 = vector.shape_cast %18 : vector<512x1xi1> to vector<512x1xi1>
    %87 = vector.broadcast %86 : vector<512x1xi1> to vector<512x128xi1>
    %88 = vector.broadcast %cst_33 : f32 to vector<512x128xf32>
    %89 = arith.select %87, %85, %88 : vector<512x128xi1>, vector<512x128xf32>
    %90 = arith.truncf %89 : vector<512x128xf32> to vector<512x128xbf16>
    %c896 = arith.constant 896 : index
    %c0_34 = arith.constant 0 : index
    %91 = vector.load %arg4[%c896, %c0_34] : memref<1152x64xbf16, #tpu.memory_space<vmem>>, vector<128x64xbf16>
    %cst_35 = arith.constant dense<0.000000e+00> : vector<512x64xf32>
    %92 = tpu.matmul %90, %91, %cst_35 {dimension_numbers = #tpu.dot_dimension_numbers<[1], [0], [0], [1], [0, 0, 1, 1], [], []>} : vector<512x128xbf16>, vector<128x64xbf16>, vector<512x64xf32> -> vector<512x64xf32>
    %93 = arith.addf %84, %92 : vector<512x64xf32>
    %c495_i32 = arith.constant 495 : i32
    %94 = tpu.dynamic_rotate %7 by %c495_i32 dim 0 : vector<512x128xf32>, i32 -> vector<512x128xf32>
    %95 = arith.andi %18, %22 : vector<512x1xi1>
    %cst_36 = arith.constant 0.000000e+00 : f32
    %96 = vector.shape_cast %95 : vector<512x1xi1> to vector<512x1xi1>
    %97 = vector.broadcast %96 : vector<512x1xi1> to vector<512x128xi1>
    %98 = vector.broadcast %cst_36 : f32 to vector<512x128xf32>
    %99 = arith.select %97, %94, %98 : vector<512x128xi1>, vector<512x128xf32>
    %100 = arith.truncf %99 : vector<512x128xf32> to vector<512x128xbf16>
    %c1024 = arith.constant 1024 : index
    %c0_37 = arith.constant 0 : index
    %101 = vector.load %arg4[%c1024, %c0_37] : memref<1152x64xbf16, #tpu.memory_space<vmem>>, vector<128x64xbf16>
    %cst_38 = arith.constant dense<0.000000e+00> : vector<512x64xf32>
    %102 = tpu.matmul %100, %101, %cst_38 {dimension_numbers = #tpu.dot_dimension_numbers<[1], [0], [0], [1], [0, 0, 1, 1], [], []>} : vector<512x128xbf16>, vector<128x64xbf16>, vector<512x64xf32> -> vector<512x64xf32>
    %103 = arith.addf %93, %102 : vector<512x64xf32>
    %c0_39 = arith.constant 0 : index
    %c0_40 = arith.constant 0 : index
    %104 = vector.load %arg5[%c0_39, %c0_40] : memref<1x64xf32, #tpu.memory_space<vmem>>, vector<1x64xf32>
    %105 = vector.broadcast %104 : vector<1x64xf32> to vector<512x64xf32>
    %106 = arith.addf %103, %105 : vector<512x64xf32>
    %cst_41 = arith.constant 0.000000e+00 : f32
    %107 = vector.broadcast %cst_41 : f32 to vector<512x64xf32>
    %108 = arith.maximumf %106, %107 : vector<512x64xf32>
    %c0_42 = arith.constant 0 : index
    %c0_43 = arith.constant 0 : index
    %109 = vector.load %arg6[%c0_42, %c0_43] : memref<8x64xf32, #tpu.memory_space<vmem>>, vector<8x64xf32>
    %cst_44 = arith.constant dense<0.000000e+00> : vector<8x512xf32>
    %110 = tpu.matmul %109, %108, %cst_44 {dimension_numbers = #tpu.dot_dimension_numbers<[1], [1], [0], [0], [0, 0, 1, 0], [], []>} : vector<8x64xf32>, vector<512x64xf32>, vector<8x512xf32> -> vector<8x512xf32>
    %c0_45 = arith.constant 0 : index
    %c0_46 = arith.constant 0 : index
    %111 = vector.load %arg7[%c0_45, %c0_46] : memref<8x1xf32, #tpu.memory_space<vmem>>, vector<8x1xf32>
    %112 = vector.broadcast %111 : vector<8x1xf32> to vector<8x512xf32>
    %113 = arith.addf %110, %112 : vector<8x512xf32>
    %c0_47 = arith.constant 0 : index
    %c0_48 = arith.constant 0 : index
    %114 = vector.load %arg8[%c0_47, %c0_48] : memref<8x512xf32, #tpu.memory_space<vmem>>, vector<8x512xf32>
    %115 = arith.addf %113, %114 : vector<8x512xf32>
    %c0_49 = arith.constant 0 : index
    %c0_50 = arith.constant 0 : index
    %116 = vector.load %arg9[%c0_49, %c0_50] : memref<8x512xf32, #tpu.memory_space<vmem>>, vector<8x512xf32>
    tpu.vector_store %arg9[%c0_49, %c0_50], %115 {strides = array<i32>} : memref<8x512xf32, #tpu.memory_space<vmem>>, vector<8x512xf32>,
    return
  }
  func.func @transform_0(%arg0: i32) -> (i32, i32) {
    %c0_i32 = arith.constant 0 : i32
    %c0_i32_0 = arith.constant 0 : i32
    return %arg0, %c0_i32 : i32, i32
  }
  func.func @transform_1(%arg0: i32) -> (i32, i32) {
    %c0_i32 = arith.constant 0 : i32
    %c0_i32_0 = arith.constant 0 : i32
    %c0_i32_1 = arith.constant 0 : i32
    return %c0_i32, %c0_i32_0 : i32, i32
  }
  func.func @transform_2(%arg0: i32) -> (i32, i32) {
    %c0_i32 = arith.constant 0 : i32
    %c0_i32_0 = arith.constant 0 : i32
    %c0_i32_1 = arith.constant 0 : i32
    return %c0_i32, %c0_i32_0 : i32, i32
  }
  func.func @transform_3(%arg0: i32) -> (i32, i32) {
    %c0_i32 = arith.constant 0 : i32
    %c0_i32_0 = arith.constant 0 : i32
    %c0_i32_1 = arith.constant 0 : i32
    return %c0_i32, %c0_i32_0 : i32, i32
  }
  func.func @transform_4(%arg0: i32) -> (i32, i32) {
    %c0_i32 = arith.constant 0 : i32
    %c0_i32_0 = arith.constant 0 : i32
    %c0_i32_1 = arith.constant 0 : i32
    return %c0_i32, %c0_i32_0 : i32, i32
  }
  func.func @transform_5(%arg0: i32) -> (i32, i32) {
    %c0_i32 = arith.constant 0 : i32
    %c0_i32_0 = arith.constant 0 : i32
    %c0_i32_1 = arith.constant 0 : i32
    return %c0_i32, %c0_i32_0 : i32, i32
  }
  func.func @transform_6(%arg0: i32) -> (i32, i32) {
    %c0_i32 = arith.constant 0 : i32
    %c0_i32_0 = arith.constant 0 : i32
    %c0_i32_1 = arith.constant 0 : i32
    return %c0_i32, %c0_i32_0 : i32, i32
  }
  func.func @transform_7(%arg0: i32) -> (i32, i32) {
    %c0_i32 = arith.constant 0 : i32
    %c0_i32_0 = arith.constant 0 : i32
    return %c0_i32, %arg0 : i32, i32
  }
  func.func @transform_8(%arg0: i32) -> (i32, i32) {
    %c0_i32 = arith.constant 0 : i32
    %c0_i32_0 = arith.constant 0 : i32
    return %c0_i32, %arg0 : i32, i32
  }
}

</mosaic_0001>

<bundles_post_ra>
// kernel: _cnn_forward.1
= control target key start
LH: loop header
LB: loop body
LE: loop exit
PB: predicated region body
PF: predicated region fallthrough
CT: control target
= control target key end

     0   :  { %v710_v58 = vlaneseq  ;;  %vm15377_vm6 = vmmov 1   ;;  %s15189_s1 = inlined_call_operand.vmem [shape: bf16[128,128], index: 1, kind: input, shape index: {}]   ;;  %s15190_s0 = inlined_call_operand.vmem [shape: bf16[512,128], index: 0, kind: input, shape index: {}]   ;;  %s15191_s3 = inlined_call_operand.vmem [shape: bf16[1152,64], index: 3, kind: input, shape index: {}]   ;;  %s15192_s2 = inlined_call_operand.vmem [shape: f32[1,128], index: 2, kind: input, shape index: {}]   ;;  %s15193_s5 = inlined_call_operand.vmem [shape: f32[8,64], index: 5, kind: input, shape index: {}]   ;;  %s15194_s4 = inlined_call_operand.vmem [shape: f32[1,64], index: 4, kind: input, shape index: {}]   ;;  %s15195_s6 = inlined_call_operand.vmem [shape: f32[8,1], index: 6, kind: input, shape index: {}]   ;;  %s15196_s7 = inlined_call_operand.vmem [shape: f32[8,512], index: 7, kind: input, shape index: {}]   ;;  %s15197_s8 = inlined_call_operand.vmem [shape: f32[8,512], index: 8, kind: output, shape index: {}]  }
   0x1   :  { %v10525_v0 = vld [vmem:[%s15189_s1] sm:$0xff]   ;;  %v10526_v1 = vld [vmem:[%s15189_s1 + $0x8] sm:$0xff]   ;;  %v10527_v2 = vld [vmem:[%s15189_s1 + $0x10] sm:$0xff]  }
   0x2   :  { %9098 = vmatprep.subr.bf16.mxu0 %v10525_v0  ;;  %v10528_v3 = vld [vmem:[%s15189_s1 + $0x18] sm:$0xff]   ;;  %v10533_v4 = vld [vmem:[%s15190_s0] sm:$0xff]   ;;  %v10530_v6 = vld [vmem:[%s15189_s1 + $0x28] sm:$0xff]  }
   0x3   :  { %9099 = vmatpush3.bf16.msra.mxu0 %v10525_v0  ;;  %9114 = vmatprep.mubr.bf16.mxu0 %v10533_v4  ;;  %v10529_v5 = vld [vmem:[%s15189_s1 + $0x20] sm:$0xff]   ;;  %v10531_v7 = vld [vmem:[%s15189_s1 + $0x30] sm:$0xff]   ;;  %v10532_v8 = vld [vmem:[%s15189_s1 + $0x38] sm:$0xff]   ;;  %v10873_v0 = vshrl.u32 %v710_v58, 7 }
   0x4   :  { %9100 = vmatprep.subr.bf16.mxu0 %v10526_v1  ;;  %v10534_v9 = vld [vmem:[%s15190_s0 + $0x8] sm:$0xff]   ;;  %v10535_v10 = vld [vmem:[%s15190_s0 + $0x10] sm:$0xff]   ;;  %v10536_v11 = vld [vmem:[%s15190_s0 + $0x18] sm:$0xff]  }
   0x5   :  { %v10537_v12 = vld [vmem:[%s15190_s0 + $0x20] sm:$0xff]   ;;  %v10538_v13 = vld [vmem:[%s15190_s0 + $0x28] sm:$0xff]   ;;  %v10539_v14 = vld [vmem:[%s15190_s0 + $0x30] sm:$0xff]   ;;  %vm15356_vm0 = vcmp.lt.s32.totalorder %v10873_v0, 7  ;;  %vm15376_vm1 = vcmp.lt.s32.totalorder %v10873_v0, 1 }
   0x6   :  { %v10540_v15 = vld [vmem:[%s15190_s0 + $0x38] sm:$0xff]   ;;  %v10541_v16 = vld [vmem:[%s15190_s0 + $0x40] sm:$0xff]   ;;  %v10542_v17 = vld [vmem:[%s15190_s0 + $0x48] sm:$0xff]  }
   0x7   :  { %9101 = vmatpush3.bf16.msra.mxu0 %v10526_v1  ;;  %v10543_v18 = vld [vmem:[%s15190_s0 + $0x50] sm:$0xff]   ;;  %v10544_v19 = vld [vmem:[%s15190_s0 + $0x58] sm:$0xff]   ;;  %v10545_v20 = vld [vmem:[%s15190_s0 + $0x60] sm:$0xff]  }
   0x8   :  { %9102 = vmatprep.subr.bf16.mxu0 %v10527_v2  ;;  %v10546_v21 = vld [vmem:[%s15190_s0 + $0x68] sm:$0xff]   ;;  %v10547_v22 = vld [vmem:[%s15190_s0 + $0x70] sm:$0xff]   ;;  %v10548_v23 = vld [vmem:[%s15190_s0 + $0x78] sm:$0xff]  }
   0x9   :  { %v10549_v24 = vld [vmem:[%s15190_s0 + $0x80] sm:$0xff]   ;;  %v10550_v25 = vld [vmem:[%s15190_s0 + $0x88] sm:$0xff]   ;;  %v10551_v26 = vld [vmem:[%s15190_s0 + $0x90] sm:$0xff]  }
   0xa   :  { %v10552_v27 = vld [vmem:[%s15190_s0 + $0x98] sm:$0xff]   ;;  %v10553_v28 = vld [vmem:[%s15190_s0 + $0xa0] sm:$0xff]   ;;  %v10554_v29 = vld [vmem:[%s15190_s0 + $0xa8] sm:$0xff]  }
   0xb   :  { %9103 = vmatpush3.bf16.msra.mxu0 %v10527_v2  ;;  %v10555_v30 = vld [vmem:[%s15190_s0 + $0xb0] sm:$0xff]   ;;  %v10556_v31 = vld [vmem:[%s15190_s0 + $0xb8] sm:$0xff]   ;;  %v10557_v32 = vld [vmem:[%s15190_s0 + $0xc0] sm:$0xff]  }
   0xc   :  { %9104 = vmatprep.subr.bf16.mxu0 %v10528_v3  ;;  %v10558_v33 = vld [vmem:[%s15190_s0 + $0xc8] sm:$0xff]   ;;  %v10559_v34 = vld [vmem:[%s15190_s0 + $0xd0] sm:$0xff]   ;;  %v10560_v35 = vld [vmem:[%s15190_s0 + $0xd8] sm:$0xff]  }
   0xd   :  { %v10561_v36 = vld [vmem:[%s15190_s0 + $0xe0] sm:$0xff]   ;;  %v10562_v37 = vld [vmem:[%s15190_s0 + $0xe8] sm:$0xff]   ;;  %v10563_v38 = vld [vmem:[%s15190_s0 + $0xf0] sm:$0xff]  }
   0xe   :  { %v10564_v39 = vld [vmem:[%s15190_s0 + $0xf8] sm:$0xff]   ;;  %v10565_v40 = vld [vmem:[%s15191_s3 + $0xc0] sm:$0xff]   ;;  %v10566_v41 = vld [vmem:[%s15191_s3 + $0xc8] sm:$0xff]  }
   0xf   :  { %9105 = vmatpush3.bf16.msra.mxu0 %v10528_v3  ;;  %9994 = vmatprep.subr.bf16.mxu1 %v10565_v40  ;;  %v10567_v42 = vld [vmem:[%s15191_s3 + $0xd0] sm:$0xff]   ;;  %v10568_v43 = vld [vmem:[%s15191_s3 + $0xd8] sm:$0xff]   ;;  %v10569_v44 = vld [vmem:[%s15191_s3 + $0xe0] sm:$0xff]  }
  0x10   :  { %9106 = vmatprep.subr.bf16.mxu0 %v10529_v5  ;;  %10002 = vmatpush3.bf16.msra.mxu1 %v10565_v40  ;;  %v10570_v45 = vld [vmem:[%s15191_s3 + $0x40] sm:$0xff]   ;;  %v10571_v46 = vld [vmem:[%s15191_s3 + $0xe8] sm:$0xff]   ;;  %v10573_v48 = vld [vmem:[%s15191_s3 + $0xf0] sm:$0xff]  }
  0x11   :  { %9995 = vmatprep.subr.bf16.mxu1 %v10566_v41  ;;  %v10572_v47 = vld [vmem:[%s15191_s3 + $0x48] sm:$0xff]   ;;  %v10574_v49 = vld [vmem:[%s15191_s3 + $0x50] sm:$0xff]   ;;  %v10575_v50 = vld [vmem:[%s15191_s3 + $0xf8] sm:$0xff]  }
  0x12   :  { %v10576_v51 = vld [vmem:[%s15191_s3 + $0x58] sm:$0xff]   ;;  %v10851_v52 = vld [vmem:[%s15191_s3 + $0x100] sm:$0xff]   ;;  %v10580_v54 = vld [vmem:[%s15191_s3 + $0x68] sm:$0xff]  }
  0x13   :  { %9107 = vmatpush3.bf16.msra.mxu0 %v10529_v5  ;;  %v10578_v53 = vld [vmem:[%s15191_s3 + $0x60] sm:$0xff]   ;;  %v10582_v55 = vld [vmem:[%s15191_s3 + $0x70] sm:$0xff]   ;;  %v10584_v56 = vld [vmem:[%s15191_s3 + $0x78] sm:$0xff]  }
  0x14   :  { %9108 = vmatprep.subr.bf16.mxu0 %v10530_v6  ;;  %10003 = vmatpush3.bf16.msra.mxu1 %v10566_v41  ;;  %v10869_v57 = vld [vmem:[%s15192_s2] ss:$0 sm:$0xff] }
  0x15   :  { %9996 = vmatprep.subr.bf16.mxu1 %v10567_v42 }
  0x17   :  { %9109 = vmatpush3.bf16.msra.mxu0 %v10530_v6 }
  0x18   :  { %9110 = vmatprep.subr.bf16.mxu0 %v10531_v7  ;;  %10004 = vmatpush3.bf16.msra.mxu1 %v10567_v42 }
  0x19   :  { %9997 = vmatprep.subr.bf16.mxu1 %v10568_v43 }
  0x1b   :  { %9111 = vmatpush3.bf16.msra.mxu0 %v10531_v7 }
  0x1c   :  { %9112 = vmatprep.subr.bf16.mxu0 %v10532_v8  ;;  %10005 = vmatpush3.bf16.msra.mxu1 %v10568_v43 }
  0x1d   :  { %9998 = vmatprep.subr.bf16.mxu1 %v10569_v44 }
  0x1f   :  { %9113 = vmatpush3.bf16.msra.mxu0 %v10532_v8 }
  0x20   :  { %10006 = vmatpush3.bf16.msra.mxu1 %v10569_v44  ;;  %9178 = vmatprep.subr.bf16.mxu0 %v10570_v45 }
  0x21   :  { %9999 = vmatprep.subr.bf16.mxu1 %v10571_v46 }
  0x22   :  { %9115 = vmatmul.mubr.bf16.vlgmr.msra.gmra.mrb[0].mxu0 %v10534_v9 }
  0x23   :  { %9118 = vmatprep.mubr.bf16.mxu0 %v10535_v10  ;;  %9179 = vmatpush3.bf16.msra.mxu0 %v10570_v45 }
  0x24   :  { %10007 = vmatpush3.bf16.msra.mxu1 %v10571_v46  ;;  %9180 = vmatprep.subr.bf16.mxu0 %v10572_v47 }
  0x25   :  { %10000 = vmatprep.subr.bf16.mxu1 %v10573_v48 }
  0x27   :  { %9181 = vmatpush3.bf16.msra.mxu0 %v10572_v47 }
  0x28   :  { %10008 = vmatpush3.bf16.msra.mxu1 %v10573_v48  ;;  %9182 = vmatprep.subr.bf16.mxu0 %v10574_v49 }
  0x29   :  { %10001 = vmatprep.subr.bf16.mxu1 %v10575_v50 }
  0x2a   :  { %9119 = vmatmul.mubr.bf16.gmra.mrb[4].mxu0 %v10536_v11 }
  0x2b   :  { %9122 = vmatprep.mubr.bf16.mxu0 %v10537_v12  ;;  %9183 = vmatpush3.bf16.msra.mxu0 %v10574_v49 }
  0x2c   :  { %10009 = vmatpush3.bf16.msra.mxu1 %v10575_v50  ;;  %9184 = vmatprep.subr.bf16.mxu0 %v10576_v51 }
  0x2d   :  { %9498 = vmatprep.subr.bf16.mxu1 %v10851_v52 }
  0x2f   :  { %9185 = vmatpush3.bf16.msra.mxu0 %v10576_v51 }
  0x30   :  { %9186 = vmatprep.subr.bf16.mxu0 %v10578_v53 }
  0x32   :  { %9123 = vmatmul.mubr.bf16.gmra.mrb[8].mxu0 %v10538_v13 }
  0x33   :  { %9126 = vmatprep.mubr.bf16.mxu0 %v10539_v14  ;;  %9187 = vmatpush3.bf16.msra.mxu0 %v10578_v53 }
  0x34   :  { %9188 = vmatprep.subr.bf16.mxu0 %v10580_v54 }
  0x37   :  { %9189 = vmatpush3.bf16.msra.mxu0 %v10580_v54 }
  0x38   :  { %9190 = vmatprep.subr.bf16.mxu0 %v10582_v55 }
  0x3a   :  { %9127 = vmatmul.mubr.bf16.gmra.mrb[12].mxu0 %v10540_v15 }
  0x3b   :  { %9130 = vmatprep.mubr.bf16.mxu0 %v10541_v16  ;;  %9191 = vmatpush3.bf16.msra.mxu0 %v10582_v55 }
  0x3c   :  { %9192 = vmatprep.subr.bf16.mxu0 %v10584_v56 }
  0x3f   :  { %9193 = vmatpush3.bf16.msra.mxu0 %v10584_v56 }
  0x42   :  { %9131 = vmatmul.mubr.bf16.gmra.mrb[16].mxu0 %v10542_v17 }
  0x43   :  { %9134 = vmatprep.mubr.bf16.mxu0 %v10543_v18 }
  0x4a   :  { %9135 = vmatmul.mubr.bf16.gmra.mrb[20].mxu0 %v10544_v19 }
  0x4b   :  { %9138 = vmatprep.mubr.bf16.mxu0 %v10545_v20 }
  0x52   :  { %9139 = vmatmul.mubr.bf16.gmra.mrb[24].mxu0 %v10546_v21 }
  0x53   :  { %9142 = vmatprep.mubr.bf16.mxu0 %v10547_v22 }
  0x5a   :  { %9143 = vmatmul.mubr.bf16.gmra.mrb[28].mxu0 %v10548_v23 }
  0x5b   :  { %9146 = vmatprep.mubr.bf16.mxu0 %v10549_v24 }
  0x62   :  { %9147 = vmatmul.mubr.bf16.gmra.mrb[32].mxu0 %v10550_v25 }
  0x63   :  { %9150 = vmatprep.mubr.bf16.mxu0 %v10551_v26 }
  0x6a   :  { %9151 = vmatmul.mubr.bf16.gmra.mrb[36].mxu0 %v10552_v27 }
  0x6b   :  { %9154 = vmatprep.mubr.bf16.mxu0 %v10553_v28 }
  0x72   :  { %9155 = vmatmul.mubr.bf16.gmra.mrb[40].mxu0 %v10554_v29 }
  0x73   :  { %9158 = vmatprep.mubr.bf16.mxu0 %v10555_v30 }
  0x7a   :  { %9159 = vmatmul.mubr.bf16.gmra.mrb[44].mxu0 %v10556_v31 }
  0x7b   :  { %9162 = vmatprep.mubr.bf16.mxu0 %v10557_v32 }
  0x82   :  { %9163 = vmatmul.mubr.bf16.gmra.mrb[48].mxu0 %v10558_v33 }
  0x83   :  { %9166 = vmatprep.mubr.bf16.mxu0 %v10559_v34 }
  0x8a   :  { %9167 = vmatmul.mubr.bf16.gmra.mrb[52].mxu0 %v10560_v35 }
  0x8b   :  { %9170 = vmatprep.mubr.bf16.mxu0 %v10561_v36 }
  0x92   :  { %9171 = vmatmul.mubr.bf16.gmra.mrb[56].mxu0 %v10562_v37 }
  0x93   :  { %9174 = vmatprep.mubr.bf16.mxu0 %v10563_v38 }
  0x9a   :  { %9175 = vmatmul.mubr.bf16.gmra.mrb[60].mxu0 %v10564_v39 }
  0xf5   :  { %v9116_v59 = vpop.f32.mrb[0].mxu0 }
  0xf6   :  { %v400_v60 = vadd.f32 %v9116_v59, %v10869_v57  ;;  %v391_v61 = vpop.f32.mrb[1].mxu0 }
  0xf7   :  { %v392_v62 = vadd.f32 %v10869_v57, %v391_v61  ;;  %v9117_v63 = vpop.f32.mrb[2].mxu0 }
  0xf8   :  { %v10875_v1 = vmax.f32 %v400_v60, 0.0  ;;  %v403_v2 = vadd.f32 %v9117_v63, %v10869_v57  ;;  %v394_v3 = vpop.f32.mrb[3].mxu0 }
  0xf9   :  { %v10878_v4 = vmax.f32 %v392_v62, 0.0  ;;  %v395_v5 = vadd.f32 %v10869_v57, %v394_v3 }
  0xfa   :  { %15997 = vst [vmem:[#allocation2_spill] sm:$0xff] %v10875_v1  ;;  %v10881_v6 = vmax.f32 %v403_v2, 0.0  ;;  %v15199_v8 = vrot.slane %v10875_v1, 1 }
  0xfb   :  { %15998 = vst [vmem:[#allocation3_spill] sm:$0xff] %v10878_v4  ;;  %v10884_v7 = vmax.f32 %v395_v5, 0.0  ;;  %v15201_v11 = vrot.slane %v10878_v4, 7 }
  0xfc   :  { %15999 = vst [vmem:[#allocation4_spill] sm:$0xff] %v10881_v6  ;;  %v10889_v9 = vpack.c.bf16 %v10881_v6, %v10875_v1  ;;  %v2573_v10 = vrot.slane %v10881_v6, 1 }
  0xfd   :  { %v15200_v12 = vrot.slane %v10884_v7, 7  ;;  %v10897_v13 = vpack.c.bf16 %v10884_v7, %v10878_v4  ;;  %v9120_v14 = vpop.f32.mrb[4].mxu0 }
  0xfe   :  { %16000 = vst [vmem:[#allocation5_spill] sm:$0xff] %v10889_v9  ;;  %v2695_v15 = vsel %vm15356_vm0, %v15199_v8, %v2573_v10  ;;  %v416_v16 = vadd.f32 %v9120_v14, %v10869_v57  ;;  %v407_v17 = vpop.f32.mrb[5].mxu0  ;;  %v11066_v8 = vadd.s32 448, %v10873_v0 }
  0xff   :  { %16001 = vst [vmem:[#allocation6_spill] sm:$0xff] %v10897_v13  ;;  %v10910_v18 = vsel %vm15376_vm1, %v15201_v11, %v15200_v12  ;;  %v408_v19 = vadd.f32 %v10869_v57, %v407_v17  ;;  %v9121_v20 = vpop.f32.mrb[6].mxu0  ;;  %v11073_v11 = vadd.s32 464, %v10873_v0 }
 0x100   :  { %16002 = vst [vmem:[#allocation7_spill] sm:$0xff] %v10910_v18  ;;  %v419_v21 = vadd.f32 %v9121_v20, %v10869_v57  ;;  %v410_v22 = vpop.f32.mrb[7].mxu0  ;;  %v10917_v25 = vmax.f32 %v416_v16, 0.0  ;;  %16039 = vst [vmem:[#allocation44_spill] sm:$0xff] %v11066_v8 }
 0x101   :  { %v10914_v23 = vmax.f32 %v408_v19, 0.0  ;;  %v411_v24 = vadd.f32 %v10869_v57, %v410_v22  ;;  %16042 = vst [vmem:[#allocation47_spill] sm:$0xff] %v11073_v11 }
 0x102   :  { %16004 = vst [vmem:[#allocation9_spill] sm:$0xff] %v10917_v25  ;;  %v10919_v26 = vmax.f32 %v419_v21, 0.0 }
 0x103   :  { %16003 = vst [vmem:[#allocation8_spill] sm:$0xff] %v10914_v23  ;;  %v15198_v27 = vrot.slane %v10914_v23, 1  ;;  %v10922_v28 = vmax.f32 %v411_v24, 0.0 }
 0x104   :  { %16005 = vst [vmem:[#allocation10_spill] sm:$0xff] %v10919_v26  ;;  %v10926_v29 = vpack.c.bf16 %v10919_v26, %v10917_v25 }
 0x105   :  { %v2694_v30 = vsel %vm15356_vm0, %v2573_v10, %v15198_v27  ;;  %v10934_v31 = vpack.c.bf16 %v10922_v28, %v10914_v23  ;;  %v9124_v32 = vpop.f32.mrb[8].mxu0  ;;  %v11063_v27 = vadd.s32 432, %v10873_v0 }
 0x106   :  { %16006 = vst [vmem:[#allocation11_spill] sm:$0xff] %v10926_v29  ;;  %v10936_v33 = vpack.c.bf16 %v2694_v30, %v2695_v15  ;;  %v432_v34 = vadd.f32 %v9124_v32, %v10869_v57  ;;  %v423_v35 = vpop.f32.mrb[9].mxu0 }
 0x107   :  { %16007 = vst [vmem:[#allocation12_spill] sm:$0xff] %v10934_v31  ;;  %v424_v36 = vadd.f32 %v10869_v57, %v423_v35  ;;  %v9125_v37 = vpop.f32.mrb[10].mxu0  ;;  %16038 = vst [vmem:[#allocation43_spill] sm:$0xff] %v11063_v27 }
 0x108   :  { %16008 = vst [vmem:[#allocation13_spill] sm:$0xff] %v10936_v33  ;;  %v435_v38 = vadd.f32 %v9125_v37, %v10869_v57  ;;  %v426_v39 = vpop.f32.mrb[11].mxu0  ;;  %v10942_v41 = vmax.f32 %v432_v34, 0.0 }
 0x109   :  { %v427_v40 = vadd.f32 %v10869_v57, %v426_v39  ;;  %v10946_v43 = vmax.f32 %v424_v36, 0.0 }
 0x10a   :  { %16009 = vst [vmem:[#allocation14_spill] sm:$0xff] %v10942_v41  ;;  %v10944_v42 = vmax.f32 %v435_v38, 0.0 }
 0x10b   :  { %16011 = vst [vmem:[#allocation16_spill] sm:$0xff] %v10946_v43  ;;  %v10948_v44 = vmax.f32 %v427_v40, 0.0 }
 0x10c   :  { %16010 = vst [vmem:[#allocation15_spill] sm:$0xff] %v10944_v42  ;;  %v10952_v45 = vpack.c.bf16 %v10944_v42, %v10942_v41 }
 0x10d   :  { %16012 = vst [vmem:[#allocation17_spill] sm:$0xff] %v10948_v44  ;;  %v10956_v46 = vpack.c.bf16 %v10948_v44, %v10946_v43  ;;  %v9128_v47 = vpop.f32.mrb[12].mxu0 }
 0x10e   :  { %16013 = vst [vmem:[#allocation18_spill] sm:$0xff] %v10952_v45  ;;  %v448_v48 = vadd.f32 %v9128_v47, %v10869_v57  ;;  %v439_v49 = vpop.f32.mrb[13].mxu0 }
 0x10f   :  { %16014 = vst [vmem:[#allocation19_spill] sm:$0xff] %v10956_v46  ;;  %v440_v50 = vadd.f32 %v10869_v57, %v439_v49  ;;  %v9129_v51 = vpop.f32.mrb[14].mxu0 }
 0x110   :  { %v451_v53 = vadd.f32 %v9129_v51, %v10869_v57  ;;  %v442_v54 = vpop.f32.mrb[15].mxu0  ;;  %v10962_v56 = vmax.f32 %v448_v48, 0.0 }
 0x111   :  { %v443_v55 = vadd.f32 %v10869_v57, %v442_v54  ;;  %v10966_v59 = vmax.f32 %v440_v50, 0.0 }
 0x112   :  { %16015 = vst [vmem:[#allocation20_spill] sm:$0xff] %v10962_v56  ;;  %v10964_v58 = vmax.f32 %v451_v53, 0.0 }
 0x113   :  { %16017 = vst [vmem:[#allocation22_spill] sm:$0xff] %v10966_v59  ;;  %v10968_v60 = vmax.f32 %v443_v55, 0.0 }
 0x114   :  { %16016 = vst [vmem:[#allocation21_spill] sm:$0xff] %v10964_v58  ;;  %v10972_v61 = vpack.c.bf16 %v10964_v58, %v10962_v56 }
 0x115   :  { %16018 = vst [vmem:[#allocation23_spill] sm:$0xff] %v10968_v60  ;;  %v10976_v62 = vpack.c.bf16 %v10968_v60, %v10966_v59  ;;  %v9132_v63 = vpop.f32.mrb[16].mxu0 }
 0x116   :  { %16019 = vst [vmem:[#allocation24_spill] sm:$0xff] %v10972_v61  ;;  %v464_v2 = vadd.f32 %v9132_v63, %v10869_v57  ;;  %v455_v3 = vpop.f32.mrb[17].mxu0 }
 0x117   :  { %16020 = vst [vmem:[#allocation25_spill] sm:$0xff] %v10976_v62  ;;  %v456_v5 = vadd.f32 %v10869_v57, %v455_v3  ;;  %v9133_v10 = vpop.f32.mrb[18].mxu0 }
 0x118   :  { %v467_v14 = vadd.f32 %v9133_v10, %v10869_v57  ;;  %v458_v15 = vpop.f32.mrb[19].mxu0  ;;  %v10982_v17 = vmax.f32 %v464_v2, 0.0 }
 0x119   :  { %v459_v16 = vadd.f32 %v10869_v57, %v458_v15  ;;  %v10986_v20 = vmax.f32 %v456_v5, 0.0 }
 0x11a   :  { %16021 = vst [vmem:[#allocation26_spill] sm:$0xff] %v10982_v17  ;;  %v10984_v19 = vmax.f32 %v467_v14, 0.0 }
 0x11b   :  { %16023 = vst [vmem:[#allocation28_spill] sm:$0xff] %v10986_v20  ;;  %v10988_v21 = vmax.f32 %v459_v16, 0.0 }
 0x11c   :  { %16022 = vst [vmem:[#allocation27_spill] sm:$0xff] %v10984_v19  ;;  %v10992_v22 = vpack.c.bf16 %v10984_v19, %v10982_v17  ;;  %v16129_v19 = vmov 0 }
 0x11d   :  { %16024 = vst [vmem:[#allocation29_spill] sm:$0xff] %v10988_v21  ;;  %v10996_v24 = vpack.c.bf16 %v10988_v21, %v10986_v20  ;;  %v9136_v30 = vpop.f32.mrb[20].mxu0 }
 0x11e   :  { %16025 = vst [vmem:[#allocation30_spill] sm:$0xff] %v10992_v22  ;;  %v480_v32 = vadd.f32 %v9136_v30, %v10869_v57  ;;  %v471_v34 = vpop.f32.mrb[21].mxu0 }
 0x11f   :  { %16026 = vst [vmem:[#allocation31_spill] sm:$0xff] %v10996_v24  ;;  %v472_v35 = vadd.f32 %v10869_v57, %v471_v34  ;;  %v9137_v36 = vpop.f32.mrb[22].mxu0 }
 0x120   :  { %v483_v37 = vadd.f32 %v9137_v36, %v10869_v57  ;;  %v474_v38 = vpop.f32.mrb[23].mxu0  ;;  %v11002_v40 = vmax.f32 %v480_v32, 0.0  ;;  %v11039_v36 = vadd.s32 384, %v10873_v0 }
 0x121   :  { %v475_v39 = vadd.f32 %v10869_v57, %v474_v38  ;;  %v11006_v48 = vmax.f32 %v472_v35, 0.0 }
 0x122   :  { %v11004_v47 = vmax.f32 %v483_v37, 0.0  ;;  %16031 = vst [vmem:[#allocation36_spill] sm:$0xff] %v11039_v36 }
 0x123   :  { %v11008_v49 = vmax.f32 %v475_v39, 0.0 }
 0x124   :  { %v11012_v50 = vpack.c.bf16 %v11004_v47, %v11002_v40 }
 0x125   :  { %v11016_v51 = vpack.c.bf16 %v11008_v49, %v11006_v48  ;;  %v9140_v53 = vpop.f32.mrb[24].mxu0 }
 0x126   :  { %16027 = vst [vmem:[#allocation32_spill] sm:$0xff] %v11012_v50  ;;  %v496_v54 = vadd.f32 %v9140_v53, %v10869_v57  ;;  %v487_v55 = vpop.f32.mrb[25].mxu0 }
 0x127   :  { %16028 = vst [vmem:[#allocation33_spill] sm:$0xff] %v11016_v51  ;;  %v488_v63 = vadd.f32 %v10869_v57, %v487_v55  ;;  %v9141_v2 = vpop.f32.mrb[26].mxu0  ;;  %v11094_v51 = vadd.s32 40, %v10873_v0 }
 0x128   :  { %v499_v3 = vadd.f32 %v9141_v2, %v10869_v57  ;;  %v490_v5 = vpop.f32.mrb[27].mxu0  ;;  %v11022_v14 = vmax.f32 %v496_v54, 0.0  ;;  %v11048_v2 = vadd.s32 8, %v10873_v0 }
 0x129   :  { %v491_v10 = vadd.f32 %v10869_v57, %v490_v5  ;;  %v11026_v16 = vmax.f32 %v488_v63, 0.0  ;;  %v11045_v63 = vadd.s32 400, %v10873_v0  ;;  %v11076_v5 = vadd.s32 24, %v10873_v0  ;;  %16047 = vst [vmem:[#allocation52_spill] sm:$0xff] %v11094_v51 }
 0x12a   :  { %v11024_v15 = vmax.f32 %v499_v3, 0.0  ;;  %16033 = vst [vmem:[#allocation38_spill] sm:$0xff] %v11048_v2  ;;  %v776_v33 = vshra.s32 %v11048_v2, 4  ;;  %v780_v45 = vshra.s32 %v11094_v51, 4 }
 0x12b   :  { %v11028_v30 = vmax.f32 %v491_v10, 0.0  ;;  %16032 = vst [vmem:[#allocation37_spill] sm:$0xff] %v11045_v63  ;;  %v11053_v10 = vadd.s32 416, %v10873_v0  ;;  %16043 = vst [vmem:[#allocation48_spill] sm:$0xff] %v11076_v5 }
 0x12c   :  { %v11032_v32 = vpack.c.bf16 %v11024_v15, %v11022_v14  ;;  %v11109_v2 = vand.u32 15, %v776_v33  ;;  %v11127_v33 = vadd.s32 496, %v10873_v0 }
 0x12d   :  { %v11036_v34 = vpack.c.bf16 %v11028_v30, %v11026_v16  ;;  %v9144_v35 = vpop.f32.mrb[28].mxu0  ;;  %16034 = vst [vmem:[#allocation39_spill] sm:$0xff] %v11053_v10 }
 0x12e   :  { %16029 = vst [vmem:[#allocation34_spill] sm:$0xff] %v11032_v32  ;;  %v512_v37 = vadd.f32 %v9144_v35, %v10869_v57  ;;  %v503_v38 = vpop.f32.mrb[29].mxu0  ;;  %v11056_v35 = vadd.s32 16, %v10873_v0  ;;  %v11085_v32 = vadd.s32 32, %v10873_v0  ;;  %16050 = vst [vmem:[#allocation55_spill] sm:$0xff] %v11109_v2  ;;  %vm15379_vm14 = vcmp.ge.s32.totalorder %v11109_v2, 1 }
 0x12f   :  { %16030 = vst [vmem:[#allocation35_spill] sm:$0xff] %v11036_v34  ;;  %v504_v39 = vadd.f32 %v10869_v57, %v503_v38  ;;  %v9145_v53 = vpop.f32.mrb[30].mxu0  ;;  %v778_v34 = vshra.s32 %v11076_v5, 4  ;;  %v11117_v5 = vadd.s32 56, %v10873_v0  ;;  %16056 = vst [vmem:[#allocation61_spill] sm:$0xff] %v11127_v33 }
 0x130   :  { %v515_v54 = vadd.f32 %v9145_v53, %v10869_v57  ;;  %v506_v55 = vpop.f32.mrb[31].mxu0  ;;  %16035 = vst [vmem:[#allocation40_spill] sm:$0xff] %v11056_v35  ;;  %v11058_v38 = vmax.f32 %v512_v37, 0.0  ;;  %16045 = vst [vmem:[#allocation50_spill] sm:$0xff] %v11085_v32  ;;  %v777_v50 = vshra.s32 %v11056_v35, 4  ;;  %v11104_v35 = vadd.s32 48, %v10873_v0 }
 0x131   :  { %v507_v3 = vadd.f32 %v10869_v57, %v506_v55  ;;  %v11068_v12 = vmax.f32 %v504_v39, 0.0  ;;  %v779_v24 = vshra.s32 %v11085_v32, 4  ;;  %16052 = vst [vmem:[#allocation57_spill] sm:$0xff] %v11117_v5  ;;  %v11143_v32 = vadd.s32 64, %v10873_v0 }
 0x132   :  { %16036 = vst [vmem:[#allocation41_spill] sm:$0xff] %v11058_v38  ;;  %v11060_v53 = vmax.f32 %v515_v54, 0.0  ;;  %v775_v54 = vshra.s32 %v10873_v0, 4  ;;  %16048 = vst [vmem:[#allocation53_spill] sm:$0xff] %v11104_v35  ;;  %v781_v51 = vshra.s32 %v11104_v35, 4  ;;  %v782_v35 = vshra.s32 %v11117_v5, 4 }
 0x133   :  { %16040 = vst [vmem:[#allocation45_spill] sm:$0xff] %v11068_v12  ;;  %v11070_v55 = vmax.f32 %v507_v3, 0.0  ;;  %16062 = vst [vmem:[#allocation67_spill] sm:$0xff] %v11143_v32  ;;  %v11167_v5 = vadd.s32 88, %v10873_v0  ;;  %v783_v1 = vshra.s32 %v11143_v32, 4 }
 0x134   :  { %16037 = vst [vmem:[#allocation42_spill] sm:$0xff] %v11060_v53  ;;  %v11080_v37 = vpack.c.bf16 %v11060_v53, %v11058_v38  ;;  %v11107_v29 = vand.u32 15, %v775_v54  ;;  %v11124_v54 = vadd.s32 480, %v10873_v0  ;;  %v11146_v53 = vadd.s32 72, %v10873_v0 }
 0x135   :  { %16041 = vst [vmem:[#allocation46_spill] sm:$0xff] %v11070_v55  ;;  %v11089_v39 = vpack.c.bf16 %v11070_v55, %v11068_v12  ;;  %v9148_v3 = vpop.f32.mrb[32].mxu0  ;;  %16068 = vst [vmem:[#allocation73_spill] sm:$0xff] %v11167_v5  ;;  %v786_v38 = vshra.s32 %v11167_v5, 4  ;;  %v11197_v18 = vand.u32 15, %v783_v1 }
 0x136   :  { %16044 = vst [vmem:[#allocation49_spill] sm:$0xff] %v11080_v37  ;;  %v528_v37 = vadd.f32 %v9148_v3, %v10869_v57  ;;  %v519_v22 = vpop.f32.mrb[33].mxu0  ;;  %16049 = vst [vmem:[#allocation54_spill] sm:$0xff] %v11107_v29  ;;  %v784_v12 = vshra.s32 %v11146_v53, 4  ;;  %vm15380_vm13 = vcmp.ge.s32.totalorder %v11107_v29, 1 }
 0x137   :  { %16046 = vst [vmem:[#allocation51_spill] sm:$0xff] %v11089_v39  ;;  %v520_v62 = vadd.f32 %v10869_v57, %v519_v22  ;;  %v9149_v39 = vpop.f32.mrb[34].mxu0  ;;  %v11113_v22 = vand.u32 15, %v777_v50  ;;  %16055 = vst [vmem:[#allocation60_spill] sm:$0xff] %v11124_v54  ;;  %v11133_v50 = vand.u32 15, %v778_v34  ;;  %v11152_v34 = vand.u32 15, %v780_v45 }
 0x138   :  { %v531_v46 = vadd.f32 %v9149_v39, %v10869_v57  ;;  %v522_v3 = vpop.f32.mrb[35].mxu0  ;;  %v11119_v31 = vmax.f32 %v528_v37, 0.0  ;;  %16063 = vst [vmem:[#allocation68_spill] sm:$0xff] %v11146_v53  ;;  %16076 = vst [vmem:[#allocation81_spill] sm:$0xff] %v11197_v18  ;;  %v11208_v53 = vadd.s32 104, %v10873_v0 }
 0x139   :  { %v523_v61 = vadd.f32 %v10869_v57, %v522_v3  ;;  %16051 = vst [vmem:[#allocation56_spill] sm:$0xff] %v11113_v22  ;;  %v11129_v39 = vmax.f32 %v520_v62, 0.0  ;;  %16059 = vst [vmem:[#allocation64_spill] sm:$0xff] %v11133_v50 }
 0x13a   :  { %16053 = vst [vmem:[#allocation58_spill] sm:$0xff] %v11119_v31  ;;  %v11121_v55 = vmax.f32 %v531_v46, 0.0  ;;  %v11140_v46 = vand.u32 15, %v779_v24  ;;  %16065 = vst [vmem:[#allocation70_spill] sm:$0xff] %v11152_v34 }
 0x13b   :  { %16057 = vst [vmem:[#allocation62_spill] sm:$0xff] %v11129_v39  ;;  %v11131_v3 = vmax.f32 %v523_v61, 0.0  ;;  %16079 = vst [vmem:[#allocation84_spill] sm:$0xff] %v11208_v53 }
 0x13c   :  { %16054 = vst [vmem:[#allocation59_spill] sm:$0xff] %v11121_v55  ;;  %v11138_v37 = vpack.c.bf16 %v11121_v55, %v11119_v31  ;;  %16061 = vst [vmem:[#allocation66_spill] sm:$0xff] %v11140_v46  ;;  %v11156_v55 = vadd.s32 80, %v10873_v0  ;;  %vm16209_vm15 = vcmp.ge.s32.totalorder %v11140_v46, 1  ;;  %v11715_v46 = vadd.s32 264, %v10873_v0 }
 0x13d   :  { %16058 = vst [vmem:[#allocation63_spill] sm:$0xff] %v11131_v3  ;;  %v11150_v61 = vpack.c.bf16 %v11131_v3, %v11129_v39  ;;  %v9152_v62 = vpop.f32.mrb[36].mxu0  ;;  %v11164_v39 = vand.u32 15, %v781_v51 }
 0x13e   :  { %16060 = vst [vmem:[#allocation65_spill] sm:$0xff] %v11138_v37  ;;  %16066 = vst [vmem:[#allocation71_spill] sm:$0xff] %v11156_v55  ;;  %v544_v37 = vadd.f32 %v9152_v62, %v10869_v57  ;;  %v535_v31 = vpop.f32.mrb[37].mxu0  ;;  %v785_v51 = vshra.s32 %v11156_v55, 4 }
 0x13f   :  { %16064 = vst [vmem:[#allocation69_spill] sm:$0xff] %v11150_v61  ;;  %v536_v61 = vadd.f32 %v10869_v57, %v535_v31  ;;  %v9153_v45 = vpop.f32.mrb[38].mxu0  ;;  %16067 = vst [vmem:[#allocation72_spill] sm:$0xff] %v11164_v39  ;;  %v11175_v31 = vand.u32 15, %v782_v35 }
 0x140   :  { %v547_v24 = vadd.f32 %v9153_v45, %v10869_v57  ;;  %v538_v62 = vpop.f32.mrb[39].mxu0  ;;  %v11180_v9 = vmax.f32 %v544_v37, 0.0  ;;  %v11199_v37 = vand.u32 15, %v784_v12  ;;  %16218 = vst [vmem:[#allocation172_spill] sm:$0xff] %v11715_v46 }
 0x141   :  { %v539_v3 = vadd.f32 %v10869_v57, %v538_v62  ;;  %16069 = vst [vmem:[#allocation74_spill] sm:$0xff] %v11175_v31  ;;  %v11184_v6 = vmax.f32 %v536_v61, 0.0  ;;  %v11190_v62 = vadd.s32 96, %v10873_v0 }
 0x142   :  { %16070 = vst [vmem:[#allocation75_spill] sm:$0xff] %v11180_v9  ;;  %v11182_v45 = vmax.f32 %v547_v24, 0.0  ;;  %16077 = vst [vmem:[#allocation82_spill] sm:$0xff] %v11199_v37 }
 0x143   :  { %16072 = vst [vmem:[#allocation77_spill] sm:$0xff] %v11184_v6  ;;  %v11186_v32 = vmax.f32 %v539_v3, 0.0  ;;  %16074 = vst [vmem:[#allocation79_spill] sm:$0xff] %v11190_v62 }
 0x144   :  { %16071 = vst [vmem:[#allocation76_spill] sm:$0xff] %v11182_v45  ;;  %v11195_v13 = vpack.c.bf16 %v11182_v45, %v11180_v9  ;;  %v11217_v45 = vand.u32 15, %v785_v51  ;;  %v11226_v9 = vadd.s32 120, %v10873_v0 }
 0x145   :  { %16073 = vst [vmem:[#allocation78_spill] sm:$0xff] %v11186_v32  ;;  %v11205_v24 = vpack.c.bf16 %v11186_v32, %v11184_v6  ;;  %v9156_v5 = vpop.f32.mrb[40].mxu0  ;;  %v787_v32 = vshra.s32 %v11190_v62, 4 }
 0x146   :  { %16075 = vst [vmem:[#allocation80_spill] sm:$0xff] %v11195_v13  ;;  %v560_v1 = vadd.f32 %v9156_v5, %v10869_v57  ;;  %v551_v12 = vpop.f32.mrb[41].mxu0  ;;  %v11214_v13 = vadd.s32 112, %v10873_v0  ;;  %16081 = vst [vmem:[#allocation86_spill] sm:$0xff] %v11217_v45 }
 0x147   :  { %16078 = vst [vmem:[#allocation83_spill] sm:$0xff] %v11205_v24  ;;  %v552_v3 = vadd.f32 %v10869_v57, %v551_v12  ;;  %v9157_v61 = vpop.f32.mrb[42].mxu0  ;;  %v11219_v24 = vand.u32 15, %v786_v38  ;;  %16083 = vst [vmem:[#allocation88_spill] sm:$0xff] %v11226_v9  ;;  %v788_v38 = vshra.s32 %v11208_v53, 4  ;;  %v11246_v12 = vadd.s32 136, %v10873_v0 }
 0x148   :  { %16080 = vst [vmem:[#allocation85_spill] sm:$0xff] %v11214_v13  ;;  %v563_v55 = vadd.f32 %v9157_v61, %v10869_v57  ;;  %v554_v5 = vpop.f32.mrb[43].mxu0  ;;  %v11232_v26 = vmax.f32 %v560_v1, 0.0  ;;  %v789_v35 = vshra.s32 %v11214_v13, 4  ;;  %v11238_v61 = vadd.s32 128, %v10873_v0 }
 0x149   :  { %16082 = vst [vmem:[#allocation87_spill] sm:$0xff] %v11219_v24  ;;  %v555_v51 = vadd.f32 %v10869_v57, %v554_v5  ;;  %v11241_v41 = vmax.f32 %v552_v3, 0.0  ;;  %16089 = vst [vmem:[#allocation94_spill] sm:$0xff] %v11246_v12  ;;  %v11253_v1 = vand.u32 15, %v787_v32  ;;  %v790_v53 = vshra.s32 %v11226_v9, 4 }
 0x14a   :  { %16084 = vst [vmem:[#allocation89_spill] sm:$0xff] %v11232_v26  ;;  %v11234_v62 = vmax.f32 %v563_v55, 0.0  ;;  %16086 = vst [vmem:[#allocation91_spill] sm:$0xff] %v11238_v61  ;;  %v11262_v43 = vand.u32 15, %v788_v38  ;;  %v791_v32 = vshra.s32 %v11238_v61, 4  ;;  %v11269_v9 = vadd.s32 144, %v10873_v0 }
 0x14b   :  { %16087 = vst [vmem:[#allocation92_spill] sm:$0xff] %v11241_v41  ;;  %v11243_v25 = vmax.f32 %v555_v51, 0.0  ;;  %16091 = vst [vmem:[#allocation96_spill] sm:$0xff] %v11253_v1  ;;  %v11275_v38 = vadd.s32 152, %v10873_v0 }
 0x14c   :  { %16085 = vst [vmem:[#allocation90_spill] sm:$0xff] %v11234_v62  ;;  %v11251_v55 = vpack.c.bf16 %v11234_v62, %v11232_v26  ;;  %16093 = vst [vmem:[#allocation98_spill] sm:$0xff] %v11262_v43  ;;  %v11265_v62 = vand.u32 15, %v789_v35  ;;  %v11311_v44 = vand.u32 15, %v791_v32 }
 0x14d   :  { %16088 = vst [vmem:[#allocation93_spill] sm:$0xff] %v11243_v25  ;;  %v11260_v51 = vpack.c.bf16 %v11243_v25, %v11241_v41  ;;  %v9160_v6 = vpop.f32.mrb[44].mxu0  ;;  %16095 = vst [vmem:[#allocation100_spill] sm:$0xff] %v11269_v9  ;;  %v11280_v41 = vand.u32 15, %v790_v53  ;;  %v794_v13 = vshra.s32 %v11275_v38, 4 }
 0x14e   :  { %16090 = vst [vmem:[#allocation95_spill] sm:$0xff] %v11251_v55  ;;  %v576_v5 = vadd.f32 %v9160_v6, %v10869_v57  ;;  %v567_v42 = vpop.f32.mrb[45].mxu0  ;;  %16094 = vst [vmem:[#allocation99_spill] sm:$0xff] %v11265_v62 }
 0x14f   :  { %16092 = vst [vmem:[#allocation97_spill] sm:$0xff] %v11260_v51  ;;  %v568_v3 = vadd.f32 %v10869_v57, %v567_v42  ;;  %v9161_v55 = vpop.f32.mrb[46].mxu0  ;;  %v792_v51 = vshra.s32 %v11246_v12, 4  ;;  %16096 = vst [vmem:[#allocation101_spill] sm:$0xff] %v11275_v38  ;;  %v11286_v12 = vadd.s32 160, %v10873_v0  ;;  %v16111_v38 = vand.u32 15, %v11045_v63 }
 0x150   :  { %v579_v25 = vadd.f32 %v9161_v55, %v10869_v57  ;;  %v570_v61 = vpop.f32.mrb[47].mxu0  ;;  %16097 = vst [vmem:[#allocation102_spill] sm:$0xff] %v11280_v41  ;;  %v11289_v23 = vmax.f32 %v576_v5, 0.0  ;;  %v793_v55 = vshra.s32 %v11269_v9, 4  ;;  %v16104_v5 = vand.u32 15, %v11039_v36  ;;  %16108 = vst [vmem:[#allocation110_spill] sm:$0xff] %v11311_v44 }
 0x151   :  { %v571_v42 = vadd.f32 %v10869_v57, %v570_v61  ;;  %16098 = vst [vmem:[#allocation103_spill] sm:$0xff] %v11286_v12  ;;  %v11295_v35 = vmax.f32 %v568_v3, 0.0  ;;  %v11314_v3 = vadd.s32 168, %v10873_v0  ;;  %vm11323_vm3 = vcmp.ge.s32.totalorder %v16111_v38, 1 }
 0x152   :  { %16099 = vst [vmem:[#allocation104_spill] sm:$0xff] %v11289_v23  ;;  %v11291_v6 = vmax.f32 %v579_v25, 0.0  ;;  %vm11307_vm2 = vcmp.ge.s32.totalorder %v16104_v5, 1  ;;  %v16105_v25 = vmov 0  ;;  %v16112_v9 = vmov 0  ;;  %vm8118_vm8 = vmpackc.low %vm15377_vm6, %vm11323_vm3 }
 0x153   :  { %16101 = vst [vmem:[#allocation106_spill] sm:$0xff] %v11295_v35  ;;  %v11297_v26 = vmax.f32 %v571_v42, 0.0  ;;  %v16106_v25 = vsel %vm11307_vm2, 4294967295, %v16105_v25  ;;  %16109 = vst [vmem:[#allocation111_spill] sm:$0xff] %v11314_v3  ;;  %v16113_v9 = vsel %vm11323_vm3, 4294967295, %v16112_v9  ;;  %v11327_v5 = vand.u32 15, %v792_v51 }
 0x154   :  { %16100 = vst [vmem:[#allocation105_spill] sm:$0xff] %v11291_v6  ;;  %v11303_v56 = vpack.c.bf16 %v11291_v6, %v11289_v23  ;;  %16107 = vst [vmem:[#allocation109_spill] sm:$0xff] %v16106_v25  ;;  %v795_v32 = vshra.s32 %v11286_v12, 4  ;;  %v11338_v38 = vand.u32 15, %v793_v55  ;;  %v11343_v23 = vand.u32 15, %v794_v13 }
 0x155   :  { %16102 = vst [vmem:[#allocation107_spill] sm:$0xff] %v11297_v26  ;;  %v11319_v61 = vpack.c.bf16 %v11297_v26, %v11295_v35  ;;  %v9164_v53 = vpop.f32.mrb[48].mxu0  ;;  %16114 = vst [vmem:[#allocation113_spill] sm:$0xff] %v16113_v9  ;;  %v796_v55 = vshra.s32 %v11314_v3, 4  ;;  %v11356_v13 = vadd.s32 176, %v10873_v0  ;;  %v16128_v51 = vand.u32 15, %v11053_v10 }
 0x156   :  { %16103 = vst [vmem:[#allocation108_spill] sm:$0xff] %v11303_v56  ;;  %16115 = vst [vmem:[#allocation114_spill] sm:$0xff] %v11327_v5  ;;  %v11333_v56 = vld [vmem:[%s15191_s3] sm:$0xff]   ;;  %v592_v36 = vadd.f32 %v9164_v53, %v10869_v57  ;;  %v583_v63 = vpop.f32.mrb[49].mxu0 }
 0x157   :  { %16110 = vst [vmem:[#allocation112_spill] sm:$0xff] %v11319_v61  ;;  %16116 = vst [vmem:[#allocation115_spill] sm:$0xff] %v11338_v38  ;;  %v584_v12 = vadd.f32 %v10869_v57, %v583_v63  ;;  %v9165_v35 = vpop.f32.mrb[50].mxu0  ;;  %9258 = vmatprep.subr.bf16.mxu0 %v11333_v56  ;;  %vm11383_vm4 = vcmp.ge.s32.totalorder %v16128_v51, 1  ;;  %v797_v51 = vshra.s32 %v11356_v13, 4 }
 0x158   :  { %16117 = vst [vmem:[#allocation116_spill] sm:$0xff] %v11343_v23  ;;  %v11347_v17 = vmax.f32 %v592_v36, 0.0  ;;  %v595_v53 = vadd.f32 %v9165_v35, %v10869_v57  ;;  %v586_v61 = vpop.f32.mrb[51].mxu0  ;;  %16120 = vst [vmem:[#allocation119_spill] sm:$0xff] %v11356_v13  ;;  %v11361_v36 = vand.u32 15, %v795_v32  ;;  %v11364_v35 = vadd.s32 184, %v10873_v0 }
 0x159   :  { %v11352_v20 = vmax.f32 %v584_v12, 0.0  ;;  %v587_v63 = vadd.f32 %v10869_v57, %v586_v61  ;;  %v11370_v12 = vadd.s32 192, %v10873_v0  ;;  %v11373_v61 = vadd.s32 200, %v10873_v0  ;;  %vm11417_vm7 = vmpackc.low %vm15377_vm6, %vm11307_vm2 }
 0x15a   :  { %16118 = vst [vmem:[#allocation117_spill] sm:$0xff] %v11347_v17  ;;  %v11359_v58 = vmax.f32 %v595_v53, 0.0  ;;  %16122 = vst [vmem:[#allocation121_spill] sm:$0xff] %v11361_v36  ;;  %v1273_v26 = vrot.slane %v11347_v17, 7  ;;  %v16130_v19 = vsel %vm11383_vm4, 4294967295, %v16129_v19 }
 0x15b   :  { %16119 = vst [vmem:[#allocation118_spill] sm:$0xff] %v11352_v20  ;;  %16123 = vst [vmem:[#allocation122_spill] sm:$0xff] %v11364_v35  ;;  %v1271_v42 = vrot.slane %v11352_v20, 7  ;;  %v11367_v3 = vmax.f32 %v587_v63, 0.0  ;;  %v11387_v63 = vand.u32 15, %v796_v55 }
 0x15c   :  { %16121 = vst [vmem:[#allocation120_spill] sm:$0xff] %v11359_v58  ;;  %16125 = vst [vmem:[#allocation124_spill] sm:$0xff] %v11370_v12  ;;  %v1274_v53 = vrot.slane %v11359_v58, 7  ;;  %v11379_v32 = vpack.c.bf16 %v11359_v58, %v11347_v17  ;;  %v16134_v58 = vand.u32 15, %v11063_v27  ;;  %v16138_v27 = vrot.slane %v11291_v6, 7 }
 0x15d   :  { %16124 = vst [vmem:[#allocation123_spill] sm:$0xff] %v11367_v3  ;;  %16126 = vst [vmem:[#allocation125_spill] sm:$0xff] %v11373_v61  ;;  %v1272_v59 = vrot.slane %v11367_v3, 7  ;;  %v11393_v60 = vpack.c.bf16 %v11367_v3, %v11352_v20  ;;  %v9168_v36 = vpop.f32.mrb[52].mxu0  ;;  %v798_v3 = vshra.s32 %v11364_v35, 4 }
 0x15e   :  { %16127 = vst [vmem:[#allocation126_spill] sm:$0xff] %v11379_v32  ;;  %16131 = vst [vmem:[#allocation127_spill] sm:$0xff] %v16130_v19  ;;  %vm11397_vm5 = vcmp.ge.s32.totalorder %v16134_v58, 1  ;;  %v16135_v32 = vmov 0  ;;  %v608_v10 = vadd.f32 %v9168_v36, %v10869_v57  ;;  %v599_v21 = vpop.f32.mrb[53].mxu0  ;;  %v1300_v17 = vsel %vm15376_vm1, %v1273_v26, %v1274_v53 }
 0x15f   :  { %16132 = vst [vmem:[#allocation128_spill] sm:$0xff] %v11387_v63  ;;  %16133 = vst [vmem:[#allocation129_spill] sm:$0xff] %v11393_v60  ;;  %v16136_v32 = vsel %vm11397_vm5, 4294967295, %v16135_v32  ;;  %v600_v60 = vadd.f32 %v10869_v57, %v599_v21  ;;  %v9169_v20 = vpop.f32.mrb[54].mxu0  ;;  %v1302_v58 = vsel %vm15376_vm1, %v1271_v42, %v1272_v59  ;;  %v1303_v13 = vsel %vm15376_vm1, %v16138_v27, %v1271_v42 }
 0x160   :  { %16137 = vst [vmem:[#allocation130_spill] sm:$0xff] %v16136_v32  ;;  %v1301_v21 = vsel %vm15376_vm1, %v1272_v59, %v1273_v26  ;;  %v11423_v55 = vmax.f32 %v608_v10, 0.0  ;;  %v611_v35 = vadd.f32 %v9169_v20, %v10869_v57  ;;  %v602_v63 = vpop.f32.mrb[55].mxu0  ;;  %v11426_v6 = vpack.c.bf16 %v1302_v58, %v1303_v13  ;;  %v10579_v59 = vld [vmem:[%s15191_s3 + $0x108] sm:$0xff]   ;;  %vm11503_vm11 = vmpackc.low %vm15377_vm6, %vm11383_vm4 }
 0x161   :  { %v11428_v23 = vpack.c.bf16 %v1300_v17, %v1301_v21  ;;  %v11435_v25 = vmax.f32 %v600_v60, 0.0  ;;  %v603_v26 = vadd.f32 %v10869_v57, %v602_v63  ;;  %v11448_v13 = vand.u32 15, %v797_v51  ;;  %vm11522_vm12 = vmpackc.low %vm15377_vm6, %vm11397_vm5 }
 0x162   :  { %16141 = vst [vmem:[#allocation131_spill] sm:$0xff] %v11423_v55  ;;  %16142 = vst [vmem:[#allocation132_spill] sm:$0xff] %v11426_v6  ;;  %v11443_v10 = vmax.f32 %v611_v35, 0.0  ;;  %9482 = vmatprep.mubr.msk.bf16.mxu1 %vm11417_vm7, %v11426_v6  ;;  %v11455_v21 = vand.u32 15, %v798_v3  ;;  %v1277_v35 = vrot.slane %v11423_v55, 7  ;;  %v16150_v36 = vand.u32 15, %v11066_v8 }
 0x163   :  { %16143 = vst [vmem:[#allocation133_spill] sm:$0xff] %v11428_v23  ;;  %16144 = vst [vmem:[#allocation134_spill] sm:$0xff] %v11435_v25  ;;  %v1275_v63 = vrot.slane %v11435_v25, 7  ;;  %v11452_v58 = vmax.f32 %v603_v26, 0.0  ;;  %9483 = vmatmul.mubr.msk.bf16.vlgmr.msra.gmra.mrb[0].mxu1 %vm8118_vm8, %v11428_v23  ;;  %v16151_v26 = vmov 0  ;;  %v16156_v27 = vmov 0 }
 0x164   :  { %16145 = vst [vmem:[#allocation135_spill] sm:$0xff] %v11443_v10  ;;  %16146 = vst [vmem:[#allocation136_spill] sm:$0xff] %v11448_v13  ;;  %v11462_v51 = vpack.c.bf16 %v11443_v10, %v11423_v55  ;;  %9499 = vmatpush3.bf16.msra.mxu1 %v10851_v52  ;;  %vm11467_vm9 = vcmp.ge.s32.totalorder %v16150_v36, 1  ;;  %v10581_v52 = vld [vmem:[%s15191_s3 + $0x110] sm:$0xff]   ;;  %v16155_v36 = vand.u32 15, %v11073_v11  ;;  %v799_v20 = vshra.s32 %v11370_v12, 4 }
 0x165   :  { %16147 = vst [vmem:[#allocation137_spill] sm:$0xff] %v11452_v58  ;;  %16148 = vst [vmem:[#allocation138_spill] sm:$0xff] %v11455_v21  ;;  %v16152_v26 = vsel %vm11467_vm9, 4294967295, %v16151_v26  ;;  %v1276_v3 = vrot.slane %v11452_v58, 7  ;;  %v11474_v60 = vpack.c.bf16 %v11452_v58, %v11435_v25  ;;  %v9172_v17 = vpop.f32.mrb[56].mxu0  ;;  %9500 = vmatprep.subr.bf16.mxu1 %v10579_v59  ;;  %v1299_v42 = vsel %vm15376_vm1, %v1274_v53, %v1275_v63 }
 0x166   :  { %16149 = vst [vmem:[#allocation139_spill] sm:$0xff] %v11462_v51  ;;  %16153 = vst [vmem:[#allocation140_spill] sm:$0xff] %v16152_v26  ;;  %vm11483_vm10 = vcmp.ge.s32.totalorder %v16155_v36, 1  ;;  %v624_v23 = vadd.f32 %v9172_v17, %v10869_v57  ;;  %v615_v6 = vpop.f32.mrb[57].mxu0  ;;  %v16159_v9 = vrot.slane %v11443_v10, 7  ;;  %v800_v51 = vshra.s32 %v11373_v61, 4 }
 0x167   :  { %16154 = vst [vmem:[#allocation141_spill] sm:$0xff] %v11474_v60  ;;  %v16157_v27 = vsel %vm11483_vm10, 4294967295, %v16156_v27  ;;  %v11495_v60 = vadd.s32 208, %v10873_v0  ;;  %v616_v36 = vadd.f32 %v10869_v57, %v615_v6  ;;  %v9173_v11 = vpop.f32.mrb[58].mxu0  ;;  %v1298_v8 = vsel %vm15376_vm1, %v1275_v63, %v1276_v3  ;;  %vm11604_vm0 = vmpackc.low %vm15377_vm6, %vm11467_vm9 }
 0x168   :  { %16158 = vst [vmem:[#allocation142_spill] sm:$0xff] %v16157_v27  ;;  %v1296_v53 = vsel %vm15376_vm1, %v1277_v35, %v16159_v9  ;;  %v1297_v9 = vsel %vm15376_vm1, %v1276_v3, %v1277_v35  ;;  %v11510_v61 = vadd.s32 216, %v10873_v0  ;;  %v11512_v12 = vmax.f32 %v624_v23, 0.0  ;;  %v618_v58 = vpop.f32.mrb[59].mxu0  ;;  %9501 = vmatpush3.bf16.msra.mxu1 %v10579_v59  ;;  %vm11620_vm8 = vmpackc.low %vm15377_vm6, %vm11483_vm10 }
 0x169   :  { %16160 = vst [vmem:[#allocation143_spill] sm:$0xff] %v11495_v60  ;;  %v627_v6 = vadd.f32 %v9173_v11, %v10869_v57  ;;  %v11515_v63 = vpack.c.bf16 %v1298_v8, %v1299_v42  ;;  %v11517_v19 = vpack.c.bf16 %v1296_v53, %v1297_v9  ;;  %v11529_v11 = vmax.f32 %v616_v36, 0.0  ;;  %9502 = vmatprep.subr.bf16.mxu1 %v10581_v52  ;;  %v10583_v42 = vld [vmem:[%s15191_s3 + $0x118] sm:$0xff]  }
 0x16a   :  { %16163 = vst [vmem:[#allocation144_spill] sm:$0xff] %v11510_v61  ;;  %16164 = vst [vmem:[#allocation145_spill] sm:$0xff] %v11512_v12  ;;  %v619_v8 = vadd.f32 %v10869_v57, %v618_v58  ;;  %v11538_v59 = vadd.s32 224, %v10873_v0  ;;  %v11547_v58 = vand.u32 15, %v799_v20  ;;  %v11549_v3 = vand.u32 15, %v800_v51 }
 0x16b   :  { %16165 = vst [vmem:[#allocation146_spill] sm:$0xff] %v11515_v63  ;;  %16166 = vst [vmem:[#allocation147_spill] sm:$0xff] %v11517_v19  ;;  %v11540_v35 = vmax.f32 %v627_v6, 0.0  ;;  %9486 = vmatprep.mubr.msk.bf16.mxu1 %vm11503_vm11, %v11515_v63  ;;  %v801_v53 = vshra.s32 %v11495_v60, 4  ;;  %v1279_v9 = vrot.slane %v11529_v11, 7  ;;  %v802_v17 = vshra.s32 %v11510_v61, 4 }
 0x16c   :  { %16169 = vst [vmem:[#allocation148_spill] sm:$0xff] %v11529_v11  ;;  %16170 = vst [vmem:[#allocation149_spill] sm:$0xff] %v11538_v59  ;;  %v11554_v6 = vmax.f32 %v619_v8, 0.0  ;;  %9487 = vmatmul.mubr.msk.bf16.gmra.mrb[4].mxu1 %vm11522_vm12, %v11517_v19  ;;  %v1281_v20 = vrot.slane %v11512_v12, 7  ;;  %v16176_v8 = vand.u32 15, %v11124_v54  ;;  %v16177_v36 = vmov 0 }
 0x16d   :  { %16171 = vst [vmem:[#allocation150_spill] sm:$0xff] %v11540_v35  ;;  %16172 = vst [vmem:[#allocation151_spill] sm:$0xff] %v11547_v58  ;;  %v1282_v51 = vrot.slane %v11540_v35, 7  ;;  %v11565_v63 = vpack.c.bf16 %v11540_v35, %v11512_v12  ;;  %9503 = vmatpush3.bf16.msra.mxu1 %v10581_v52  ;;  %v9176_v32 = vpop.f32.mrb[60].mxu0  ;;  %v16181_v61 = vrot.slane %v11443_v10, 7  ;;  %v16182_v60 = vand.u32 15, %v11127_v33 }
 0x16e   :  { %16173 = vst [vmem:[#allocation152_spill] sm:$0xff] %v11549_v3  ;;  %16174 = vst [vmem:[#allocation153_spill] sm:$0xff] %v11554_v6  ;;  %vm11569_vm11 = vcmp.ge.s32.totalorder %v16176_v8, 1  ;;  %v1280_v19 = vrot.slane %v11554_v6, 7  ;;  %v11577_v23 = vpack.c.bf16 %v11554_v6, %v11529_v11  ;;  %9504 = vmatprep.subr.bf16.mxu1 %v10583_v42  ;;  %v10585_v8 = vld [vmem:[%s15191_s3 + $0x120] sm:$0xff]   ;;  %v16183_v25 = vmov 0 }
 0x16f   :  { %16175 = vst [vmem:[#allocation154_spill] sm:$0xff] %v11565_v63  ;;  %v16178_v36 = vsel %vm11569_vm11, 4294967295, %v16177_v36  ;;  %v1295_v52 = vsel %vm15376_vm1, %v16181_v61, %v1279_v9  ;;  %vm11588_vm12 = vcmp.ge.s32.totalorder %v16182_v60, 1  ;;  %v640_v54 = vadd.f32 %v9176_v32, %v10869_v57  ;;  %v631_v6 = vpop.f32.mrb[61].mxu0 }
 0x170   :  { %16179 = vst [vmem:[#allocation155_spill] sm:$0xff] %v16178_v36  ;;  %16180 = vst [vmem:[#allocation156_spill] sm:$0xff] %v11577_v23  ;;  %v16184_v25 = vsel %vm11588_vm12, 4294967295, %v16183_v25  ;;  %v1292_v61 = vsel %vm15376_vm1, %v1281_v20, %v1282_v51  ;;  %v632_v11 = vadd.f32 %v10869_v57, %v631_v6  ;;  %v9177_v12 = vpop.f32.mrb[62].mxu0  ;;  %v1294_v60 = vsel %vm15376_vm1, %v1279_v9, %v1280_v19 }
 0x171   :  { %16185 = vst [vmem:[#allocation157_spill] sm:$0xff] %v16184_v25  ;;  %v1293_v32 = vsel %vm15376_vm1, %v1280_v19, %v1281_v20  ;;  %v11610_v23 = vmax.f32 %v640_v54, 0.0  ;;  %v643_v35 = vadd.f32 %v9177_v12, %v10869_v57  ;;  %v634_v33 = vpop.f32.mrb[63].mxu0  ;;  %9505 = vmatpush3.bf16.msra.mxu1 %v10583_v42  ;;  %v11613_v6 = vpack.c.bf16 %v1294_v60, %v1295_v52  ;;  %v10586_v12 = vld [vmem:[%s15191_s3 + $0x128] sm:$0xff]   ;;  %v16237_v25 = vld [vmem:[#allocation42_spill] sm:$0xff] }
 0x172   :  { %v11615_v10 = vpack.c.bf16 %v1292_v61, %v1293_v32  ;;  %v11625_v19 = vmax.f32 %v632_v11, 0.0  ;;  %v635_v54 = vadd.f32 %v10869_v57, %v634_v33  ;;  %9506 = vmatprep.subr.bf16.mxu1 %v10585_v8  ;;  %vm15413_vm1 = vcmp.ge.s32.totalorder %v11164_v39, 1 }
 0x173   :  { %16188 = vst [vmem:[#allocation158_spill] sm:$0xff] %v11610_v23  ;;  %16189 = vst [vmem:[#allocation159_spill] sm:$0xff] %v11613_v6  ;;  %v11633_v42 = vand.u32 15, %v801_v53  ;;  %v11636_v52 = vmax.f32 %v643_v35, 0.0  ;;  %9490 = vmatprep.mubr.msk.bf16.mxu1 %vm11604_vm0, %v11613_v6  ;;  %v11643_v57 = vand.u32 15, %v802_v17  ;;  %v11646_v33 = vadd.s32 232, %v10873_v0 }
 0x174   :  { %16190 = vst [vmem:[#allocation160_spill] sm:$0xff] %v11615_v10  ;;  %16193 = vst [vmem:[#allocation161_spill] sm:$0xff] %v11625_v19  ;;  %v1283_v11 = vrot.slane %v11625_v19, 7  ;;  %v11649_v53 = vmax.f32 %v635_v54, 0.0  ;;  %9491 = vmatmul.mubr.msk.bf16.gmra.mrb[8].mxu1 %vm11620_vm8, %v11615_v10  ;;  %v803_v35 = vshra.s32 %v11538_v59, 4  ;;  %v11664_v17 = vadd.s32 240, %v10873_v0 }
 0x175   :  { %16194 = vst [vmem:[#allocation162_spill] sm:$0xff] %v11633_v42  ;;  %16195 = vst [vmem:[#allocation163_spill] sm:$0xff] %v11636_v52  ;;  %v1285_v61 = vrot.slane %v11610_v23, 7  ;;  %v1286_v60 = vrot.slane %v11636_v52, 7  ;;  %v11670_v32 = vpack.c.bf16 %v11636_v52, %v11610_v23  ;;  %9507 = vmatpush3.bf16.msra.mxu1 %v10585_v8  ;;  %vm16203_vm8 = vcmp.ge.s32.totalorder %v11113_v22, 1  ;;  %v10587_v6 = vld [vmem:[%s15191_s3 + $0x130] sm:$0xff]  }
 0x176   :  { %16196 = vst [vmem:[#allocation164_spill] sm:$0xff] %v11643_v57  ;;  %16197 = vst [vmem:[#allocation165_spill] sm:$0xff] %v11646_v33  ;;  %v11681_v54 = vadd.s32 248, %v10873_v0  ;;  %v1284_v20 = vrot.slane %v11649_v53, 7  ;;  %v11686_v26 = vpack.c.bf16 %v11649_v53, %v11625_v19  ;;  %9508 = vmatprep.subr.bf16.mxu1 %v10586_v12  ;;  %vm16210_vm6 = vcmp.ge.s32.totalorder %v11152_v34, 1  ;;  %v10594_v22 = vld [vmem:[%s15191_s3 + $0x8] sm:$0xff]  }
 0x177   :  { %16198 = vst [vmem:[#allocation166_spill] sm:$0xff] %v11649_v53  ;;  %vm11658_vm0 = vmpackc.low %vm15379_vm14, %vm15380_vm13  ;;  %vm16204_vm14 = vcmp.ge.s32.totalorder %v11133_v50, 1  ;;  %v11702_v27 = vadd.s32 256, %v10873_v0  ;;  %v16215_v59 = vrot.slane %v10878_v4, 7  ;;  %v16262_v52 = vld [vmem:[#allocation11_spill] sm:$0xff]  ;;  %v11849_v8 = vadd.s32 296, %v10873_v0 }
 0x178   :  { %16201 = vst [vmem:[#allocation167_spill] sm:$0xff] %v11664_v17  ;;  %16202 = vst [vmem:[#allocation168_spill] sm:$0xff] %v11670_v32  ;;  %9194 = vmatprep.mubr.msk.bf16.mxu0 %vm11658_vm0, %v11670_v32  ;;  %vm16223_vm0 = vmmov 1   ;;  %v16252_v32 = vld [vmem:[#allocation59_spill] sm:$0xff]  ;;  %v16274_v19 = vrot.slane %v10878_v4, 1 }
 0x179   :  { %vm11676_vm13 = vmpackc.low %vm16204_vm14, %vm16203_vm8  ;;  %16207 = vst [vmem:[#allocation169_spill] sm:$0xff] %v11681_v54  ;;  %vm16213_vm14 = vcmp.lt.s32.totalorder %v10873_v0, 1  ;;  %9509 = vmatpush3.bf16.msra.mxu1 %v10586_v12 }
 0x17a   :  { %16208 = vst [vmem:[#allocation170_spill] sm:$0xff] %v11686_v26  ;;  %vm11692_vm7 = vmpackc.low %vm16210_vm6, %vm16209_vm15  ;;  %v1291_v10 = vsel %vm16213_vm14, %v1282_v51, %v1283_v11  ;;  %v804_v51 = vshra.s32 %v11646_v33, 4  ;;  %v16219_v26 = vld [vmem:[#allocation7_spill] sm:$0xff]  ;;  %9510 = vmatprep.subr.bf16.mxu1 %v10587_v6 }
 0x17b   :  { %16214 = vst [vmem:[#allocation171_spill] sm:$0xff] %v11702_v27  ;;  %vm16216_vm8 = vmmov %vm16213_vm14 }
 0x17c   :  { %v1351_v50 = vsel %vm16216_vm8, %v1286_v60, %v16215_v59  ;;  %vm16217_vm6 = vmmov %vm16216_vm8  ;;  %v16221_v59 = vld [vmem:[#allocation6_spill] sm:$0xff]  ;;  %v11774_v12 = vand.u32 15, %v804_v51  ;;  %v11787_v51 = vadd.s32 280, %v10873_v0 }
 0x17d   :  { %v1288_v34 = vsel %vm16217_vm6, %v1285_v61, %v1286_v60  ;;  %v11721_v2 = vpack.c.bf16 %v16219_v26, %v1351_v50  ;;  %9195 = vmatmul.mubr.msk.bf16.vlgmr.msra.gmra.mrb[64].mxu0 %vm11676_vm13, %v16221_v59  ;;  %vm16222_vm15 = vmmov %vm16217_vm6  ;;  %v805_v50 = vshra.s32 %v11664_v17, 4  ;;  %v16227_v26 = vld [vmem:[#allocation5_spill] sm:$0xff]  ;;  %9511 = vmatpush3.bf16.msra.mxu1 %v10587_v6 }
 0x17e   :  { %v1290_v63 = vsel %vm16222_vm15, %v1283_v11, %v1284_v20  ;;  %vm11731_vm14 = vmpackc.low %vm16223_vm0, %vm11569_vm11  ;;  %9198 = vmatprep.mubr.msk.bf16.mxu0 %vm11692_vm7, %v16227_v26  ;;  %v16233_v17 = vld [vmem:[#allocation41_spill] sm:$0xff]  ;;  %vm15460_vm7 = vcmp.ge.s32.totalorder %v11217_v45, 1  ;;  %9259 = vmatpush3.bf16.msra.mxu0 %v11333_v56  ;;  %vm15458_vm15 = vcmp.ge.s32.totalorder %v11253_v1, 1  ;;  %v10595_v56 = vld [vmem:[%s15191_s3 + $0x10] sm:$0xff]   ;;  %16239 = vst [vmem:[#allocation42_spill] sm:$0xff] %v11787_v51 }
 0x17f   :  { %16220 = vst [vmem:[#allocation7_spill] sm:$0xff] %v11721_v2  ;;  %vm16226_vm8 = vmmov %vm16217_vm6  ;;  %v11741_v9 = vpack.c.bf16 %v1290_v63, %v1291_v10  ;;  %vm15442_vm6 = vcmp.ge.s32.totalorder %v11219_v24, 1  ;;  %v11763_v10 = vand.u32 15, %v803_v35  ;;  %v16235_v63 = vld [vmem:[#allocation45_spill] sm:$0xff]  ;;  %v808_v35 = vshra.s32 %v11715_v46, 4  ;;  %9260 = vmatprep.subr.bf16.mxu0 %v10594_v22  ;;  %v16245_v46 = vld [vmem:[#allocation58_spill] sm:$0xff] }
 0x180   :  { %v1289_v33 = vsel %vm16226_vm8, %v1284_v20, %v1285_v61  ;;  %vm11748_vm13 = vmpackc.low %vm16223_vm0, %vm11588_vm12  ;;  %v806_v20 = vshra.s32 %v11681_v54, 4  ;;  %v11754_v61 = vadd.s32 272, %v10873_v0  ;;  %16236 = vst [vmem:[#allocation45_spill] sm:$0xff] %v11774_v12  ;;  %v11799_v54 = vand.u32 15, %v805_v50  ;;  %v10589_v50 = vld [vmem:[%s15191_s3 + $0x140] sm:$0xff]   ;;  %v16255_v2 = vld [vmem:[#allocation63_spill] sm:$0xff] }
 0x181   :  { %16228 = vst [vmem:[#allocation173_spill] sm:$0xff] %v11741_v9  ;;  %v11743_v11 = vpack.c.bf16 %v1288_v34, %v1289_v33  ;;  %v10588_v34 = vld [vmem:[%s15191_s3 + $0x138] sm:$0xff]   ;;  %16234 = vst [vmem:[#allocation41_spill] sm:$0xff] %v11763_v10  ;;  %v807_v33 = vshra.s32 %v11702_v27, 4  ;;  %9494 = vmatprep.mubr.msk.bf16.mxu1 %vm11731_vm14, %v11741_v9  ;;  %v16238_v27 = vld [vmem:[#allocation46_spill] sm:$0xff]  ;;  %vm16240_vm14 = vcmp.ge.s32.totalorder %v11175_v31, 1 }
 0x182   :  { %16232 = vst [vmem:[#allocation175_spill] sm:$0xff] %v11754_v61  ;;  %vm11795_vm8 = vmpackc.low %vm16240_vm14, %vm15413_vm1  ;;  %v11801_v36 = vand.u32 15, %v806_v20  ;;  %v809_v60 = vshra.s32 %v11754_v61, 4  ;;  %v16246_v9 = vld [vmem:[#allocation62_spill] sm:$0xff]  ;;  %9512 = vmatprep.subr.bf16.mxu1 %v10588_v34  ;;  %vm16248_vm14 = vcmp.ge.s32.totalorder %v11199_v37, 1  ;;  %9261 = vmatpush3.bf16.msra.mxu0 %v10594_v22  ;;  %v11822_v61 = vand.u32 15, %v808_v35 }
 0x183   :  { %16229 = vst [vmem:[#allocation174_spill] sm:$0xff] %v11743_v11  ;;  %9495 = vmatmul.mubr.msk.bf16.gmra.mrb[12].mxu1 %vm11748_vm13, %v11743_v11  ;;  %16243 = vst [vmem:[#allocation46_spill] sm:$0xff] %v11799_v54  ;;  %vm16247_vm13 = vcmp.ge.s32.totalorder %v11197_v18, 1  ;;  %v11818_v20 = vand.u32 15, %v807_v33  ;;  %v11825_v18 = vadd.s32 288, %v10873_v0  ;;  %9262 = vmatprep.subr.bf16.mxu0 %v10595_v56  ;;  %v10597_v37 = vld [vmem:[%s15191_s3 + $0x18] sm:$0xff]  }
 0x184   :  { %9514 = vmatprep.mubr.bf16.mxu1 %v16221_v59  ;;  %16244 = vst [vmem:[#allocation176_spill] sm:$0xff] %v11801_v36  ;;  %vm11811_vm1 = vmpackc.low %vm16248_vm14, %vm16247_vm13  ;;  %v16256_v11 = vld [vmem:[#allocation12_spill] sm:$0xff]  ;;  %v810_v22 = vshra.s32 %v11787_v51, 4  ;;  %v16259_v59 = vld [vmem:[#allocation2_spill] sm:$0xff]  ;;  %vm16261_vm13 = vcmp.lt.s32.totalorder %v10873_v0, 1  ;;  %9513 = vmatpush3.bf16.msra.mxu1 %v10588_v34  ;;  %v11846_v39 = vand.u32 15, %v809_v60 }
 0x185   :  { %16251 = vst [vmem:[#allocation58_spill] sm:$0xff] %v11818_v20  ;;  %16253 = vst [vmem:[#allocation62_spill] sm:$0xff] %v11822_v61  ;;  %9199 = vmatmul.mubr.msk.bf16.gmra.mrb[68].mxu0 %vm11795_vm8, %v16256_v11  ;;  %v16257_v35 = vld [vmem:[#allocation4_spill] sm:$0xff]  ;;  %v16260_v29 = vrot.slane %v16259_v59, 7  ;;  %v16266_v51 = vrot.slane %v10884_v7, 7  ;;  %9578 = vmatprep.subr.bf16.mxu1 %v10589_v50  ;;  %v11863_v31 = vadd.s32 304, %v10873_v0 }
 0x186   :  { %16254 = vst [vmem:[#allocation59_spill] sm:$0xff] %v11825_v18  ;;  %v16258_v6 = vrot.slane %v16257_v35, 7  ;;  %9202 = vmatprep.mubr.msk.bf16.mxu0 %vm11811_vm1, %v16262_v52  ;;  %16263 = vst [vmem:[#allocation63_spill] sm:$0xff] %v11846_v39  ;;  %9263 = vmatpush3.bf16.msra.mxu0 %v10595_v56  ;;  %v16270_v60 = vrot.slane %v16259_v59, 1  ;;  %vm16272_vm1 = vcmp.lt.s32.totalorder %v10873_v0, 7  ;;  %v10598_v59 = vld [vmem:[%s15191_s3 + $0x20] sm:$0xff]  }
 0x187   :  { %16264 = vst [vmem:[#allocation4_spill] sm:$0xff] %v11849_v8  ;;  %v16265_v33 = vmov %v16260_v29  ;;  %vm16267_vm8 = vmmov %vm16261_vm13  ;;  %9264 = vmatprep.subr.bf16.mxu0 %v10597_v37  ;;  %v16278_v56 = vrot.slane %v10922_v28, 7  ;;  %v16310_v24 = vld [vmem:[#allocation17_spill] sm:$0xff]  ;;  %v16315_v1 = vld [vmem:[#allocation76_spill] sm:$0xff] }
 0x188   :  { %v1348_v53 = vsel %vm16261_vm13, %v16260_v29, %v16258_v6  ;;  %v1349_v23 = vsel %vm16267_vm8, %v16266_v51, %v16265_v33  ;;  %v10590_v29 = vld [vmem:[%s15191_s3 + $0x148] sm:$0xff]   ;;  %16268 = vst [vmem:[#allocation2_spill] sm:$0xff] %v11863_v31  ;;  %v16271_v6 = vrot.slane %v10884_v7, 1  ;;  %vm16275_vm8 = vmmov %vm16272_vm1  ;;  %vm15481_vm13 = vcmp.ge.s32.totalorder %v11311_v44, 1  ;;  %v16393_v44 = vld [vmem:[#allocation28_spill] sm:$0xff] }
 0x189   :  { %v11865_v34 = vpack.c.bf16 %v1348_v53, %v1349_v23  ;;  %v811_v23 = vshra.s32 %v11825_v18, 4  ;;  %v11883_v53 = vadd.s32 312, %v10873_v0 }
 0x18a   :  { %v2696_v51 = vsel %vm16272_vm1, %v16271_v6, %v16270_v60  ;;  %v16273_v33 = vmov %v16271_v6  ;;  %v16279_v60 = vld [vmem:[#allocation8_spill] sm:$0xff]  ;;  %vm16281_vm1 = vcmp.lt.s32.totalorder %v10873_v0, 1  ;;  %9265 = vmatpush3.bf16.msra.mxu0 %v10597_v37  ;;  %v10599_v37 = vld [vmem:[%s15191_s3 + $0x28] sm:$0xff]  }
 0x18b   :  { %16269 = vst [vmem:[#allocation177_spill] sm:$0xff] %v11865_v34  ;;  %v2697_v39 = vsel %vm16275_vm8, %v16274_v19, %v16273_v33  ;;  %16276 = vst [vmem:[#allocation178_spill] sm:$0xff] %v11883_v53  ;;  %v16280_v19 = vrot.slane %v16279_v60, 7  ;;  %9515 = vmatmul.mubr.bf16.vlgmr.msra.gmra.mrb[16].mxu1 %v16227_v26  ;;  %v11897_v33 = vand.u32 15, %v810_v22  ;;  %v16284_v34 = vrot.slane %v16257_v35, 7  ;;  %9266 = vmatprep.subr.bf16.mxu0 %v10598_v59 }
 0x18c   :  { %v11888_v7 = vpack.c.bf16 %v2696_v51, %v2697_v39  ;;  %vm16285_vm8 = vmmov %vm16281_vm1  ;;  %v16286_v39 = vld [vmem:[#allocation10_spill] sm:$0xff]  ;;  %9518 = vmatprep.mubr.bf16.mxu1 %v16256_v11  ;;  %9579 = vmatpush3.bf16.msra.mxu1 %v10589_v50  ;;  %v16303_v50 = vrot.slane %v10922_v28, 1 }
 0x18d   :  { %v1346_v6 = vsel %vm16281_vm1, %v16280_v19, %v16278_v56  ;;  %16282 = vst [vmem:[#allocation8_spill] sm:$0xff] %v11897_v33  ;;  %v16283_v18 = vmov %v16280_v19  ;;  %v16287_v51 = vrot.slane %v16286_v39, 7  ;;  %vm16290_vm14 = vmmov %vm16281_vm1  ;;  %v16292_v19 = vrot.slane %v10922_v28, 7  ;;  %9580 = vmatprep.subr.bf16.mxu1 %v10590_v29 }
 0x18e   :  { %16277 = vst [vmem:[#allocation179_spill] sm:$0xff] %v11888_v7  ;;  %v1347_v4 = vsel %vm16285_vm8, %v16284_v34, %v16283_v18  ;;  %v16288_v7 = vld [vmem:[#allocation9_spill] sm:$0xff]  ;;  %vm11923_vm8 = vmpackc.low %vm15442_vm6, %vm15460_vm7  ;;  %vm16304_vm6 = vcmp.lt.s32.totalorder %v10873_v0, 7  ;;  %9267 = vmatpush3.bf16.msra.mxu0 %v10598_v59  ;;  %v10600_v59 = vld [vmem:[%s15191_s3 + $0x30] sm:$0xff]  }
 0x18f   :  { %v16289_v55 = vrot.slane %v16288_v7, 7  ;;  %v11928_v35 = vpack.c.bf16 %v1346_v6, %v1347_v4  ;;  %v10591_v4 = vld [vmem:[%s15191_s3 + $0x150] sm:$0xff]   ;;  %9268 = vmatprep.subr.bf16.mxu0 %v10599_v37 }
 0x190   :  { %9581 = vmatpush3.bf16.msra.mxu1 %v10590_v29  ;;  %v10592_v29 = vld [vmem:[%s15191_s3 + $0x158] sm:$0xff]  }
 0x191   :  { %v1344_v61 = vsel %vm16290_vm14, %v16289_v55, %v16287_v51  ;;  %v16291_v56 = vmov %v16289_v55  ;;  %v812_v55 = vshra.s32 %v11849_v8, 4  ;;  %16296 = vst [vmem:[#allocation10_spill] sm:$0xff] %v11928_v35  ;;  %vm16299_vm14 = vcmp.ge.s32.totalorder %v11262_v43, 1  ;;  %9582 = vmatprep.subr.bf16.mxu1 %v10591_v4 }
 0x192   :  { %v1345_v22 = vsel %vm16281_vm1, %v16292_v19, %v16291_v56  ;;  %v16298_v56 = vld [vmem:[#allocation77_spill] sm:$0xff]  ;;  %vm11938_vm1 = vmpackc.low %vm16299_vm14, %vm15458_vm15  ;;  %v16306_v51 = vrot.slane %v16279_v60, 1  ;;  %v11958_v8 = vand.u32 15, %v811_v23  ;;  %v16316_v23 = vld [vmem:[#allocation19_spill] sm:$0xff]  ;;  %vm16357_vm15 = vcmp.ge.s32.totalorder %v11280_v41, 1  ;;  %9269 = vmatpush3.bf16.msra.mxu0 %v10599_v37 }
 0x193   :  { %v11930_v34 = vpack.c.bf16 %v1344_v61, %v1345_v22  ;;  %v16302_v61 = vrot.slane %v16288_v7, 1  ;;  %v16305_v22 = vmov %v16303_v50  ;;  %vm16307_vm14 = vmmov %vm16304_vm6  ;;  %9203 = vmatmul.mubr.msk.bf16.gmra.mrb[72].mxu0 %vm11923_vm8, %v16316_v23  ;;  %v11992_v18 = vand.u32 15, %v812_v55  ;;  %9519 = vmatmul.mubr.bf16.gmra.mrb[20].mxu1 %v16262_v52 }
 0x194   :  { %v2693_v19 = vsel %vm16307_vm14, %v16306_v51, %v16305_v22  ;;  %16308 = vst [vmem:[#allocation77_spill] sm:$0xff] %v11958_v8  ;;  %v16325_v51 = vld [vmem:[#allocation18_spill] sm:$0xff]  ;;  %v16339_v22 = vld [vmem:[#allocation121_spill] sm:$0xff]  ;;  %9522 = vmatprep.mubr.bf16.mxu1 %v16316_v23  ;;  %9583 = vmatpush3.bf16.msra.mxu1 %v10591_v4 }
 0x195   :  { %16297 = vst [vmem:[#allocation9_spill] sm:$0xff] %v11930_v34  ;;  %v2692_v6 = vsel %vm16304_vm6, %v16303_v50, %v16302_v61  ;;  %v16311_v61 = vrot.slane %v16310_v24, 7  ;;  %v16312_v50 = vld [vmem:[#allocation16_spill] sm:$0xff]  ;;  %vm16314_vm6 = vcmp.lt.s32.totalorder %v10873_v0, 1  ;;  %v16322_v34 = vld [vmem:[#allocation14_spill] sm:$0xff]  ;;  %9206 = vmatprep.mubr.msk.bf16.mxu0 %vm11938_vm1, %v16325_v51  ;;  %16326 = vst [vmem:[#allocation17_spill] sm:$0xff] %v11992_v18  ;;  %9584 = vmatprep.subr.bf16.mxu1 %v10592_v29 }
 0x196   :  { %v11963_v43 = vpack.c.bf16 %v2692_v6, %v2693_v19  ;;  %v16313_v28 = vrot.slane %v16312_v50, 7  ;;  %v16318_v19 = vrot.slane %v16286_v39, 7  ;;  %vm16319_vm14 = vmmov %vm16314_vm6  ;;  %v16323_v35 = vrot.slane %v16322_v34, 7  ;;  %9270 = vmatprep.subr.bf16.mxu0 %v10600_v59 }
 0x197   :  { %vm16330_vm8 = vmmov %vm16314_vm6  ;;  %v16333_v55 = vrot.slane %v16312_v50, 1  ;;  %vm16335_vm1 = vcmp.lt.s32.totalorder %v10873_v0, 7  ;;  %9271 = vmatpush3.bf16.msra.mxu0 %v10600_v59 }
 0x198   :  { %16309 = vst [vmem:[#allocation180_spill] sm:$0xff] %v11963_v43  ;;  %v1342_v60 = vsel %vm16314_vm6, %v16313_v28, %v16311_v61  ;;  %v16317_v11 = vmov %v16313_v28  ;;  %v16320_v43 = vld [vmem:[#allocation15_spill] sm:$0xff]  ;;  %v16324_v28 = vld [vmem:[#allocation78_spill] sm:$0xff]  ;;  %vm16352_vm7 = vmmov %vm16314_vm6  ;;  %9585 = vmatpush3.bf16.msra.mxu1 %v10592_v29 }
 0x199   :  { %v1343_v6 = vsel %vm16319_vm14, %v16318_v19, %v16317_v11  ;;  %v16321_v45 = vrot.slane %v16320_v43, 7  ;;  %v16328_v11 = vmov %v16323_v35  ;;  %v16329_v19 = vrot.slane %v16310_v24, 7  ;;  %v10601_v29 = vld [vmem:[%s15191_s3 + $0x168] sm:$0xff]  }
 0x19a   :  { %v11994_v8 = vpack.c.bf16 %v1342_v60, %v1343_v6  ;;  %vm15485_vm14 = vcmp.ge.s32.totalorder %v11338_v38, 1  ;;  %v16334_v60 = vrot.slane %v16286_v39, 1  ;;  %v16342_v39 = vrot.slane %v16322_v34, 1 }
 0x19b   :  { %v1340_v61 = vsel %vm16314_vm6, %v16323_v35, %v16321_v45  ;;  %v1341_v26 = vsel %vm16330_vm8, %v16329_v19, %v16328_v11  ;;  %v16331_v35 = vld [vmem:[#allocation116_spill] sm:$0xff]  ;;  %v16337_v19 = vrot.slane %v16288_v7, 1  ;;  %vm16338_vm8 = vmmov %vm16335_vm1  ;;  %v16343_v7 = vrot.slane %v16310_v24, 1  ;;  %9523 = vmatmul.mubr.bf16.gmra.mrb[24].mxu1 %v16325_v51 }
 0x19c   :  { %16327 = vst [vmem:[#allocation16_spill] sm:$0xff] %v11994_v8  ;;  %v12008_v33 = vpack.c.bf16 %v1340_v61, %v1341_v26  ;;  %v2690_v6 = vsel %vm16335_vm1, %v16334_v60, %v16333_v55  ;;  %v16336_v11 = vmov %v16334_v60  ;;  %v16340_v8 = vld [vmem:[#allocation128_spill] sm:$0xff]  ;;  %v813_v26 = vshra.s32 %v11863_v31, 4 }
 0x19d   :  { %v2691_v45 = vsel %vm16338_vm8, %v16337_v19, %v16336_v11  ;;  %v2688_v55 = vsel %vm16335_vm1, %v16343_v7, %v16342_v39  ;;  %v16344_v60 = vmov %v16343_v7  ;;  %v16345_v11 = vrot.slane %v16312_v50, 1  ;;  %vm16346_vm8 = vmmov %vm16335_vm1 }
 0x19e   :  { %16332 = vst [vmem:[#allocation76_spill] sm:$0xff] %v12008_v33  ;;  %v12028_v61 = vpack.c.bf16 %v2690_v6, %v2691_v45  ;;  %v814_v31 = vshra.s32 %v11883_v53, 4  ;;  %v16348_v6 = vld [vmem:[#allocation23_spill] sm:$0xff]  ;;  %v16350_v33 = vld [vmem:[#allocation22_spill] sm:$0xff]  ;;  %v16354_v50 = vrot.slane %v16320_v43, 7  ;;  %vm16355_vm1 = vmmov %vm16314_vm6  ;;  %v16462_v51 = vrot.slane %v11026_v16, 7 }
 0x19f   :  { %v2689_v19 = vsel %vm16346_vm8, %v16345_v11, %v16344_v60  ;;  %v16351_v18 = vrot.slane %v16350_v33, 7  ;;  %vm16356_vm8 = vcmp.ge.s32.totalorder %v11265_v62, 1  ;;  %v12068_v60 = vadd.s32 320, %v10873_v0 }
 0x1a0   :  { %16341 = vst [vmem:[#allocation15_spill] sm:$0xff] %v12028_v61  ;;  %v12044_v45 = vpack.c.bf16 %v2688_v55, %v2689_v19  ;;  %v16349_v61 = vrot.slane %v16348_v6, 7  ;;  %vm12063_vm6 = vmpackc.low %vm16357_vm15, %vm16356_vm8  ;;  %v16364_v19 = vld [vmem:[#allocation20_spill] sm:$0xff]  ;;  %v16368_v52 = vrot.slane %v16348_v6, 7  ;;  %v16394_v62 = vrot.slane %v16393_v44, 7 }
 0x1a1   :  { %v16353_v24 = vmov %v16351_v18  ;;  %16360 = vst [vmem:[#allocation78_spill] sm:$0xff] %v12068_v60  ;;  %vm16369_vm15 = vmmov %vm16355_vm1  ;;  %v16399_v55 = vld [vmem:[#allocation24_spill] sm:$0xff] }
 0x1a2   :  { %16347 = vst [vmem:[#allocation14_spill] sm:$0xff] %v12044_v45  ;;  %v1338_v39 = vsel %vm16352_vm7, %v16351_v18, %v16349_v61  ;;  %v1339_v7 = vsel %vm16355_vm1, %v16354_v50, %v16353_v24  ;;  %v16362_v61 = vld [vmem:[#allocation21_spill] sm:$0xff]  ;;  %v16365_v24 = vrot.slane %v16364_v19, 7  ;;  %vm16366_vm7 = vmmov %vm16355_vm1  ;;  %vm16370_vm1 = vcmp.ge.s32.totalorder %v11327_v5, 1 }
 0x1a3   :  { %v12070_v18 = vpack.c.bf16 %v1338_v39, %v1339_v7  ;;  %v16363_v11 = vrot.slane %v16362_v61, 7  ;;  %vm12088_vm8 = vmpackc.low %vm16370_vm1, %vm15481_vm13  ;;  %v12093_v39 = vadd.s32 328, %v10873_v0  ;;  %v10596_v7 = vld [vmem:[%s15191_s3 + $0x160] sm:$0xff]   ;;  %v16379_v5 = vrot.slane %v16322_v34, 1 }
 0x1a4   :  { %v16367_v23 = vmov %v16365_v24  ;;  %v12113_v45 = vadd.s32 336, %v10873_v0  ;;  %9586 = vmatprep.subr.bf16.mxu1 %v10596_v7 }
 0x1a5   :  { %16361 = vst [vmem:[#allocation116_spill] sm:$0xff] %v12070_v18  ;;  %v1336_v50 = vsel %vm16366_vm7, %v16365_v24, %v16363_v11  ;;  %v1337_v53 = vsel %vm16369_vm15, %v16368_v52, %v16367_v23  ;;  %16373 = vst [vmem:[#allocation23_spill] sm:$0xff] %v12093_v39  ;;  %v16375_v52 = vrot.slane %v16350_v33, 1  ;;  %v16376_v23 = vrot.slane %v16320_v43, 1  ;;  %9587 = vmatpush3.bf16.msra.mxu1 %v10596_v7  ;;  %v10604_v7 = vld [vmem:[%s15191_s3 + $0x178] sm:$0xff]  }
 0x1a6   :  { %v12098_v11 = vpack.c.bf16 %v1336_v50, %v1337_v53  ;;  %vm16377_vm7 = vcmp.lt.s32.totalorder %v10873_v0, 7  ;;  %v10602_v53 = vld [vmem:[%s15191_s3 + $0x38] sm:$0xff]   ;;  %v16382_v50 = vrot.slane %v16364_v19, 1  ;;  %9588 = vmatprep.subr.bf16.mxu1 %v10601_v29 }
 0x1a7   :  { %v2686_v24 = vsel %vm16377_vm7, %v16376_v23, %v16375_v52  ;;  %v16378_v18 = vmov %v16376_v23  ;;  %vm16380_vm15 = vmmov %vm16377_vm7  ;;  %v16383_v52 = vrot.slane %v16348_v6, 1  ;;  %v16388_v23 = vld [vmem:[#allocation25_spill] sm:$0xff]  ;;  %9272 = vmatprep.subr.bf16.mxu0 %v10602_v53 }
 0x1a8   :  { %16374 = vst [vmem:[#allocation22_spill] sm:$0xff] %v12098_v11  ;;  %v2687_v41 = vsel %vm16380_vm15, %v16379_v5, %v16378_v18  ;;  %vm16384_vm1 = vmmov %vm16377_vm7  ;;  %v16386_v5 = vrot.slane %v16350_v33, 1  ;;  %9207 = vmatmul.mubr.msk.bf16.gmra.mrb[76].mxu0 %vm12063_vm6, %v16388_v23  ;;  %vm16395_vm15 = vcmp.lt.s32.totalorder %v10873_v0, 1  ;;  %v16396_v33 = vmov %v16394_v62  ;;  %9526 = vmatprep.mubr.bf16.mxu1 %v16388_v23 }
 0x1a9   :  { %v12118_v37 = vpack.c.bf16 %v2686_v24, %v2687_v41  ;;  %v2684_v43 = vsel %vm16384_vm1, %v16383_v52, %v16382_v50  ;;  %v16385_v34 = vmov %v16383_v52  ;;  %vm16387_vm7 = vmmov %vm16384_vm1  ;;  %v12135_v41 = vand.u32 15, %v813_v26  ;;  %9210 = vmatprep.mubr.msk.bf16.mxu0 %vm12088_vm8, %v16399_v55  ;;  %9273 = vmatpush3.bf16.msra.mxu0 %v10602_v53 }
 0x1aa   :  { %v2685_v18 = vsel %vm16387_vm7, %v16386_v5, %v16385_v34  ;;  %v16397_v50 = vrot.slane %v16362_v61, 7  ;;  %vm16398_vm1 = vmmov %vm16395_vm15  ;;  %v12154_v26 = vand.u32 15, %v814_v31  ;;  %v16401_v34 = vld [vmem:[#allocation27_spill] sm:$0xff]  ;;  %vm15490_vm8 = vcmp.ge.s32.totalorder %v11448_v13, 1  ;;  %9589 = vmatpush3.bf16.msra.mxu1 %v10601_v29 }
 0x1ab   :  { %16381 = vst [vmem:[#allocation21_spill] sm:$0xff] %v12118_v37  ;;  %16389 = vst [vmem:[#allocation20_spill] sm:$0xff] %v12135_v41  ;;  %v12137_v24 = vpack.c.bf16 %v2684_v43, %v2685_v18  ;;  %v16391_v37 = vld [vmem:[#allocation29_spill] sm:$0xff]  ;;  %v16402_v5 = vrot.slane %v16401_v34, 7  ;;  %v16403_v18 = vld [vmem:[#allocation26_spill] sm:$0xff]  ;;  %v815_v31 = vshra.s32 %v12068_v60, 4  ;;  %9527 = vmatmul.mubr.bf16.gmra.mrb[28].mxu1 %v16399_v55 }
 0x1ac   :  { %v16392_v11 = vrot.slane %v16391_v37, 7  ;;  %v1335_v52 = vsel %vm16398_vm1, %v16397_v50, %v16396_v33  ;;  %16400 = vst [vmem:[#allocation29_spill] sm:$0xff] %v12154_v26  ;;  %vm16405_vm6 = vmmov %vm16398_vm1  ;;  %v16407_v33 = vrot.slane %v16391_v37, 7  ;;  %v16410_v50 = vrot.slane %v16393_v44, 1  ;;  %v16439_v60 = vld [vmem:[#allocation92_spill] sm:$0xff] }
 0x1ad   :  { %16390 = vst [vmem:[#allocation181_spill] sm:$0xff] %v12137_v24  ;;  %vm16408_vm7 = vmmov %vm16398_vm1  ;;  %vm16412_vm1 = vcmp.lt.s32.totalorder %v10873_v0, 7  ;;  %v16449_v23 = vrot.slane %v16403_v18, 1  ;;  %v12326_v29 = vand.u32 15, %v815_v31 }
 0x1ae   :  { %v1334_v6 = vsel %vm16395_vm15, %v16394_v62, %v16392_v11  ;;  %v16404_v62 = vrot.slane %v16403_v18, 7  ;;  %vm16426_vm13 = vmmov %vm16408_vm7 }
 0x1af   :  { %v12156_v43 = vpack.c.bf16 %v1334_v6, %v1335_v52  ;;  %v16411_v52 = vrot.slane %v16362_v61, 1  ;;  %16475 = vst [vmem:[#allocation184_spill] sm:$0xff] %v12326_v29 }
 0x1b0   :  { %v1332_v11 = vsel %vm16405_vm6, %v16404_v62, %v16402_v5  ;;  %v16406_v24 = vmov %v16404_v62  ;;  %v16414_v62 = vrot.slane %v16364_v19, 1  ;;  %vm16415_vm6 = vmmov %vm16412_vm1 }
 0x1b1   :  { %v1333_v4 = vsel %vm16408_vm7, %v16407_v33, %v16406_v24  ;;  %v2682_v24 = vsel %vm16412_vm1, %v16411_v52, %v16410_v50  ;;  %v16413_v5 = vmov %v16411_v52  ;;  %v16418_v50 = vrot.slane %v16391_v37, 1 }
 0x1b2   :  { %v12176_v6 = vpack.c.bf16 %v1332_v11, %v1333_v4  ;;  %v2683_v59 = vsel %vm16415_vm6, %v16414_v62, %v16413_v5  ;;  %v816_v11 = vshra.s32 %v12093_v39, 4  ;;  %v16417_v4 = vrot.slane %v16403_v18, 1  ;;  %vm16421_vm6 = vmmov %vm16412_vm1  ;;  %v16422_v62 = vld [vmem:[#allocation89_spill] sm:$0xff] }
 0x1b3   :  { %v12193_v33 = vpack.c.bf16 %v2682_v24, %v2683_v59  ;;  %v16419_v19 = vmov %v16418_v50  ;;  %v16420_v52 = vrot.slane %v16393_v44, 1  ;;  %v16424_v59 = vrot.slane %v11008_v49, 7 }
 0x1b4   :  { %16409 = vst [vmem:[#allocation28_spill] sm:$0xff] %v12176_v6  ;;  %v2680_v61 = vsel %vm16412_vm1, %v16418_v50, %v16417_v4  ;;  %v16425_v39 = vrot.slane %v11006_v48, 7  ;;  %v16428_v44 = vrot.slane %v16401_v34, 7  ;;  %vm16429_vm1 = vmmov %vm16408_vm7 }
 0x1b5   :  { %16416 = vst [vmem:[#allocation27_spill] sm:$0xff] %v12193_v33  ;;  %v2681_v5 = vsel %vm16421_vm6, %v16420_v52, %v16419_v19  ;;  %vm16430_vm6 = vcmp.ge.s32.totalorder %v16331_v35, 1  ;;  %v16434_v52 = vrot.slane %v11004_v47, 7 }
 0x1b6   :  { %v12209_v24 = vpack.c.bf16 %v2680_v61, %v2681_v5  ;;  %v1330_v4 = vsel %vm16426_vm13, %v16425_v39, %v16424_v59  ;;  %v16427_v37 = vmov %v16425_v39  ;;  %vm12229_vm7 = vmpackc.low %vm16430_vm6, %vm15485_vm14  ;;  %v16435_v5 = vrot.slane %v11002_v40, 7  ;;  %v16467_v61 = vld [vmem:[#allocation30_spill] sm:$0xff] }
 0x1b7   :  { %v1331_v50 = vsel %vm16429_vm1, %v16428_v44, %v16427_v37  ;;  %vm16436_vm13 = vmmov %vm16429_vm1  ;;  %v16438_v44 = vrot.slane %v11008_v49, 7  ;;  %vm16440_vm6 = vcmp.ge.s32.totalorder %v16339_v22, 1  ;;  %vm16441_vm14 = vcmp.ge.s32.totalorder %v16340_v8, 1 }
 0x1b8   :  { %16423 = vst [vmem:[#allocation26_spill] sm:$0xff] %v12209_v24  ;;  %v12233_v39 = vpack.c.bf16 %v1330_v4, %v1331_v50  ;;  %v1328_v59 = vsel %vm16436_vm13, %v16435_v5, %v16434_v52  ;;  %v16437_v37 = vmov %v16435_v5  ;;  %vm12252_vm15 = vmpackc.low %vm16441_vm14, %vm16440_vm6  ;;  %v10603_v4 = vld [vmem:[%s15191_s3 + $0x170] sm:$0xff]   ;;  %v16445_v52 = vrot.slane %v11006_v48, 1 }
 0x1b9   :  { %v1329_v19 = vsel %vm16429_vm1, %v16438_v44, %v16437_v37  ;;  %v16446_v5 = vrot.slane %v16401_v34, 1  ;;  %vm16447_vm13 = vcmp.lt.s32.totalorder %v10873_v0, 7  ;;  %v16456_v34 = vrot.slane %v11006_v48, 1  ;;  %9590 = vmatprep.subr.bf16.mxu1 %v10603_v4 }
 0x1ba   :  { %16433 = vst [vmem:[#allocation89_spill] sm:$0xff] %v12233_v39  ;;  %v12259_v50 = vpack.c.bf16 %v1328_v59, %v1329_v19  ;;  %vm16450_vm14 = vmmov %vm16447_vm13  ;;  %v16452_v19 = vrot.slane %v11002_v40, 1  ;;  %v16453_v59 = vrot.slane %v11008_v49, 1  ;;  %v16464_v48 = vmov %v16462_v51  ;;  %9591 = vmatpush3.bf16.msra.mxu1 %v10603_v4 }
 0x1bb   :  { %v2678_v37 = vsel %vm16447_vm13, %v16446_v5, %v16445_v52  ;;  %v16448_v44 = vmov %v16446_v5  ;;  %vm16454_vm1 = vmmov %vm16447_vm13  ;;  %v16458_v5 = vld [vmem:[#allocation90_spill] sm:$0xff]  ;;  %vm16463_vm13 = vcmp.lt.s32.totalorder %v10873_v0, 1  ;;  %9592 = vmatprep.subr.bf16.mxu1 %v10604_v7 }
 0x1bc   :  { %16444 = vst [vmem:[#allocation92_spill] sm:$0xff] %v12259_v50  ;;  %v2679_v53 = vsel %vm16450_vm14, %v16449_v23, %v16448_v44  ;;  %v2676_v50 = vsel %vm16454_vm1, %v16453_v59, %v16452_v19  ;;  %v16455_v52 = vmov %v16453_v59  ;;  %vm16457_vm6 = vmmov %vm16454_vm1  ;;  %v16459_v44 = vld [vmem:[#allocation31_spill] sm:$0xff]  ;;  %v16465_v19 = vrot.slane %v11004_v47, 7  ;;  %v16505_v23 = vld [vmem:[#allocation104_spill] sm:$0xff] }
 0x1bd   :  { %v12274_v39 = vpack.c.bf16 %v2678_v37, %v2679_v53  ;;  %v2677_v18 = vsel %vm16457_vm6, %v16456_v34, %v16455_v52  ;;  %9211 = vmatmul.mubr.msk.bf16.gmra.mrb[80].mxu0 %vm12229_vm7, %v16459_v44  ;;  %v16461_v53 = vrot.slane %v11028_v30, 7  ;;  %vm16466_vm14 = vmmov %vm16463_vm13  ;;  %v16469_v34 = vrot.slane %v11024_v15, 7  ;;  %v16483_v52 = vld [vmem:[#allocation93_spill] sm:$0xff]  ;;  %9530 = vmatprep.mubr.bf16.mxu1 %v16459_v44 }
 0x1be   :  { %v12292_v37 = vpack.c.bf16 %v2676_v50, %v2677_v18  ;;  %v1327_v59 = vsel %vm16466_vm14, %v16465_v19, %v16464_v48  ;;  %9214 = vmatprep.mubr.msk.bf16.mxu0 %vm12252_vm15, %v16467_v61  ;;  %vm16471_vm7 = vmmov %vm16463_vm13  ;;  %v16473_v48 = vrot.slane %v11028_v30, 7  ;;  %vm15499_vm6 = vcmp.ge.s32.totalorder %v11633_v42, 1  ;;  %9593 = vmatpush3.bf16.msra.mxu1 %v10604_v7 }
 0x1bf   :  { %16451 = vst [vmem:[#allocation182_spill] sm:$0xff] %v12274_v39  ;;  %v1326_v49 = vsel %vm16463_vm13, %v16462_v51, %v16461_v53  ;;  %v16470_v51 = vrot.slane %v11022_v14, 7  ;;  %vm16474_vm1 = vmmov %vm16471_vm7  ;;  %vm16479_vm13 = vcmp.lt.s32.totalorder %v10873_v0, 7  ;;  %9531 = vmatmul.mubr.bf16.gmra.mrb[32].mxu1 %v16467_v61 }
 0x1c0   :  { %16460 = vst [vmem:[#allocation90_spill] sm:$0xff] %v12292_v37  ;;  %v12310_v50 = vpack.c.bf16 %v1326_v49, %v1327_v59  ;;  %v16477_v59 = vrot.slane %v11026_v16, 1  ;;  %vm16482_vm14 = vmmov %vm16479_vm13  ;;  %v16493_v16 = vrot.slane %v11024_v15, 7 }
 0x1c1   :  { %v1324_v18 = vsel %vm16471_vm7, %v16470_v51, %v16469_v34  ;;  %v16472_v53 = vmov %v16470_v51  ;;  %v16478_v34 = vrot.slane %v11004_v47, 1 }
 0x1c2   :  { %16468 = vst [vmem:[#allocation183_spill] sm:$0xff] %v12310_v50  ;;  %v1325_v19 = vsel %vm16474_vm1, %v16473_v48, %v16472_v53  ;;  %v16481_v48 = vrot.slane %v11002_v40, 1  ;;  %v16622_v50 = vrot.slane %v16483_v52, 1 }
 0x1c3   :  { %v12331_v49 = vpack.c.bf16 %v1324_v18, %v1325_v19  ;;  %v2674_v51 = vsel %vm16479_vm13, %v16478_v34, %v16477_v59  ;;  %v16480_v53 = vmov %v16478_v34  ;;  %v16485_v19 = vrot.slane %v11022_v14, 1 }
 0x1c4   :  { %v2675_v31 = vsel %vm16482_vm14, %v16481_v48, %v16480_v53  ;;  %vm16488_vm14 = vmmov %vm16479_vm13  ;;  %v16490_v48 = vrot.slane %v16238_v27, 7 }
 0x1c5   :  { %16476 = vst [vmem:[#allocation185_spill] sm:$0xff] %v12331_v49  ;;  %v12348_v18 = vpack.c.bf16 %v2674_v51, %v2675_v31  ;;  %v16486_v49 = vrot.slane %v11028_v30, 1  ;;  %v16491_v31 = vrot.slane %v16235_v63, 7 }
 0x1c7   :  { %16484 = vst [vmem:[#allocation93_spill] sm:$0xff] %v12348_v18  ;;  %v2672_v47 = vsel %vm16479_vm13, %v16486_v49, %v16485_v19  ;;  %v16487_v40 = vmov %v16486_v49  ;;  %v1322_v49 = vsel %vm16474_vm1, %v16491_v31, %v16490_v48  ;;  %v16492_v30 = vmov %v16491_v31  ;;  %vm16494_vm13 = vmmov %vm16474_vm1  ;;  %v16618_v18 = vld [vmem:[#allocation77_spill] sm:$0xff] }
 0x1c8   :  { %v2673_v34 = vsel %vm16488_vm14, %v16477_v59, %v16487_v40  ;;  %v1323_v19 = vsel %vm16494_vm13, %v16493_v16, %v16492_v30  ;;  %vm16495_vm14 = vcmp.ge.s32.totalorder %v11455_v21, 1  ;;  %v12387_v40 = vand.u32 15, %v816_v11  ;;  %vm16504_vm13 = vmmov %vm16474_vm1 }
 0x1c9   :  { %v12364_v51 = vpack.c.bf16 %v2672_v47, %v2673_v34  ;;  %vm12383_vm7 = vmpackc.low %vm16495_vm14, %vm15490_vm8  ;;  %v12389_v59 = vpack.c.bf16 %v1322_v49, %v1323_v19  ;;  %v16500_v34 = vrot.slane %v16237_v25, 7  ;;  %v16501_v48 = vrot.slane %v16233_v17, 7  ;;  %v16531_v47 = vld [vmem:[#allocation32_spill] sm:$0xff] }
 0x1ca   :  { %16498 = vst [vmem:[#allocation187_spill] sm:$0xff] %v12387_v40  ;;  %v16503_v16 = vrot.slane %v16238_v27, 7  ;;  %vm16506_vm14 = vcmp.ge.s32.totalorder %v11547_v58, 1  ;;  %vm16507_vm8 = vcmp.ge.s32.totalorder %v11549_v3, 1  ;;  %v16509_v49 = vrot.slane %v16235_v63, 1 }
 0x1cb   :  { %16489 = vst [vmem:[#allocation186_spill] sm:$0xff] %v12364_v51  ;;  %16499 = vst [vmem:[#allocation188_spill] sm:$0xff] %v12389_v59  ;;  %v1320_v31 = vsel %vm16474_vm1, %v16501_v48, %v16500_v34  ;;  %v16502_v30 = vmov %v16501_v48  ;;  %v16510_v19 = vrot.slane %v11024_v15, 1  ;;  %vm16511_vm1 = vcmp.lt.s32.totalorder %v10873_v0, 7 }
 0x1cc   :  { %v1321_v53 = vsel %vm16504_vm13, %v16503_v16, %v16502_v30  ;;  %vm7767_vm15 = vmpackc.low %vm16507_vm8, %vm16506_vm14  ;;  %v16513_v30 = vrot.slane %v11022_v14, 1  ;;  %v16520_v15 = vrot.slane %v16235_v63, 1  ;;  %v16526_v11 = vrot.slane %v16246_v9, 7 }
 0x1cd   :  { %v12408_v4 = vpack.c.bf16 %v1320_v31, %v1321_v53  ;;  %v2670_v34 = vsel %vm16511_vm1, %v16510_v19, %v16509_v49  ;;  %v16512_v48 = vmov %v16510_v19  ;;  %vm16514_vm13 = vmmov %vm16511_vm1  ;;  %v16516_v53 = vrot.slane %v16233_v17, 1  ;;  %v16522_v19 = vld [vmem:[#allocation106_spill] sm:$0xff] }
 0x1ce   :  { %v2671_v16 = vsel %vm16514_vm13, %v16513_v30, %v16512_v48  ;;  %v16517_v31 = vrot.slane %v16238_v27, 1  ;;  %vm16518_vm8 = vmmov %vm16511_vm1  ;;  %v16523_v30 = vld [vmem:[#allocation33_spill] sm:$0xff]  ;;  %v16528_v63 = vmov %v16526_v11  ;;  %v16612_v59 = vrot.slane %v16315_v1, 1 }
 0x1cf   :  { %16508 = vst [vmem:[#allocation104_spill] sm:$0xff] %v12408_v4  ;;  %v12423_v44 = vpack.c.bf16 %v2670_v34, %v2671_v16  ;;  %vm16521_vm14 = vmmov %vm16511_vm1  ;;  %9215 = vmatmul.mubr.msk.bf16.gmra.mrb[84].mxu0 %vm12383_vm7, %v16523_v30  ;;  %v16525_v16 = vrot.slane %v16255_v2, 7  ;;  %vm16527_vm1 = vcmp.lt.s32.totalorder %v10873_v0, 1  ;;  %9534 = vmatprep.mubr.bf16.mxu1 %v16523_v30  ;;  %v16571_v30 = vld [vmem:[#allocation118_spill] sm:$0xff]  ;;  %v16608_v4 = vld [vmem:[#allocation63_spill] sm:$0xff] }
 0x1d0   :  { %v2668_v55 = vsel %vm16518_vm8, %v16517_v31, %v16516_v53  ;;  %v16519_v49 = vmov %v16517_v31  ;;  %v16529_v53 = vrot.slane %v16237_v25, 7  ;;  %vm16530_vm13 = vmmov %vm16527_vm1  ;;  %9218 = vmatprep.mubr.msk.bf16.mxu0 %vm7767_vm15, %v16531_v47  ;;  %vm15513_vm8 = vcmp.ge.s32.totalorder %v11799_v54, 1  ;;  %9535 = vmatmul.mubr.bf16.gmra.mrb[36].mxu1 %v16531_v47 }
 0x1d1   :  { %16515 = vst [vmem:[#allocation189_spill] sm:$0xff] %v12423_v44  ;;  %v2669_v14 = vsel %vm16521_vm14, %v16520_v15, %v16519_v49  ;;  %v1318_v27 = vsel %vm16527_vm1, %v16526_v11, %v16525_v16  ;;  %v16533_v11 = vrot.slane %v16252_v32, 7  ;;  %vm16535_vm7 = vmmov %vm16527_vm1  ;;  %v16539_v49 = vld [vmem:[#allocation105_spill] sm:$0xff]  ;;  %v2618_v61 = vrot.slane %v16571_v30, 1 }
 0x1d2   :  { %v12441_v34 = vpack.c.bf16 %v2668_v55, %v2669_v14  ;;  %v1319_v31 = vsel %vm16530_vm13, %v16529_v53, %v16528_v63  ;;  %v12460_v55 = vld [vmem:[%s15191_s3 + $0x180] sm:$0xff]   ;;  %v16534_v14 = vrot.slane %v16245_v46, 7  ;;  %v16537_v53 = vrot.slane %v16255_v2, 7  ;;  %vm16538_vm15 = vmmov %vm16527_vm1 }
 0x1d3   :  { %v12462_v15 = vpack.c.bf16 %v1318_v27, %v1319_v31  ;;  %v16541_v31 = vrot.slane %v16246_v9, 1  ;;  %vm16543_vm1 = vmmov %vm16521_vm14  ;;  %9658 = vmatprep.subr.bf16.mxu1 %v12460_v55  ;;  %v16560_v9 = vrot.slane %v16252_v32, 7 }
 0x1d4   :  { %16524 = vst [vmem:[#allocation106_spill] sm:$0xff] %v12441_v34  ;;  %v1316_v16 = vsel %vm16535_vm7, %v16534_v14, %v16533_v11  ;;  %v16536_v63 = vmov %v16534_v14  ;;  %v16545_v34 = vrot.slane %v16233_v17, 1  ;;  %vm16546_vm13 = vmmov %vm16543_vm1 }
 0x1d5   :  { %16532 = vst [vmem:[#allocation190_spill] sm:$0xff] %v12462_v15  ;;  %v1317_v7 = vsel %vm16538_vm15, %v16537_v53, %v16536_v63  ;;  %v16542_v15 = vrot.slane %v16237_v25, 1  ;;  %v16547_v53 = vld [vmem:[#allocation107_spill] sm:$0xff]  ;;  %vm16558_vm15 = vmmov %vm16535_vm7 }
 0x1d6   :  { %v12479_v27 = vpack.c.bf16 %v1316_v16, %v1317_v7  ;;  %v1268_v48 = vrot.slane %v16547_v53, 7  ;;  %v16548_v16 = vld [vmem:[#allocation62_spill] sm:$0xff] }
 0x1d7   :  { %v2666_v11 = vsel %vm16543_vm1, %v16542_v15, %v16541_v31  ;;  %v16544_v14 = vmov %v16542_v15  ;;  %v16551_v15 = vrot.slane %v16255_v2, 1 }
 0x1d8   :  { %16540 = vst [vmem:[#allocation105_spill] sm:$0xff] %v12479_v27  ;;  %v2667_v63 = vsel %vm16546_vm13, %v16545_v34, %v16544_v14  ;;  %v16550_v27 = vrot.slane %v16245_v46, 1  ;;  %v16553_v34 = vmov %v16541_v31  ;;  %vm16554_vm13 = vmmov %vm16543_vm1  ;;  %v2615_v14 = vrot.slane %v16547_v53, 1 }
 0x1d9   :  { %v12497_v7 = vpack.c.bf16 %v2666_v11, %v2667_v63  ;;  %v16552_v17 = vmov %v16551_v15  ;;  %v16556_v63 = vrot.slane %v16324_v28, 7 }
 0x1da   :  { %v2664_v25 = vsel %vm16543_vm1, %v16551_v15, %v16550_v27  ;;  %v2665_v31 = vsel %vm16554_vm13, %v16553_v34, %v16552_v17  ;;  %vm16561_vm1 = vmmov %vm16535_vm7  ;;  %v16562_v17 = vld [vmem:[#allocation117_spill] sm:$0xff]  ;;  %vm16563_vm13 = vcmp.ge.s32.totalorder %v11643_v57, 1  ;;  %v16566_v34 = vld [vmem:[#allocation75_spill] sm:$0xff] }
 0x1db   :  { %16549 = vst [vmem:[#allocation107_spill] sm:$0xff] %v12497_v7  ;;  %v12513_v11 = vpack.c.bf16 %v2664_v25, %v2665_v31  ;;  %v16557_v7 = vrot.slane %v16298_v56, 7  ;;  %vm7770_vm7 = vmpackc.low %vm16563_vm13, %vm15499_vm6  ;;  %v16567_v31 = vrot.slane %v16566_v34, 7  ;;  %vm16572_vm13 = vcmp.ge.s32.totalorder %v11763_v10, 1 }
 0x1dc   :  { %vm16573_vm6 = vcmp.ge.s32.totalorder %v11774_v12, 1  ;;  %v16615_v51 = vrot.slane %v16566_v34, 1 }
 0x1dd   :  { %16555 = vst [vmem:[#allocation191_spill] sm:$0xff] %v12513_v11  ;;  %v1314_v27 = vsel %vm16558_vm15, %v16557_v7, %v16556_v63  ;;  %v16559_v2 = vmov %v16557_v7  ;;  %v16565_v7 = vrot.slane %v16315_v1, 7  ;;  %vm16568_vm15 = vmmov %vm16561_vm1 }
 0x1de   :  { %v1315_v15 = vsel %vm16561_vm1, %v16560_v9, %v16559_v2  ;;  %v16569_v2 = vmov %v16567_v31  ;;  %v16570_v9 = vrot.slane %v16324_v28, 7  ;;  %vm7773_vm14 = vmpackc.low %vm16573_vm6, %vm16572_vm13 }
 0x1df   :  { %v12533_v25 = vpack.c.bf16 %v1314_v27, %v1315_v15  ;;  %v1312_v63 = vsel %vm16568_vm15, %v16567_v31, %v16565_v7  ;;  %v16575_v15 = vrot.slane %v16298_v56, 1  ;;  %v16576_v7 = vrot.slane %v16252_v32, 1 }
 0x1e0   :  { %v1313_v53 = vsel %vm16561_vm1, %v16570_v9, %v16569_v2  ;;  %vm16577_vm15 = vcmp.lt.s32.totalorder %v10873_v0, 7  ;;  %v16579_v2 = vrot.slane %v16245_v46, 1  ;;  %v16581_v9 = vld [vmem:[#allocation120_spill] sm:$0xff]  ;;  %v16587_v32 = vrot.slane %v16298_v56, 1 }
 0x1e1   :  { %16564 = vst [vmem:[#allocation117_spill] sm:$0xff] %v12533_v25  ;;  %v12552_v27 = vpack.c.bf16 %v1312_v63, %v1313_v53  ;;  %v2662_v31 = vsel %vm16577_vm15, %v16576_v7, %v16575_v15  ;;  %v16578_v25 = vmov %v16576_v7  ;;  %vm16580_vm1 = vmmov %vm16577_vm15  ;;  %v2621_v11 = vrot.slane %v16581_v9, 1  ;;  %v16589_v7 = vld [vmem:[#allocation123_spill] sm:$0xff] }
 0x1e2   :  { %v2663_v30 = vsel %vm16580_vm1, %v16579_v2, %v16578_v25  ;;  %v16583_v53 = vrot.slane %v16566_v34, 1  ;;  %v16584_v63 = vrot.slane %v16324_v28, 1  ;;  %vm16585_vm6 = vmmov %vm16580_vm1  ;;  %v2619_v25 = vrot.slane %v16589_v7, 1  ;;  %v16590_v2 = vld [vmem:[#allocation35_spill] sm:$0xff]  ;;  %v16599_v7 = vld [vmem:[#allocation34_spill] sm:$0xff] }
 0x1e3   :  { %16574 = vst [vmem:[#allocation75_spill] sm:$0xff] %v12552_v27  ;;  %v12567_v44 = vpack.c.bf16 %v2662_v31, %v2663_v30  ;;  %vm16588_vm13 = vmmov %vm16580_vm1  ;;  %9219 = vmatmul.mubr.msk.bf16.gmra.mrb[88].mxu0 %vm7770_vm7, %v16590_v2  ;;  %v16592_v30 = vrot.slane %v16483_v52, 7  ;;  %v16593_v9 = vrot.slane %v16439_v60, 7  ;;  %vm16594_vm15 = vcmp.lt.s32.totalorder %v10873_v0, 1  ;;  %9538 = vmatprep.mubr.bf16.mxu1 %v16590_v2 }
 0x1e4   :  { %v2660_v27 = vsel %vm16585_vm6, %v16584_v63, %v16583_v53  ;;  %v16586_v15 = vmov %v16584_v63  ;;  %v16596_v56 = vrot.slane %v16315_v1, 7  ;;  %vm16597_vm1 = vmmov %vm16594_vm15  ;;  %9222 = vmatprep.mubr.msk.bf16.mxu0 %vm7773_vm14, %v16599_v7  ;;  %vm15583_vm14 = vcmp.ge.s32.totalorder %v16608_v4, 1  ;;  %9539 = vmatmul.mubr.bf16.gmra.mrb[40].mxu1 %v16599_v7 }
 0x1e5   :  { %16582 = vst [vmem:[#allocation118_spill] sm:$0xff] %v12567_v44  ;;  %v2661_v46 = vsel %vm16588_vm13, %v16587_v32, %v16586_v15  ;;  %v1310_v53 = vsel %vm16594_vm15, %v16593_v9, %v16592_v30  ;;  %v16595_v28 = vmov %v16593_v9  ;;  %v16598_v15 = vld [vmem:[#allocation131_spill] sm:$0xff]  ;;  %vm16603_vm7 = vmmov %vm16597_vm1  ;;  %v16605_v44 = vrot.slane %v16483_v52, 7 }
 0x1e6   :  { %v12583_v31 = vpack.c.bf16 %v2660_v27, %v2661_v46  ;;  %v1311_v63 = vsel %vm16597_vm1, %v16596_v56, %v16595_v28  ;;  %v2624_v32 = vrot.slane %v16598_v15, 1  ;;  %v16601_v46 = vrot.slane %v16458_v5, 7  ;;  %vm16606_vm6 = vmmov %vm16597_vm1  ;;  %v16607_v56 = vld [vmem:[#allocation134_spill] sm:$0xff] }
 0x1e7   :  { %v12599_v27 = vpack.c.bf16 %v1310_v53, %v1311_v63  ;;  %v2622_v15 = vrot.slane %v16607_v56, 1  ;;  %v16609_v53 = vld [vmem:[#allocation8_spill] sm:$0xff]  ;;  %vm16613_vm15 = vmmov %vm16588_vm13  ;;  %v16630_v52 = vrot.slane %v16458_v5, 7  ;;  %v16644_v2 = vrot.slane %v16458_v5, 1  ;;  %v16655_v5 = vld [vmem:[#allocation153_spill] sm:$0xff] }
 0x1e8   :  { %16591 = vst [vmem:[#allocation120_spill] sm:$0xff] %v12583_v31  ;;  %v16602_v31 = vrot.slane %v16422_v62, 7  ;;  %vm16616_vm1 = vmmov %vm16588_vm13  ;;  %vm16640_vm13 = vcmp.ge.s32.totalorder %v11818_v20, 1  ;;  %v12865_v7 = vadd.s32 408, %v10873_v0 }
 0x1e9   :  { %16600 = vst [vmem:[#allocation123_spill] sm:$0xff] %v12599_v27  ;;  %v16611_v27 = vrot.slane %v16439_v60, 1 }
 0x1ea   :  { %v1308_v30 = vsel %vm16603_vm7, %v16602_v31, %v16601_v46  ;;  %v16604_v9 = vmov %v16602_v31  ;;  %v16614_v46 = vmov %v16612_v59  ;;  %16709 = vst [vmem:[#allocation201_spill] sm:$0xff] %v12865_v7 }
 0x1eb   :  { %v1309_v28 = vsel %vm16606_vm6, %v16605_v44, %v16604_v9  ;;  %v2658_v31 = vsel %vm16613_vm15, %v16612_v59, %v16611_v27  ;;  %v2659_v44 = vsel %vm16616_vm1, %v16615_v51, %v16614_v46  ;;  %v16617_v9 = vld [vmem:[#allocation135_spill] sm:$0xff]  ;;  %vm16623_vm15 = vmmov %vm16616_vm1  ;;  %v16624_v59 = vmov %v16622_v50 }
 0x1ec   :  { %v12616_v63 = vpack.c.bf16 %v1308_v30, %v1309_v28  ;;  %v2625_v56 = vrot.slane %v16617_v9, 1  ;;  %v16619_v30 = vld [vmem:[#allocation17_spill] sm:$0xff]  ;;  %v12633_v28 = vpack.c.bf16 %v2658_v31, %v2659_v44  ;;  %v16625_v34 = vmov %v16611_v27 }
 0x1ed   :  { %v2657_v51 = vsel %vm16616_vm1, %v16625_v34, %v16624_v59  ;;  %v16626_v27 = vld [vmem:[#allocation137_spill] sm:$0xff]  ;;  %v16628_v44 = vrot.slane %v16522_v19, 7  ;;  %vm16633_vm1 = vcmp.ge.s32.totalorder %v11801_v36, 1  ;;  %v16635_v34 = vrot.slane %v16539_v49, 7 }
 0x1ee   :  { %16610 = vst [vmem:[#allocation131_spill] sm:$0xff] %v12616_v63  ;;  %16620 = vst [vmem:[#allocation134_spill] sm:$0xff] %v12633_v28  ;;  %v16621_v63 = vrot.slane %v16422_v62, 1  ;;  %v2623_v46 = vrot.slane %v16626_v27, 1 }
 0x1ef   :  { %v1306_v9 = vsel %vm16606_vm6, %v16628_v44, %v1268_v48  ;;  %vm7776_vm7 = vmpackc.low %vm16633_vm1, %vm15513_vm8  ;;  %vm16641_vm1 = vcmp.ge.s32.totalorder %v16548_v16, 1 }
 0x1f0   :  { %v2656_v1 = vsel %vm16623_vm15, %v16622_v50, %v16621_v63  ;;  %v16629_v50 = vmov %v16628_v44  ;;  %vm16631_vm15 = vmmov %vm16606_vm6  ;;  %v16632_v63 = vld [vmem:[#allocation145_spill] sm:$0xff] }
 0x1f1   :  { %v12649_v31 = vpack.c.bf16 %v2656_v1, %v2657_v51  ;;  %v1307_v60 = vsel %vm16631_vm15, %v16630_v52, %v16629_v50  ;;  %v2628_v59 = vrot.slane %v16632_v63, 1  ;;  %v16636_v51 = vrot.slane %v16505_v23, 7  ;;  %vm16638_vm15 = vmmov %vm16606_vm6  ;;  %v16639_v52 = vld [vmem:[#allocation148_spill] sm:$0xff] }
 0x1f2   :  { %v12667_v1 = vpack.c.bf16 %v1306_v9, %v1307_v60  ;;  %v2626_v63 = vrot.slane %v16639_v52, 1  ;;  %vm7779_vm8 = vmpackc.low %vm16641_vm1, %vm16640_vm13  ;;  %v16643_v60 = vrot.slane %v16522_v19, 1  ;;  %v16649_v52 = vld [vmem:[#allocation150_spill] sm:$0xff] }
 0x1f3   :  { %16627 = vst [vmem:[#allocation135_spill] sm:$0xff] %v12649_v31  ;;  %v1304_v27 = vsel %vm16606_vm6, %v16636_v51, %v16635_v34  ;;  %v16637_v44 = vmov %v16636_v51  ;;  %vm16645_vm6 = vcmp.lt.s32.totalorder %v10873_v0, 7  ;;  %v16646_v51 = vmov %v16644_v2 }
 0x1f4   :  { %16634 = vst [vmem:[#allocation137_spill] sm:$0xff] %v12667_v1  ;;  %v1305_v50 = vsel %vm16638_vm15, %v1268_v48, %v16637_v44  ;;  %v2654_v34 = vsel %vm16645_vm6, %v16644_v2, %v16643_v60  ;;  %v16647_v48 = vrot.slane %v16422_v62, 1  ;;  %vm16648_vm15 = vmmov %vm16645_vm6  ;;  %v2629_v47 = vrot.slane %v16649_v52, 1  ;;  %v16656_v62 = vld [vmem:[#allocation51_spill] sm:$0xff]  ;;  %v16663_v52 = vld [vmem:[#allocation158_spill] sm:$0xff] }
 0x1f5   :  { %v12684_v9 = vpack.c.bf16 %v1304_v27, %v1305_v50  ;;  %v16651_v27 = vrot.slane %v16505_v23, 1  ;;  %vm16652_vm13 = vmmov %vm16645_vm6  ;;  %9223 = vmatmul.mubr.msk.bf16.gmra.mrb[92].mxu0 %vm7776_vm7, %v16656_v62  ;;  %9542 = vmatprep.mubr.bf16.mxu1 %v16656_v62 }
 0x1f6   :  { %v2655_v44 = vsel %vm16648_vm15, %v16647_v48, %v16646_v51  ;;  %vm16654_vm1 = vmmov %vm16645_vm6  ;;  %v16658_v51 = vrot.slane %v16539_v49, 1  ;;  %v16669_v49 = vld [vmem:[#allocation163_spill] sm:$0xff] }
 0x1f7   :  { %16642 = vst [vmem:[#allocation145_spill] sm:$0xff] %v12684_v9  ;;  %v12699_v1 = vpack.c.bf16 %v2654_v34, %v2655_v44  ;;  %v2652_v50 = vsel %vm16652_vm13, %v2615_v14, %v16651_v27  ;;  %v16653_v9 = vmov %v16643_v60  ;;  %v2627_v60 = vrot.slane %v16655_v5, 1  ;;  %vm16659_vm6 = vmmov %vm16654_vm1 }
 0x1f8   :  { %v2653_v2 = vsel %vm16654_vm1, %v16653_v9, %v2615_v14  ;;  %v2650_v34 = vsel %vm16659_vm6, %v16658_v51, %v2618_v61  ;;  %v16660_v48 = vmov %v16658_v51  ;;  %v16661_v44 = vmov %v16651_v27  ;;  %vm16662_vm15 = vmmov %vm16654_vm1  ;;  %v16664_v9 = vld [vmem:[#allocation49_spill] sm:$0xff] }
 0x1f9   :  { %16650 = vst [vmem:[#allocation148_spill] sm:$0xff] %v12699_v1  ;;  %v12711_v31 = vpack.c.bf16 %v2652_v50, %v2653_v2  ;;  %v2651_v19 = vsel %vm16662_vm15, %v16661_v44, %v16660_v48  ;;  %v2632_v14 = vrot.slane %v16663_v52, 1  ;;  %9226 = vmatprep.mubr.msk.bf16.mxu0 %vm7779_vm8, %v16664_v9  ;;  %v16666_v50 = vrot.slane %v16562_v17, 1  ;;  %vm16667_vm7 = vmmov %vm16654_vm1  ;;  %9543 = vmatmul.mubr.bf16.gmra.mrb[44].mxu1 %v16664_v9  ;;  %v16706_v9 = vld [vmem:[#allocation36_spill] sm:$0xff] }
 0x1fa   :  { %v12725_v27 = vpack.c.bf16 %v2650_v34, %v2651_v19  ;;  %vm16668_vm13 = vmmov %vm16654_vm1  ;;  %v2633_v51 = vrot.slane %v16669_v49, 1  ;;  %v2646_v48 = vsel %vm16654_vm1, %v2621_v11, %v2622_v15  ;;  %v16673_v19 = vld [vmem:[#allocation161_spill] sm:$0xff]  ;;  %v16736_v1 = vld [vmem:[#allocation60_spill] sm:$0xff] }
 0x1fb   :  { %16657 = vst [vmem:[#allocation150_spill] sm:$0xff] %v12711_v31  ;;  %v2648_v2 = vsel %vm16667_vm7, %v2619_v25, %v16666_v50  ;;  %v2649_v5 = vsel %vm16668_vm13, %v2618_v61, %v2619_v25  ;;  %v16671_v44 = vmov %v16666_v50  ;;  %vm16672_vm8 = vmmov %vm16654_vm1  ;;  %v2630_v52 = vrot.slane %v16673_v19, 1  ;;  %v16677_v25 = vld [vmem:[#allocation166_spill] sm:$0xff] }
 0x1fc   :  { %16665 = vst [vmem:[#allocation153_spill] sm:$0xff] %v12725_v27  ;;  %v12734_v23 = vpack.c.bf16 %v2648_v2, %v2649_v5  ;;  %v2647_v34 = vsel %vm16672_vm8, %v16671_v44, %v2621_v11  ;;  %vm16675_vm6 = vmmov %vm16654_vm1  ;;  %v2631_v2 = vrot.slane %v16677_v25, 1 }
 0x1fd   :  { %v12743_v27 = vpack.c.bf16 %v2646_v48, %v2647_v34  ;;  %v2644_v50 = vsel %vm16675_vm6, %v2623_v46, %v2624_v32  ;;  %vm16676_vm15 = vmmov %vm16654_vm1  ;;  %v2640_v49 = vsel %vm16675_vm6, %v2627_v60, %v2628_v59  ;;  %v16688_v34 = vld [vmem:[#allocation3_spill] sm:$0xff] }
 0x1fe   :  { %16670 = vst [vmem:[#allocation158_spill] sm:$0xff] %v12734_v23  ;;  %v2645_v61 = vsel %vm16676_vm15, %v2622_v15, %v2623_v46  ;;  %vm16679_vm7 = vmmov %vm16654_vm1  ;;  %v12763_v15 = vadd.s32 344, %v10873_v0  ;;  %v16689_v19 = vrot.slane %v16688_v34, 1  ;;  %v16723_v23 = vld [vmem:[#allocation112_spill] sm:$0xff] }
 0x1ff   :  { %16674 = vst [vmem:[#allocation163_spill] sm:$0xff] %v12743_v27  ;;  %v12751_v5 = vpack.c.bf16 %v2644_v50, %v2645_v61  ;;  %v2642_v17 = vsel %vm16679_vm7, %v2625_v56, %v2626_v63  ;;  %vm16680_vm13 = vmmov %vm16654_vm1  ;;  %vm16681_vm1 = vcmp.ge.s32.totalorder %v16609_v53, 1  ;;  %vm16684_vm7 = vcmp.ge.s32.totalorder %v16618_v18, 1 }
 0x200   :  { %v2643_v11 = vsel %vm16680_vm13, %v2624_v32, %v2625_v56  ;;  %vm7782_vm8 = vmpackc.low %vm16681_vm1, %vm15583_vm14  ;;  %vm16685_vm13 = vcmp.ge.s32.totalorder %v16619_v30, 1  ;;  %v12776_v32 = vadd.s32 352, %v10873_v0  ;;  %v12906_v27 = vadd.s32 456, %v10873_v0 }
 0x201   :  { %16678 = vst [vmem:[#allocation161_spill] sm:$0xff] %v12751_v5  ;;  %v12765_v46 = vpack.c.bf16 %v2642_v17, %v2643_v11  ;;  %vm16683_vm15 = vmmov %vm16675_vm6  ;;  %v16694_v17 = vld [vmem:[#allocation69_spill] sm:$0xff] }
 0x202   :  { %v2641_v48 = vsel %vm16683_vm15, %v2626_v63, %v2627_v60  ;;  %vm7785_vm12 = vmpackc.low %vm16685_vm13, %vm16684_vm7  ;;  %v12787_v63 = vadd.s32 360, %v10873_v0  ;;  %9227 = vmatmul.mubr.msk.bf16.gmra.mrb[96].mxu0 %vm7782_vm8, %v16694_v17  ;;  %vm15526_vm8 = vcmp.ge.s32.totalorder %v12326_v29, 1  ;;  %9546 = vmatprep.mubr.bf16.mxu1 %v16694_v17  ;;  %v16705_v17 = vld [vmem:[#allocation80_spill] sm:$0xff]  ;;  %16722 = vst [vmem:[#allocation208_spill] sm:$0xff] %v12906_v27  ;;  %v832_v31 = vshra.s32 %v12906_v27, 4 }
 0x203   :  { %16682 = vst [vmem:[#allocation166_spill] sm:$0xff] %v12765_v46  ;;  %v12778_v56 = vpack.c.bf16 %v2640_v49, %v2641_v48  ;;  %vm16687_vm1 = vmmov %vm16675_vm6  ;;  %v16697_v48 = vld [vmem:[#allocation65_spill] sm:$0xff]  ;;  %v12940_v27 = vadd.s32 488, %v10873_v0 }
 0x204   :  { %v2635_v44 = vsel %vm16687_vm1, %v2632_v14, %v2633_v51  ;;  %vm16690_vm6 = vmmov %vm16687_vm1  ;;  %9230 = vmatprep.mubr.msk.bf16.mxu0 %vm7785_vm12, %v16697_v48  ;;  %9547 = vmatmul.mubr.bf16.gmra.mrb[48].mxu1 %v16697_v48 }
 0x205   :  { %16686 = vst [vmem:[#allocation192_spill] sm:$0xff] %v12778_v56  ;;  %v2698_v50 = vsel %vm16690_vm6, %v2633_v51, %v16689_v19  ;;  %vm16692_vm15 = vmmov %vm16687_vm1  ;;  %v2637_v51 = vsel %vm16687_vm1, %v2630_v52, %v2631_v2  ;;  %vm15581_vm6 = vcmp.ge.s32.totalorder %v12135_v41, 1  ;;  %v12828_v19 = vadd.s32 368, %v10873_v0 }
 0x206   :  { %v12789_v60 = vpack.c.bf16 %v2698_v50, %v2635_v44  ;;  %v2638_v61 = vsel %vm16692_vm15, %v2629_v47, %v2630_v52  ;;  %vm16693_vm7 = vmmov %vm16687_vm1  ;;  %vm15525_vm15 = vcmp.ge.s32.totalorder %v12154_v26, 1  ;;  %v820_v52 = vshra.s32 %v12787_v63, 4  ;;  %16732 = vst [vmem:[#allocation212_spill] sm:$0xff] %v12940_v27 }
 0x207   :  { %v2639_v25 = vsel %vm16693_vm7, %v2628_v59, %v2629_v47  ;;  %vm16696_vm13 = vmmov %vm16687_vm1  ;;  %v817_v47 = vshra.s32 %v12113_v45, 4  ;;  %v818_v59 = vshra.s32 %v12763_v15, 4  ;;  %vm15523_vm7 = vcmp.ge.s32.totalorder %v12387_v40, 1 }
 0x208   :  { %16691 = vst [vmem:[#allocation3_spill] sm:$0xff] %v12789_v60  ;;  %v12796_v11 = vpack.c.bf16 %v2638_v61, %v2639_v25  ;;  %v2636_v49 = vsel %vm16696_vm13, %v2631_v2, %v2632_v14  ;;  %v819_v14 = vshra.s32 %v12776_v32, 4  ;;  %vm7788_vm12 = vmpackc.low %vm15525_vm15, %vm15581_vm6  ;;  %v12831_v50 = vadd.s32 376, %v10873_v0  ;;  %v16714_v60 = vld [vmem:[#allocation95_spill] sm:$0xff] }
 0x209   :  { %v12803_v44 = vpack.c.bf16 %v2636_v49, %v2637_v51  ;;  %vm7791_vm13 = vmpackc.low %vm15523_vm7, %vm15526_vm8  ;;  %v12823_v2 = vand.u32 15, %v817_v47  ;;  %v12825_v34 = vand.u32 15, %v818_v59  ;;  %v12835_v25 = vand.u32 15, %v820_v52  ;;  %v16704_v51 = vld [vmem:[#allocation83_spill] sm:$0xff] }
 0x20a   :  { %16695 = vst [vmem:[#allocation193_spill] sm:$0xff] %v12796_v11  ;;  %v12833_v61 = vand.u32 15, %v819_v14  ;;  %v12838_v49 = vadd.s32 392, %v10873_v0  ;;  %9231 = vmatmul.mubr.msk.bf16.gmra.mrb[100].mxu0 %vm7788_vm12, %v16704_v51  ;;  %v821_v47 = vshra.s32 %v12828_v19, 4  ;;  %v822_v59 = vshra.s32 %v12831_v50, 4  ;;  %9550 = vmatprep.mubr.bf16.mxu1 %v16704_v51  ;;  %v16713_v11 = vld [vmem:[#allocation97_spill] sm:$0xff] }
 0x20b   :  { %16698 = vst [vmem:[#allocation194_spill] sm:$0xff] %v12803_v44  ;;  %16699 = vst [vmem:[#allocation195_spill] sm:$0xff] %v12823_v2  ;;  %9234 = vmatprep.mubr.msk.bf16.mxu0 %vm7791_vm13, %v16705_v17  ;;  %vm15538_vm1 = vcmp.ge.s32.totalorder %v12823_v2, 1  ;;  %vm15535_vm7 = vcmp.ge.s32.totalorder %v12825_v34, 1  ;;  %v823_v14 = vshra.s32 %v16706_v9, 4  ;;  %vm15534_vm8 = vcmp.ge.s32.totalorder %v12835_v25, 1 }
 0x20c   :  { %16700 = vst [vmem:[#allocation196_spill] sm:$0xff] %v12825_v34  ;;  %16701 = vst [vmem:[#allocation197_spill] sm:$0xff] %v12833_v61  ;;  %vm15537_vm15 = vcmp.ge.s32.totalorder %v12833_v61, 1  ;;  %v824_v52 = vshra.s32 %v12838_v49, 4  ;;  %v12860_v9 = vand.u32 15, %v821_v47  ;;  %v12862_v62 = vand.u32 15, %v822_v59  ;;  %9551 = vmatmul.mubr.bf16.gmra.mrb[52].mxu1 %v16705_v17 }
 0x20d   :  { %16702 = vst [vmem:[#allocation198_spill] sm:$0xff] %v12835_v25  ;;  %16703 = vst [vmem:[#allocation199_spill] sm:$0xff] %v12838_v49  ;;  %v12867_v48 = vand.u32 15, %v823_v14  ;;  %v12872_v44 = vadd.s32 424, %v10873_v0  ;;  %v16715_v47 = vld [vmem:[#allocation37_spill] sm:$0xff]  ;;  %v826_v56 = vshra.s32 %v12865_v7, 4  ;;  %9554 = vmatprep.mubr.bf16.mxu1 %v16713_v11 }
 0x20e   :  { %vm7794_vm12 = vmpackc.low %vm15535_vm7, %vm15538_vm1  ;;  %16707 = vst [vmem:[#allocation36_spill] sm:$0xff] %v12860_v9  ;;  %v12869_v51 = vand.u32 15, %v824_v52  ;;  %vm15547_vm7 = vcmp.ge.s32.totalorder %v12862_v62, 1  ;;  %v825_v59 = vshra.s32 %v16715_v47, 4  ;;  %v16716_v14 = vld [vmem:[#allocation39_spill] sm:$0xff]  ;;  %v835_v49 = vshra.s32 %v16736_v1, 4 }
 0x20f   :  { %vm7797_vm13 = vmpackc.low %vm15534_vm8, %vm15537_vm15  ;;  %16708 = vst [vmem:[#allocation200_spill] sm:$0xff] %v12862_v62  ;;  %vm15550_vm8 = vcmp.ge.s32.totalorder %v12860_v9, 1  ;;  %vm15549_vm15 = vcmp.ge.s32.totalorder %v12867_v48, 1  ;;  %v827_v52 = vshra.s32 %v16716_v14, 4  ;;  %v828_v46 = vshra.s32 %v12872_v44, 4 }
 0x210   :  { %16710 = vst [vmem:[#allocation202_spill] sm:$0xff] %v12867_v48  ;;  %16711 = vst [vmem:[#allocation203_spill] sm:$0xff] %v12869_v51  ;;  %vm15546_vm1 = vcmp.ge.s32.totalorder %v12869_v51, 1  ;;  %v12894_v47 = vand.u32 15, %v825_v59  ;;  %v12896_v5 = vand.u32 15, %v826_v56  ;;  %v12899_v14 = vadd.s32 440, %v10873_v0 }
 0x211   :  { %16712 = vst [vmem:[#allocation204_spill] sm:$0xff] %v12872_v44  ;;  %v12901_v17 = vand.u32 15, %v827_v52  ;;  %v16724_v44 = vld [vmem:[#allocation108_spill] sm:$0xff]  ;;  %v16725_v56 = vld [vmem:[#allocation43_spill] sm:$0xff]  ;;  %v12973_v1 = vadd.s32 504, %v10873_v0 }
 0x212   :  { %9235 = vmatmul.mubr.msk.bf16.gmra.mrb[104].mxu0 %vm7794_vm12, %v16713_v11  ;;  %vm7800_vm12 = vmpackc.low %vm15547_vm7, %vm15550_vm8  ;;  %16717 = vst [vmem:[#allocation37_spill] sm:$0xff] %v12894_v47  ;;  %v12903_v11 = vand.u32 15, %v828_v46  ;;  %vm15561_vm7 = vcmp.ge.s32.totalorder %v12896_v5, 1  ;;  %v829_v59 = vshra.s32 %v16725_v56, 4  ;;  %v830_v7 = vshra.s32 %v12899_v14, 4  ;;  %v16726_v46 = vld [vmem:[#allocation44_spill] sm:$0xff] }
 0x213   :  { %9238 = vmatprep.mubr.msk.bf16.mxu0 %vm7797_vm13, %v16714_v60  ;;  %vm7803_vm13 = vmpackc.low %vm15546_vm1, %vm15549_vm15  ;;  %16718 = vst [vmem:[#allocation39_spill] sm:$0xff] %v12896_v5  ;;  %vm15567_vm1 = vcmp.ge.s32.totalorder %v12894_v47, 1  ;;  %vm15562_vm15 = vcmp.ge.s32.totalorder %v12901_v17, 1  ;;  %v831_v52 = vshra.s32 %v16726_v46, 4  ;;  %v12933_v46 = vadd.s32 472, %v10873_v0  ;;  %v16733_v5 = vld [vmem:[#allocation129_spill] sm:$0xff] }
 0x214   :  { %16719 = vst [vmem:[#allocation205_spill] sm:$0xff] %v12899_v14  ;;  %16720 = vst [vmem:[#allocation206_spill] sm:$0xff] %v12901_v17  ;;  %vm15560_vm8 = vcmp.ge.s32.totalorder %v12903_v11, 1  ;;  %9555 = vmatmul.mubr.bf16.gmra.mrb[56].mxu1 %v16714_v60  ;;  %v12928_v56 = vand.u32 15, %v829_v59  ;;  %v12930_v14 = vand.u32 15, %v830_v7  ;;  %v16734_v59 = vld [vmem:[#allocation126_spill] sm:$0xff] }
 0x215   :  { %16721 = vst [vmem:[#allocation207_spill] sm:$0xff] %v12903_v11  ;;  %9558 = vmatprep.mubr.bf16.mxu1 %v16723_v23  ;;  %16729 = vst [vmem:[#allocation209_spill] sm:$0xff] %v12933_v46  ;;  %v12935_v60 = vand.u32 15, %v831_v52  ;;  %v12946_v11 = vld [vmem:[%s15191_s3 + $0x80] sm:$0xff]   ;;  %v16735_v7 = vld [vmem:[#allocation47_spill] sm:$0xff]  ;;  %v836_v17 = vshra.s32 %v12940_v27, 4 }
 0x216   :  { %16727 = vst [vmem:[#allocation43_spill] sm:$0xff] %v12928_v56  ;;  %16728 = vst [vmem:[#allocation44_spill] sm:$0xff] %v12930_v14  ;;  %v833_v52 = vshra.s32 %v16735_v7, 4  ;;  %9338 = vmatprep.subr.bf16.mxu0 %v12946_v11  ;;  %v16742_v27 = vld [vmem:[#allocation141_spill] sm:$0xff] }
 0x217   :  { %16730 = vst [vmem:[#allocation210_spill] sm:$0xff] %v12935_v60  ;;  %16739 = vst [vmem:[#allocation213_spill] sm:$0xff] %v12973_v1 }
 0x218   :  { %v12968_v7 = vand.u32 15, %v833_v52 }
 0x21a   :  { %9239 = vmatmul.mubr.msk.bf16.gmra.mrb[108].mxu0 %vm7800_vm12, %v16723_v23  ;;  %vm7806_vm12 = vmpackc.low %vm15561_vm7, %vm15567_vm1  ;;  %v12937_v23 = vand.u32 15, %v832_v31  ;;  %vm15574_vm7 = vcmp.ge.s32.totalorder %v12930_v14, 1  ;;  %v834_v31 = vshra.s32 %v12933_v46, 4  ;;  %16737 = vst [vmem:[#allocation47_spill] sm:$0xff] %v12968_v7  ;;  %v16743_v14 = vld [vmem:[#allocation139_spill] sm:$0xff] }
 0x21b   :  { %9242 = vmatprep.mubr.msk.bf16.mxu0 %vm7803_vm13, %v16724_v44  ;;  %vm7809_vm13 = vmpackc.low %vm15560_vm8, %vm15562_vm15  ;;  %vm15575_vm8 = vcmp.ge.s32.totalorder %v12928_v56, 1  ;;  %vm15579_vm15 = vcmp.ge.s32.totalorder %v12935_v60, 1 }
 0x21c   :  { %16731 = vst [vmem:[#allocation211_spill] sm:$0xff] %v12937_v23  ;;  %9559 = vmatmul.mubr.bf16.gmra.mrb[60].mxu1 %v16724_v44  ;;  %v12970_v46 = vand.u32 15, %v834_v31  ;;  %v12975_v44 = vand.u32 15, %v835_v49  ;;  %v838_v31 = vshra.s32 %v12973_v1, 4  ;;  %v16747_v1 = vld [vmem:[#allocation156_spill] sm:$0xff] }
 0x21d   :  { %9562 = vmatprep.mubr.bf16.mxu1 %v16733_v5 }
 0x21e   :  { %16738 = vst [vmem:[#allocation60_spill] sm:$0xff] %v12970_v46  ;;  %16740 = vst [vmem:[#allocation214_spill] sm:$0xff] %v12975_v44  ;;  %v13000_v49 = vand.u32 15, %v838_v31 }
 0x220   :  { %16746 = vst [vmem:[#allocation216_spill] sm:$0xff] %v13000_v49 }
 0x222   :  { %9243 = vmatmul.mubr.msk.bf16.gmra.mrb[112].mxu0 %vm7806_vm12, %v16733_v5  ;;  %vm15578_vm12 = vcmp.ge.s32.totalorder %v12937_v23, 1  ;;  %v12977_v5 = vand.u32 15, %v836_v17  ;;  %v16744_v23 = vld [vmem:[#allocation61_spill] sm:$0xff]  ;;  %v903_v17 = vand.u32 15, %v10873_v0  ;;  %v16748_v0 = vmov 0 }
 0x223   :  { %9246 = vmatprep.mubr.msk.bf16.mxu0 %vm7809_vm13, %v16734_v59  ;;  %vm7812_vm13 = vmpackc.low %vm15574_vm7, %vm15575_vm8  ;;  %vm15592_vm7 = vcmp.ge.s32.totalorder %v12968_v7, 1  ;;  %vm15584_vm8 = vcmp.ge.s32.totalorder %v12970_v46, 1  ;;  %v837_v52 = vshra.s32 %v16744_v23, 4  ;;  %v16756_v46 = vld [vmem:[#allocation55_spill] sm:$0xff]  ;;  %v16854_v7 = vld [vmem:[#allocation102_spill] sm:$0xff] }
 0x224   :  { %vm7815_vm1 = vmpackc.low %vm15578_vm12, %vm15579_vm15  ;;  %16741 = vst [vmem:[#allocation215_spill] sm:$0xff] %v12977_v5  ;;  %vm15587_vm12 = vcmp.ge.s32.totalorder %v12975_v44, 1  ;;  %vm15586_vm15 = vcmp.ge.s32.totalorder %v12977_v5, 1  ;;  %9563 = vmatmul.mubr.bf16.gmra.mrb[0].mxu1 %v16734_v59  ;;  %vm13003_vm6 = vcmp.ge.s32.totalorder %v903_v17, 1  ;;  %v16752_v59 = vld [vmem:[#allocation54_spill] sm:$0xff] }
 0x225   :  { %9566 = vmatprep.mubr.bf16.mxu1 %v16742_v27  ;;  %v12998_v23 = vand.u32 15, %v837_v52  ;;  %v16749_v0 = vsel %vm13003_vm6, 4294967295, %v16748_v0  ;;  %v16754_v52 = vld [vmem:[#allocation40_spill] sm:$0xff]  ;;  %v16755_v5 = vld [vmem:[#allocation50_spill] sm:$0xff] }
 0x226   :  { %16750 = vst [vmem:[#allocation217_spill] sm:$0xff] %v16749_v0  ;;  %v905_v31 = vand.u32 15, %v16754_v52  ;;  %v907_v17 = vand.u32 15, %v16755_v5  ;;  %v16758_v0 = vmov 0  ;;  %v16762_v52 = vmov 0  ;;  %v16765_v5 = vld [vmem:[#allocation174_spill] sm:$0xff] }
 0x227   :  { %16745 = vst [vmem:[#allocation61_spill] sm:$0xff] %v12998_v23  ;;  %vm15610_vm14 = vcmp.ge.s32.totalorder %v12998_v23, 1 }
 0x228   :  { %vm13024_vm11 = vcmp.ge.s32.totalorder %v905_v31, 1  ;;  %v16769_v31 = vld [vmem:[#allocation66_spill] sm:$0xff] }
 0x229   :  { %v16759_v0 = vsel %vm13024_vm11, 4294967295, %v16758_v0 }
 0x22a   :  { %9247 = vmatmul.mubr.msk.bf16.gmra.mrb[116].mxu0 %vm7812_vm13, %v16742_v27  ;;  %vm7821_vm13 = vmpackc.low %vm15586_vm15, %vm15587_vm12  ;;  %v16751_v27 = vld [vmem:[#allocation154_spill] sm:$0xff]  ;;  %vm16753_vm15 = vcmp.ge.s32.totalorder %v16752_v59, 1  ;;  %16760 = vst [vmem:[#allocation40_spill] sm:$0xff] %v16759_v0 }
 0x22b   :  { %9250 = vmatprep.mubr.msk.bf16.mxu0 %vm7815_vm1, %v16743_v14  ;;  %vm7818_vm1 = vmpackc.low %vm15584_vm8, %vm15592_vm7  ;;  %vm15600_vm8 = vcmp.ge.s32.totalorder %v13000_v49, 1  ;;  %v16761_v59 = vld [vmem:[#allocation170_spill] sm:$0xff] }
 0x22c   :  { %vm1352_vm12 = vmand %vm16753_vm15, %vm13003_vm6  ;;  %9567 = vmatmul.mubr.bf16.gmra.mrb[4].mxu1 %v16743_v14  ;;  %vm13029_vm15 = vcmp.ge.s32.totalorder %v907_v17, 1  ;;  %v16768_v14 = vld [vmem:[#allocation38_spill] sm:$0xff]  ;;  %v16772_v17 = vld [vmem:[#allocation67_spill] sm:$0xff] }
 0x22d   :  { %9570 = vmatprep.mubr.bf16.mxu1 %v16747_v1  ;;  %v16763_v52 = vsel %vm13029_vm15, 4294967295, %v16762_v52  ;;  %v904_v49 = vand.u32 15, %v16768_v14  ;;  %v911_v44 = vand.u32 15, %v16772_v17  ;;  %v16775_v0 = vld [vmem:[#allocation70_spill] sm:$0xff]  ;;  %v16777_v14 = vmov 0  ;;  %v16783_v17 = vld [vmem:[#allocation7_spill] sm:$0xff] }
 0x22e   :  { %16764 = vst [vmem:[#allocation50_spill] sm:$0xff] %v16763_v52  ;;  %v16787_v52 = vld [vmem:[#allocation177_spill] sm:$0xff] }
 0x232   :  { %9251 = vmatmul.mubr.msk.bf16.gmra.mrb[120].mxu0 %vm7818_vm1, %v16747_v1  ;;  %vm7824_vm1 = vmpackc.low %vm15600_vm8, %vm15610_vm14  ;;  %v16766_v1 = vld [vmem:[#allocation56_spill] sm:$0xff] }
 0x233   :  { %9254 = vmatprep.mubr.msk.bf16.mxu0 %vm7821_vm13, %v16751_v27  ;;  %vm16757_vm13 = vcmp.ge.s32.totalorder %v16756_v46, 1  ;;  %vm16767_vm6 = vcmp.ge.s32.totalorder %v16766_v1, 1  ;;  %v16771_v46 = vld [vmem:[#allocation53_spill] sm:$0xff] }
 0x234   :  { %vm7835_vm7 = vmpackc.low %vm16757_vm13, %vm1352_vm12  ;;  %vm16770_vm12 = vcmp.ge.s32.totalorder %v16769_v31, 1  ;;  %v909_v23 = vand.u32 15, %v16771_v46  ;;  %9571 = vmatmul.mubr.bf16.gmra.mrb[8].mxu1 %v16751_v27  ;;  %v10610_v46 = vld [vmem:[%s15191_s3 + $0x88] sm:$0xff]   ;;  %v16780_v27 = vmov 0  ;;  %v16792_v1 = vld [vmem:[#allocation81_spill] sm:$0xff] }
 0x235   :  { %vm1354_vm8 = vmand %vm16767_vm6, %vm13024_vm11  ;;  %9574 = vmatprep.mubr.bf16.mxu1 %v16761_v59  ;;  %vm16776_vm6 = vcmp.ge.s32.totalorder %v16775_v0, 1  ;;  %vm13051_vm11 = vcmp.le.s32.totalorder %v904_v49, 14  ;;  %v16788_v49 = vld [vmem:[#allocation48_spill] sm:$0xff] }
 0x236   :  { %vm1356_vm13 = vmand %vm16770_vm12, %vm13029_vm15  ;;  %v16778_v14 = vsel %vm13051_vm11, 4294967295, %v16777_v14  ;;  %vm13058_vm12 = vcmp.ge.s32.totalorder %v909_v23, 1  ;;  %vm13063_vm15 = vcmp.ge.s32.totalorder %v911_v44, 1  ;;  %v906_v31 = vand.u32 15, %v16788_v49  ;;  %v16789_v23 = vld [vmem:[#allocation72_spill] sm:$0xff]  ;;  %v16794_v49 = vld [vmem:[#allocation71_spill] sm:$0xff] }
 0x237   :  { %vm7841_vm14 = vmpackc.low %vm16776_vm6, %vm1356_vm13  ;;  %16779 = vst [vmem:[#allocation38_spill] sm:$0xff] %v16778_v14  ;;  %v16781_v27 = vsel %vm13058_vm12, 4294967295, %v16780_v27  ;;  %vm16790_vm13 = vcmp.ge.s32.totalorder %v16789_v23, 1  ;;  %v913_v0 = vand.u32 15, %v16794_v49  ;;  %v16797_v23 = vld [vmem:[#allocation179_spill] sm:$0xff]  ;;  %v16798_v14 = vld [vmem:[#allocation74_spill] sm:$0xff] }
 0x238   :  { %16782 = vst [vmem:[#allocation53_spill] sm:$0xff] %v16781_v27  ;;  %v16796_v27 = vld [vmem:[#allocation79_spill] sm:$0xff]  ;;  %vm16799_vm6 = vcmp.ge.s32.totalorder %v16798_v14, 1  ;;  %v16808_v49 = vmov 0 }
 0x23a   :  { %9255 = vmatmul.mubr.msk.bf16.gmra.mrb[124].mxu0 %vm7824_vm1, %v16761_v59  ;;  %v16784_v59 = vmov 0 }
 0x23b   :  { %9274 = vmatprep.mubr.msk.bf16.mxu0 %vm7835_vm7, %v16765_v5  ;;  %v16773_v5 = vld [vmem:[#allocation64_spill] sm:$0xff]  ;;  %v16785_v59 = vsel %vm13063_vm15, 4294967295, %v16784_v59 }
 0x23c   :  { %vm16774_vm7 = vcmp.ge.s32.totalorder %v16773_v5, 1  ;;  %16786 = vst [vmem:[#allocation67_spill] sm:$0xff] %v16785_v59  ;;  %v915_v5 = vand.u32 15, %v16796_v27  ;;  %v16803_v59 = vld [vmem:[#allocation82_spill] sm:$0xff]  ;;  %v10613_v27 = vld [vmem:[%s15191_s3 + $0x98] sm:$0xff]  }
 0x23d   :  { %vm7838_vm1 = vmpackc.low %vm16774_vm7, %vm1354_vm8 }
 0x23e   :  { %vm8155_vm8 = vmpackc.low %vm13051_vm11, %vm16223_vm0  ;;  %vm16804_vm11 = vcmp.ge.s32.totalorder %v16803_v59, 1  ;;  %v16819_v59 = vld [vmem:[#allocation68_spill] sm:$0xff] }
 0x23f   :  { %vm1358_vm7 = vmand %vm16790_vm13, %vm13058_vm12  ;;  %vm13091_vm12 = vcmp.le.s32.totalorder %v906_v31, 14  ;;  %v16811_v31 = vld [vmem:[#allocation10_spill] sm:$0xff]  ;;  %v912_v14 = vand.u32 15, %v16819_v59 }
 0x240   :  { %vm7844_vm13 = vmpackc.low %vm16799_vm6, %vm1358_vm7 }
 0x241   :  { %vm8158_vm7 = vmpackc.low %vm13091_vm12, %vm16223_vm0 }
 0x242   :  { %9275 = vmatmul.mubr.msk.bf16.vlgmr.msra.gmra.mrb[64].mxu0 %vm7838_vm1, %v16783_v17  ;;  %v16791_v17 = vld [vmem:[#allocation52_spill] sm:$0xff] }
 0x243   :  { %9278 = vmatprep.mubr.msk.bf16.mxu0 %vm7841_vm14, %v16787_v52  ;;  %9339 = vmatpush3.bf16.msra.mxu0 %v12946_v11  ;;  %v908_v44 = vand.u32 15, %v16791_v17  ;;  %v10611_v52 = vld [vmem:[%s15191_s3 + $0x90] sm:$0xff]   ;;  %vm16793_vm14 = vcmp.ge.s32.totalorder %v16792_v1, 1  ;;  %v16800_v17 = vmov 0  ;;  %v16805_v1 = vmov 0 }
 0x244   :  { %9340 = vmatprep.subr.bf16.mxu0 %v10610_v46  ;;  %vm1360_vm1 = vmand %vm16793_vm14, %vm13063_vm15  ;;  %v16795_v11 = vld [vmem:[#allocation168_spill] sm:$0xff]  ;;  %v16801_v17 = vsel %vm13091_vm12, 4294967295, %v16800_v17  ;;  %vm13149_vm12 = vcmp.le.s32.totalorder %v912_v14, 14  ;;  %v16840_v14 = vmov 0 }
 0x245   :  { %9575 = vmatmul.mubr.bf16.gmra.mrb[12].mxu1 %v16795_v11  ;;  %16802 = vst [vmem:[#allocation48_spill] sm:$0xff] %v16801_v17  ;;  %vm7847_vm10 = vmpackc.low %vm16804_vm11, %vm1360_vm1  ;;  %vm13097_vm14 = vcmp.le.s32.totalorder %v908_v44, 14  ;;  %vm13112_vm11 = vcmp.ge.s32.totalorder %v915_v5, 1  ;;  %v16815_v44 = vld [vmem:[#allocation9_spill] sm:$0xff]  ;;  %v10606_v5 = vld [vmem:[%s15191_s3 + $0x188] sm:$0xff]  }
 0x246   :  { %9594 = vmatprep.mubr.msk.bf16.mxu1 %vm8155_vm8, %v16797_v23  ;;  %v16806_v1 = vsel %vm13097_vm14, 4294967295, %v16805_v1  ;;  %vm13104_vm8 = vcmp.ge.s32.totalorder %v913_v0, 1  ;;  %vm8161_vm1 = vmpackc.low %vm13097_vm14, %vm16223_vm0  ;;  %v16816_v0 = vld [vmem:[#allocation57_spill] sm:$0xff]  ;;  %v16826_v17 = vld [vmem:[#allocation87_spill] sm:$0xff] }
 0x247   :  { %9341 = vmatpush3.bf16.msra.mxu0 %v10610_v46  ;;  %16807 = vst [vmem:[#allocation52_spill] sm:$0xff] %v16806_v1  ;;  %v16809_v49 = vsel %vm13104_vm8, 4294967295, %v16808_v49  ;;  %v16812_v46 = vmov 0  ;;  %v910_v11 = vand.u32 15, %v16816_v0  ;;  %v16822_v23 = vld [vmem:[#allocation85_spill] sm:$0xff]  ;;  %v16825_v1 = vld [vmem:[#allocation180_spill] sm:$0xff] }
 0x248   :  { %9342 = vmatprep.subr.bf16.mxu0 %v10611_v52  ;;  %16810 = vst [vmem:[#allocation71_spill] sm:$0xff] %v16809_v49  ;;  %v16813_v46 = vsel %vm13112_vm11, 4294967295, %v16812_v46  ;;  %v917_v0 = vand.u32 15, %v16822_v23  ;;  %v16823_v49 = vld [vmem:[#allocation13_spill] sm:$0xff]  ;;  %v16831_v23 = vld [vmem:[#allocation98_spill] sm:$0xff] }
 0x249   :  { %16814 = vst [vmem:[#allocation79_spill] sm:$0xff] %v16813_v46  ;;  %vm13142_vm14 = vcmp.le.s32.totalorder %v910_v11, 14  ;;  %v16828_v46 = vmov 0  ;;  %v16836_v11 = vmov 0 }
 0x24a   :  { %9279 = vmatmul.mubr.msk.bf16.gmra.mrb[68].mxu0 %vm7844_vm13, %v16811_v31  ;;  %v16817_v31 = vld [vmem:[#allocation86_spill] sm:$0xff]  ;;  %v16829_v46 = vsel %vm13142_vm14, 4294967295, %v16828_v46 }
 0x24b   :  { %9282 = vmatprep.mubr.msk.bf16.mxu0 %vm7847_vm10, %v16815_v44  ;;  %9343 = vmatpush3.bf16.msra.mxu0 %v10611_v52  ;;  %vm16818_vm6 = vcmp.ge.s32.totalorder %v16817_v31, 1  ;;  %v16820_v44 = vld [vmem:[#allocation96_spill] sm:$0xff]  ;;  %v10614_v52 = vld [vmem:[%s15191_s3 + $0xa0] sm:$0xff]   ;;  %v16824_v31 = vld [vmem:[#allocation91_spill] sm:$0xff]  ;;  %16830 = vst [vmem:[#allocation57_spill] sm:$0xff] %v16829_v46 }
 0x24c   :  { %vm1362_vm13 = vmand %vm16818_vm6, %vm13104_vm8  ;;  %9344 = vmatprep.subr.bf16.mxu0 %v10613_v27  ;;  %vm16821_vm10 = vcmp.ge.s32.totalorder %v16820_v44, 1  ;;  %v919_v59 = vand.u32 15, %v16824_v31  ;;  %vm16827_vm6 = vcmp.ge.s32.totalorder %v16826_v17, 1  ;;  %v16833_v44 = vmov 0  ;;  %v10607_v31 = vld [vmem:[%s15191_s3 + $0x190] sm:$0xff]  }
 0x24d   :  { %vm1364_vm15 = vmand %vm16821_vm10, %vm13112_vm11  ;;  %9595 = vmatmul.mubr.msk.bf16.vlgmr.msra.gmra.mrb[16].mxu1 %vm8158_vm7, %v16823_v49  ;;  %vm16832_vm10 = vcmp.ge.s32.totalorder %v16831_v23, 1  ;;  %v16834_v44 = vsel %vm13149_vm12, 4294967295, %v16833_v44  ;;  %vm13156_vm7 = vcmp.ge.s32.totalorder %v917_v0, 1  ;;  %v16839_v23 = vld [vmem:[#allocation16_spill] sm:$0xff]  ;;  %v16844_v0 = vld [vmem:[#allocation73_spill] sm:$0xff] }
 0x24e   :  { %9598 = vmatprep.mubr.msk.bf16.mxu1 %vm8161_vm1, %v16825_v1  ;;  %vm7850_vm8 = vmpackc.low %vm16827_vm6, %vm1362_vm13  ;;  %9659 = vmatpush3.bf16.msra.mxu1 %v12460_v55  ;;  %16835 = vst [vmem:[#allocation68_spill] sm:$0xff] %v16834_v44  ;;  %v16837_v11 = vsel %vm13156_vm7, 4294967295, %v16836_v11  ;;  %v10615_v55 = vld [vmem:[%s15191_s3 + $0xa8] sm:$0xff]   ;;  %vm13167_vm1 = vcmp.ge.s32.totalorder %v919_v59, 1  ;;  %v914_v17 = vand.u32 15, %v16844_v0  ;;  %v16847_v1 = vld [vmem:[#allocation84_spill] sm:$0xff] }
 0x24f   :  { %vm7853_vm11 = vmpackc.low %vm16832_vm10, %vm1364_vm15  ;;  %9660 = vmatprep.subr.bf16.mxu1 %v10606_v5  ;;  %9345 = vmatpush3.bf16.msra.mxu0 %v10613_v27  ;;  %16838 = vst [vmem:[#allocation85_spill] sm:$0xff] %v16837_v11  ;;  %v16841_v14 = vsel %vm13167_vm1, 4294967295, %v16840_v14  ;;  %v16843_v27 = vld [vmem:[#allocation76_spill] sm:$0xff]  ;;  %v916_v46 = vand.u32 15, %v16847_v1  ;;  %v10608_v59 = vld [vmem:[%s15191_s3 + $0x198] sm:$0xff]  }
 0x250   :  { %9346 = vmatprep.subr.bf16.mxu0 %v10614_v52  ;;  %vm8164_vm15 = vmpackc.low %vm13142_vm14, %vm16223_vm0  ;;  %16842 = vst [vmem:[#allocation91_spill] sm:$0xff] %v16841_v14  ;;  %v16850_v0 = vld [vmem:[#allocation100_spill] sm:$0xff]  ;;  %v16852_v1 = vld [vmem:[#allocation103_spill] sm:$0xff]  ;;  %v16861_v14 = vmov 0 }
 0x251   :  { %vm8167_vm13 = vmpackc.low %vm13149_vm12, %vm16223_vm0  ;;  %v10616_v11 = vld [vmem:[%s15191_s3 + $0xb0] sm:$0xff]   ;;  %v923_v44 = vand.u32 15, %v16852_v1  ;;  %v16853_v49 = vld [vmem:[#allocation14_spill] sm:$0xff]  ;;  %vm13197_vm12 = vcmp.le.s32.totalorder %v914_v17, 14  ;;  %vm13203_vm14 = vcmp.le.s32.totalorder %v916_v46, 14  ;;  %v16868_v46 = vmov 0 }
 0x252   :  { %9283 = vmatmul.mubr.msk.bf16.gmra.mrb[72].mxu0 %vm7850_vm8, %v16839_v23  ;;  %9661 = vmatpush3.bf16.msra.mxu1 %v10606_v5  ;;  %v16845_v23 = vld [vmem:[#allocation99_spill] sm:$0xff]  ;;  %v921_v5 = vand.u32 15, %v16850_v0  ;;  %v16859_v0 = vld [vmem:[#allocation114_spill] sm:$0xff]  ;;  %v16862_v14 = vsel %vm13203_vm14, 4294967295, %v16861_v14  ;;  %v10618_v17 = vld [vmem:[%s15191_s3 + $0xb8] sm:$0xff]  }
 0x253   :  { %9286 = vmatprep.mubr.msk.bf16.mxu0 %vm7853_vm11, %v16843_v27  ;;  %vm16846_vm8 = vcmp.ge.s32.totalorder %v16845_v23, 1  ;;  %9662 = vmatprep.subr.bf16.mxu1 %v10607_v31  ;;  %v16848_v27 = vld [vmem:[#allocation110_spill] sm:$0xff]  ;;  %v16851_v23 = vld [vmem:[#allocation15_spill] sm:$0xff]  ;;  %16863 = vst [vmem:[#allocation84_spill] sm:$0xff] %v16862_v14 }
 0x254   :  { %vm1366_vm6 = vmand %vm16846_vm8, %vm13156_vm7  ;;  %9347 = vmatpush3.bf16.msra.mxu0 %v10614_v52  ;;  %vm16849_vm11 = vcmp.ge.s32.totalorder %v16848_v27, 1  ;;  %vm16855_vm8 = vcmp.ge.s32.totalorder %v16854_v7, 1  ;;  %v16856_v52 = vmov 0  ;;  %v10612_v1 = vld [vmem:[%s15191_s3 + $0x1a0] sm:$0xff]   ;;  %v16864_v27 = vmov 0 }
 0x255   :  { %vm1368_vm10 = vmand %vm16849_vm11, %vm13167_vm1  ;;  %9348 = vmatprep.subr.bf16.mxu0 %v10615_v55  ;;  %9599 = vmatmul.mubr.msk.bf16.gmra.mrb[20].mxu1 %vm8164_vm15, %v16851_v23  ;;  %v16857_v52 = vsel %vm13197_vm12, 4294967295, %v16856_v52  ;;  %vm16860_vm11 = vcmp.ge.s32.totalorder %v16859_v0, 1  ;;  %vm13210_vm15 = vcmp.ge.s32.totalorder %v921_v5, 1  ;;  %v16872_v5 = vld [vmem:[#allocation88_spill] sm:$0xff] }
 0x256   :  { %9602 = vmatprep.mubr.msk.bf16.mxu1 %vm8167_vm13, %v16853_v49  ;;  %vm7856_vm7 = vmpackc.low %vm16855_vm8, %vm1366_vm6  ;;  %16858 = vst [vmem:[#allocation73_spill] sm:$0xff] %v16857_v52  ;;  %9663 = vmatpush3.bf16.msra.mxu1 %v10607_v31  ;;  %v16865_v27 = vsel %vm13210_vm15, 4294967295, %v16864_v27  ;;  %v16867_v31 = vld [vmem:[#allocation116_spill] sm:$0xff]  ;;  %vm13221_vm6 = vcmp.ge.s32.totalorder %v923_v44, 1  ;;  %v918_v0 = vand.u32 15, %v16872_v5  ;;  %v10617_v44 = vld [vmem:[%s15191_s3 + $0x1a8] sm:$0xff]  }
 0x257   :  { %vm7859_vm1 = vmpackc.low %vm16860_vm11, %vm1368_vm10  ;;  %9664 = vmatprep.subr.bf16.mxu1 %v10608_v59  ;;  %16866 = vst [vmem:[#allocation100_spill] sm:$0xff] %v16865_v27  ;;  %v16869_v46 = vsel %vm13221_vm6, 4294967295, %v16868_v46  ;;  %v16876_v5 = vld [vmem:[#allocation119_spill] sm:$0xff]  ;;  %v16877_v27 = vld [vmem:[#allocation21_spill] sm:$0xff] }
 0x258   :  { %9349 = vmatpush3.bf16.msra.mxu0 %v10615_v55  ;;  %vm8170_vm13 = vmpackc.low %vm13197_vm12, %vm16223_vm0  ;;  %16870 = vst [vmem:[#allocation103_spill] sm:$0xff] %v16869_v46  ;;  %v16871_v55 = vld [vmem:[#allocation22_spill] sm:$0xff]  ;;  %v16879_v49 = vld [vmem:[#allocation181_spill] sm:$0xff]  ;;  %vm16884_vm12 = vcmp.ge.s32.totalorder %v16340_v8, 1 }
 0x259   :  { %9350 = vmatprep.subr.bf16.mxu0 %v10616_v11  ;;  %vm8173_vm10 = vmpackc.low %vm13203_vm14, %vm16223_vm0  ;;  %vm13248_vm14 = vcmp.le.s32.totalorder %v918_v0, 14  ;;  %v13268_v0 = vld [vmem:[%s15191_s3 + $0xc0] sm:$0xff]  }
 0x25a   :  { %9287 = vmatmul.mubr.msk.bf16.gmra.mrb[76].mxu0 %vm7856_vm7, %v16867_v31  ;;  %9665 = vmatpush3.bf16.msra.mxu1 %v10608_v59  ;;  %vm16873_vm7 = vcmp.ge.s32.totalorder %v11338_v38, 1  ;;  %v16874_v31 = vld [vmem:[#allocation94_spill] sm:$0xff]  ;;  %v925_v59 = vand.u32 15, %v16876_v5  ;;  %v16888_v5 = vmov 0 }
 0x25b   :  { %9290 = vmatprep.mubr.msk.bf16.mxu0 %vm7859_vm1, %v16871_v55  ;;  %vm1370_vm8 = vmand %vm16873_vm7, %vm13210_vm15  ;;  %v920_v7 = vand.u32 15, %v16874_v31  ;;  %9666 = vmatprep.subr.bf16.mxu1 %v10612_v1  ;;  %vm16875_vm1 = vcmp.ge.s32.totalorder %v16339_v22, 1  ;;  %v16878_v55 = vld [vmem:[#allocation124_spill] sm:$0xff]  ;;  %vm16880_vm7 = vcmp.ge.s32.totalorder %v16331_v35, 1  ;;  %v16885_v31 = vmov 0 }
 0x25c   :  { %9351 = vmatpush3.bf16.msra.mxu0 %v10616_v11  ;;  %vm1372_vm11 = vmand %vm16875_vm1, %vm13221_vm6  ;;  %v927_v38 = vand.u32 15, %v16878_v55  ;;  %v16881_v11 = vmov 0  ;;  %v10619_v55 = vld [vmem:[%s15191_s3 + $0x1b0] sm:$0xff]  }
 0x25d   :  { %9352 = vmatprep.subr.bf16.mxu0 %v10618_v17  ;;  %9603 = vmatmul.mubr.msk.bf16.gmra.mrb[24].mxu1 %vm8170_vm13, %v16877_v27  ;;  %vm7862_vm15 = vmpackc.low %vm16880_vm7, %vm1370_vm8  ;;  %v16882_v11 = vsel %vm13248_vm14, 4294967295, %v16881_v11  ;;  %vm13254_vm6 = vcmp.le.s32.totalorder %v920_v7, 14  ;;  %vm13261_vm13 = vcmp.ge.s32.totalorder %v925_v59, 1  ;;  %v16891_v7 = vmov 0  ;;  %v16896_v59 = vld [vmem:[#allocation111_spill] sm:$0xff] }
 0x25e   :  { %9606 = vmatprep.mubr.msk.bf16.mxu1 %vm8173_vm10, %v16879_v49  ;;  %16883 = vst [vmem:[#allocation88_spill] sm:$0xff] %v16882_v11  ;;  %9667 = vmatpush3.bf16.msra.mxu1 %v10612_v1  ;;  %vm7865_vm1 = vmpackc.low %vm16884_vm12, %vm1372_vm11  ;;  %v16886_v31 = vsel %vm13254_vm6, 4294967295, %v16885_v31  ;;  %v16889_v5 = vsel %vm13261_vm13, 4294967295, %v16888_v5  ;;  %vm13275_vm10 = vcmp.ge.s32.totalorder %v927_v38, 1  ;;  %v16894_v1 = vld [vmem:[#allocation101_spill] sm:$0xff]  ;;  %v924_v46 = vand.u32 15, %v16896_v59 }
 0x25f   :  { %16887 = vst [vmem:[#allocation94_spill] sm:$0xff] %v16886_v31  ;;  %9668 = vmatprep.subr.bf16.mxu1 %v10617_v44  ;;  %16890 = vst [vmem:[#allocation119_spill] sm:$0xff] %v16889_v5  ;;  %v16892_v7 = vsel %vm13275_vm10, 4294967295, %v16891_v7  ;;  %v10620_v38 = vld [vmem:[%s15191_s3 + $0x1b8] sm:$0xff]   ;;  %vm16897_vm7 = vcmp.ge.s32.totalorder %v11547_v58, 1  ;;  %v16901_v59 = vmov 0 }
 0x260   :  { %9353 = vmatpush3.bf16.msra.mxu0 %v10618_v17  ;;  %vm8176_vm12 = vmpackc.low %vm13248_vm14, %vm16223_vm0  ;;  %16893 = vst [vmem:[#allocation124_spill] sm:$0xff] %v16892_v7  ;;  %v922_v17 = vand.u32 15, %v16894_v1  ;;  %vm16904_vm14 = vcmp.ge.s32.totalorder %v11549_v3, 1  ;;  %v16905_v7 = vmov 0 }
 0x261   :  { %9418 = vmatprep.subr.bf16.mxu0 %v13268_v0  ;;  %vm8179_vm8 = vmpackc.low %vm13254_vm6, %vm16223_vm0 }
 0x262   :  { %9291 = vmatmul.mubr.msk.bf16.gmra.mrb[80].mxu0 %vm7862_vm15, %v12156_v43  ;;  %9669 = vmatpush3.bf16.msra.mxu1 %v10617_v44  ;;  %vm16895_vm15 = vcmp.ge.s32.totalorder %v11448_v13, 1  ;;  %v16899_v44 = vld [vmem:[#allocation149_spill] sm:$0xff]  ;;  %vm13302_vm6 = vcmp.le.s32.totalorder %v922_v17, 14  ;;  %v16915_v17 = vld [vmem:[#allocation92_spill] sm:$0xff] }
 0x263   :  { %9294 = vmatprep.mubr.msk.bf16.mxu0 %vm7865_vm1, %v12176_v6  ;;  %vm1374_vm11 = vmand %vm16895_vm15, %vm13261_vm13  ;;  %9670 = vmatprep.subr.bf16.mxu1 %v10619_v55  ;;  %v16898_v6 = vld [vmem:[#allocation143_spill] sm:$0xff]  ;;  %v931_v5 = vand.u32 15, %v16899_v44  ;;  %vm16900_vm15 = vcmp.ge.s32.totalorder %v11455_v21, 1  ;;  %v16902_v59 = vsel %vm13302_vm6, 4294967295, %v16901_v59  ;;  %v16911_v44 = vld [vmem:[#allocation89_spill] sm:$0xff] }
 0x264   :  { %vm1376_vm1 = vmand %vm16897_vm7, %vm13275_vm10  ;;  %v929_v1 = vand.u32 15, %v16898_v6  ;;  %16903 = vst [vmem:[#allocation101_spill] sm:$0xff] %v16902_v59  ;;  %vm13308_vm7 = vcmp.le.s32.totalorder %v924_v46, 14  ;;  %v16908_v6 = vmov 0  ;;  %v16916_v46 = vld [vmem:[#allocation122_spill] sm:$0xff]  ;;  %vm16922_vm10 = vcmp.ge.s32.totalorder %v11643_v57, 1 }
 0x265   :  { %9607 = vmatmul.mubr.msk.bf16.gmra.mrb[28].mxu1 %vm8176_vm12, %v12193_v33  ;;  %vm7868_vm13 = vmpackc.low %vm16900_vm15, %vm1374_vm11  ;;  %v16906_v7 = vsel %vm13308_vm7, 4294967295, %v16905_v7  ;;  %vm13320_vm11 = vcmp.ge.s32.totalorder %v931_v5, 1  ;;  %v16918_v5 = vld [vmem:[#allocation125_spill] sm:$0xff] }
 0x266   :  { %9610 = vmatprep.mubr.msk.bf16.mxu1 %vm8179_vm8, %v12209_v24  ;;  %9671 = vmatpush3.bf16.msra.mxu1 %v10619_v55  ;;  %vm7871_vm9 = vmpackc.low %vm16904_vm14, %vm1376_vm1  ;;  %16907 = vst [vmem:[#allocation111_spill] sm:$0xff] %v16906_v7  ;;  %vm13312_vm12 = vcmp.ge.s32.totalorder %v929_v1, 1  ;;  %v16912_v55 = vmov 0  ;;  %v926_v1 = vand.u32 15, %v16916_v46  ;;  %v928_v58 = vand.u32 15, %v16918_v5 }
 0x267   :  { %9672 = vmatprep.subr.bf16.mxu1 %v10620_v38  ;;  %v16909_v6 = vsel %vm13312_vm12, 4294967295, %v16908_v6  ;;  %vm8182_vm8 = vmpackc.low %vm13302_vm6, %vm16223_vm0  ;;  %v16913_v55 = vsel %vm13320_vm11, 4294967295, %v16912_v55  ;;  %v16923_v5 = vmov 0 }
 0x268   :  { %16910 = vst [vmem:[#allocation143_spill] sm:$0xff] %v16909_v6  ;;  %16914 = vst [vmem:[#allocation149_spill] sm:$0xff] %v16913_v55  ;;  %v16930_v55 = vmov 0  ;;  %v16937_v6 = vld [vmem:[#allocation185_spill] sm:$0xff] }
 0x269   :  { %vm8185_vm14 = vmpackc.low %vm13308_vm7, %vm16223_vm0  ;;  %vm16926_vm7 = vcmp.ge.s32.totalorder %v11774_v12, 1  ;;  %v16944_v12 = vld [vmem:[#allocation59_spill] sm:$0xff] }
 0x26a   :  { %9295 = vmatmul.mubr.msk.bf16.gmra.mrb[84].mxu0 %vm7868_vm13, %v16911_v44  ;;  %9673 = vmatpush3.bf16.msra.mxu1 %v10620_v38  ;;  %v13332_v44 = vld [vmem:[%s15191_s3 + $0x1c0] sm:$0xff]   ;;  %vm16917_vm13 = vcmp.ge.s32.totalorder %v11633_v42, 1  ;;  %v16921_v38 = vld [vmem:[#allocation171_spill] sm:$0xff]  ;;  %v16943_v42 = vld [vmem:[#allocation93_spill] sm:$0xff]  ;;  %v939_v57 = vand.u32 15, %v16944_v12 }
 0x26b   :  { %9298 = vmatprep.mubr.msk.bf16.mxu0 %vm7871_vm9, %v16915_v17  ;;  %vm1378_vm1 = vmand %vm16917_vm13, %vm13312_vm12  ;;  %vm16919_vm9 = vcmp.ge.s32.totalorder %v11763_v10, 1  ;;  %v16920_v17 = vld [vmem:[#allocation167_spill] sm:$0xff]  ;;  %9738 = vmatprep.subr.bf16.mxu1 %v13332_v44  ;;  %v935_v13 = vand.u32 15, %v16921_v38  ;;  %vm13350_vm12 = vcmp.le.s32.totalorder %v926_v1, 14  ;;  %v16934_v1 = vmov 0  ;;  %v16957_v12 = vld [vmem:[#allocation188_spill] sm:$0xff] }
 0x26c   :  { %vm1380_vm15 = vmand %vm16919_vm9, %vm13320_vm11  ;;  %v933_v46 = vand.u32 15, %v16920_v17  ;;  %v16924_v5 = vsel %vm13350_vm12, 4294967295, %v16923_v5  ;;  %vm13356_vm11 = vcmp.le.s32.totalorder %v928_v58, 14  ;;  %v16927_v17 = vmov 0  ;;  %v16933_v38 = vld [vmem:[#allocation183_spill] sm:$0xff]  ;;  %v16938_v58 = vld [vmem:[#allocation144_spill] sm:$0xff] }
 0x26d   :  { %9611 = vmatmul.mubr.msk.bf16.gmra.mrb[32].mxu1 %vm8182_vm8, %v12274_v39  ;;  %vm7874_vm13 = vmpackc.low %vm16922_vm10, %vm1378_vm1  ;;  %16925 = vst [vmem:[#allocation122_spill] sm:$0xff] %v16924_v5  ;;  %v16928_v17 = vsel %vm13356_vm11, 4294967295, %v16927_v17  ;;  %vm13368_vm8 = vcmp.ge.s32.totalorder %v935_v13, 1  ;;  %v16942_v13 = vld [vmem:[#allocation175_spill] sm:$0xff] }
 0x26e   :  { %9614 = vmatprep.mubr.msk.bf16.mxu1 %vm8185_vm14, %v12292_v37  ;;  %vm7877_vm9 = vmpackc.low %vm16926_vm7, %vm1380_vm15  ;;  %16929 = vst [vmem:[#allocation125_spill] sm:$0xff] %v16928_v17  ;;  %vm13360_vm6 = vcmp.ge.s32.totalorder %v933_v46, 1  ;;  %v16935_v1 = vsel %vm13368_vm8, 4294967295, %v16934_v1  ;;  %v930_v46 = vand.u32 15, %v16938_v58  ;;  %vm16939_vm14 = vcmp.ge.s32.totalorder %v11799_v54, 1  ;;  %v16945_v37 = vld [vmem:[#allocation186_spill] sm:$0xff] }
 0x26f   :  { %v16931_v55 = vsel %vm13360_vm6, 4294967295, %v16930_v55  ;;  %vm8188_vm10 = vmpackc.low %vm13350_vm12, %vm16223_vm0  ;;  %16936 = vst [vmem:[#allocation171_spill] sm:$0xff] %v16935_v1  ;;  %vm16941_vm15 = vcmp.ge.s32.totalorder %v11818_v20, 1  ;;  %v16947_v58 = vmov 0  ;;  %v16961_v1 = vld [vmem:[#allocation104_spill] sm:$0xff]  ;;  %v16967_v20 = vld [vmem:[#allocation189_spill] sm:$0xff] }
 0x270   :  { %16932 = vst [vmem:[#allocation167_spill] sm:$0xff] %v16931_v55  ;;  %vm8191_vm7 = vmpackc.low %vm13356_vm11, %vm16223_vm0  ;;  %vm13392_vm12 = vcmp.le.s32.totalorder %v930_v46, 14  ;;  %v16958_v46 = vmov 0  ;;  %v16964_v55 = vld [vmem:[#allocation172_spill] sm:$0xff]  ;;  %v16968_v54 = vld [vmem:[#allocation78_spill] sm:$0xff] }
 0x271   :  { %vm1382_vm1 = vmand %vm16939_vm14, %vm13360_vm6  ;;  %v16948_v58 = vsel %vm13392_vm12, 4294967295, %v16947_v58  ;;  %vm16950_vm14 = vcmp.ge.s32.totalorder %v16548_v16, 1  ;;  %v943_v16 = vand.u32 15, %v16968_v54  ;;  %v16981_v54 = vld [vmem:[#allocation190_spill] sm:$0xff] }
 0x272   :  { %9299 = vmatmul.mubr.msk.bf16.gmra.mrb[88].mxu0 %vm7874_vm13, %v16933_v38  ;;  %v16940_v38 = vld [vmem:[#allocation165_spill] sm:$0xff]  ;;  %vm1384_vm13 = vmand %vm16941_vm15, %vm13368_vm8  ;;  %16949 = vst [vmem:[#allocation144_spill] sm:$0xff] %v16948_v58 }
 0x273   :  { %9302 = vmatprep.mubr.msk.bf16.mxu0 %vm7877_vm9, %v16937_v6  ;;  %v932_v10 = vand.u32 15, %v16940_v38  ;;  %v937_v6 = vand.u32 15, %v16942_v13  ;;  %vm16946_vm9 = vcmp.ge.s32.totalorder %v11801_v36, 1  ;;  %vm7883_vm6 = vmpackc.low %vm16950_vm14, %vm1384_vm13  ;;  %v16951_v38 = vmov 0  ;;  %v16969_v36 = vld [vmem:[#allocation106_spill] sm:$0xff] }
 0x274   :  { %vm7880_vm11 = vmpackc.low %vm16946_vm9, %vm1382_vm1  ;;  %v16954_v13 = vmov 0  ;;  %vm16965_vm9 = vcmp.ge.s32.totalorder %v16618_v18, 1  ;;  %v947_v18 = vand.u32 15, %v12776_v32  ;;  %v17003_v32 = vld [vmem:[#allocation117_spill] sm:$0xff] }
 0x275   :  { %9615 = vmatmul.mubr.msk.bf16.gmra.mrb[36].mxu1 %vm8188_vm10, %v16943_v42  ;;  %vm13398_vm5 = vcmp.le.s32.totalorder %v932_v10, 14  ;;  %vm13402_vm15 = vcmp.ge.s32.totalorder %v937_v6, 1  ;;  %vm8194_vm10 = vmpackc.low %vm13392_vm12, %vm16223_vm0  ;;  %v16962_v10 = vld [vmem:[#allocation169_spill] sm:$0xff] }
 0x276   :  { %9618 = vmatprep.mubr.msk.bf16.mxu1 %vm8191_vm7, %v16945_v37  ;;  %v16952_v38 = vsel %vm13398_vm5, 4294967295, %v16951_v38  ;;  %v16955_v13 = vsel %vm13402_vm15, 4294967295, %v16954_v13  ;;  %vm13410_vm7 = vcmp.ge.s32.totalorder %v939_v57, 1  ;;  %vm8197_vm1 = vmpackc.low %vm13398_vm5, %vm16223_vm0  ;;  %v934_v6 = vand.u32 15, %v16962_v10  ;;  %v16966_v57 = vld [vmem:[#allocation2_spill] sm:$0xff] }
 0x277   :  { %16953 = vst [vmem:[#allocation165_spill] sm:$0xff] %v16952_v38  ;;  %16956 = vst [vmem:[#allocation175_spill] sm:$0xff] %v16955_v13  ;;  %v16959_v46 = vsel %vm13410_vm7, 4294967295, %v16958_v46  ;;  %v16971_v10 = vmov 0  ;;  %v16988_v13 = vld [vmem:[#allocation4_spill] sm:$0xff] }
 0x278   :  { %16960 = vst [vmem:[#allocation59_spill] sm:$0xff] %v16959_v46  ;;  %vm1388_vm14 = vmand %vm16965_vm9, %vm13410_vm7  ;;  %vm13434_vm5 = vcmp.le.s32.totalorder %v934_v6, 14  ;;  %v16982_v6 = vmov 0  ;;  %v16985_v46 = vld [vmem:[#allocation105_spill] sm:$0xff] }
 0x279   :  { %v16972_v10 = vsel %vm13434_vm5, 4294967295, %v16971_v10 }
 0x27a   :  { %9303 = vmatmul.mubr.msk.bf16.gmra.mrb[92].mxu0 %vm7880_vm11, %v16957_v12  ;;  %vm16963_vm11 = vcmp.ge.s32.totalorder %v16608_v4, 1  ;;  %v936_v12 = vand.u32 15, %v16964_v55  ;;  %16973 = vst [vmem:[#allocation169_spill] sm:$0xff] %v16972_v10  ;;  %v16975_v55 = vmov 0  ;;  %v16991_v4 = vld [vmem:[#allocation191_spill] sm:$0xff] }
 0x27b   :  { %9306 = vmatprep.mubr.msk.bf16.mxu0 %vm7883_vm6, %v16961_v1  ;;  %vm1386_vm13 = vmand %vm16963_vm11, %vm13402_vm15  ;;  %v941_v1 = vand.u32 15, %v16966_v57  ;;  %vm16970_vm6 = vcmp.ge.s32.totalorder %v16609_v53, 1  ;;  %vm16974_vm11 = vcmp.ge.s32.totalorder %v16619_v30, 1  ;;  %v16978_v57 = vmov 0 }
 0x27c   :  { %vm7886_vm8 = vmpackc.low %vm16970_vm6, %vm1386_vm13  ;;  %vm13440_vm12 = vcmp.le.s32.totalorder %v936_v12, 14  ;;  %vm16989_vm6 = vcmp.ge.s32.totalorder %v12326_v29, 1  ;;  %v17013_v29 = vld [vmem:[#allocation120_spill] sm:$0xff] }
 0x27d   :  { %9619 = vmatmul.mubr.msk.bf16.gmra.mrb[40].mxu1 %vm8194_vm10, %v16967_v20  ;;  %vm7889_vm15 = vmpackc.low %vm16974_vm11, %vm1388_vm14  ;;  %v16976_v55 = vsel %vm13440_vm12, 4294967295, %v16975_v55  ;;  %vm13444_vm9 = vcmp.ge.s32.totalorder %v941_v1, 1  ;;  %v16986_v1 = vld [vmem:[#allocation42_spill] sm:$0xff] }
 0x27e   :  { %9622 = vmatprep.mubr.msk.bf16.mxu1 %vm8197_vm1, %v16969_v36  ;;  %16977 = vst [vmem:[#allocation172_spill] sm:$0xff] %v16976_v55  ;;  %v16979_v57 = vsel %vm13444_vm9, 4294967295, %v16978_v57  ;;  %vm8200_vm10 = vmpackc.low %vm13434_vm5, %vm16223_vm0  ;;  %vm13452_vm1 = vcmp.ge.s32.totalorder %v943_v16, 1  ;;  %v938_v12 = vand.u32 15, %v16986_v1  ;;  %v945_v16 = vand.u32 15, %v12113_v45 }
 0x27f   :  { %16980 = vst [vmem:[#allocation2_spill] sm:$0xff] %v16979_v57  ;;  %v16983_v6 = vsel %vm13452_vm1, 4294967295, %v16982_v6  ;;  %vm8203_vm13 = vmpackc.low %vm13440_vm12, %vm16223_vm0  ;;  %v16993_v1 = vmov 0  ;;  %v17000_v45 = vmov 0  ;;  %v17010_v57 = vld [vmem:[#allocation23_spill] sm:$0xff] }
 0x280   :  { %16984 = vst [vmem:[#allocation78_spill] sm:$0xff] %v16983_v6  ;;  %vm1392_vm11 = vmand %vm16989_vm6, %vm13452_vm1  ;;  %vm13476_vm12 = vcmp.le.s32.totalorder %v938_v12, 14  ;;  %vm13486_vm6 = vcmp.ge.s32.totalorder %v945_v16, 1  ;;  %v17004_v12 = vmov 0  ;;  %v17007_v6 = vld [vmem:[#allocation75_spill] sm:$0xff] }
 0x281   :  { %v16994_v1 = vsel %vm13476_vm12, 4294967295, %v16993_v1  ;;  %v17001_v45 = vsel %vm13486_vm6, 4294967295, %v17000_v45 }
 0x282   :  { %9307 = vmatmul.mubr.msk.bf16.gmra.mrb[96].mxu0 %vm7886_vm8, %v16981_v54  ;;  %vm16987_vm8 = vcmp.ge.s32.totalorder %v12135_v41, 1  ;;  %v940_v54 = vand.u32 15, %v16988_v13  ;;  %16995 = vst [vmem:[#allocation42_spill] sm:$0xff] %v16994_v1  ;;  %v16997_v13 = vmov 0  ;;  %17002 = vst [vmem:[#allocation218_spill] sm:$0xff] %v17001_v45  ;;  %v948_v45 = vand.u32 15, %v12787_v63 }
 0x283   :  { %9310 = vmatprep.mubr.msk.bf16.mxu0 %vm7889_vm15, %v16985_v46  ;;  %vm1390_vm14 = vmand %vm16987_vm8, %vm13444_vm9  ;;  %v16990_v46 = vld [vmem:[#allocation107_spill] sm:$0xff]  ;;  %vm16992_vm15 = vcmp.ge.s32.totalorder %v12154_v26, 1  ;;  %vm16996_vm8 = vcmp.ge.s32.totalorder %v12387_v40, 1  ;;  %v17040_v63 = vld [vmem:[#allocation145_spill] sm:$0xff] }
 0x284   :  { %vm7892_vm7 = vmpackc.low %vm16992_vm15, %vm1390_vm14  ;;  %vm13482_vm5 = vcmp.le.s32.totalorder %v940_v54, 14  ;;  %v17008_v54 = vld [vmem:[#allocation178_spill] sm:$0xff]  ;;  %vm17011_vm15 = vcmp.ge.s32.totalorder %v12833_v61, 1 }
 0x285   :  { %9623 = vmatmul.mubr.msk.bf16.gmra.mrb[44].mxu1 %vm8200_vm10, %v16990_v46  ;;  %vm7895_vm9 = vmpackc.low %vm16996_vm8, %vm1392_vm11  ;;  %v16998_v13 = vsel %vm13482_vm5, 4294967295, %v16997_v13  ;;  %v942_v16 = vand.u32 15, %v17008_v54  ;;  %v17015_v54 = vmov 0 }
 0x286   :  { %9626 = vmatprep.mubr.msk.bf16.mxu1 %vm8203_vm13, %v16991_v4  ;;  %16999 = vst [vmem:[#allocation4_spill] sm:$0xff] %v16998_v13  ;;  %vm8206_vm10 = vmpackc.low %vm13476_vm12, %vm16223_vm0  ;;  %vm13494_vm13 = vcmp.ge.s32.totalorder %v947_v18, 1  ;;  %v949_v18 = vand.u32 15, %v12828_v19  ;;  %v17022_v19 = vmov 0 }
 0x287   :  { %v17005_v12 = vsel %vm13494_vm13, 4294967295, %v17004_v12  ;;  %vm8209_vm14 = vmpackc.low %vm13482_vm5, %vm16223_vm0  ;;  %vm13517_vm5 = vcmp.le.s32.totalorder %v942_v16, 14  ;;  %v17026_v16 = vld [vmem:[#allocation131_spill] sm:$0xff] }
 0x288   :  { %17006 = vst [vmem:[#allocation219_spill] sm:$0xff] %v17005_v12  ;;  %vm1396_vm8 = vmand %vm17011_vm15, %vm13494_vm13  ;;  %v17016_v54 = vsel %vm13517_vm5, 4294967295, %v17015_v54  ;;  %vm13527_vm15 = vcmp.ge.s32.totalorder %v949_v18, 1  ;;  %v17025_v12 = vld [vmem:[#allocation123_spill] sm:$0xff]  ;;  %v17036_v18 = vmov 0 }
 0x289   :  { %17017 = vst [vmem:[#allocation178_spill] sm:$0xff] %v17016_v54  ;;  %v17023_v19 = vsel %vm13527_vm15, 4294967295, %v17022_v19  ;;  %v17284_v54 = vld [vmem:[#allocation105_spill] sm:$0xff] }
 0x28a   :  { %9311 = vmatmul.mubr.msk.bf16.gmra.mrb[100].mxu0 %vm7892_vm7, %v17003_v32  ;;  %vm17009_vm7 = vcmp.ge.s32.totalorder %v12823_v2, 1  ;;  %v944_v32 = vand.u32 15, %v17010_v57  ;;  %v17019_v57 = vmov 0  ;;  %17024 = vst [vmem:[#allocation220_spill] sm:$0xff] %v17023_v19  ;;  %v17039_v19 = vld [vmem:[#allocation137_spill] sm:$0xff] }
 0x28b   :  { %9314 = vmatprep.mubr.msk.bf16.mxu0 %vm7895_vm9, %v17007_v6  ;;  %vm1394_vm11 = vmand %vm17009_vm7, %vm13486_vm6  ;;  %v17012_v6 = vld [vmem:[#allocation118_spill] sm:$0xff]  ;;  %vm17014_vm9 = vcmp.ge.s32.totalorder %v12825_v34, 1  ;;  %vm17018_vm7 = vcmp.ge.s32.totalorder %v12835_v25, 1 }
 0x28c   :  { %vm7898_vm1 = vmpackc.low %vm17014_vm9, %vm1394_vm11  ;;  %vm13523_vm12 = vcmp.le.s32.totalorder %v944_v32, 14  ;;  %v946_v32 = vand.u32 15, %v12763_v15  ;;  %vm17027_vm11 = vcmp.ge.s32.totalorder %v12860_v9, 1  ;;  %v17032_v15 = vmov 0  ;;  %v17046_v9 = vld [vmem:[#allocation199_spill] sm:$0xff] }
 0x28d   :  { %9627 = vmatmul.mubr.msk.bf16.gmra.mrb[48].mxu1 %vm8206_vm10, %v17012_v6  ;;  %vm7901_vm6 = vmpackc.low %vm17018_vm7, %vm1396_vm8  ;;  %v17020_v57 = vsel %vm13523_vm12, 4294967295, %v17019_v57 }
 0x28e   :  { %9630 = vmatprep.mubr.msk.bf16.mxu1 %vm8209_vm14, %v17013_v29  ;;  %17021 = vst [vmem:[#allocation23_spill] sm:$0xff] %v17020_v57  ;;  %vm8212_vm10 = vmpackc.low %vm13517_vm5, %vm16223_vm0  ;;  %vm13553_vm13 = vcmp.le.s32.totalorder %v946_v32, 14  ;;  %v950_v32 = vand.u32 15, %v12831_v50  ;;  %v17051_v50 = vmov 0 }
 0x28f   :  { %vm8215_vm14 = vmpackc.low %vm13523_vm12, %vm16223_vm0  ;;  %v17033_v15 = vsel %vm13553_vm13, 4294967295, %v17032_v15  ;;  %vm13559_vm12 = vcmp.le.s32.totalorder %v948_v45, 14  ;;  %v17056_v45 = vmov 0 }
 0x290   :  { %vm1398_vm8 = vmand %vm17027_vm11, %vm13527_vm15  ;;  %17034 = vst [vmem:[#allocation221_spill] sm:$0xff] %v17033_v15  ;;  %vm17035_vm11 = vcmp.ge.s32.totalorder %v12869_v51, 1  ;;  %v17037_v18 = vsel %vm13559_vm12, 4294967295, %v17036_v18  ;;  %v17047_v51 = vld [vmem:[#allocation148_spill] sm:$0xff] }
 0x291   :  { %17038 = vst [vmem:[#allocation222_spill] sm:$0xff] %v17037_v18 }
 0x292   :  { %9315 = vmatmul.mubr.msk.bf16.gmra.mrb[104].mxu0 %vm7898_vm1, %v17025_v12  ;;  %vm17029_vm1 = vcmp.ge.s32.totalorder %v12867_v48, 1  ;;  %v952_v12 = vand.u32 15, %v17046_v9  ;;  %v17049_v48 = vld [vmem:[#allocation39_spill] sm:$0xff]  ;;  %v17060_v9 = vld [vmem:[#allocation133_spill] sm:$0xff] }
 0x293   :  { %9318 = vmatprep.mubr.msk.bf16.mxu0 %vm7901_vm6, %v17026_v16  ;;  %vm1400_vm9 = vmand %vm17029_vm1, %vm11307_vm2  ;;  %v17030_v16 = vld [vmem:[#allocation135_spill] sm:$0xff]  ;;  %vm17031_vm6 = vcmp.ge.s32.totalorder %v12862_v62, 1  ;;  %v17069_v62 = vld [vmem:[#allocation153_spill] sm:$0xff] }
 0x294   :  { %vm7904_vm7 = vmpackc.low %vm17031_vm6, %vm1398_vm8  ;;  %vm13591_vm2 = vcmp.le.s32.totalorder %v952_v12, 14  ;;  %v17065_v12 = vld [vmem:[#allocation140_spill] sm:$0xff] }
 0x295   :  { %9631 = vmatmul.mubr.msk.bf16.gmra.mrb[52].mxu1 %vm8212_vm10, %v12633_v28  ;;  %vm7907_vm15 = vmpackc.low %vm17035_vm11, %vm1400_vm9  ;;  %vm13585_vm11 = vcmp.le.s32.totalorder %v950_v32, 14  ;;  %v17057_v45 = vsel %vm13591_vm2, 4294967295, %v17056_v45  ;;  %v17064_v32 = vld [vmem:[#allocation201_spill] sm:$0xff] }
 0x296   :  { %9634 = vmatprep.mubr.msk.bf16.mxu1 %vm8215_vm14, %v17030_v16  ;;  %vm8218_vm10 = vmpackc.low %vm13553_vm13, %vm16223_vm0  ;;  %vm17042_vm14 = vcmp.ge.s32.totalorder %v12894_v47, 1  ;;  %v17052_v50 = vsel %vm13585_vm11, 4294967295, %v17051_v50  ;;  %v17054_v47 = vld [vmem:[#allocation207_spill] sm:$0xff]  ;;  %17058 = vst [vmem:[#allocation223_spill] sm:$0xff] %v17057_v45  ;;  %vm17252_vm13 = vnez %v16976_v55  ;;  %v17261_v55 = vld [vmem:[#allocation58_spill] sm:$0xff] }
 0x297   :  { %vm1402_vm8 = vmand %vm17042_vm14, %vm11323_vm3  ;;  %17053 = vst [vmem:[#allocation199_spill] sm:$0xff] %v17052_v50  ;;  %vm17055_vm14 = vcmp.ge.s32.totalorder %v17054_v47, 1  ;;  %v954_v47 = vand.u32 15, %v17064_v32  ;;  %v17073_v32 = vmov 0  ;;  %v17093_v45 = vld [vmem:[#allocation163_spill] sm:$0xff]  ;;  %v17141_v50 = vld [vmem:[#allocation194_spill] sm:$0xff] }
 0x298   :  { %vm8221_vm1 = vmpackc.low %vm13559_vm12, %vm16223_vm0 }
 0x29a   :  { %9319 = vmatmul.mubr.msk.bf16.gmra.mrb[108].mxu0 %vm7904_vm7, %v17039_v19  ;;  %v17044_v19 = vld [vmem:[#allocation206_spill] sm:$0xff] }
 0x29b   :  { %9322 = vmatprep.mubr.msk.bf16.mxu0 %vm7907_vm15, %v17040_v63  ;;  %vm17045_vm9 = vcmp.ge.s32.totalorder %v17044_v19, 1  ;;  %v17048_v63 = vld [vmem:[#allocation150_spill] sm:$0xff]  ;;  %vm17050_vm15 = vcmp.ge.s32.totalorder %v17049_v48, 1  ;;  %v17059_v19 = vld [vmem:[#allocation132_spill] sm:$0xff] }
 0x29c   :  { %vm1404_vm6 = vmand %vm17045_vm9, %vm11383_vm4  ;;  %v17061_v48 = vld [vmem:[#allocation130_spill] sm:$0xff] }
 0x29d   :  { %9635 = vmatmul.mubr.msk.bf16.gmra.mrb[56].mxu1 %vm8218_vm10, %v17047_v51  ;;  %vm7910_vm7 = vmpackc.low %vm17050_vm15, %vm1402_vm8  ;;  %vm17062_vm8 = vnez %v17061_v48  ;;  %vm17066_vm15 = vnez %v17065_v12  ;;  %v17071_v48 = vld [vmem:[#allocation44_spill] sm:$0xff]  ;;  %v17078_v12 = vmov 0  ;;  %v17155_v51 = vld [vmem:[#allocation74_spill] sm:$0xff] }
 0x29e   :  { %9638 = vmatprep.mubr.msk.bf16.mxu1 %vm8221_vm1, %v17048_v63  ;;  %vm7913_vm3 = vmpackc.low %vm17055_vm14, %vm1404_vm6  ;;  %vm17063_vm1 = vcmp.ge.s32.totalorder %v12928_v56, 1  ;;  %v17076_v56 = vld [vmem:[#allocation211_spill] sm:$0xff] }
 0x29f   :  { %vm8224_vm10 = vmpackc.low %vm13585_vm11, %vm16223_vm0  ;;  %vm17077_vm4 = vcmp.ge.s32.totalorder %v17076_v56, 1 }
 0x2a0   :  { %vm1406_vm9 = vmand %vm17063_vm1, %vm17062_vm8  ;;  %vm13617_vm8 = vcmp.le.s32.totalorder %v954_v47, 14  ;;  %v17085_v47 = vld [vmem:[#allocation47_spill] sm:$0xff] }
 0x2a1   :  { %vm8227_vm6 = vmpackc.low %vm13591_vm2, %vm16223_vm0  ;;  %v17074_v32 = vsel %vm13617_vm8, 4294967295, %v17073_v32 }
 0x2a2   :  { %9323 = vmatmul.mubr.msk.bf16.gmra.mrb[112].mxu0 %vm7910_vm7, %v17059_v19  ;;  %vm17067_vm7 = vcmp.ge.s32.totalorder %v12935_v60, 1  ;;  %v17068_v19 = vld [vmem:[#allocation204_spill] sm:$0xff]  ;;  %17075 = vst [vmem:[#allocation201_spill] sm:$0xff] %v17074_v32  ;;  %v17081_v60 = vld [vmem:[#allocation146_spill] sm:$0xff] }
 0x2a3   :  { %9326 = vmatprep.mubr.msk.bf16.mxu0 %vm7913_vm3, %v17060_v9  ;;  %vm1408_vm14 = vmand %vm17067_vm7, %vm17066_vm15  ;;  %v956_v63 = vand.u32 15, %v17068_v19  ;;  %v17070_v9 = vld [vmem:[#allocation158_spill] sm:$0xff]  ;;  %vm17072_vm3 = vcmp.ge.s32.totalorder %v17071_v48, 1  ;;  %v17082_v19 = vld [vmem:[#allocation147_spill] sm:$0xff] }
 0x2a4   :  { %vm7916_vm1 = vmpackc.low %vm17072_vm3, %vm1406_vm9  ;;  %v17083_v48 = vld [vmem:[#allocation142_spill] sm:$0xff]  ;;  %v17092_v32 = vld [vmem:[#allocation208_spill] sm:$0xff] }
 0x2a5   :  { %9639 = vmatmul.mubr.msk.bf16.gmra.mrb[60].mxu1 %vm8224_vm10, %v17069_v62  ;;  %vm7919_vm2 = vmpackc.low %vm17077_vm4, %vm1408_vm14  ;;  %vm13623_vm11 = vcmp.le.s32.totalorder %v956_v63, 14  ;;  %vm17084_vm9 = vnez %v17083_v48  ;;  %v17088_v63 = vld [vmem:[#allocation155_spill] sm:$0xff]  ;;  %v960_v62 = vand.u32 15, %v17092_v32  ;;  %v17095_v48 = vld [vmem:[#allocation60_spill] sm:$0xff] }
 0x2a6   :  { %9642 = vmatprep.mubr.msk.bf16.mxu1 %vm8227_vm6, %v17070_v9  ;;  %v17079_v12 = vsel %vm13623_vm11, 4294967295, %v17078_v12  ;;  %vm8230_vm10 = vmpackc.low %vm13617_vm8, %vm16223_vm0  ;;  %vm17086_vm6 = vcmp.ge.s32.totalorder %v17085_v47, 1  ;;  %v17087_v9 = vld [vmem:[#allocation205_spill] sm:$0xff]  ;;  %vm17089_vm14 = vnez %v17088_v63  ;;  %v17100_v47 = vld [vmem:[#allocation215_spill] sm:$0xff]  ;;  %v17102_v63 = vmov 0 }
 0x2a7   :  { %17080 = vst [vmem:[#allocation204_spill] sm:$0xff] %v17079_v12  ;;  %vm1410_vm7 = vmand %vm17086_vm6, %vm17084_vm9  ;;  %v958_v56 = vand.u32 15, %v17087_v9  ;;  %v17097_v9 = vmov 0  ;;  %vm17101_vm15 = vcmp.ge.s32.totalorder %v17100_v47, 1  ;;  %vm13655_vm8 = vcmp.le.s32.totalorder %v960_v62, 14  ;;  %v17106_v32 = vld [vmem:[#allocation160_spill] sm:$0xff] }
 0x2a8   :  { %vm8233_vm4 = vmpackc.low %vm13623_vm11, %vm16223_vm0  ;;  %v17103_v63 = vsel %vm13655_vm8, 4294967295, %v17102_v63  ;;  %v17112_v62 = vld [vmem:[#allocation38_spill] sm:$0xff] }
 0x2a9   :  { %vm13649_vm9 = vcmp.le.s32.totalorder %v958_v56, 14  ;;  %17104 = vst [vmem:[#allocation208_spill] sm:$0xff] %v17103_v63  ;;  %v17109_v56 = vld [vmem:[#allocation61_spill] sm:$0xff]  ;;  %v17117_v12 = vld [vmem:[#allocation166_spill] sm:$0xff] }
 0x2aa   :  { %9327 = vmatmul.mubr.msk.bf16.gmra.mrb[116].mxu0 %vm7916_vm1, %v17081_v60  ;;  %v17090_v60 = vld [vmem:[#allocation214_spill] sm:$0xff]  ;;  %v17098_v9 = vsel %vm13649_vm9, 4294967295, %v17097_v9  ;;  %v17129_v63 = vld [vmem:[#allocation173_spill] sm:$0xff] }
 0x2ab   :  { %9330 = vmatprep.mubr.msk.bf16.mxu0 %vm7919_vm2, %v17082_v19  ;;  %vm17091_vm3 = vcmp.ge.s32.totalorder %v17090_v60, 1  ;;  %v17094_v19 = vld [vmem:[#allocation161_spill] sm:$0xff]  ;;  %vm17096_vm2 = vcmp.ge.s32.totalorder %v17095_v48, 1  ;;  %17099 = vst [vmem:[#allocation205_spill] sm:$0xff] %v17098_v9  ;;  %v17105_v60 = vld [vmem:[#allocation159_spill] sm:$0xff]  ;;  %v17116_v9 = vld [vmem:[#allocation212_spill] sm:$0xff] }
 0x2ac   :  { %vm1412_vm1 = vmand %vm17091_vm3, %vm17089_vm14  ;;  %v17107_v48 = vld [vmem:[#allocation157_spill] sm:$0xff] }
 0x2ad   :  { %9643 = vmatmul.mubr.msk.bf16.gmra.mrb[0].mxu1 %vm8230_vm10, %v17093_v45  ;;  %vm7922_vm6 = vmpackc.low %vm17096_vm2, %vm1410_vm7  ;;  %vm17108_vm7 = vnez %v17107_v48  ;;  %v964_v45 = vand.u32 15, %v17116_v9  ;;  %v17119_v48 = vld [vmem:[#allocation216_spill] sm:$0xff]  ;;  %v17130_v9 = vld [vmem:[#allocation3_spill] sm:$0xff] }
 0x2ae   :  { %9646 = vmatprep.mubr.msk.bf16.mxu1 %vm8233_vm4, %v17094_v19  ;;  %vm7925_vm11 = vmpackc.low %vm17101_vm15, %vm1412_vm1  ;;  %vm17110_vm4 = vcmp.ge.s32.totalorder %v17109_v56, 1  ;;  %v17111_v19 = vld [vmem:[#allocation209_spill] sm:$0xff]  ;;  %vm17113_vm1 = vnez %v17112_v62  ;;  %v17124_v56 = vld [vmem:[#allocation54_spill] sm:$0xff]  ;;  %v17126_v62 = vmov 0 }
 0x2af   :  { %vm8236_vm10 = vmpackc.low %vm13649_vm9, %vm16223_vm0  ;;  %v962_v47 = vand.u32 15, %v17111_v19  ;;  %v17121_v19 = vmov 0  ;;  %vm17125_vm14 = vcmp.ge.s32.totalorder %v17124_v56, 1  ;;  %vm13687_vm9 = vcmp.le.s32.totalorder %v964_v45, 14  ;;  %v17136_v45 = vld [vmem:[#allocation52_spill] sm:$0xff] }
 0x2b0   :  { %vm1414_vm3 = vmand %vm17110_vm4, %vm17108_vm7  ;;  %v17127_v62 = vsel %vm13687_vm9, 4294967295, %v17126_v62 }
 0x2b1   :  { %vm8239_vm15 = vmpackc.low %vm13655_vm8, %vm16223_vm0  ;;  %vm13681_vm7 = vcmp.le.s32.totalorder %v962_v47, 14  ;;  %17128 = vst [vmem:[#allocation212_spill] sm:$0xff] %v17127_v62  ;;  %v17133_v47 = vld [vmem:[#allocation64_spill] sm:$0xff]  ;;  %v17147_v62 = vld [vmem:[#allocation66_spill] sm:$0xff] }
 0x2b2   :  { %9331 = vmatmul.mubr.msk.bf16.gmra.mrb[120].mxu0 %vm7922_vm6, %v17105_v60  ;;  %v17114_v60 = vld [vmem:[#allocation55_spill] sm:$0xff]  ;;  %v17122_v19 = vsel %vm13681_vm7, 4294967295, %v17121_v19 }
 0x2b3   :  { %9334 = vmatprep.mubr.msk.bf16.mxu0 %vm7925_vm11, %v17106_v32  ;;  %vm17115_vm2 = vcmp.ge.s32.totalorder %v17114_v60, 1  ;;  %v17118_v32 = vld [vmem:[#allocation192_spill] sm:$0xff]  ;;  %vm17120_vm11 = vcmp.ge.s32.totalorder %v17119_v48, 1  ;;  %17123 = vst [vmem:[#allocation209_spill] sm:$0xff] %v17122_v19  ;;  %v17140_v19 = vld [vmem:[#allocation193_spill] sm:$0xff]  ;;  %vm15845_vm12 = vcmp.le.s32.totalorder %v17114_v60, 14 }
 0x2b4   :  { %vm2700_vm6 = vmand %vm17115_vm2, %vm17113_vm1  ;;  %v17131_v48 = vld [vmem:[#allocation48_spill] sm:$0xff] }
 0x2b5   :  { %9647 = vmatmul.mubr.msk.bf16.gmra.mrb[4].mxu1 %vm8236_vm10, %v17117_v12  ;;  %vm7928_vm4 = vmpackc.low %vm17120_vm11, %vm1414_vm3  ;;  %vm17132_vm3 = vnez %v17131_v48  ;;  %v17142_v48 = vld [vmem:[#allocation56_spill] sm:$0xff] }
 0x2b6   :  { %9650 = vmatprep.mubr.msk.bf16.mxu1 %vm8239_vm15, %v17118_v32  ;;  %vm7939_vm8 = vmpackc.low %vm2700_vm6, %vm17125_vm14  ;;  %vm17134_vm15 = vcmp.ge.s32.totalorder %v17133_v47, 1  ;;  %v17135_v32 = vld [vmem:[#allocation213_spill] sm:$0xff]  ;;  %vm17137_vm6 = vnez %v17136_v45  ;;  %vm17143_vm1 = vcmp.ge.s32.totalorder %v17142_v48, 1  ;;  %v17164_v60 = vld [vmem:[#allocation40_spill] sm:$0xff] }
 0x2b7   :  { %vm8242_vm10 = vmpackc.low %vm13681_vm7, %vm16223_vm0  ;;  %v966_v12 = vand.u32 15, %v17135_v32  ;;  %v17144_v32 = vmov 0  ;;  %v17149_v45 = vld [vmem:[#allocation217_spill] sm:$0xff] }
 0x2b8   :  { %vm2702_vm2 = vmand %vm17134_vm15, %vm17132_vm3 }
 0x2b9   :  { %vm8245_vm14 = vmpackc.low %vm13687_vm9, %vm16223_vm0  ;;  %vm13713_vm3 = vcmp.le.s32.totalorder %v966_v12, 14  ;;  %vm17148_vm9 = vcmp.ge.s32.totalorder %v17147_v62, 1  ;;  %v17152_v12 = vld [vmem:[#allocation13_spill] sm:$0xff] }
 0x2ba   :  { %9335 = vmatmul.mubr.msk.bf16.gmra.mrb[124].mxu0 %vm7928_vm4, %v17129_v63  ;;  %v17138_v63 = vld [vmem:[#allocation70_spill] sm:$0xff]  ;;  %vm7942_vm15 = vmpackc.low %vm2702_vm2, %vm17143_vm1  ;;  %v17145_v32 = vsel %vm13713_vm3, 4294967295, %v17144_v32 }
 0x2bb   :  { %9354 = vmatprep.mubr.msk.bf16.mxu0 %vm7939_vm8, %v17130_v9  ;;  %vm17139_vm11 = vcmp.ge.s32.totalorder %v17138_v63, 1  ;;  %vm15841_vm8 = vcmp.le.s32.totalorder %v17124_v56, 14  ;;  %17146 = vst [vmem:[#allocation213_spill] sm:$0xff] %v17145_v32  ;;  %vm8248_vm1 = vmpackc.low %vm13713_vm3, %vm16223_vm0  ;;  %v17157_v56 = vld [vmem:[#allocation68_spill] sm:$0xff]  ;;  %vm15855_vm0 = vcmp.le.s32.totalorder %v17147_v62, 14  ;;  %v10640_v62 = vld [vmem:[%s15191_s3 + $0xd8] sm:$0xff]  }
 0x2bc   :  { %vm2704_vm4 = vmand %vm17139_vm11, %vm17137_vm6  ;;  %vm17150_vm11 = vnez %v17149_v45  ;;  %v17168_v45 = vld [vmem:[#allocation50_spill] sm:$0xff] }
 0x2bd   :  { %9651 = vmatmul.mubr.msk.bf16.gmra.mrb[8].mxu1 %vm8242_vm10, %v17140_v19  ;;  %vm7945_vm7 = vmpackc.low %vm2704_vm4, %vm17148_vm9  ;;  %v17151_v19 = vld [vmem:[#allocation179_spill] sm:$0xff] }
 0x2be   :  { %9654 = vmatprep.mubr.msk.bf16.mxu1 %vm8245_vm14, %v17141_v50  ;;  %vm5135_vm10 = vmand %vm15841_vm8, %vm17150_vm11  ;;  %v17153_v50 = vld [vmem:[#allocation57_spill] sm:$0xff]  ;;  %vm17156_vm14 = vcmp.ge.s32.totalorder %v17155_v51, 1  ;;  %vm15849_vm8 = vcmp.le.s32.totalorder %v17142_v48, 14  ;;  %v10623_v48 = vld [vmem:[%s15191_s3 + $0x1d0] sm:$0xff]  }
 0x2bf   :  { %vm17154_vm2 = vnez %v17153_v50  ;;  %vm8259_vm4 = vmpackc.low %vm15845_vm12, %vm5135_vm10  ;;  %v17161_v50 = vld [vmem:[#allocation72_spill] sm:$0xff]  ;;  %vm15857_vm10 = vcmp.le.s32.totalorder %v17133_v47, 14  ;;  %vm17165_vm12 = vnez %v17164_v60  ;;  %v17181_v47 = vld [vmem:[#allocation53_spill] sm:$0xff] }
 0x2c0   :  { %vm2706_vm9 = vmand %vm17156_vm14, %vm17154_vm2  ;;  %vm17162_vm14 = vcmp.ge.s32.totalorder %v17161_v50, 1 }
 0x2c1   :  { %vm7948_vm2 = vmpackc.low %vm2706_vm9, %vm17162_vm14  ;;  %vm17169_vm9 = vnez %v17168_v45 }
 0x2c2   :  { %9355 = vmatmul.mubr.msk.bf16.vlgmr.msra.gmra.mrb[64].mxu0 %vm7942_vm15, %v17151_v19  ;;  %v10638_v19 = vld [vmem:[%s15191_s3 + $0xc8] sm:$0xff]   ;;  %vm17158_vm15 = vnez %v17157_v56  ;;  %vm5137_vm11 = vmand %vm15849_vm8, %vm17165_vm12  ;;  %v17166_v56 = vld [vmem:[#allocation81_spill] sm:$0xff]  ;;  %vm15861_vm12 = vcmp.le.s32.totalorder %v17161_v50, 14 }
 0x2c3   :  { %9358 = vmatprep.mubr.msk.bf16.mxu0 %vm7945_vm7, %v17152_v12  ;;  %9419 = vmatpush3.bf16.msra.mxu0 %v13268_v0  ;;  %v17159_v12 = vld [vmem:[#allocation82_spill] sm:$0xff]  ;;  %v17163_v0 = vld [vmem:[#allocation177_spill] sm:$0xff]  ;;  %vm17167_vm3 = vcmp.ge.s32.totalorder %v17166_v56, 1  ;;  %vm8262_vm14 = vmpackc.low %vm15857_vm10, %vm5137_vm11  ;;  %vm17174_vm11 = vnez %v16862_v14  ;;  %vm17182_vm10 = vnez %v17181_v47 }
 0x2c4   :  { %9420 = vmatprep.subr.bf16.mxu0 %v10638_v19  ;;  %vm17160_vm7 = vcmp.ge.s32.totalorder %v17159_v12, 1  ;;  %v17183_v14 = vld [vmem:[#allocation96_spill] sm:$0xff]  ;;  %v17187_v50 = vld [vmem:[#allocation14_spill] sm:$0xff] }
 0x2c5   :  { %vm2708_vm6 = vmand %vm17160_vm7, %vm17158_vm15  ;;  %9655 = vmatmul.mubr.msk.bf16.gmra.mrb[12].mxu1 %vm8248_vm1, %v17130_v9  ;;  %v10639_v9 = vld [vmem:[%s15191_s3 + $0xd0] sm:$0xff]   ;;  %vm15853_vm1 = vcmp.le.s32.totalorder %v17138_v63, 14  ;;  %v17180_v63 = vld [vmem:[#allocation9_spill] sm:$0xff] }
 0x2c6   :  { %9674 = vmatprep.mubr.msk.bf16.mxu1 %vm8259_vm4, %v17163_v0  ;;  %vm7951_vm7 = vmpackc.low %vm2708_vm6, %vm17167_vm3  ;;  %v17170_v0 = vld [vmem:[#allocation180_spill] sm:$0xff]  ;;  %vm17171_vm3 = vnez %v16857_v52  ;;  %v17175_v52 = vld [vmem:[#allocation98_spill] sm:$0xff] }
 0x2c7   :  { %9421 = vmatpush3.bf16.msra.mxu0 %v10638_v19  ;;  %vm5139_vm4 = vmand %vm15855_vm0, %vm17169_vm9  ;;  %v17172_v19 = vld [vmem:[#allocation87_spill] sm:$0xff]  ;;  %vm15868_vm0 = vcmp.le.s32.totalorder %v17155_v51, 14  ;;  %v10625_v51 = vld [vmem:[%s15191_s3 + $0x1e0] sm:$0xff]  }
 0x2c8   :  { %9422 = vmatprep.subr.bf16.mxu0 %v10639_v9  ;;  %vm17173_vm6 = vcmp.ge.s32.totalorder %v17172_v19, 1  ;;  %vm8265_vm15 = vmpackc.low %vm15853_vm1, %vm5139_vm4  ;;  %vm15862_vm1 = vcmp.le.s32.totalorder %v17166_v56, 14  ;;  %v17197_v56 = vld [vmem:[#allocation76_spill] sm:$0xff] }
 0x2c9   :  { %vm2710_vm8 = vmand %vm17173_vm6, %vm17171_vm3 }
 0x2ca   :  { %9359 = vmatmul.mubr.msk.bf16.gmra.mrb[68].mxu0 %vm7948_vm2, %v17170_v0  ;;  %v10622_v0 = vld [vmem:[%s15191_s3 + $0x1c8] sm:$0xff]   ;;  %vm17176_vm2 = vcmp.ge.s32.totalorder %v17175_v52, 1  ;;  %vm5141_vm3 = vmand %vm15861_vm12, %vm17182_vm10 }
 0x2cb   :  { %9362 = vmatprep.mubr.msk.bf16.mxu0 %vm7951_vm7, %v16851_v23  ;;  %9423 = vmatpush3.bf16.msra.mxu0 %v10639_v9  ;;  %vm2712_vm7 = vmand %vm17176_vm2, %vm17174_vm11  ;;  %v17177_v9 = vld [vmem:[#allocation10_spill] sm:$0xff]  ;;  %vm17184_vm2 = vcmp.ge.s32.totalorder %v17183_v14, 1 }
 0x2cc   :  { %9424 = vmatprep.subr.bf16.mxu0 %v10640_v62  ;;  %v17178_v23 = vld [vmem:[#allocation86_spill] sm:$0xff]  ;;  %vm7957_vm11 = vmpackc.low %vm2712_vm7, %vm17184_vm2 }
 0x2cd   :  { %9675 = vmatmul.mubr.msk.bf16.vlgmr.msra.gmra.mrb[16].mxu1 %vm8262_vm14, %v17177_v9  ;;  %vm17179_vm4 = vcmp.ge.s32.totalorder %v17178_v23, 1  ;;  %vm8268_vm7 = vmpackc.low %vm15868_vm0, %vm5141_vm3  ;;  %vm17191_vm3 = vnez %v16886_v31  ;;  %vm15875_vm0 = vcmp.le.s32.totalorder %v17172_v19, 14  ;;  %v17201_v31 = vld [vmem:[#allocation110_spill] sm:$0xff] }
 0x2ce   :  { %vm7954_vm6 = vmpackc.low %vm2710_vm8, %vm17179_vm4  ;;  %9678 = vmatprep.mubr.msk.bf16.mxu1 %vm8265_vm15, %v17180_v63  ;;  %9739 = vmatpush3.bf16.msra.mxu1 %v13332_v44  ;;  %vm15866_vm8 = vcmp.le.s32.totalorder %v17159_v12, 14  ;;  %v17185_v63 = vld [vmem:[#allocation67_spill] sm:$0xff]  ;;  %v10641_v44 = vld [vmem:[%s15191_s3 + $0xe0] sm:$0xff]   ;;  %vm17188_vm4 = vnez %v16882_v11 }
 0x2cf   :  { %9740 = vmatprep.subr.bf16.mxu1 %v10622_v0  ;;  %9425 = vmatpush3.bf16.msra.mxu0 %v10640_v62  ;;  %vm17186_vm15 = vnez %v17185_v63  ;;  %v17189_v62 = vld [vmem:[#allocation102_spill] sm:$0xff]  ;;  %v17194_v11 = vld [vmem:[#allocation16_spill] sm:$0xff]  ;;  %v17195_v12 = vld [vmem:[#allocation99_spill] sm:$0xff] }
 0x2d0   :  { %vm5143_vm14 = vmand %vm15862_vm1, %vm17186_vm15  ;;  %9426 = vmatprep.subr.bf16.mxu0 %v10641_v44  ;;  %vm17190_vm2 = vcmp.ge.s32.totalorder %v17189_v62, 1 }
 0x2d1   :  { %vm2714_vm12 = vmand %vm17190_vm2, %vm17188_vm4  ;;  %vm17202_vm4 = vcmp.ge.s32.totalorder %v17201_v31, 1 }
 0x2d2   :  { %9363 = vmatmul.mubr.msk.bf16.gmra.mrb[72].mxu0 %vm7954_vm6, %v17187_v50  ;;  %9741 = vmatpush3.bf16.msra.mxu1 %v10622_v0  ;;  %vm8271_vm1 = vmpackc.low %vm15866_vm8, %vm5143_vm14  ;;  %v10624_v50 = vld [vmem:[%s15191_s3 + $0x1d8] sm:$0xff]   ;;  %v10642_v0 = vld [vmem:[%s15191_s3 + $0xe8] sm:$0xff]   ;;  %vm17196_vm14 = vcmp.ge.s32.totalorder %v17195_v12, 1  ;;  %vm15871_vm8 = vcmp.le.s32.totalorder %v17183_v14, 14 }
 0x2d3   :  { %9366 = vmatprep.mubr.msk.bf16.mxu0 %vm7957_vm11, %v16877_v27  ;;  %9742 = vmatprep.subr.bf16.mxu1 %v10623_v48  ;;  %v17192_v27 = vld [vmem:[#allocation114_spill] sm:$0xff]  ;;  %vm7960_vm2 = vmpackc.low %vm2714_vm12, %vm17196_vm14  ;;  %vm15874_vm12 = vcmp.le.s32.totalorder %v17175_v52, 14  ;;  %vm17206_vm14 = vcmp.ge.s32.totalorder %v16331_v35, 1  ;;  %v17217_v52 = vld [vmem:[#allocation91_spill] sm:$0xff] }
 0x2d4   :  { %9427 = vmatpush3.bf16.msra.mxu0 %v10641_v44  ;;  %vm17193_vm11 = vcmp.ge.s32.totalorder %v17192_v27, 1  ;;  %v17198_v44 = vld [vmem:[#allocation71_spill] sm:$0xff] }
 0x2d5   :  { %vm2716_vm6 = vmand %vm17193_vm11, %vm17191_vm3  ;;  %9428 = vmatprep.subr.bf16.mxu0 %v10642_v0  ;;  %9679 = vmatmul.mubr.msk.bf16.gmra.mrb[20].mxu1 %vm8268_vm7, %v17194_v11  ;;  %vm17199_vm15 = vnez %v17198_v44  ;;  %vm17200_vm11 = vcmp.le.s32.totalorder %v17178_v23, 14 }
 0x2d6   :  { %9682 = vmatprep.mubr.msk.bf16.mxu1 %vm8271_vm1, %v17197_v56  ;;  %vm5145_vm3 = vmand %vm17200_vm11, %vm17199_vm15  ;;  %9743 = vmatpush3.bf16.msra.mxu1 %v10623_v48  ;;  %v17203_v56 = vld [vmem:[#allocation79_spill] sm:$0xff]  ;;  %v10643_v48 = vld [vmem:[%s15191_s3 + $0xf0] sm:$0xff]  }
 0x2d7   :  { %vm7963_vm10 = vmpackc.low %vm2716_vm6, %vm17202_vm4  ;;  %9744 = vmatprep.subr.bf16.mxu1 %v10624_v50  ;;  %vm17204_vm1 = vnez %v17203_v56  ;;  %vm17205_vm6 = vnez %v16902_v59  ;;  %v17209_v59 = vld [vmem:[#allocation116_spill] sm:$0xff] }
 0x2d8   :  { %9429 = vmatpush3.bf16.msra.mxu0 %v10642_v0  ;;  %vm5147_vm7 = vmand %vm15871_vm8, %vm17204_vm1  ;;  %v10626_v0 = vld [vmem:[%s15191_s3 + $0x1e8] sm:$0xff]  }
 0x2d9   :  { %9430 = vmatprep.subr.bf16.mxu0 %v10643_v48  ;;  %vm8274_vm4 = vmpackc.low %vm15875_vm0, %vm5145_vm3  ;;  %vm17207_vm3 = vnez %v16906_v7  ;;  %vm15880_vm0 = vcmp.le.s32.totalorder %v17189_v62, 14  ;;  %v17213_v7 = vld [vmem:[#allocation85_spill] sm:$0xff] }
 0x2da   :  { %9367 = vmatmul.mubr.msk.bf16.gmra.mrb[76].mxu0 %vm7960_vm2, %v16879_v49  ;;  %vm2718_vm11 = vmand %vm17206_vm14, %vm17205_vm6  ;;  %9745 = vmatpush3.bf16.msra.mxu1 %v10624_v50  ;;  %v10644_v50 = vld [vmem:[%s15191_s3 + $0xf8] sm:$0xff]   ;;  %vm17214_vm1 = vnez %v17213_v7  ;;  %vm17216_vm6 = vcmp.ge.s32.totalorder %v16339_v22, 1  ;;  %v10627_v49 = vld [vmem:[%s15191_s3 + $0x1f0] sm:$0xff]  }
 0x2db   :  { %9370 = vmatprep.mubr.msk.bf16.mxu0 %vm7963_vm10, %v12193_v33  ;;  %vm8277_vm8 = vmpackc.low %vm15874_vm12, %vm5147_vm7  ;;  %9746 = vmatprep.subr.bf16.mxu1 %v10625_v51  ;;  %vm17208_vm10 = vcmp.ge.s32.totalorder %v16340_v8, 1  ;;  %v17210_v33 = vld [vmem:[#allocation115_spill] sm:$0xff]  ;;  %vm15879_vm12 = vcmp.le.s32.totalorder %v17201_v31, 14 }
 0x2dc   :  { %9431 = vmatpush3.bf16.msra.mxu0 %v10643_v48  ;;  %vm2720_vm2 = vmand %vm17208_vm10, %vm17207_vm3  ;;  %vm17211_vm7 = vcmp.ge.s32.totalorder %v17210_v33, 1  ;;  %v17212_v48 = vld [vmem:[#allocation22_spill] sm:$0xff]  ;;  %vm17215_vm10 = vcmp.le.s32.totalorder %v17195_v12, 14  ;;  %vm15886_vm9 = vcmp.le.s32.totalorder %v17210_v33, 14 }
 0x2dd   :  { %9432 = vmatprep.subr.bf16.mxu0 %v10644_v50  ;;  %9683 = vmatmul.mubr.msk.bf16.gmra.mrb[24].mxu1 %vm8274_vm4, %v17209_v59  ;;  %vm7966_vm14 = vmpackc.low %vm2718_vm11, %vm17211_vm7  ;;  %vm15882_vm4 = vcmp.le.s32.totalorder %v17192_v27, 14  ;;  %v13940_v33 = vld [vmem:[%s15191_s3 + $0x200] sm:$0xff]  }
 0x2de   :  { %9686 = vmatprep.mubr.msk.bf16.mxu1 %vm8277_vm8, %v17212_v48  ;;  %vm5149_vm3 = vmand %vm17215_vm10, %vm17214_vm1  ;;  %9747 = vmatpush3.bf16.msra.mxu1 %v10625_v51  ;;  %vm17218_vm8 = vnez %v17217_v52  ;;  %v10628_v51 = vld [vmem:[%s15191_s3 + $0x1f8] sm:$0xff]  }
 0x2df   :  { %vm7969_vm15 = vmpackc.low %vm2720_vm2, %vm17216_vm6  ;;  %9748 = vmatprep.subr.bf16.mxu1 %v10626_v0  ;;  %vm17219_vm6 = vnez %v16924_v5  ;;  %vm17220_vm2 = vcmp.ge.s32.totalorder %v11455_v21, 1  ;;  %v17226_v5 = vld [vmem:[#allocation100_spill] sm:$0xff] }
 0x2e0   :  { %9433 = vmatpush3.bf16.msra.mxu0 %v10644_v50  ;;  %vm5151_vm11 = vmand %vm15879_vm12, %vm17218_vm8  ;;  %v17223_v50 = vld [vmem:[#allocation136_spill] sm:$0xff] }
 0x2e1   :  { %vm8280_vm7 = vmpackc.low %vm15880_vm0, %vm5149_vm3  ;;  %vm17221_vm3 = vnez %v16928_v17  ;;  %vm15888_vm0 = vcmp.le.s32.totalorder %v16339_v22, 14  ;;  %v17228_v17 = vld [vmem:[#allocation151_spill] sm:$0xff]  ;;  %v17247_v22 = vld [vmem:[#allocation124_spill] sm:$0xff] }
 0x2e2   :  { %9371 = vmatmul.mubr.msk.bf16.gmra.mrb[80].mxu0 %vm7966_vm14, %v12209_v24  ;;  %vm2722_vm10 = vmand %vm17220_vm2, %vm17219_vm6  ;;  %9749 = vmatpush3.bf16.msra.mxu1 %v10626_v0  ;;  %vm17224_vm2 = vcmp.ge.s32.totalorder %v17223_v50, 1  ;;  %v17225_v0 = vld [vmem:[#allocation28_spill] sm:$0xff]  ;;  %vm17229_vm8 = vcmp.ge.s32.totalorder %v17228_v17, 1  ;;  %v17232_v24 = vld [vmem:[#allocation90_spill] sm:$0xff] }
 0x2e3   :  { %9374 = vmatprep.mubr.msk.bf16.mxu0 %vm7969_vm15, %v12274_v39  ;;  %vm8283_vm1 = vmpackc.low %vm15882_vm4, %vm5151_vm11  ;;  %9750 = vmatprep.subr.bf16.mxu1 %v10627_v49  ;;  %vm17222_vm15 = vcmp.ge.s32.totalorder %v11549_v3, 1  ;;  %vm15890_vm11 = vcmp.le.s32.totalorder %v16331_v35, 14  ;;  %vm17227_vm4 = vnez %v17226_v5  ;;  %v17230_v39 = vld [vmem:[#allocation103_spill] sm:$0xff] }
 0x2e4   :  { %vm2724_vm14 = vmand %vm17222_vm15, %vm17221_vm3 }
 0x2e5   :  { %9687 = vmatmul.mubr.msk.bf16.gmra.mrb[28].mxu1 %vm8280_vm7, %v12156_v43  ;;  %vm7972_vm12 = vmpackc.low %vm2722_vm10, %vm17224_vm2  ;;  %vm15893_vm7 = vcmp.le.s32.totalorder %v16340_v8, 14  ;;  %vm17231_vm10 = vnez %v17230_v39  ;;  %v17243_v8 = vld [vmem:[#allocation119_spill] sm:$0xff] }
 0x2e6   :  { %9690 = vmatprep.mubr.msk.bf16.mxu1 %vm8283_vm1, %v17225_v0  ;;  %vm5153_vm6 = vmand %vm15886_vm9, %vm17227_vm4  ;;  %9751 = vmatpush3.bf16.msra.mxu1 %v10627_v49  ;;  %vm17233_vm9 = vnez %v16948_v58  ;;  %v17234_v49 = vld [vmem:[#allocation164_spill] sm:$0xff]  ;;  %v17239_v58 = vld [vmem:[#allocation89_spill] sm:$0xff]  ;;  %vm15908_vm4 = vcmp.le.s32.totalorder %v11549_v3, 14 }
 0x2e7   :  { %vm7975_vm15 = vmpackc.low %vm2724_vm14, %vm17229_vm8  ;;  %9752 = vmatprep.subr.bf16.mxu1 %v10628_v51  ;;  %vm17235_vm3 = vcmp.ge.s32.totalorder %v17234_v49, 1  ;;  %v17263_v3 = vld [vmem:[#allocation149_spill] sm:$0xff] }
 0x2e8   :  { %vm5155_vm2 = vmand %vm15888_vm0, %vm17231_vm10 }
 0x2e9   :  { %vm8286_vm1 = vmpackc.low %vm15890_vm11, %vm5153_vm6  ;;  %vm17236_vm6 = vnez %v16952_v38  ;;  %v17245_v38 = vld [vmem:[#allocation41_spill] sm:$0xff] }
 0x2ea   :  { %9375 = vmatmul.mubr.msk.bf16.gmra.mrb[84].mxu0 %vm7972_vm12, %v17232_v24  ;;  %vm2726_vm8 = vmand %vm17235_vm3, %vm17233_vm9  ;;  %9753 = vmatpush3.bf16.msra.mxu1 %v10628_v51  ;;  %vm15897_vm12 = vcmp.le.s32.totalorder %v17223_v50, 14  ;;  %v17237_v24 = vld [vmem:[#allocation45_spill] sm:$0xff]  ;;  %v17240_v51 = vld [vmem:[#allocation162_spill] sm:$0xff]  ;;  %vm15901_vm9 = vcmp.le.s32.totalorder %v17228_v17, 14 }
 0x2eb   :  { %9378 = vmatprep.mubr.msk.bf16.mxu0 %vm7975_vm15, %v16943_v42  ;;  %vm8289_vm14 = vmpackc.low %vm15893_vm7, %vm5155_vm2  ;;  %vm17238_vm15 = vcmp.ge.s32.totalorder %v17237_v24, 1  ;;  %9818 = vmatprep.subr.bf16.mxu1 %v13940_v33  ;;  %vm17241_vm3 = vcmp.ge.s32.totalorder %v17240_v51, 1  ;;  %v17242_v42 = vld [vmem:[#allocation92_spill] sm:$0xff]  ;;  %vm15905_vm2 = vcmp.le.s32.totalorder %v11455_v21, 14  ;;  %vm17244_vm7 = vnez %v17243_v8  ;;  %v17253_v17 = vld [vmem:[#allocation62_spill] sm:$0xff] }
 0x2ec   :  { %vm2728_vm0 = vmand %vm17238_vm15, %vm17236_vm6  ;;  %vm17246_vm15 = vcmp.ge.s32.totalorder %v17245_v38, 1  ;;  %v17250_v50 = vld [vmem:[#allocation176_spill] sm:$0xff]  ;;  %v17256_v21 = vld [vmem:[#allocation46_spill] sm:$0xff] }
 0x2ed   :  { %9691 = vmatmul.mubr.msk.bf16.gmra.mrb[32].mxu1 %vm8286_vm1, %v17239_v58  ;;  %vm7978_vm11 = vmpackc.low %vm2726_vm8, %vm17241_vm3  ;;  %vm17248_vm1 = vnez %v17247_v22  ;;  %vm17249_vm3 = vnez %v16972_v10  ;;  %v17258_v10 = vld [vmem:[#allocation185_spill] sm:$0xff] }
 0x2ee   :  { %9694 = vmatprep.mubr.msk.bf16.mxu1 %vm8289_vm14, %v17242_v42  ;;  %vm5157_vm10 = vmand %vm15897_vm12, %vm17244_vm7  ;;  %vm17251_vm12 = vcmp.ge.s32.totalorder %v17250_v50, 1 }
 0x2ef   :  { %vm7981_vm6 = vmpackc.low %vm2728_vm0, %vm17246_vm15  ;;  %vm15912_vm15 = vcmp.le.s32.totalorder %v17240_v51, 14 }
 0x2f0   :  { %vm5159_vm8 = vmand %vm15901_vm9, %vm17248_vm1  ;;  %vm17254_vm9 = vcmp.ge.s32.totalorder %v17253_v17, 1 }
 0x2f1   :  { %vm8292_vm14 = vmpackc.low %vm15905_vm2, %vm5157_vm10  ;;  %vm17257_vm10 = vcmp.ge.s32.totalorder %v17256_v21, 1  ;;  %vm15913_vm2 = vcmp.le.s32.totalorder %v17245_v38, 14  ;;  %v17270_v38 = vld [vmem:[#allocation63_spill] sm:$0xff] }
 0x2f2   :  { %9379 = vmatmul.mubr.msk.bf16.gmra.mrb[88].mxu0 %vm7978_vm11, %v16945_v37  ;;  %vm2730_vm7 = vmand %vm17251_vm12, %vm17249_vm3  ;;  %v17255_v37 = vld [vmem:[#allocation183_spill] sm:$0xff]  ;;  %vm15916_vm12 = vcmp.le.s32.totalorder %v17234_v49, 14  ;;  %vm17262_vm3 = vcmp.ge.s32.totalorder %v17261_v55, 1 }
 0x2f3   :  { %9382 = vmatprep.mubr.msk.bf16.mxu0 %vm7981_vm6, %v16967_v20  ;;  %vm8295_vm0 = vmpackc.low %vm15908_vm4, %vm5159_vm8  ;;  %v17259_v20 = vld [vmem:[#allocation143_spill] sm:$0xff] }
 0x2f4   :  { %vm2732_vm11 = vmand %vm17254_vm9, %vm17252_vm13  ;;  %vm17260_vm8 = vnez %v17259_v20  ;;  %vm15919_vm9 = vcmp.le.s32.totalorder %v17237_v24, 14  ;;  %v17277_v24 = vld [vmem:[#allocation171_spill] sm:$0xff] }
 0x2f5   :  { %9695 = vmatmul.mubr.msk.bf16.gmra.mrb[36].mxu1 %vm8292_vm14, %v17255_v37  ;;  %vm7984_vm6 = vmpackc.low %vm2730_vm7, %vm17257_vm10  ;;  %vm17264_vm14 = vnez %v17263_v3  ;;  %vm17265_vm10 = vnez %v16994_v1  ;;  %v17272_v1 = vld [vmem:[#allocation104_spill] sm:$0xff] }
 0x2f6   :  { %9698 = vmatprep.mubr.msk.bf16.mxu1 %vm8295_vm0, %v17258_v10  ;;  %vm5161_vm4 = vmand %vm15912_vm15, %vm17260_vm8  ;;  %vm17266_vm15 = vcmp.ge.s32.totalorder %v16609_v53, 1  ;;  %vm17267_vm8 = vnez %v16998_v13  ;;  %v17275_v13 = vld [vmem:[#allocation77_spill] sm:$0xff] }
 0x2f7   :  { %vm7987_vm1 = vmpackc.low %vm2732_vm11, %vm17262_vm3  ;;  %vm15922_vm11 = vcmp.le.s32.totalorder %v17256_v21, 14 }
 0x2f8   :  { %vm5163_vm7 = vmand %vm15913_vm2, %vm17264_vm14  ;;  %vm17268_vm2 = vcmp.ge.s32.totalorder %v16619_v30, 1 }
 0x2f9   :  { %vm8298_vm0 = vmpackc.low %vm15916_vm12, %vm5161_vm4  ;;  %vm17271_vm4 = vcmp.ge.s32.totalorder %v17270_v38, 1  ;;  %vm15923_vm12 = vcmp.le.s32.totalorder %v17261_v55, 14 }
 0x2fa   :  { %9383 = vmatmul.mubr.msk.bf16.gmra.mrb[92].mxu0 %vm7984_vm6, %v16969_v36  ;;  %vm2734_vm13 = vmand %vm17266_vm15, %vm17265_vm10  ;;  %v17269_v36 = vld [vmem:[#allocation188_spill] sm:$0xff]  ;;  %vm15925_vm15 = vcmp.le.s32.totalorder %v17250_v50, 14  ;;  %vm17276_vm10 = vcmp.ge.s32.totalorder %v17275_v13, 1 }
 0x2fb   :  { %9386 = vmatprep.mubr.msk.bf16.mxu0 %vm7987_vm1, %v16990_v46  ;;  %vm8301_vm3 = vmpackc.low %vm15919_vm9, %vm5163_vm7  ;;  %v17273_v46 = vld [vmem:[#allocation167_spill] sm:$0xff] }
 0x2fc   :  { %vm2736_vm6 = vmand %vm17268_vm2, %vm17267_vm8  ;;  %vm17274_vm7 = vnez %v17273_v46  ;;  %vm15928_vm2 = vcmp.le.s32.totalorder %v17253_v17, 14  ;;  %vm17280_vm8 = vnez %v17020_v57  ;;  %v17287_v57 = vld [vmem:[#allocation184_spill] sm:$0xff]  ;;  %v17289_v17 = vld [vmem:[#allocation59_spill] sm:$0xff] }
 0x2fd   :  { %9699 = vmatmul.mubr.msk.bf16.gmra.mrb[40].mxu1 %vm8298_vm0, %v17269_v36  ;;  %vm7990_vm1 = vmpackc.low %vm2734_vm13, %vm17271_vm4  ;;  %vm17278_vm0 = vnez %v17277_v24  ;;  %vm17279_vm4 = vcmp.ge.s32.totalorder %v12154_v26, 1  ;;  %v17485_v46 = vld [vmem:[#allocation51_spill] sm:$0xff] }
 0x2fe   :  { %9702 = vmatprep.mubr.msk.bf16.mxu1 %vm8301_vm3, %v17272_v1  ;;  %vm5165_vm9 = vmand %vm15922_vm11, %vm17274_vm7 }
 0x2ff   :  { %vm7993_vm14 = vmpackc.low %vm2736_vm6, %vm17276_vm10  ;;  %vm15932_vm6 = vcmp.le.s32.totalorder %v17270_v38, 14  ;;  %v17322_v38 = vld [vmem:[#allocation150_spill] sm:$0xff] }
 0x300   :  { %vm5167_vm13 = vmand %vm15923_vm12, %vm17278_vm0  ;;  %vm17281_vm12 = vcmp.ge.s32.totalorder %v12387_v40, 1 }
 0x301   :  { %vm8304_vm3 = vmpackc.low %vm15925_vm15, %vm5165_vm9  ;;  %vm17283_vm9 = vcmp.ge.s32.totalorder %v12135_v41, 1  ;;  %vm15933_vm15 = vcmp.le.s32.totalorder %v17275_v13, 14  ;;  %v17304_v13 = vld [vmem:[#allocation199_spill] sm:$0xff] }
 0x302   :  { %9387 = vmatmul.mubr.msk.bf16.gmra.mrb[96].mxu0 %vm7990_vm1, %v16991_v4  ;;  %vm2738_vm11 = vmand %vm17279_vm4, %vm13517_vm5  ;;  %v17282_v4 = vld [vmem:[#allocation190_spill] sm:$0xff]  ;;  %vm15935_vm4 = vcmp.le.s32.totalorder %v16609_v53, 14  ;;  %vm17288_vm5 = vcmp.ge.s32.totalorder %v17287_v57, 1  ;;  %v17308_v53 = vld [vmem:[#allocation223_spill] sm:$0xff] }
 0x303   :  { %9390 = vmatprep.mubr.msk.bf16.mxu0 %vm7993_vm14, %v17012_v6  ;;  %vm8307_vm10 = vmpackc.low %vm15928_vm2, %vm5167_vm13  ;;  %v17285_v6 = vld [vmem:[#allocation175_spill] sm:$0xff] }
 0x304   :  { %vm2740_vm1 = vmand %vm17281_vm12, %vm17280_vm8  ;;  %vm17286_vm13 = vnez %v17285_v6  ;;  %vm15938_vm12 = vcmp.le.s32.totalorder %v16619_v30, 14  ;;  %v17303_v30 = vld [vmem:[#allocation148_spill] sm:$0xff] }
 0x305   :  { %9703 = vmatmul.mubr.msk.bf16.gmra.mrb[44].mxu1 %vm8304_vm3, %v17282_v4  ;;  %vm7996_vm14 = vmpackc.low %vm2738_vm11, %vm17283_vm9  ;;  %vm17290_vm3 = vnez %v17289_v17  ;;  %vm17291_vm9 = vnez %v17033_v15  ;;  %v17297_v15 = vld [vmem:[#allocation75_spill] sm:$0xff] }
 0x306   :  { %9706 = vmatprep.mubr.msk.bf16.mxu1 %vm8307_vm10, %v17284_v54  ;;  %vm5169_vm2 = vmand %vm15932_vm6, %vm17286_vm13  ;;  %vm17292_vm6 = vcmp.ge.s32.totalorder %v12825_v34, 1  ;;  %vm17293_vm13 = vnez %v17037_v18  ;;  %v17301_v18 = vld [vmem:[#allocation78_spill] sm:$0xff] }
 0x307   :  { %vm7999_vm0 = vmpackc.low %vm2740_vm1, %vm17288_vm5  ;;  %vm15944_vm1 = vcmp.le.s32.totalorder %v12135_v41, 14  ;;  %v17306_v41 = vld [vmem:[#allocation200_spill] sm:$0xff] }
 0x308   :  { %vm5171_vm11 = vmand %vm15933_vm15, %vm17290_vm3  ;;  %vm17294_vm15 = vcmp.ge.s32.totalorder %v12835_v25, 1 }
 0x309   :  { %vm8310_vm10 = vmpackc.low %vm15935_vm4, %vm5169_vm2  ;;  %vm17296_vm2 = vcmp.ge.s32.totalorder %v12823_v2, 1  ;;  %vm15947_vm4 = vcmp.le.s32.totalorder %v17287_v57, 14  ;;  %v17310_v57 = vld [vmem:[#allocation203_spill] sm:$0xff] }
 0x30a   :  { %9391 = vmatmul.mubr.msk.bf16.gmra.mrb[100].mxu0 %vm7996_vm14, %v17013_v29  ;;  %vm2742_vm8 = vmand %vm17292_vm6, %vm17291_vm9  ;;  %v17295_v29 = vld [vmem:[#allocation117_spill] sm:$0xff]  ;;  %vm15951_vm6 = vcmp.le.s32.totalorder %v12154_v26, 14  ;;  %vm17300_vm9 = vcmp.ge.s32.totalorder %v12833_v61, 1  ;;  %v17313_v26 = vld [vmem:[#allocation36_spill] sm:$0xff] }
 0x30b   :  { %9394 = vmatprep.mubr.msk.bf16.mxu0 %vm7999_vm0, %v12633_v28  ;;  %vm8313_vm5 = vmpackc.low %vm15938_vm12, %vm5171_vm11  ;;  %v17298_v28 = vld [vmem:[#allocation2_spill] sm:$0xff] }
 0x30c   :  { %vm2744_vm14 = vmand %vm17294_vm15, %vm17293_vm13  ;;  %vm17299_vm11 = vnez %v17298_v28  ;;  %vm15952_vm15 = vcmp.le.s32.totalorder %v12387_v40, 14  ;;  %v17320_v40 = vld [vmem:[#allocation219_spill] sm:$0xff] }
 0x30d   :  { %9707 = vmatmul.mubr.msk.bf16.gmra.mrb[48].mxu1 %vm8310_vm10, %v17295_v29  ;;  %vm8002_vm0 = vmpackc.low %vm2742_vm8, %vm17296_vm2  ;;  %vm17302_vm10 = vnez %v17301_v18  ;;  %vm17305_vm2 = vnez %v17304_v13  ;;  %v17315_v13 = vld [vmem:[#allocation131_spill] sm:$0xff] }
 0x30e   :  { %9710 = vmatprep.mubr.msk.bf16.mxu1 %vm8313_vm5, %v17297_v15  ;;  %vm5173_vm12 = vmand %vm15944_vm1, %vm17299_vm11  ;;  %vm17307_vm1 = vcmp.ge.s32.totalorder %v17306_v41, 1  ;;  %vm17309_vm11 = vnez %v17308_v53  ;;  %v17318_v53 = vld [vmem:[#allocation202_spill] sm:$0xff] }
 0x30f   :  { %vm8005_vm3 = vmpackc.low %vm2744_vm14, %vm17300_vm9  ;;  %vm15958_vm14 = vcmp.le.s32.totalorder %v12823_v2, 14  ;;  %v17326_v2 = vld [vmem:[#allocation39_spill] sm:$0xff] }
 0x310   :  { %vm5175_vm8 = vmand %vm15947_vm4, %vm17302_vm10  ;;  %vm17311_vm4 = vcmp.ge.s32.totalorder %v17310_v57, 1 }
 0x311   :  { %vm8316_vm5 = vmpackc.low %vm15951_vm6, %vm5173_vm12  ;;  %vm17314_vm12 = vcmp.ge.s32.totalorder %v17313_v26, 1  ;;  %vm15961_vm6 = vcmp.le.s32.totalorder %v12833_v61, 14  ;;  %v17330_v61 = vld [vmem:[#allocation207_spill] sm:$0xff] }
 0x312   :  { %9395 = vmatmul.mubr.msk.bf16.gmra.mrb[104].mxu0 %vm8002_vm0, %v17030_v16  ;;  %vm2746_vm13 = vmand %vm17307_vm1, %vm17305_vm2  ;;  %v17312_v16 = vld [vmem:[#allocation123_spill] sm:$0xff]  ;;  %vm15964_vm1 = vcmp.le.s32.totalorder %v12825_v34, 14  ;;  %vm17319_vm2 = vcmp.ge.s32.totalorder %v17318_v53, 1  ;;  %v17333_v34 = vld [vmem:[#allocation37_spill] sm:$0xff] }
 0x313   :  { %9398 = vmatprep.mubr.msk.bf16.mxu0 %vm8005_vm3, %v17303_v30  ;;  %vm8319_vm9 = vmpackc.low %vm15952_vm15, %vm5175_vm8  ;;  %v17316_v30 = vld [vmem:[#allocation218_spill] sm:$0xff] }
 0x314   :  { %vm2748_vm0 = vmand %vm17311_vm4, %vm17309_vm11  ;;  %vm17317_vm8 = vnez %v17316_v30  ;;  %vm15965_vm4 = vcmp.le.s32.totalorder %v12835_v25, 14  ;;  %v17324_v30 = vld [vmem:[#allocation201_spill] sm:$0xff] }
 0x315   :  { %9711 = vmatmul.mubr.msk.bf16.gmra.mrb[52].mxu1 %vm8316_vm5, %v17312_v16  ;;  %vm8008_vm3 = vmpackc.low %vm2746_vm13, %vm17314_vm12  ;;  %vm17321_vm5 = vnez %v17320_v40  ;;  %vm17325_vm12 = vnez %v17324_v30  ;;  %v17328_v40 = vld [vmem:[#allocation204_spill] sm:$0xff]  ;;  %v17335_v30 = vld [vmem:[#allocation145_spill] sm:$0xff] }
 0x316   :  { %9714 = vmatprep.mubr.msk.bf16.mxu1 %vm8319_vm9, %v17315_v13  ;;  %vm5177_vm15 = vmand %vm15958_vm14, %vm17317_vm8  ;;  %v17323_v13 = vld [vmem:[#allocation153_spill] sm:$0xff]  ;;  %vm17327_vm14 = vcmp.ge.s32.totalorder %v17326_v2, 1  ;;  %vm17329_vm8 = vnez %v17328_v40  ;;  %v17338_v40 = vld [vmem:[#allocation206_spill] sm:$0xff] }
 0x317   :  { %vm8011_vm10 = vmpackc.low %vm2748_vm0, %vm17319_vm2  ;;  %vm15969_vm0 = vcmp.le.s32.totalorder %v17313_v26, 14  ;;  %v17340_v25 = vld [vmem:[#allocation109_spill] sm:$0xff]  ;;  %v17346_v26 = vld [vmem:[#allocation44_spill] sm:$0xff] }
 0x318   :  { %vm5179_vm13 = vmand %vm15961_vm6, %vm17321_vm5  ;;  %vm17331_vm6 = vcmp.ge.s32.totalorder %v17330_v61, 1 }
 0x319   :  { %vm8322_vm9 = vmpackc.low %vm15964_vm1, %vm5177_vm15  ;;  %vm17334_vm15 = vcmp.ge.s32.totalorder %v17333_v34, 1  ;;  %vm15972_vm1 = vcmp.le.s32.totalorder %v17318_v53, 14  ;;  %v17350_v53 = vld [vmem:[#allocation211_spill] sm:$0xff] }
 0x31a   :  { %9399 = vmatmul.mubr.msk.bf16.gmra.mrb[108].mxu0 %vm8008_vm3, %v17322_v38  ;;  %vm2750_vm11 = vmand %vm17327_vm14, %vm17325_vm12  ;;  %v17332_v38 = vld [vmem:[#allocation137_spill] sm:$0xff]  ;;  %vm15974_vm14 = vcmp.le.s32.totalorder %v17306_v41, 14  ;;  %vm17339_vm12 = vcmp.ge.s32.totalorder %v17338_v40, 1  ;;  %v17353_v41 = vld [vmem:[#allocation43_spill] sm:$0xff] }
 0x31b   :  { %9402 = vmatprep.mubr.msk.bf16.mxu0 %vm8011_vm10, %v17323_v13  ;;  %vm8325_vm2 = vmpackc.low %vm15965_vm4, %vm5179_vm13  ;;  %v17336_v13 = vld [vmem:[#allocation220_spill] sm:$0xff] }
 0x31c   :  { %vm2752_vm3 = vmand %vm17331_vm6, %vm17329_vm8  ;;  %vm17337_vm13 = vnez %v17336_v13  ;;  %vm15973_vm6 = vcmp.le.s32.totalorder %v17310_v57, 14  ;;  %v17344_v13 = vld [vmem:[#allocation205_spill] sm:$0xff] }
 0x31d   :  { %9715 = vmatmul.mubr.msk.bf16.gmra.mrb[56].mxu1 %vm8322_vm9, %v17332_v38  ;;  %vm8014_vm10 = vmpackc.low %vm2750_vm11, %vm17334_vm15  ;;  %vm17341_vm9 = vnez %v17340_v25  ;;  %v17342_v38 = vld [vmem:[#allocation158_spill] sm:$0xff]  ;;  %vm17345_vm15 = vnez %v17344_v13  ;;  %v17348_v25 = vld [vmem:[#allocation208_spill] sm:$0xff] }
 0x31e   :  { %9718 = vmatprep.mubr.msk.bf16.mxu1 %vm8325_vm2, %v17335_v30  ;;  %vm5181_vm4 = vmand %vm15969_vm0, %vm17337_vm13  ;;  %v17343_v30 = vld [vmem:[#allocation163_spill] sm:$0xff]  ;;  %vm17347_vm0 = vcmp.ge.s32.totalorder %v17346_v26, 1  ;;  %vm17349_vm13 = vnez %v17348_v25  ;;  %v17355_v13 = vld [vmem:[#allocation133_spill] sm:$0xff] }
 0x31f   :  { %vm8017_vm5 = vmpackc.low %vm2752_vm3, %vm17339_vm12  ;;  %vm15977_vm3 = vcmp.le.s32.totalorder %v17333_v34, 14  ;;  %v17358_v25 = vld [vmem:[#allocation210_spill] sm:$0xff]  ;;  %v17362_v57 = vld [vmem:[#allocation161_spill] sm:$0xff] }
 0x320   :  { %vm5183_vm11 = vmand %vm15972_vm1, %vm17341_vm9  ;;  %vm17351_vm9 = vcmp.ge.s32.totalorder %v17350_v53, 1  ;;  %vm15980_vm1 = vcmp.le.s32.totalorder %v17338_v40, 14  ;;  %v17366_v34 = vld [vmem:[#allocation60_spill] sm:$0xff]  ;;  %v17370_v40 = vld [vmem:[#allocation215_spill] sm:$0xff] }
 0x321   :  { %vm8328_vm2 = vmpackc.low %vm15974_vm14, %vm5181_vm4  ;;  %vm17354_vm4 = vcmp.ge.s32.totalorder %v17353_v41, 1  ;;  %vm17359_vm14 = vcmp.ge.s32.totalorder %v17358_v25, 1 }
 0x322   :  { %9403 = vmatmul.mubr.msk.bf16.gmra.mrb[112].mxu0 %vm8014_vm10, %v17342_v38  ;;  %vm2754_vm8 = vmand %vm17347_vm0, %vm17345_vm15  ;;  %v17352_v38 = vld [vmem:[#allocation132_spill] sm:$0xff]  ;;  %vm15982_vm0 = vcmp.le.s32.totalorder %v17326_v2, 14  ;;  %v17373_v2 = vld [vmem:[#allocation47_spill] sm:$0xff] }
 0x323   :  { %9406 = vmatprep.mubr.msk.bf16.mxu0 %vm8017_vm5, %v17343_v30  ;;  %vm8331_vm12 = vmpackc.low %vm15973_vm6, %vm5183_vm11  ;;  %v17356_v30 = vld [vmem:[#allocation113_spill] sm:$0xff] }
 0x324   :  { %vm2756_vm10 = vmand %vm17351_vm9, %vm17349_vm13  ;;  %vm17357_vm11 = vnez %v17356_v30  ;;  %vm15981_vm9 = vcmp.le.s32.totalorder %v17330_v61, 14  ;;  %v17364_v30 = vld [vmem:[#allocation209_spill] sm:$0xff]  ;;  %v17382_v61 = vld [vmem:[#allocation192_spill] sm:$0xff] }
 0x325   :  { %9719 = vmatmul.mubr.msk.bf16.gmra.mrb[60].mxu1 %vm8328_vm2, %v17352_v38  ;;  %vm8020_vm5 = vmpackc.low %vm2754_vm8, %vm17354_vm4  ;;  %v17360_v38 = vld [vmem:[#allocation127_spill] sm:$0xff]  ;;  %vm17365_vm4 = vnez %v17364_v30 }
 0x326   :  { %9722 = vmatprep.mubr.msk.bf16.mxu1 %vm8331_vm12, %v17355_v13  ;;  %vm5185_vm6 = vmand %vm15977_vm3, %vm17357_vm11  ;;  %vm17361_vm2 = vnez %v17360_v38  ;;  %v17363_v13 = vld [vmem:[#allocation166_spill] sm:$0xff]  ;;  %vm17367_vm11 = vcmp.ge.s32.totalorder %v17366_v34, 1  ;;  %v17368_v38 = vld [vmem:[#allocation212_spill] sm:$0xff] }
 0x327   :  { %vm8023_vm15 = vmpackc.low %vm2756_vm10, %vm17359_vm14  ;;  %vm15984_vm10 = vcmp.le.s32.totalorder %v17353_v41, 14  ;;  %vm17369_vm13 = vnez %v17368_v38  ;;  %v17375_v30 = vld [vmem:[#allocation147_spill] sm:$0xff]  ;;  %v17378_v38 = vld [vmem:[#allocation214_spill] sm:$0xff] }
 0x328   :  { %vm5187_vm8 = vmand %vm15980_vm1, %vm17361_vm2  ;;  %vm17371_vm2 = vcmp.ge.s32.totalorder %v17370_v40, 1  ;;  %vm15986_vm1 = vcmp.le.s32.totalorder %v17358_v25, 14  ;;  %v17388_v25 = vld [vmem:[#allocation61_spill] sm:$0xff] }
 0x329   :  { %vm8334_vm12 = vmpackc.low %vm15982_vm0, %vm5185_vm6  ;;  %vm17374_vm6 = vcmp.ge.s32.totalorder %v17373_v2, 1  ;;  %vm17379_vm0 = vcmp.ge.s32.totalorder %v17378_v38, 1 }
 0x32a   :  { %9407 = vmatmul.mubr.msk.bf16.gmra.mrb[116].mxu0 %vm8020_vm5, %v17362_v57  ;;  %vm2758_vm3 = vmand %vm17367_vm11, %vm17365_vm4  ;;  %v17372_v57 = vld [vmem:[#allocation146_spill] sm:$0xff]  ;;  %vm15987_vm11 = vcmp.le.s32.totalorder %v17346_v26, 14 }
 0x32b   :  { %9410 = vmatprep.mubr.msk.bf16.mxu0 %vm8023_vm15, %v17363_v13  ;;  %vm8337_vm14 = vmpackc.low %vm15981_vm9, %vm5187_vm8  ;;  %v17376_v13 = vld [vmem:[#allocation130_spill] sm:$0xff] }
 0x32c   :  { %vm2760_vm5 = vmand %vm17371_vm2, %vm17369_vm13  ;;  %vm17377_vm8 = vnez %v17376_v13  ;;  %vm15989_vm2 = vcmp.le.s32.totalorder %v17350_v53, 14  ;;  %v17385_v13 = vld [vmem:[#allocation216_spill] sm:$0xff]  ;;  %v17398_v53 = vld [vmem:[#allocation194_spill] sm:$0xff] }
 0x32d   :  { %9723 = vmatmul.mubr.msk.bf16.gmra.mrb[0].mxu1 %vm8334_vm12, %v17372_v57  ;;  %vm8026_vm15 = vmpackc.low %vm2758_vm3, %vm17374_vm6  ;;  %v17380_v57 = vld [vmem:[#allocation140_spill] sm:$0xff]  ;;  %vm17384_vm6 = vnez %v17145_v32  ;;  %v17394_v32 = vld [vmem:[#allocation142_spill] sm:$0xff] }
 0x32e   :  { %9726 = vmatprep.mubr.msk.bf16.mxu1 %vm8337_vm14, %v17375_v30  ;;  %vm5189_vm9 = vmand %vm15984_vm10, %vm17377_vm8  ;;  %vm17381_vm12 = vnez %v17380_v57  ;;  %v17383_v30 = vld [vmem:[#allocation193_spill] sm:$0xff]  ;;  %vm17386_vm8 = vcmp.ge.s32.totalorder %v17385_v13, 1  ;;  %v17387_v57 = vld [vmem:[#allocation159_spill] sm:$0xff] }
 0x32f   :  { %vm8029_vm4 = vmpackc.low %vm2760_vm5, %vm17379_vm0  ;;  %vm15991_vm5 = vcmp.le.s32.totalorder %v17373_v2, 14 }
 0x330   :  { %vm5191_vm3 = vmand %vm15986_vm1, %vm17381_vm12  ;;  %vm17389_vm12 = vcmp.ge.s32.totalorder %v17388_v25, 1  ;;  %vm1091_vm1 = vcmp.le.s32.totalorder %v17378_v38, 14 }
 0x331   :  { %vm8340_vm14 = vmpackc.low %vm15987_vm11, %vm5189_vm9 }
 0x332   :  { %9411 = vmatmul.mubr.msk.bf16.gmra.mrb[120].mxu0 %vm8026_vm15, %v17382_v61  ;;  %vm2762_vm10 = vmand %vm17386_vm8, %vm17384_vm6  ;;  %v17390_v61 = vld [vmem:[#allocation160_spill] sm:$0xff]  ;;  %vm1090_vm8 = vcmp.le.s32.totalorder %v17366_v34, 14  ;;  %vm17395_vm6 = vnez %v17394_v32  ;;  %v17400_v32 = vld [vmem:[#allocation173_spill] sm:$0xff] }
 0x333   :  { %9414 = vmatprep.mubr.msk.bf16.mxu0 %vm8029_vm4, %v17383_v30  ;;  %vm8343_vm0 = vmpackc.low %vm15989_vm2, %vm5191_vm3  ;;  %v17391_v30 = vld [vmem:[#allocation217_spill] sm:$0xff]  ;;  %vm17393_vm4 = vmmov 1   ;;  %v17743_v34 = vld [vmem:[#allocation3_spill] sm:$0xff] }
 0x334   :  { %vm8032_vm15 = vmpackc.low %vm2762_vm10, %vm17389_vm12  ;;  %vm17392_vm9 = vnez %v17391_v30  ;;  %v17402_v30 = vld [vmem:[#allocation174_spill] sm:$0xff] }
 0x335   :  { %9727 = vmatmul.mubr.msk.bf16.gmra.mrb[4].mxu1 %vm8340_vm14, %v17387_v57  ;;  %vm8043_vm11 = vmpackc.low %vm17393_vm4, %vm17392_vm9  ;;  %vm15992_vm14 = vcmp.le.s32.totalorder %v17370_v40, 14  ;;  %v17396_v57 = vld [vmem:[#allocation155_spill] sm:$0xff]  ;;  %vm15994_vm9 = vcmp.le.s32.totalorder %v17388_v25, 14 }
 0x336   :  { %9730 = vmatprep.mubr.msk.bf16.mxu1 %vm8343_vm0, %v17390_v61  ;;  %vm5193_vm3 = vmand %vm15991_vm5, %vm17395_vm6  ;;  %vm17397_vm2 = vnez %v17396_v57  ;;  %v17399_v61 = vld [vmem:[#allocation7_spill] sm:$0xff]  ;;  %vm17401_vm6 = vnez %v17164_v60  ;;  %v17404_v57 = vld [vmem:[#allocation157_spill] sm:$0xff] }
 0x337   :  { %vm5195_vm10 = vmand %vm1091_vm1, %vm17397_vm2  ;;  %vm17403_vm2 = vnez %v17168_v45  ;;  %v17407_v60 = vld [vmem:[#allocation54_spill] sm:$0xff]  ;;  %v17411_v45 = vld [vmem:[#allocation5_spill] sm:$0xff] }
 0x338   :  { %vm8346_vm0 = vmpackc.low %vm1090_vm8, %vm5193_vm3  ;;  %vm17405_vm3 = vnez %v17404_v57  ;;  %v17421_v57 = vld [vmem:[#allocation70_spill] sm:$0xff] }
 0x339   :  { %vm8349_vm12 = vmpackc.low %vm15992_vm14, %vm5195_vm10 }
 0x33a   :  { %9415 = vmatmul.mubr.msk.bf16.gmra.mrb[124].mxu0 %vm8032_vm15, %v17398_v53  ;;  %vm8046_vm5 = vmpackc.low %vm17393_vm4, %vm17401_vm6  ;;  %vm15993_vm15 = vcmp.le.s32.totalorder %v17385_v13, 14  ;;  %v17406_v53 = vld [vmem:[#allocation177_spill] sm:$0xff] }
 0x33b   :  { %9434 = vmatprep.mubr.msk.bf16.mxu0 %vm8043_vm11, %v17399_v61  ;;  %vm8049_vm11 = vmpackc.low %vm17393_vm4, %vm17403_vm2  ;;  %vm17412_vm2 = vnez %v17181_v47  ;;  %v17423_v47 = vld [vmem:[#allocation12_spill] sm:$0xff] }
 0x33c   :  { %vm5197_vm10 = vmand %vm15994_vm9, %vm17405_vm3 }
 0x33d   :  { %9731 = vmatmul.mubr.msk.bf16.gmra.mrb[8].mxu1 %vm8346_vm0, %v17400_v32  ;;  %vm8352_vm0 = vmpackc.low %vm15993_vm15, %vm5197_vm10  ;;  %v17409_v32 = vld [vmem:[#allocation55_spill] sm:$0xff] }
 0x33e   :  { %9734 = vmatprep.mubr.msk.bf16.mxu1 %vm8349_vm12, %v17402_v30  ;;  %vm17408_vm12 = vcmp.le.s32.totalorder %v17407_v60, 14  ;;  %vm17410_vm6 = vcmp.le.s32.totalorder %v17409_v32, 14  ;;  %vm8052_vm3 = vmpackc.low %vm17393_vm4, %vm17412_vm2  ;;  %v17417_v30 = vld [vmem:[#allocation64_spill] sm:$0xff]  ;;  %vm17425_vm2 = vnez %v17198_v44  ;;  %v17430_v44 = vld [vmem:[#allocation74_spill] sm:$0xff] }
 0x33f   :  { %vm8363_vm14 = vmpackc.low %vm17410_vm6, %vm17408_vm12  ;;  %vm17418_vm12 = vcmp.le.s32.totalorder %v17417_v30, 14 }
 0x342   :  { %9435 = vmatmul.mubr.msk.bf16.vlgmr.msra.gmra.mrb[64].mxu0 %vm8046_vm5, %v17406_v53  ;;  %vm17413_vm5 = vnez %v17185_v63  ;;  %v17414_v53 = vld [vmem:[#allocation9_spill] sm:$0xff]  ;;  %v10630_v63 = vld [vmem:[%s15191_s3 + $0x208] sm:$0xff]  }
 0x343   :  { %9438 = vmatprep.mubr.msk.bf16.mxu0 %vm8049_vm11, %v17177_v9  ;;  %vm8055_vm11 = vmpackc.low %vm17393_vm4, %vm17413_vm5  ;;  %v17415_v9 = vld [vmem:[#allocation56_spill] sm:$0xff]  ;;  %vm17426_vm5 = vnez %v17203_v56  ;;  %v17434_v56 = vld [vmem:[#allocation82_spill] sm:$0xff] }
 0x344   :  { %vm17416_vm10 = vcmp.le.s32.totalorder %v17415_v9, 14 }
 0x345   :  { %9735 = vmatmul.mubr.msk.bf16.gmra.mrb[12].mxu1 %vm8352_vm0, %v17399_v61  ;;  %vm8366_vm6 = vmpackc.low %vm17418_vm12, %vm17416_vm10  ;;  %v17419_v61 = vld [vmem:[#allocation66_spill] sm:$0xff]  ;;  %vm17431_vm10 = vcmp.le.s32.totalorder %v17430_v44, 14 }
 0x346   :  { %9754 = vmatprep.mubr.msk.bf16.mxu1 %vm8363_vm14, %v17411_v45  ;;  %vm17420_vm0 = vcmp.le.s32.totalorder %v17419_v61, 14  ;;  %vm17422_vm14 = vcmp.le.s32.totalorder %v17421_v57, 14  ;;  %v17424_v45 = vld [vmem:[#allocation11_spill] sm:$0xff] }
 0x347   :  { %vm8369_vm15 = vmpackc.low %vm17422_vm14, %vm17420_vm0  ;;  %vm17435_vm0 = vcmp.le.s32.totalorder %v17434_v56, 14  ;;  %v17436_v61 = vld [vmem:[#allocation19_spill] sm:$0xff] }
 0x34a   :  { %9439 = vmatmul.mubr.msk.bf16.gmra.mrb[68].mxu0 %vm8052_vm3, %v17414_v53  ;;  %vm8058_vm3 = vmpackc.low %vm17393_vm4, %vm17425_vm2  ;;  %v17427_v53 = vld [vmem:[#allocation76_spill] sm:$0xff]  ;;  %vm17438_vm2 = vnez %v17213_v7  ;;  %v10634_v7 = vld [vmem:[%s15191_s3 + $0x228] sm:$0xff]  }
 0x34b   :  { %9442 = vmatprep.mubr.msk.bf16.mxu0 %vm8055_vm11, %v17194_v11  ;;  %vm8061_vm11 = vmpackc.low %vm17393_vm4, %vm17426_vm5  ;;  %v10631_v11 = vld [vmem:[%s15191_s3 + $0x210] sm:$0xff]   ;;  %vm17439_vm5 = vnez %v17217_v52  ;;  %v17443_v52 = vld [vmem:[#allocation98_spill] sm:$0xff] }
 0x34d   :  { %9755 = vmatmul.mubr.msk.bf16.vlgmr.msra.gmra.mrb[16].mxu1 %vm8366_vm6, %v17423_v47  ;;  %v17428_v47 = vld [vmem:[#allocation72_spill] sm:$0xff] }
 0x34e   :  { %9758 = vmatprep.mubr.msk.bf16.mxu1 %vm8369_vm15, %v17424_v45  ;;  %9819 = vmatpush3.bf16.msra.mxu1 %v13940_v33  ;;  %vm17429_vm15 = vcmp.le.s32.totalorder %v17428_v47, 14  ;;  %v17432_v33 = vld [vmem:[#allocation81_spill] sm:$0xff] }
 0x34f   :  { %9820 = vmatprep.subr.bf16.mxu1 %v10630_v63  ;;  %vm8372_vm12 = vmpackc.low %vm17431_vm10, %vm17429_vm15  ;;  %vm17433_vm6 = vcmp.le.s32.totalorder %v17432_v33, 14  ;;  %v10632_v45 = vld [vmem:[%s15191_s3 + $0x218] sm:$0xff]   ;;  %vm17440_vm15 = vcmp.le.s32.totalorder %v17178_v23, 14  ;;  %vm17441_vm10 = vcmp.le.s32.totalorder %v17172_v19, 14 }
 0x350   :  { %vm8375_vm14 = vmpackc.low %vm17435_vm0, %vm17433_vm6  ;;  %vm17442_vm6 = vcmp.le.s32.totalorder %v17183_v14, 14  ;;  %vm17444_vm0 = vcmp.le.s32.totalorder %v17443_v52, 14 }
 0x352   :  { %9443 = vmatmul.mubr.msk.bf16.gmra.mrb[72].mxu0 %vm8058_vm3, %v17427_v53  ;;  %9821 = vmatpush3.bf16.msra.mxu1 %v10630_v63  ;;  %v17437_v53 = vld [vmem:[#allocation18_spill] sm:$0xff]  ;;  %vm8064_vm3 = vmpackc.low %vm17393_vm4, %vm17438_vm2  ;;  %vm17447_vm2 = vnez %v17226_v5  ;;  %v17453_v5 = vld [vmem:[#allocation31_spill] sm:$0xff] }
 0x353   :  { %9446 = vmatprep.mubr.msk.bf16.mxu0 %vm8061_vm11, %v17209_v59  ;;  %9822 = vmatprep.subr.bf16.mxu1 %v10631_v11  ;;  %vm8067_vm11 = vmpackc.low %vm17393_vm4, %vm17439_vm5  ;;  %v10633_v59 = vld [vmem:[%s15191_s3 + $0x220] sm:$0xff]   ;;  %vm17448_vm5 = vnez %v17230_v39  ;;  %v10636_v39 = vld [vmem:[%s15191_s3 + $0x238] sm:$0xff]  }
 0x354   :  { %v17460_v63 = vld [vmem:[#allocation121_spill] sm:$0xff] }
 0x355   :  { %9759 = vmatmul.mubr.msk.bf16.gmra.mrb[20].mxu1 %vm8372_vm12, %v17436_v61  ;;  %vm8378_vm12 = vmpackc.low %vm17441_vm10, %vm17440_vm15  ;;  %v17445_v61 = vld [vmem:[#allocation25_spill] sm:$0xff]  ;;  %vm17449_vm15 = vcmp.le.s32.totalorder %v17195_v12, 14  ;;  %vm17450_vm10 = vcmp.le.s32.totalorder %v17189_v62, 14 }
 0x356   :  { %9762 = vmatprep.mubr.msk.bf16.mxu1 %vm8375_vm14, %v17437_v53  ;;  %9823 = vmatpush3.bf16.msra.mxu1 %v10631_v11  ;;  %vm8381_vm14 = vmpackc.low %vm17444_vm0, %vm17442_vm6  ;;  %vm17451_vm6 = vcmp.le.s32.totalorder %v17201_v31, 14  ;;  %vm17452_vm0 = vcmp.le.s32.totalorder %v17192_v27, 14  ;;  %v17464_v11 = vld [vmem:[#allocation33_spill] sm:$0xff]  ;;  %v17474_v53 = vld [vmem:[#allocation152_spill] sm:$0xff] }
 0x357   :  { %9824 = vmatprep.subr.bf16.mxu1 %v10632_v45 }
 0x35a   :  { %9447 = vmatmul.mubr.msk.bf16.gmra.mrb[76].mxu0 %vm8064_vm3, %v17212_v48  ;;  %9825 = vmatpush3.bf16.msra.mxu1 %v10632_v45  ;;  %v17446_v48 = vld [vmem:[#allocation24_spill] sm:$0xff]  ;;  %vm8070_vm3 = vmpackc.low %vm17393_vm4, %vm17447_vm2  ;;  %vm17455_vm2 = vnez %v17243_v8  ;;  %v17472_v45 = vld [vmem:[#allocation151_spill] sm:$0xff] }
 0x35b   :  { %9450 = vmatprep.mubr.msk.bf16.mxu0 %vm8067_vm11, %v12156_v43  ;;  %9826 = vmatprep.subr.bf16.mxu1 %v10633_v59  ;;  %vm8073_vm11 = vmpackc.low %vm17393_vm4, %vm17448_vm5  ;;  %v10635_v43 = vld [vmem:[%s15191_s3 + $0x230] sm:$0xff]   ;;  %vm17456_vm5 = vnez %v17247_v22 }
 0x35c   :  { %v17462_v8 = vld [vmem:[#allocation128_spill] sm:$0xff] }
 0x35d   :  { %9763 = vmatmul.mubr.msk.bf16.gmra.mrb[24].mxu1 %vm8378_vm12, %v17445_v61  ;;  %vm8384_vm12 = vmpackc.low %vm17450_vm10, %vm17449_vm15  ;;  %vm17459_vm10 = vcmp.le.s32.totalorder %v16331_v35, 14  ;;  %v17465_v22 = vld [vmem:[#allocation32_spill] sm:$0xff]  ;;  %v17513_v61 = vld [vmem:[#allocation137_spill] sm:$0xff] }
 0x35e   :  { %9766 = vmatprep.mubr.msk.bf16.mxu1 %vm8381_vm14, %v17446_v48  ;;  %9827 = vmatpush3.bf16.msra.mxu1 %v10633_v59  ;;  %vm8387_vm14 = vmpackc.low %vm17452_vm0, %vm17451_vm6  ;;  %vm17461_vm6 = vcmp.le.s32.totalorder %v17460_v63, 14  ;;  %vm17463_vm0 = vcmp.le.s32.totalorder %v17462_v8, 14  ;;  %v17477_v59 = vld [vmem:[#allocation34_spill] sm:$0xff]  ;;  %v17514_v48 = vld [vmem:[#allocation20_spill] sm:$0xff] }
 0x35f   :  { %9828 = vmatprep.subr.bf16.mxu1 %v10634_v7 }
 0x362   :  { %9451 = vmatmul.mubr.msk.bf16.gmra.mrb[80].mxu0 %vm8070_vm3, %v17225_v0  ;;  %9829 = vmatpush3.bf16.msra.mxu1 %v10634_v7  ;;  %v17454_v0 = vld [vmem:[#allocation30_spill] sm:$0xff]  ;;  %vm8076_vm3 = vmpackc.low %vm17393_vm4, %vm17455_vm2  ;;  %vm17466_vm2 = vnez %v17259_v20  ;;  %v17476_v20 = vld [vmem:[#allocation35_spill] sm:$0xff] }
 0x363   :  { %9454 = vmatprep.mubr.msk.bf16.mxu0 %vm8073_vm11, %v17239_v58  ;;  %9830 = vmatprep.subr.bf16.mxu1 %v10635_v43  ;;  %vm8079_vm11 = vmpackc.low %vm17393_vm4, %vm17456_vm5  ;;  %v17457_v58 = vld [vmem:[#allocation115_spill] sm:$0xff]  ;;  %vm17467_vm5 = vnez %v17263_v3  ;;  %v17481_v3 = vld [vmem:[#allocation41_spill] sm:$0xff] }
 0x364   :  { %vm17458_vm15 = vcmp.le.s32.totalorder %v17457_v58, 14  ;;  %v17507_v7 = vld [vmem:[#allocation80_spill] sm:$0xff] }
 0x365   :  { %9767 = vmatmul.mubr.msk.bf16.gmra.mrb[28].mxu1 %vm8384_vm12, %v17453_v5  ;;  %vm8390_vm12 = vmpackc.low %vm17459_vm10, %vm17458_vm15  ;;  %v17520_v5 = vld [vmem:[#allocation187_spill] sm:$0xff] }
 0x366   :  { %9770 = vmatprep.mubr.msk.bf16.mxu1 %vm8387_vm14, %v17454_v0  ;;  %9831 = vmatpush3.bf16.msra.mxu1 %v10635_v43  ;;  %vm8393_vm14 = vmpackc.low %vm17463_vm0, %vm17461_vm6  ;;  %vm17475_vm0 = vcmp.le.s32.totalorder %v17474_v53, 14  ;;  %v17516_v43 = vld [vmem:[#allocation29_spill] sm:$0xff] }
 0x367   :  { %9832 = vmatprep.subr.bf16.mxu1 %v10636_v39  ;;  %v17522_v0 = vld [vmem:[#allocation97_spill] sm:$0xff] }
 0x36a   :  { %9455 = vmatmul.mubr.msk.bf16.gmra.mrb[84].mxu0 %vm8076_vm3, %v17242_v42  ;;  %9833 = vmatpush3.bf16.msra.mxu1 %v10636_v39  ;;  %vm8082_vm3 = vmpackc.low %vm17393_vm4, %vm17466_vm2  ;;  %v17468_v42 = vld [vmem:[#allocation136_spill] sm:$0xff] }
 0x36b   :  { %9458 = vmatprep.mubr.msk.bf16.mxu0 %vm8079_vm11, %v17255_v37  ;;  %vm8085_vm11 = vmpackc.low %vm17393_vm4, %vm17467_vm5  ;;  %vm17469_vm15 = vcmp.le.s32.totalorder %v17468_v42, 14  ;;  %v17470_v37 = vld [vmem:[#allocation138_spill] sm:$0xff]  ;;  %v17518_v39 = vld [vmem:[#allocation184_spill] sm:$0xff] }
 0x36c   :  { %vm17471_vm10 = vcmp.le.s32.totalorder %v17470_v37, 14  ;;  %vm8088_vm2 = vmpackc.low %vm17393_vm4, %vm17274_vm7  ;;  %vm17487_vm7 = vnez %v17285_v6  ;;  %v17495_v6 = vld [vmem:[#allocation65_spill] sm:$0xff] }
 0x36d   :  { %9771 = vmatmul.mubr.msk.bf16.gmra.mrb[32].mxu1 %vm8390_vm12, %v17464_v11  ;;  %vm8396_vm6 = vmpackc.low %vm17471_vm10, %vm17469_vm15  ;;  %vm17473_vm12 = vcmp.le.s32.totalorder %v17472_v45, 14  ;;  %vm17480_vm15 = vcmp.le.s32.totalorder %v17234_v49, 14  ;;  %v17523_v11 = vld [vmem:[#allocation95_spill] sm:$0xff] }
 0x36e   :  { %9774 = vmatprep.mubr.msk.bf16.mxu1 %vm8393_vm14, %v17465_v22  ;;  %vm8399_vm14 = vmpackc.low %vm17475_vm0, %vm17473_vm12  ;;  %v17524_v22 = vld [vmem:[#allocation220_spill] sm:$0xff] }
 0x372   :  { %9459 = vmatmul.mubr.msk.bf16.gmra.mrb[88].mxu0 %vm8082_vm3, %v17258_v10  ;;  %vm17478_vm3 = vnez %v17277_v24  ;;  %v17486_v10 = vld [vmem:[#allocation49_spill] sm:$0xff]  ;;  %v17492_v24 = vld [vmem:[#allocation62_spill] sm:$0xff] }
 0x373   :  { %9462 = vmatprep.mubr.msk.bf16.mxu0 %vm8085_vm11, %v17269_v36  ;;  %vm8091_vm5 = vmpackc.low %vm17393_vm4, %vm17478_vm3  ;;  %vm17479_vm11 = vcmp.le.s32.totalorder %v17240_v51, 14  ;;  %v17483_v36 = vld [vmem:[#allocation45_spill] sm:$0xff] }
 0x374   :  { %vm8402_vm10 = vmpackc.low %vm17480_vm15, %vm17479_vm11  ;;  %vm17484_vm12 = vcmp.le.s32.totalorder %v17483_v36, 14  ;;  %vm17490_vm11 = vcmp.le.s32.totalorder %v17250_v50, 14 }
 0x375   :  { %9775 = vmatmul.mubr.msk.bf16.gmra.mrb[36].mxu1 %vm8396_vm6, %v17476_v20  ;;  %vm17482_vm6 = vcmp.le.s32.totalorder %v17481_v3, 14  ;;  %v17526_v20 = vld [vmem:[#allocation145_spill] sm:$0xff] }
 0x376   :  { %9778 = vmatprep.mubr.msk.bf16.mxu1 %vm8399_vm14, %v17477_v59  ;;  %vm8405_vm0 = vmpackc.low %vm17484_vm12, %vm17482_vm6  ;;  %vm17493_vm6 = vcmp.le.s32.totalorder %v17492_v24, 14  ;;  %v17527_v59 = vld [vmem:[#allocation195_spill] sm:$0xff] }
 0x377   :  { %vm8094_vm14 = vmpackc.low %vm17393_vm4, %vm17487_vm7 }
 0x37a   :  { %9463 = vmatmul.mubr.msk.bf16.gmra.mrb[92].mxu0 %vm8088_vm2, %v17272_v1  ;;  %vm17488_vm2 = vnez %v17289_v17  ;;  %v17500_v17 = vld [vmem:[#allocation8_spill] sm:$0xff]  ;;  %v17502_v1 = vld [vmem:[#allocation77_spill] sm:$0xff] }
 0x37b   :  { %9466 = vmatprep.mubr.msk.bf16.mxu0 %vm8091_vm5, %v17282_v4  ;;  %vm8097_vm3 = vmpackc.low %vm17393_vm4, %vm17488_vm2  ;;  %vm17489_vm5 = vcmp.le.s32.totalorder %v17256_v21, 14  ;;  %v17494_v4 = vld [vmem:[#allocation69_spill] sm:$0xff] }
 0x37c   :  { %vm8408_vm15 = vmpackc.low %vm17490_vm11, %vm17489_vm5  ;;  %vm17501_vm5 = vcmp.le.s32.totalorder %v17500_v17, 14 }
 0x37d   :  { %9779 = vmatmul.mubr.msk.bf16.gmra.mrb[40].mxu1 %vm8402_vm10, %v17485_v46  ;;  %vm17491_vm10 = vcmp.le.s32.totalorder %v17261_v55, 14  ;;  %v17529_v46 = vld [vmem:[#allocation196_spill] sm:$0xff] }
 0x37e   :  { %9782 = vmatprep.mubr.msk.bf16.mxu1 %vm8405_vm0, %v17486_v10  ;;  %vm8411_vm12 = vmpackc.low %vm17493_vm6, %vm17491_vm10  ;;  %vm17496_vm0 = vnez %v17298_v28  ;;  %v17506_v28 = vld [vmem:[#allocation83_spill] sm:$0xff]  ;;  %v17531_v10 = vld [vmem:[#allocation197_spill] sm:$0xff] }
 0x37f   :  { %vm8100_vm7 = vmpackc.low %vm17393_vm4, %vm17496_vm0 }
 0x382   :  { %9467 = vmatmul.mubr.msk.bf16.gmra.mrb[96].mxu0 %vm8094_vm14, %v17284_v54  ;;  %vm17497_vm14 = vnez %v17301_v18  ;;  %v17504_v54 = vld [vmem:[#allocation17_spill] sm:$0xff]  ;;  %v17508_v18 = vld [vmem:[#allocation218_spill] sm:$0xff] }
 0x383   :  { %9470 = vmatprep.mubr.msk.bf16.mxu0 %vm8097_vm3, %v17295_v29  ;;  %vm8103_vm2 = vmpackc.low %vm17393_vm4, %vm17497_vm14  ;;  %v17498_v29 = vld [vmem:[#allocation63_spill] sm:$0xff]  ;;  %vm17505_vm10 = vcmp.le.s32.totalorder %v17504_v54, 14 }
 0x384   :  { %vm17499_vm3 = vcmp.le.s32.totalorder %v17498_v29, 14 }
 0x385   :  { %9783 = vmatmul.mubr.msk.bf16.gmra.mrb[44].mxu1 %vm8408_vm15, %v17494_v4  ;;  %vm8414_vm11 = vmpackc.low %vm17501_vm5, %vm17499_vm3  ;;  %vm17503_vm15 = vcmp.le.s32.totalorder %v17502_v1, 14  ;;  %vm17517_vm3 = vcmp.le.s32.totalorder %v17516_v43, 14  ;;  %v17533_v4 = vld [vmem:[#allocation198_spill] sm:$0xff] }
 0x386   :  { %9786 = vmatprep.mubr.msk.bf16.mxu1 %vm8411_vm12, %v17495_v6  ;;  %vm8417_vm6 = vmpackc.low %vm17505_vm10, %vm17503_vm15  ;;  %vm17509_vm12 = vnez %v17508_v18  ;;  %vm17521_vm15 = vcmp.le.s32.totalorder %v17520_v5, 14  ;;  %v17535_v6 = vld [vmem:[#allocation112_spill] sm:$0xff] }
 0x387   :  { %vm8106_vm0 = vmpackc.low %vm17393_vm4, %vm17509_vm12  ;;  %v17539_v18 = vld [vmem:[#allocation200_spill] sm:$0xff] }
 0x38a   :  { %9471 = vmatmul.mubr.msk.bf16.gmra.mrb[100].mxu0 %vm8100_vm7, %v17297_v15  ;;  %v17510_v15 = vld [vmem:[#allocation219_spill] sm:$0xff] }
 0x38b   :  { %9474 = vmatprep.mubr.msk.bf16.mxu0 %vm8103_vm2, %v17312_v16  ;;  %vm17511_vm7 = vnez %v17510_v15  ;;  %v17512_v16 = vld [vmem:[#allocation131_spill] sm:$0xff]  ;;  %vm17515_vm2 = vcmp.le.s32.totalorder %v17514_v48, 14  ;;  %v17541_v15 = vld [vmem:[#allocation202_spill] sm:$0xff] }
 0x38c   :  { %vm8109_vm14 = vmpackc.low %vm17393_vm4, %vm17511_vm7  ;;  %vm17530_vm7 = vcmp.le.s32.totalorder %v17529_v46, 14 }
 0x38d   :  { %9787 = vmatmul.mubr.msk.bf16.gmra.mrb[48].mxu1 %vm8414_vm11, %v17506_v28  ;;  %vm8420_vm5 = vmpackc.low %vm17517_vm3, %vm17515_vm2  ;;  %vm17519_vm11 = vcmp.le.s32.totalorder %v17518_v39, 14  ;;  %vm17532_vm2 = vcmp.le.s32.totalorder %v17531_v10, 14  ;;  %vm17534_vm3 = vcmp.le.s32.totalorder %v17533_v4, 14  ;;  %v17536_v28 = vld [vmem:[#allocation108_spill] sm:$0xff] }
 0x38e   :  { %9790 = vmatprep.mubr.msk.bf16.mxu1 %vm8417_vm6, %v17507_v7  ;;  %vm8423_vm10 = vmpackc.low %vm17521_vm15, %vm17519_vm11  ;;  %vm17525_vm6 = vnez %v17524_v22  ;;  %v17537_v7 = vld [vmem:[#allocation36_spill] sm:$0xff]  ;;  %v17549_v22 = vld [vmem:[#allocation39_spill] sm:$0xff] }
 0x38f   :  { %vm8112_vm12 = vmpackc.low %vm17393_vm4, %vm17525_vm6  ;;  %vm17540_vm4 = vcmp.le.s32.totalorder %v17539_v18, 14 }
 0x390   :  { %vm8429_vm11 = vmpackc.low %vm17534_vm3, %vm17532_vm2 }
 0x392   :  { %9475 = vmatmul.mubr.msk.bf16.gmra.mrb[104].mxu0 %vm8106_vm0, %v17512_v16  ;;  %vm17528_vm0 = vcmp.le.s32.totalorder %v17527_v59, 14  ;;  %v17543_v16 = vld [vmem:[#allocation203_spill] sm:$0xff] }
 0x393   :  { %9478 = vmatprep.mubr.msk.bf16.mxu0 %vm8109_vm14, %v17513_v61  ;;  %vm8426_vm14 = vmpackc.low %vm17530_vm7, %vm17528_vm0  ;;  %vm17544_vm6 = vcmp.le.s32.totalorder %v17543_v16, 14  ;;  %v17545_v61 = vld [vmem:[#allocation129_spill] sm:$0xff]  ;;  %vm17550_vm7 = vcmp.le.s32.totalorder %v17549_v22, 14 }
 0x395   :  { %9791 = vmatmul.mubr.msk.bf16.gmra.mrb[52].mxu1 %vm8420_vm5, %v17522_v0  ;;  %vm17538_vm5 = vcmp.le.s32.totalorder %v17537_v7, 14  ;;  %v17546_v0 = vld [vmem:[#allocation126_spill] sm:$0xff] }
 0x396   :  { %9794 = vmatprep.mubr.msk.bf16.mxu1 %vm8423_vm10, %v17523_v11  ;;  %vm8432_vm15 = vmpackc.low %vm17540_vm4, %vm17538_vm5  ;;  %vm17542_vm10 = vcmp.le.s32.totalorder %v17541_v15, 14  ;;  %v17547_v11 = vld [vmem:[#allocation37_spill] sm:$0xff]  ;;  %v17556_v15 = vld [vmem:[#allocation139_spill] sm:$0xff]  ;;  %vm17557_vm5 = vcmp.le.s32.totalorder %v17353_v41, 14  ;;  %vm17558_vm4 = vcmp.le.s32.totalorder %v17346_v26, 14 }
 0x397   :  { %vm17548_vm0 = vcmp.le.s32.totalorder %v17547_v11, 14  ;;  %v17563_v11 = vld [vmem:[#allocation156_spill] sm:$0xff] }
 0x39a   :  { %9479 = vmatmul.mubr.msk.bf16.gmra.mrb[108].mxu0 %vm8112_vm12, %v17526_v20  ;;  %vm8435_vm12 = vmpackc.low %vm17544_vm6, %vm17542_vm10  ;;  %v17551_v20 = vld [vmem:[#allocation206_spill] sm:$0xff] }
 0x39b   :  { %vm17552_vm2 = vcmp.le.s32.totalorder %v17551_v20, 14  ;;  %v17564_v20 = vld [vmem:[#allocation154_spill] sm:$0xff] }
 0x39d   :  { %9795 = vmatmul.mubr.msk.bf16.gmra.mrb[56].mxu1 %vm8426_vm14, %v17535_v6  ;;  %vm8438_vm14 = vmpackc.low %vm17550_vm7, %vm17548_vm0  ;;  %v17553_v6 = vld [vmem:[#allocation207_spill] sm:$0xff]  ;;  %vm17565_vm0 = vcmp.le.s32.totalorder %v17373_v2, 14 }
 0x39e   :  { %9798 = vmatprep.mubr.msk.bf16.mxu1 %vm8429_vm11, %v17536_v28  ;;  %vm17554_vm3 = vcmp.le.s32.totalorder %v17553_v6, 14  ;;  %v17555_v28 = vld [vmem:[#allocation141_spill] sm:$0xff]  ;;  %vm8450_vm7 = vmpackc.low %vm1090_vm8, %vm17565_vm0  ;;  %vm17578_vm0 = vcmp.le.s32.totalorder %v17417_v30, 14  ;;  %v17590_v30 = vld [vmem:[#allocation68_spill] sm:$0xff] }
 0x39f   :  { %vm8441_vm11 = vmpackc.low %vm17554_vm3, %vm17552_vm2 }
 0x3a5   :  { %9799 = vmatmul.mubr.msk.bf16.gmra.mrb[60].mxu1 %vm8432_vm15, %v17545_v61  ;;  %vm8444_vm15 = vmpackc.low %vm17558_vm4, %vm17557_vm5  ;;  %v17559_v61 = vld [vmem:[#allocation210_spill] sm:$0xff]  ;;  %vm17572_vm4 = vcmp.le.s32.totalorder %v17385_v13, 14 }
 0x3a6   :  { %9802 = vmatprep.mubr.msk.bf16.mxu1 %vm8435_vm12, %v17546_v0  ;;  %vm17560_vm10 = vcmp.le.s32.totalorder %v17559_v61, 14  ;;  %v17561_v0 = vld [vmem:[#allocation211_spill] sm:$0xff]  ;;  %v17569_v61 = vld [vmem:[#allocation38_spill] sm:$0xff] }
 0x3a7   :  { %vm17562_vm6 = vcmp.le.s32.totalorder %v17561_v0, 14  ;;  %vm17570_vm3 = vnez %v17569_v61  ;;  %v17579_v61 = vld [vmem:[#allocation52_spill] sm:$0xff] }
 0x3a8   :  { %vm8447_vm12 = vmpackc.low %vm17562_vm6, %vm17560_vm10  ;;  %vm17573_vm10 = vcmp.le.s32.totalorder %v17407_v60, 14  ;;  %v17585_v60 = vld [vmem:[#allocation180_spill] sm:$0xff] }
 0x3ad   :  { %9803 = vmatmul.mubr.msk.bf16.gmra.mrb[0].mxu1 %vm8438_vm14, %v17555_v28  ;;  %vm17566_vm14 = vcmp.le.s32.totalorder %v17370_v40, 14  ;;  %v17568_v28 = vld [vmem:[#allocation168_spill] sm:$0xff] }
 0x3ae   :  { %9806 = vmatprep.mubr.msk.bf16.mxu1 %vm8441_vm11, %v17556_v15  ;;  %vm8453_vm2 = vmpackc.low %vm17566_vm14, %vm1091_vm1  ;;  %v17567_v15 = vld [vmem:[#allocation170_spill] sm:$0xff]  ;;  %vm17571_vm11 = vcmp.le.s32.totalorder %v17409_v32, 14  ;;  %vm17580_vm14 = vnez %v17579_v61 }
 0x3af   :  { %vm6482_vm5 = vmand %vm17571_vm11, %vm17570_vm3  ;;  %vm17582_vm11 = vcmp.le.s32.totalorder %v17415_v9, 14  ;;  %v17583_v32 = vld [vmem:[#allocation66_spill] sm:$0xff] }
 0x3b0   :  { %vm8467_vm6 = vmpackc.low %vm6482_vm5, %vm17573_vm10  ;;  %vm17589_vm10 = vcmp.le.s32.totalorder %v17430_v44, 14  ;;  %v17595_v9 = vld [vmem:[#allocation14_spill] sm:$0xff]  ;;  %v17600_v44 = vld [vmem:[#allocation84_spill] sm:$0xff] }
 0x3b5   :  { %9807 = vmatmul.mubr.msk.bf16.gmra.mrb[4].mxu1 %vm8444_vm15, %v17563_v11  ;;  %vm8456_vm15 = vmpackc.low %vm17572_vm4, %vm15994_vm9  ;;  %v17574_v11 = vld [vmem:[#allocation6_spill] sm:$0xff]  ;;  %vm17584_vm9 = vcmp.le.s32.totalorder %v17583_v32, 14 }
 0x3b6   :  { %9810 = vmatprep.mubr.msk.bf16.mxu1 %vm8447_vm12, %v17564_v20  ;;  %v17575_v20 = vld [vmem:[#allocation13_spill] sm:$0xff] }
 0x3bd   :  { %9811 = vmatmul.mubr.msk.bf16.gmra.mrb[8].mxu1 %vm8450_vm7, %v17567_v15  ;;  %v17576_v15 = vld [vmem:[#allocation48_spill] sm:$0xff] }
 0x3be   :  { %9814 = vmatprep.mubr.msk.bf16.mxu1 %vm8453_vm2, %v17568_v28  ;;  %vm17577_vm12 = vnez %v17576_v15  ;;  %vm17581_vm2 = vcmp.le.s32.totalorder %v17421_v57, 14  ;;  %v17586_v28 = vld [vmem:[#allocation15_spill] sm:$0xff]  ;;  %v17596_v57 = vld [vmem:[#allocation21_spill] sm:$0xff] }
 0x3bf   :  { %vm6484_vm7 = vmand %vm17578_vm0, %vm17577_vm12  ;;  %vm17591_vm12 = vnez %v17590_v30  ;;  %vm17592_vm0 = vcmp.le.s32.totalorder %v17434_v56, 14  ;;  %v17607_v56 = vld [vmem:[#allocation88_spill] sm:$0xff] }
 0x3c0   :  { %vm6486_vm3 = vmand %vm17581_vm2, %vm17580_vm14  ;;  %vm17593_vm2 = vcmp.le.s32.totalorder %v17428_v47, 14  ;;  %v17605_v47 = vld [vmem:[#allocation181_spill] sm:$0xff] }
 0x3c1   :  { %vm8470_vm4 = vmpackc.low %vm6484_vm7, %vm17582_vm11  ;;  %vm17594_vm11 = vcmp.le.s32.totalorder %v17432_v33, 14  ;;  %v17606_v33 = vld [vmem:[#allocation27_spill] sm:$0xff] }
 0x3c2   :  { %vm8473_vm5 = vmpackc.low %vm6486_vm3, %vm17584_vm9 }
 0x3c3   :  { %vm6490_vm14 = vmand %vm17592_vm0, %vm17591_vm12  ;;  %vm17603_vm0 = vcmp.le.s32.totalorder %v17178_v23, 14  ;;  %v17615_v23 = vld [vmem:[#allocation26_spill] sm:$0xff] }
 0x3c4   :  { %vm8479_vm9 = vmpackc.low %vm6490_vm14, %vm17594_vm11  ;;  %vm17609_vm11 = vcmp.le.s32.totalorder %v17189_v62, 14  ;;  %v17620_v62 = vld [vmem:[#allocation111_spill] sm:$0xff] }
 0x3c5   :  { %9815 = vmatmul.mubr.msk.bf16.gmra.mrb[12].mxu1 %vm8456_vm15, %v17574_v11  ;;  %v17587_v11 = vld [vmem:[#allocation57_spill] sm:$0xff] }
 0x3c6   :  { %9834 = vmatprep.mubr.msk.bf16.mxu1 %vm8467_vm6, %v17575_v20  ;;  %vm17588_vm15 = vnez %v17587_v11  ;;  %v17597_v20 = vld [vmem:[#allocation73_spill] sm:$0xff] }
 0x3c7   :  { %vm6488_vm6 = vmand %vm17589_vm10, %vm17588_vm15  ;;  %vm17598_vm3 = vnez %v17597_v20  ;;  %vm17601_vm15 = vnez %v17600_v44  ;;  %vm17602_vm10 = vcmp.le.s32.totalorder %v17443_v52, 14  ;;  %v17617_v52 = vld [vmem:[#allocation101_spill] sm:$0xff] }
 0x3c8   :  { %vm8476_vm7 = vmpackc.low %vm6488_vm6, %vm17593_vm2  ;;  %vm17604_vm2 = vcmp.le.s32.totalorder %v17183_v14, 14  ;;  %v17616_v14 = vld [vmem:[#allocation182_spill] sm:$0xff] }
 0x3c9   :  { %vm6494_vm12 = vmand %vm17602_vm10, %vm17601_vm15  ;;  %vm17613_vm10 = vcmp.le.s32.totalorder %v17195_v12, 14  ;;  %v17627_v12 = vld [vmem:[#allocation122_spill] sm:$0xff] }
 0x3ca   :  { %vm8485_vm14 = vmpackc.low %vm6494_vm12, %vm17604_vm2  ;;  %vm17619_vm2 = vcmp.le.s32.totalorder %v16331_v35, 14  ;;  %v17630_v35 = vld [vmem:[#allocation125_spill] sm:$0xff] }
 0x3cd   :  { %9835 = vmatmul.mubr.msk.bf16.vlgmr.msra.gmra.mrb[16].mxu1 %vm8470_vm4, %v17585_v60  ;;  %vm17599_vm4 = vcmp.le.s32.totalorder %v17172_v19, 14  ;;  %v17610_v19 = vld [vmem:[#allocation94_spill] sm:$0xff] }
 0x3ce   :  { %9838 = vmatprep.mubr.msk.bf16.mxu1 %vm8473_vm5, %v17586_v28  ;;  %vm6492_vm5 = vmand %vm17599_vm4, %vm17598_vm3  ;;  %vm17611_vm3 = vnez %v17610_v19  ;;  %vm17612_vm4 = vcmp.le.s32.totalorder %v17192_v27, 14  ;;  %v17625_v27 = vld [vmem:[#allocation90_spill] sm:$0xff] }
 0x3cf   :  { %vm8482_vm6 = vmpackc.low %vm6492_vm5, %vm17603_vm0  ;;  %vm17614_vm0 = vcmp.le.s32.totalorder %v17201_v31, 14  ;;  %v17626_v31 = vld [vmem:[#allocation93_spill] sm:$0xff]  ;;  %v17651_v60 = vld [vmem:[#allocation106_spill] sm:$0xff] }
 0x3d0   :  { %vm6498_vm15 = vmand %vm17612_vm4, %vm17611_vm3  ;;  %vm17623_vm4 = vcmp.le.s32.totalorder %v17457_v58, 14 }
 0x3d1   :  { %vm8491_vm12 = vmpackc.low %vm6498_vm15, %vm17614_vm0  ;;  %vm17629_vm0 = vcmp.le.s32.totalorder %v17470_v37, 14  ;;  %v17639_v37 = vld [vmem:[#allocation189_spill] sm:$0xff] }
 0x3d5   :  { %9839 = vmatmul.mubr.msk.bf16.gmra.mrb[20].mxu1 %vm8476_vm7, %v17595_v9  ;;  %vm17608_vm7 = vnez %v17607_v56  ;;  %v17665_v9 = vld [vmem:[#allocation191_spill] sm:$0xff] }
 0x3d6   :  { %9842 = vmatprep.mubr.msk.bf16.mxu1 %vm8479_vm9, %v17596_v57  ;;  %vm6496_vm9 = vmand %vm17609_vm11, %vm17608_vm7  ;;  %vm17621_vm7 = vnez %v17620_v62  ;;  %vm17622_vm11 = vcmp.le.s32.totalorder %v17462_v8, 14  ;;  %v17637_v8 = vld [vmem:[#allocation186_spill] sm:$0xff] }
 0x3d7   :  { %vm8488_vm5 = vmpackc.low %vm6496_vm9, %vm17613_vm10  ;;  %vm17624_vm10 = vcmp.le.s32.totalorder %v17460_v63, 14 }
 0x3d8   :  { %vm6502_vm3 = vmand %vm17622_vm11, %vm17621_vm7  ;;  %vm17633_vm11 = vcmp.le.s32.totalorder %v17468_v42, 14  ;;  %v17644_v42 = vld [vmem:[#allocation165_spill] sm:$0xff] }
 0x3d9   :  { %vm8497_vm15 = vmpackc.low %vm6502_vm3, %vm17624_vm10  ;;  %vm17643_vm10 = vcmp.le.s32.totalorder %v17234_v49, 14  ;;  %v17653_v49 = vld [vmem:[#allocation107_spill] sm:$0xff] }
 0x3dd   :  { %9843 = vmatmul.mubr.msk.bf16.gmra.mrb[24].mxu1 %vm8482_vm6, %v17605_v47  ;;  %vm17618_vm6 = vnez %v17617_v52  ;;  %v17679_v47 = vld [vmem:[#allocation120_spill] sm:$0xff] }
 0x3de   :  { %9846 = vmatprep.mubr.msk.bf16.mxu1 %vm8485_vm14, %v17606_v33  ;;  %vm6500_vm14 = vmand %vm17619_vm2, %vm17618_vm6  ;;  %vm17631_vm6 = vnez %v17630_v35  ;;  %vm17632_vm2 = vcmp.le.s32.totalorder %v17474_v53, 14  ;;  %v17641_v53 = vld [vmem:[#allocation144_spill] sm:$0xff] }
 0x3df   :  { %vm8494_vm9 = vmpackc.low %vm6500_vm14, %vm17623_vm4  ;;  %vm17634_vm4 = vcmp.le.s32.totalorder %v17472_v45, 14 }
 0x3e0   :  { %vm6506_vm7 = vmand %vm17632_vm2, %vm17631_vm6  ;;  %vm17647_vm6 = vcmp.le.s32.totalorder %v17240_v51, 14  ;;  %v17658_v51 = vld [vmem:[#allocation172_spill] sm:$0xff] }
 0x3e1   :  { %vm8503_vm3 = vmpackc.low %vm6506_vm7, %vm17634_vm4  ;;  %vm17648_vm7 = vcmp.le.s32.totalorder %v17481_v3, 14  ;;  %vm17657_vm4 = vcmp.le.s32.totalorder %v17250_v50, 14  ;;  %v17667_v50 = vld [vmem:[#allocation118_spill] sm:$0xff] }
 0x3e5   :  { %9847 = vmatmul.mubr.msk.bf16.gmra.mrb[28].mxu1 %vm8488_vm5, %v17615_v23  ;;  %vm17628_vm5 = vnez %v17627_v12  ;;  %v17691_v23 = vld [vmem:[#allocation135_spill] sm:$0xff] }
 0x3e6   :  { %9850 = vmatprep.mubr.msk.bf16.mxu1 %vm8491_vm12, %v17616_v14  ;;  %vm6504_vm12 = vmand %vm17629_vm0, %vm17628_vm5  ;;  %vm17645_vm5 = vnez %v17644_v42  ;;  %vm17646_vm0 = vcmp.le.s32.totalorder %v17483_v36, 14  ;;  %v17655_v36 = vld [vmem:[#allocation169_spill] sm:$0xff] }
 0x3e7   :  { %vm8500_vm14 = vmpackc.low %vm6504_vm12, %vm17633_vm11 }
 0x3e8   :  { %vm6510_vm12 = vmand %vm17646_vm0, %vm17645_vm5  ;;  %vm17661_vm5 = vcmp.le.s32.totalorder %v17256_v21, 14  ;;  %v17672_v21 = vld [vmem:[#allocation4_spill] sm:$0xff] }
 0x3e9   :  { %vm8509_vm11 = vmpackc.low %vm6510_vm12, %vm17648_vm7  ;;  %vm17662_vm12 = vcmp.le.s32.totalorder %v17261_v55, 14  ;;  %vm17671_vm7 = vcmp.le.s32.totalorder %v17500_v17, 14  ;;  %v17681_v17 = vld [vmem:[#allocation134_spill] sm:$0xff] }
 0x3ed   :  { %9851 = vmatmul.mubr.msk.bf16.gmra.mrb[32].mxu1 %vm8494_vm9, %v17625_v27  ;;  %vm17642_vm9 = vnez %v17641_v53  ;;  %v17701_v27 = vld [vmem:[#allocation150_spill] sm:$0xff] }
 0x3ee   :  { %9854 = vmatprep.mubr.msk.bf16.mxu1 %vm8497_vm15, %v17626_v31  ;;  %vm6508_vm15 = vmand %vm17643_vm10, %vm17642_vm9  ;;  %vm17659_vm9 = vnez %v17658_v51  ;;  %vm17660_vm10 = vcmp.le.s32.totalorder %v17492_v24, 14  ;;  %v17669_v24 = vld [vmem:[#allocation42_spill] sm:$0xff] }
 0x3ef   :  { %vm8506_vm2 = vmpackc.low %vm6508_vm15, %vm17647_vm6 }
 0x3f0   :  { %vm6514_vm15 = vmand %vm17660_vm10, %vm17659_vm9  ;;  %vm17675_vm9 = vcmp.le.s32.totalorder %v17498_v29, 14  ;;  %v17686_v29 = vld [vmem:[#allocation23_spill] sm:$0xff] }
 0x3f1   :  { %vm8515_vm6 = vmpackc.low %vm6514_vm15, %vm17662_vm12  ;;  %vm17676_vm15 = vcmp.le.s32.totalorder %v17502_v1, 14  ;;  %vm17685_vm12 = vcmp.le.s32.totalorder %v17516_v43, 14  ;;  %v17692_v43 = vld [vmem:[#allocation148_spill] sm:$0xff] }
 0x3f5   :  { %v14632_v58 = vpop.f32.mrb[112].mxu0  ;;  %9855 = vmatmul.mubr.msk.bf16.gmra.mrb[36].mxu1 %vm8500_vm14, %v17637_v8  ;;  %vm17656_vm14 = vnez %v17655_v36 }
 0x3f6   :  { %17635 = vst [vmem:[#allocation40_spill] sm:$0xff] %v14632_v58  ;;  %v14634_v63 = vpop.f32.mrb[113].mxu0  ;;  %9858 = vmatprep.mubr.msk.bf16.mxu1 %vm8503_vm3, %v17639_v37  ;;  %vm6512_vm3 = vmand %vm17657_vm4, %vm17656_vm14  ;;  %vm17673_vm14 = vnez %v17672_v21  ;;  %vm17674_vm4 = vcmp.le.s32.totalorder %v17504_v54, 14  ;;  %v17683_v54 = vld [vmem:[#allocation178_spill] sm:$0xff]  ;;  %v17729_v21 = vld [vmem:[#allocation208_spill] sm:$0xff] }
 0x3f7   :  { %17636 = vst [vmem:[#allocation50_spill] sm:$0xff] %v14634_v63  ;;  %v14637_v15 = vpop.f32.mrb[114].mxu0  ;;  %vm8512_vm0 = vmpackc.low %vm6512_vm3, %vm17661_vm5  ;;  %v17712_v37 = vld [vmem:[#allocation158_spill] sm:$0xff] }
 0x3f8   :  { %17638 = vst [vmem:[#allocation87_spill] sm:$0xff] %v14637_v15  ;;  %v14640_v61 = vpop.f32.mrb[115].mxu0  ;;  %vm6518_vm3 = vmand %vm17674_vm4, %vm17673_vm14  ;;  %vm17689_vm14 = vcmp.le.s32.totalorder %v17514_v48, 14  ;;  %v17696_v48 = vld [vmem:[#allocation222_spill] sm:$0xff] }
 0x3f9   :  { %17640 = vst [vmem:[#allocation10_spill] sm:$0xff] %v14640_v61  ;;  %vm8521_vm5 = vmpackc.low %vm6518_vm3, %vm17676_vm15  ;;  %vm17690_vm3 = vcmp.le.s32.totalorder %v17518_v39, 14  ;;  %vm17695_vm15 = vcmp.le.s32.totalorder %v17529_v46, 14  ;;  %v17702_v46 = vld [vmem:[#allocation153_spill] sm:$0xff] }
 0x3fd   :  { %v14654_v45 = vpop.f32.mrb[116].mxu0  ;;  %9859 = vmatmul.mubr.msk.bf16.gmra.mrb[40].mxu1 %vm8506_vm2, %v17651_v60  ;;  %vm17670_vm2 = vnez %v17669_v24  ;;  %v17720_v60 = vld [vmem:[#allocation37_spill] sm:$0xff] }
 0x3fe   :  { %17649 = vst [vmem:[#allocation86_spill] sm:$0xff] %v14654_v45  ;;  %v14656_v32 = vpop.f32.mrb[117].mxu0  ;;  %9862 = vmatprep.mubr.msk.bf16.mxu1 %vm8509_vm11, %v17653_v49  ;;  %vm6516_vm11 = vmand %vm17671_vm7, %vm17670_vm2  ;;  %vm17687_vm2 = vnez %v17686_v29  ;;  %vm17688_vm7 = vcmp.le.s32.totalorder %v17520_v5, 14  ;;  %v17693_v5 = vld [vmem:[#allocation221_spill] sm:$0xff]  ;;  %v17722_v49 = vld [vmem:[#allocation206_spill] sm:$0xff] }
 0x3ff   :  { %17650 = vst [vmem:[#allocation53_spill] sm:$0xff] %v14656_v32  ;;  %v14659_v28 = vpop.f32.mrb[118].mxu0  ;;  %vm8518_vm10 = vmpackc.low %vm6516_vm11, %vm17675_vm9  ;;  %v17735_v29 = vld [vmem:[#allocation192_spill] sm:$0xff] }
 0x400   :  { %17652 = vst [vmem:[#allocation96_spill] sm:$0xff] %v14659_v28  ;;  %v14662_v11 = vpop.f32.mrb[119].mxu0  ;;  %vm6522_vm11 = vmand %vm17688_vm7, %vm17687_vm2  ;;  %vm17699_vm2 = vcmp.le.s32.totalorder %v17527_v59, 14  ;;  %v17706_v59 = vld [vmem:[#allocation223_spill] sm:$0xff] }
 0x401   :  { %17654 = vst [vmem:[#allocation67_spill] sm:$0xff] %v14662_v11  ;;  %vm8527_vm9 = vmpackc.low %vm6522_vm11, %vm17690_vm3  ;;  %vm17700_vm11 = vcmp.le.s32.totalorder %v17531_v10, 14  ;;  %vm17705_vm3 = vcmp.le.s32.totalorder %v17539_v18, 14  ;;  %v17710_v10 = vld [vmem:[#allocation202_spill] sm:$0xff]  ;;  %v17713_v18 = vld [vmem:[#allocation163_spill] sm:$0xff] }
 0x405   :  { %v14676_v3 = vpop.f32.mrb[120].mxu0  ;;  %9863 = vmatmul.mubr.msk.bf16.gmra.mrb[44].mxu1 %vm8512_vm0, %v17665_v9  ;;  %vm17684_vm0 = vnez %v17683_v54  ;;  %v17724_v9 = vld [vmem:[#allocation161_spill] sm:$0xff] }
 0x406   :  { %17663 = vst [vmem:[#allocation102_spill] sm:$0xff] %v14676_v3  ;;  %v14678_v30 = vpop.f32.mrb[121].mxu0  ;;  %9866 = vmatprep.mubr.msk.bf16.mxu1 %vm8515_vm6, %v17667_v50  ;;  %vm6520_vm6 = vmand %vm17685_vm12, %vm17684_vm0  ;;  %vm17697_vm0 = vnez %v17696_v48  ;;  %vm17698_vm12 = vcmp.le.s32.totalorder %v17533_v4, 14  ;;  %v17703_v4 = vld [vmem:[#allocation199_spill] sm:$0xff] }
 0x407   :  { %17664 = vst [vmem:[#allocation114_spill] sm:$0xff] %v14678_v30  ;;  %v14681_v57 = vpop.f32.mrb[122].mxu0  ;;  %vm8524_vm4 = vmpackc.low %vm6520_vm6, %vm17689_vm14 }
 0x408   :  { %17666 = vst [vmem:[#allocation16_spill] sm:$0xff] %v14681_v57  ;;  %v14684_v20 = vpop.f32.mrb[123].mxu0  ;;  %vm6526_vm6 = vmand %vm17698_vm12, %vm17697_vm0  ;;  %vm17709_vm0 = vcmp.le.s32.totalorder %v17537_v7, 14  ;;  %v17717_v7 = vld [vmem:[#allocation204_spill] sm:$0xff] }
 0x409   :  { %17668 = vst [vmem:[#allocation99_spill] sm:$0xff] %v14684_v20  ;;  %vm8533_vm14 = vmpackc.low %vm6526_vm6, %vm17700_vm11  ;;  %vm17711_vm6 = vcmp.le.s32.totalorder %v17710_v10, 14  ;;  %vm17716_vm11 = vcmp.le.s32.totalorder %v17549_v22, 14  ;;  %v17725_v22 = vld [vmem:[#allocation166_spill] sm:$0xff] }
 0x40d   :  { %v14698_v55 = vpop.f32.mrb[124].mxu0  ;;  %9867 = vmatmul.mubr.msk.bf16.gmra.mrb[48].mxu1 %vm8518_vm10, %v17679_v47  ;;  %vm17694_vm10 = vnez %v17693_v5  ;;  %v17733_v47 = vld [vmem:[#allocation210_spill] sm:$0xff] }
 0x40e   :  { %17677 = vst [vmem:[#allocation71_spill] sm:$0xff] %v14698_v55  ;;  %v14700_v44 = vpop.f32.mrb[125].mxu0  ;;  %9870 = vmatprep.mubr.msk.bf16.mxu1 %vm8521_vm5, %v17681_v17  ;;  %vm6524_vm5 = vmand %vm17695_vm15, %vm17694_vm10  ;;  %vm17707_vm10 = vnez %v17706_v59  ;;  %vm17708_vm15 = vcmp.le.s32.totalorder %v17543_v16, 14  ;;  %v17714_v16 = vld [vmem:[#allocation201_spill] sm:$0xff]  ;;  %v17748_v59 = vld [vmem:[#allocation179_spill] sm:$0xff] }
 0x40f   :  { %17678 = vst [vmem:[#allocation110_spill] sm:$0xff] %v14700_v44  ;;  %v14703_v33 = vpop.f32.mrb[126].mxu0  ;;  %vm8530_vm7 = vmpackc.low %vm6524_vm5, %vm17699_vm2  ;;  %v14905_v44 = vld [vmem:[%s15194_s4] ss:$0 sm:$0xff] }
 0x410   :  { %17680 = vst [vmem:[#allocation79_spill] sm:$0xff] %v14703_v33  ;;  %v14706_v56 = vpop.f32.mrb[127].mxu0  ;;  %vm6530_vm5 = vmand %vm17708_vm15, %vm17707_vm10  ;;  %vm17721_vm10 = vcmp.le.s32.totalorder %v17720_v60, 14 }
 0x411   :  { %17682 = vst [vmem:[#allocation116_spill] sm:$0xff] %v14706_v56  ;;  %vm8539_vm2 = vmpackc.low %vm6530_vm5, %vm17711_vm6  ;;  %vm17723_vm5 = vcmp.le.s32.totalorder %v17722_v49, 14  ;;  %vm17728_vm6 = vcmp.le.s32.totalorder %v17346_v26, 14  ;;  %v17736_v26 = vld [vmem:[#allocation193_spill] sm:$0xff]  ;;  %v14898_v56 = vld [vmem:[%s15193_s5] sm:$0xff] }
 0x412   :  { %17749 = vst [vmem:[#allocation22_spill] sm:$0xff] %v14898_v56 }
 0x415   :  { %v14720_v1 = vpop.f32.mrb[64].mxu0  ;;  %9871 = vmatmul.mubr.msk.bf16.gmra.mrb[52].mxu1 %vm8524_vm4, %v17691_v23  ;;  %vm17704_vm4 = vnez %v17703_v4 }
 0x416   :  { %v14722_v19 = vpop.f32.mrb[65].mxu0  ;;  %9874 = vmatprep.mubr.msk.bf16.mxu1 %vm8527_vm9, %v17692_v43  ;;  %vm6528_vm9 = vmand %vm17705_vm3, %vm17704_vm4  ;;  %vm17718_vm4 = vnez %v17717_v7  ;;  %vm17719_vm3 = vcmp.le.s32.totalorder %v17553_v6, 14  ;;  %v17726_v6 = vld [vmem:[#allocation205_spill] sm:$0xff] }
 0x417   :  { %v14725_v14 = vpop.f32.mrb[66].mxu0  ;;  %vm8536_vm12 = vmpackc.low %vm6528_vm9, %vm17709_vm0 }
 0x418   :  { %v14728_v52 = vpop.f32.mrb[67].mxu0  ;;  %vm6534_vm9 = vmand %vm17719_vm3, %vm17718_vm4  ;;  %vm17732_vm4 = vcmp.le.s32.totalorder %v17353_v41, 14 }
 0x419   :  { %vm8545_vm0 = vmpackc.low %vm6534_vm9, %vm17723_vm5  ;;  %vm17734_vm9 = vcmp.le.s32.totalorder %v17733_v47, 14 }
 0x41d   :  { %v14742_v39 = vpop.f32.mrb[68].mxu0  ;;  %9875 = vmatmul.mubr.msk.bf16.gmra.mrb[56].mxu1 %vm8530_vm7, %v17701_v27  ;;  %vm17715_vm7 = vnez %v17714_v16  ;;  %v17742_v27 = vld [vmem:[#allocation194_spill] sm:$0xff] }
 0x41e   :  { %v14744_v62 = vpop.f32.mrb[69].mxu0  ;;  %9878 = vmatprep.mubr.msk.bf16.mxu1 %vm8533_vm14, %v17702_v46  ;;  %vm6532_vm14 = vmand %vm17716_vm11, %vm17715_vm7  ;;  %vm17730_vm7 = vnez %v17729_v21  ;;  %vm17731_vm11 = vcmp.le.s32.totalorder %v17561_v0, 14  ;;  %v17737_v0 = vld [vmem:[#allocation209_spill] sm:$0xff] }
 0x41f   :  { %v14747_v31 = vpop.f32.mrb[70].mxu0  ;;  %vm8542_vm15 = vmpackc.low %vm6532_vm14, %vm17721_vm10 }
 0x420   :  { %v14750_v12 = vpop.f32.mrb[71].mxu0  ;;  %vm6538_vm14 = vmand %vm17731_vm11, %vm17730_vm7 }
 0x421   :  { %vm8551_vm10 = vmpackc.low %vm6538_vm14, %vm17734_vm9  ;;  %vm17747_vm14 = vcmp.le.s32.totalorder %v17388_v25, 14 }
 0x425   :  { %v14764_v35 = vpop.f32.mrb[72].mxu0  ;;  %9879 = vmatmul.mubr.msk.bf16.gmra.mrb[60].mxu1 %vm8536_vm12, %v17712_v37  ;;  %vm17727_vm12 = vnez %v17726_v6 }
 0x426   :  { %v14766_v8 = vpop.f32.mrb[73].mxu0  ;;  %9882 = vmatprep.mubr.msk.bf16.mxu1 %vm8539_vm2, %v17713_v18  ;;  %vm6536_vm2 = vmand %vm17728_vm6, %vm17727_vm12  ;;  %vm17741_vm6 = vcmp.le.s32.totalorder %v17373_v2, 14 }
 0x427   :  { %v14769_v53 = vpop.f32.mrb[74].mxu0  ;;  %vm8548_vm3 = vmpackc.low %vm6536_vm2, %vm17732_vm4  ;;  %vm7328_vm4 = vcmask 523264  }
 0x428   :  { %v14772_v42 = vpop.f32.mrb[75].mxu0  ;;  %9062 = vmatprep.mubr.msk.f32.mxu0 %vm7328_vm4, %v14898_v56 }
 0x42d   :  { %v14786_v36 = vpop.f32.mrb[76].mxu0  ;;  %9883 = vmatmul.mubr.msk.bf16.gmra.mrb[0].mxu1 %vm8542_vm15, %v17724_v9  ;;  %vm17738_vm15 = vnez %v17737_v0 }
 0x42e   :  { %v14788_v51 = vpop.f32.mrb[77].mxu0  ;;  %9886 = vmatprep.mubr.msk.bf16.mxu1 %vm8545_vm0, %v17725_v22  ;;  %vm6540_vm5 = vmand %vm1090_vm8, %vm17738_vm15  ;;  %vm17740_vm0 = vcmp.le.s32.totalorder %v17370_v40, 14  ;;  %v17744_v40 = vld [vmem:[#allocation213_spill] sm:$0xff]  ;;  %vm17746_vm8 = vcmp.le.s32.totalorder %v17385_v13, 14 }
 0x42f   :  { %v14791_v50 = vpop.f32.mrb[78].mxu0  ;;  %vm6542_vm12 = vmand %vm17740_vm0, %vm17369_vm13  ;;  %vm17745_vm13 = vnez %v17744_v40 }
 0x430   :  { %v14794_v24 = vpop.f32.mrb[79].mxu0  ;;  %vm8554_vm2 = vmpackc.low %vm6540_vm5, %vm17741_vm6 }
 0x431   :  { %vm8557_vm7 = vmpackc.low %vm6542_vm12, %vm1091_vm1 }
 0x432   :  { %vm6544_vm11 = vmand %vm17746_vm8, %vm17745_vm13 }
 0x433   :  { %vm8560_vm1 = vmpackc.low %vm6544_vm11, %vm17747_vm14 }
 0x435   :  { %v14808_v17 = vpop.f32.mrb[80].mxu0  ;;  %9887 = vmatmul.mubr.msk.bf16.gmra.mrb[4].mxu1 %vm8548_vm3, %v17735_v29  ;;  %vm14966_vm3 = vmpackc.low %vm7328_vm4, %vm7328_vm4 }
 0x436   :  { %v14810_v54 = vpop.f32.mrb[81].mxu0  ;;  %9890 = vmatprep.mubr.msk.bf16.mxu1 %vm8551_vm10, %v17736_v26 }
 0x437   :  { %v14813_v23 = vpop.f32.mrb[82].mxu0 }
 0x438   :  { %v14816_v43 = vpop.f32.mrb[83].mxu0 }
 0x43d   :  { %v14830_v5 = vpop.f32.mrb[84].mxu0  ;;  %9891 = vmatmul.mubr.msk.bf16.gmra.mrb[8].mxu1 %vm8554_vm2, %v17742_v27 }
 0x43e   :  { %v14832_v48 = vpop.f32.mrb[85].mxu0  ;;  %9894 = vmatprep.mubr.msk.bf16.mxu1 %vm8557_vm7, %v17743_v34 }
 0x43f   :  { %v14835_v46 = vpop.f32.mrb[86].mxu0 }
 0x440   :  { %v14838_v4 = vpop.f32.mrb[87].mxu0 }
 0x445   :  { %v14846_v2 = vpop.f32.mrb[88].mxu0  ;;  %9895 = vmatmul.mubr.msk.bf16.gmra.mrb[12].mxu1 %vm8560_vm1, %v17748_v59 }
 0x446   :  { %v14848_v38 = vpop.f32.mrb[89].mxu0 }
 0x447   :  { %v14851_v10 = vpop.f32.mrb[90].mxu0 }
 0x448   :  { %v14853_v37 = vpop.f32.mrb[91].mxu0 }
 0x44d   :  { %v14855_v18 = vpop.f32.mrb[92].mxu0 }
 0x44e   :  { %v14857_v16 = vpop.f32.mrb[93].mxu0 }
 0x44f   :  { %v14859_v7 = vpop.f32.mrb[94].mxu0 }
 0x450   :  { %v14861_v13 = vpop.f32.mrb[95].mxu0 }
 0x455   :  { %v14863_v25 = vpop.f32.mrb[96].mxu0 }
 0x456   :  { %v14865_v60 = vpop.f32.mrb[97].mxu0 }
 0x457   :  { %v14867_v49 = vpop.f32.mrb[98].mxu0 }
 0x458   :  { %v14869_v9 = vpop.f32.mrb[99].mxu0 }
 0x45d   :  { %v14871_v22 = vpop.f32.mrb[100].mxu0 }
 0x45e   :  { %v14873_v6 = vpop.f32.mrb[101].mxu0 }
 0x45f   :  { %v14875_v21 = vpop.f32.mrb[102].mxu0 }
 0x460   :  { %v14877_v47 = vpop.f32.mrb[103].mxu0 }
 0x465   :  { %v14879_v29 = vpop.f32.mrb[104].mxu0 }
 0x466   :  { %v14881_v26 = vpop.f32.mrb[105].mxu0 }
 0x467   :  { %v14883_v0 = vpop.f32.mrb[106].mxu0 }
 0x468   :  { %v14885_v41 = vpop.f32.mrb[107].mxu0 }
 0x46d   :  { %v14887_v27 = vpop.f32.mrb[108].mxu0 }
 0x46e   :  { %v14889_v34 = vpop.f32.mrb[109].mxu0 }
 0x46f   :  { %v14891_v40 = vpop.f32.mrb[110].mxu0 }
 0x470   :  { %v14893_v59 = vpop.f32.mrb[111].mxu0 }
 0x4a0   :  { %v9836_v33 = vpop.f32.mrb[16].mxu1 }
 0x4a1   :  { %v10010_v55 = vadd.f32 %v9836_v33, %v14720_v1  ;;  %v6867_v20 = vpop.f32.mrb[17].mxu1 }
 0x4a2   :  { %v10011_v57 = vadd.f32 %v6867_v20, %v14722_v19  ;;  %v9837_v30 = vpop.f32.mrb[18].mxu1 }
 0x4a3   :  { %v7195_v3 = vadd.f32 %v10010_v55, %v14905_v44  ;;  %v10012_v11 = vadd.f32 %v9837_v30, %v14725_v14  ;;  %v6870_v28 = vpop.f32.mrb[19].mxu1 }
 0x4a4   :  { %v7193_v32 = vadd.f32 %v10011_v57, %v14905_v44  ;;  %v10013_v56 = vadd.f32 %v6870_v28, %v14728_v52 }
 0x4a5   :  { %v7196_v45 = vadd.f32 %v10012_v11, %v14905_v44  ;;  %v7259_v15 = vmax.f32 %v7195_v3, 0.0 }
 0x4a6   :  { %v7194_v61 = vadd.f32 %v10013_v56, %v14905_v44  ;;  %v7257_v33 = vmax.f32 %v7193_v32, 0.0 }
 0x4a7   :  { %v7260_v63 = vmax.f32 %v7196_v45, 0.0 }
 0x4a8   :  { %v7258_v1 = vmax.f32 %v7194_v61, 0.0  ;;  %v9840_v58 = vpop.f32.mrb[20].mxu1 }
 0x4a9   :  { %v14915_v20 = vpack.c.bf16 %v7260_v63, %v7259_v15  ;;  %v10014_v55 = vadd.f32 %v9840_v58, %v14742_v39  ;;  %v6883_v19 = vpop.f32.mrb[21].mxu1 }
 0x4aa   :  { %v14918_v30 = vpack.c.bf16 %v7258_v1, %v7257_v33  ;;  %v10015_v57 = vadd.f32 %v6883_v19, %v14744_v62  ;;  %v9841_v14 = vpop.f32.mrb[22].mxu1 }
 0x4ab   :  { %v7199_v28 = vadd.f32 %v10014_v55, %v14905_v44  ;;  %v10016_v11 = vadd.f32 %v9841_v14, %v14747_v31  ;;  %v6886_v56 = vpop.f32.mrb[23].mxu1 }
 0x4ac   :  { %v7197_v45 = vadd.f32 %v10015_v57, %v14905_v44  ;;  %v10017_v61 = vadd.f32 %v6886_v56, %v14750_v12 }
 0x4ad   :  { %v7200_v63 = vadd.f32 %v10016_v11, %v14905_v44  ;;  %v7263_v58 = vmax.f32 %v7199_v28, 0.0 }
 0x4ae   :  { %v7198_v15 = vadd.f32 %v10017_v61, %v14905_v44  ;;  %v7261_v3 = vmax.f32 %v7197_v45, 0.0 }
 0x4af   :  { %v7264_v32 = vmax.f32 %v7200_v63, 0.0 }
 0x4b0   :  { %v7262_v52 = vmax.f32 %v7198_v15, 0.0  ;;  %v9844_v39 = vpop.f32.mrb[24].mxu1 }
 0x4b1   :  { %v14927_v62 = vpack.c.bf16 %v7264_v32, %v7263_v58  ;;  %v10018_v33 = vadd.f32 %v9844_v39, %v14764_v35  ;;  %v6899_v1 = vpop.f32.mrb[25].mxu1 }
 0x4b2   :  { %v14930_v31 = vpack.c.bf16 %v7262_v52, %v7261_v3  ;;  %v10019_v55 = vadd.f32 %v6899_v1, %v14766_v8  ;;  %v9845_v19 = vpop.f32.mrb[26].mxu1 }
 0x4b3   :  { %v7203_v12 = vadd.f32 %v10018_v33, %v14905_v44  ;;  %v10020_v57 = vadd.f32 %v9845_v19, %v14769_v53  ;;  %v6902_v14 = vpop.f32.mrb[27].mxu1 }
 0x4b4   :  { %v7201_v28 = vadd.f32 %v10019_v55, %v14905_v44  ;;  %v10021_v11 = vadd.f32 %v6902_v14, %v14772_v42 }
 0x4b5   :  { %v7204_v56 = vadd.f32 %v10020_v57, %v14905_v44  ;;  %v7267_v35 = vmax.f32 %v7203_v12, 0.0 }
 0x4b6   :  { %v7202_v45 = vadd.f32 %v10021_v11, %v14905_v44  ;;  %v7265_v63 = vmax.f32 %v7201_v28, 0.0 }
 0x4b7   :  { %v7268_v61 = vmax.f32 %v7204_v56, 0.0 }
 0x4b8   :  { %v7266_v15 = vmax.f32 %v7202_v45, 0.0  ;;  %v9848_v58 = vpop.f32.mrb[28].mxu1 }
 0x4b9   :  { %v14939_v8 = vpack.c.bf16 %v7268_v61, %v7267_v35  ;;  %v10022_v32 = vadd.f32 %v9848_v58, %v14786_v36  ;;  %v6915_v3 = vpop.f32.mrb[29].mxu1 }
 0x4ba   :  { %v14942_v53 = vpack.c.bf16 %v7266_v15, %v7265_v63  ;;  %v10023_v52 = vadd.f32 %v6915_v3, %v14788_v51  ;;  %v9849_v39 = vpop.f32.mrb[30].mxu1 }
 0x4bb   :  { %v7207_v42 = vadd.f32 %v10022_v32, %v14905_v44  ;;  %v10024_v33 = vadd.f32 %v9849_v39, %v14791_v50  ;;  %v6918_v1 = vpop.f32.mrb[31].mxu1 }
 0x4bc   :  { %v7205_v55 = vadd.f32 %v10023_v52, %v14905_v44  ;;  %v10025_v19 = vadd.f32 %v6918_v1, %v14794_v24 }
 0x4bd   :  { %v7208_v12 = vadd.f32 %v10024_v33, %v14905_v44  ;;  %v7271_v36 = vmax.f32 %v7207_v42, 0.0 }
 0x4be   :  { %v7206_v57 = vadd.f32 %v10025_v19, %v14905_v44  ;;  %v7269_v28 = vmax.f32 %v7205_v55, 0.0 }
 0x4bf   :  { %v7272_v14 = vmax.f32 %v7208_v12, 0.0 }
 0x4c0   :  { %v7270_v11 = vmax.f32 %v7206_v57, 0.0  ;;  %v9852_v56 = vpop.f32.mrb[32].mxu1 }
 0x4c1   :  { %v14951_v51 = vpack.c.bf16 %v7272_v14, %v7271_v36  ;;  %v10026_v45 = vadd.f32 %v9852_v56, %v14808_v17  ;;  %v6931_v35 = vpop.f32.mrb[33].mxu1 }
 0x4c2   :  { %v14954_v50 = vpack.c.bf16 %v7270_v11, %v7269_v28  ;;  %v10027_v61 = vadd.f32 %v6931_v35, %v14810_v54  ;;  %v9853_v63 = vpop.f32.mrb[34].mxu1 }
 0x4c3   :  { %v7211_v24 = vadd.f32 %v10026_v45, %v14905_v44  ;;  %v10028_v15 = vadd.f32 %v9853_v63, %v14813_v23  ;;  %v6934_v58 = vpop.f32.mrb[35].mxu1 }
 0x4c4   :  { %v7209_v32 = vadd.f32 %v10027_v61, %v14905_v44  ;;  %v10029_v3 = vadd.f32 %v6934_v58, %v14816_v43 }
 0x4c5   :  { %v7212_v52 = vadd.f32 %v10028_v15, %v14905_v44  ;;  %v7275_v17 = vmax.f32 %v7211_v24, 0.0 }
 0x4c6   :  { %v7210_v39 = vadd.f32 %v10029_v3, %v14905_v44  ;;  %v7273_v33 = vmax.f32 %v7209_v32, 0.0 }
 0x4c7   :  { %v7276_v42 = vmax.f32 %v7212_v52, 0.0 }
 0x4c8   :  { %v7274_v1 = vmax.f32 %v7210_v39, 0.0  ;;  %v9856_v55 = vpop.f32.mrb[36].mxu1 }
 0x4c9   :  { %v9904_v54 = vpack.c.bf16 %v7276_v42, %v7275_v17  ;;  %v10030_v19 = vadd.f32 %v9856_v55, %v14830_v5  ;;  %v6947_v12 = vpop.f32.mrb[37].mxu1 }
 0x4ca   :  { %v9898_v43 = vpack.c.bf16 %v7274_v1, %v7273_v33  ;;  %v10031_v57 = vadd.f32 %v6947_v12, %v14832_v48  ;;  %v9857_v36 = vpop.f32.mrb[38].mxu1  ;;  %v10646_v48 = vmov 0  }
 0x4cb   :  { %v7215_v14 = vadd.f32 %v10030_v19, %v14905_v44  ;;  %v10032_v28 = vadd.f32 %v9857_v36, %v14835_v46  ;;  %v6950_v11 = vpop.f32.mrb[39].mxu1  ;;  %10524 = vset.pattern.permute.xlu0 %v10646_v48  ;;  %v7322_v46 = vld [vmem:[%s15195_s6] sm:$0xff] }
 0x4cc   :  { %v7213_v56 = vadd.f32 %v10031_v57, %v14905_v44  ;;  %v10033_v5 = vadd.f32 %v6950_v11, %v14838_v4  ;;  %9900 = vmatprep.subr.msk.bf16.mxu0 %vm14966_vm3, %v9898_v43  ;;  %7325 = vperm.xlu0 %10524, %v7322_v46  }
 0x4cd   :  { %v7216_v45 = vadd.f32 %v10032_v28, %v14905_v44  ;;  %9903 = vmatpush3.bf16.xpose.msk.msra.mxu0 %vm14966_vm3, %v14918_v30  ;;  %v7279_v4 = vmax.f32 %v7215_v14, 0.0 }
 0x4ce   :  { %v7214_v35 = vadd.f32 %v10033_v5, %v14905_v44  ;;  %9906 = vmatprep.subr.msk.bf16.mxu0 %vm14966_vm3, %v9904_v54  ;;  %v7277_v63 = vmax.f32 %v7213_v56, 0.0 }
 0x4cf   :  { %v7280_v61 = vmax.f32 %v7216_v45, 0.0 }
 0x4d0   :  { %v7278_v24 = vmax.f32 %v7214_v35, 0.0  ;;  %v9860_v15 = vpop.f32.mrb[40].mxu1 }
 0x4d1   :  { %v9916_v58 = vpack.c.bf16 %v7280_v61, %v7279_v4  ;;  %v10034_v30 = vadd.f32 %v9860_v15, %v14846_v2  ;;  %v6963_v32 = vpop.f32.mrb[41].mxu1 }
 0x4d2   :  { %v9910_v3 = vpack.c.bf16 %v7278_v24, %v7277_v63  ;;  %v10035_v52 = vadd.f32 %v6963_v32, %v14848_v38  ;;  %v9861_v39 = vpop.f32.mrb[42].mxu1 }
 0x4d3   :  { %v7219_v17 = vadd.f32 %v10034_v30, %v14905_v44  ;;  %v10036_v42 = vadd.f32 %v9861_v39, %v14851_v10  ;;  %v6966_v33 = vpop.f32.mrb[43].mxu1 }
 0x4d4   :  { %v7217_v1 = vadd.f32 %v10035_v52, %v14905_v44  ;;  %v10037_v55 = vadd.f32 %v6966_v33, %v14853_v37 }
 0x4d5   :  { %v7220_v54 = vadd.f32 %v10036_v42, %v14905_v44  ;;  %9909 = vmatpush3.bf16.xpose.msk.msra.mxu0 %vm14966_vm3, %v14915_v20  ;;  %v7283_v38 = vmax.f32 %v7219_v17, 0.0 }
 0x4d6   :  { %v7218_v2 = vadd.f32 %v10037_v55, %v14905_v44  ;;  %9912 = vmatprep.subr.msk.bf16.mxu0 %vm14966_vm3, %v9910_v3  ;;  %v7281_v12 = vmax.f32 %v7217_v1, 0.0 }
 0x4d7   :  { %v7284_v19 = vmax.f32 %v7220_v54, 0.0 }
 0x4d8   :  { %v7282_v10 = vmax.f32 %v7218_v2, 0.0  ;;  %v9864_v43 = vpop.f32.mrb[44].mxu1 }
 0x4d9   :  { %v9928_v57 = vpack.c.bf16 %v7284_v19, %v7283_v38  ;;  %v10038_v36 = vadd.f32 %v9864_v43, %v14855_v18  ;;  %v6979_v37 = vpop.f32.mrb[45].mxu1 }
 0x4da   :  { %v9922_v14 = vpack.c.bf16 %v7282_v10, %v7281_v12  ;;  %v10039_v28 = vadd.f32 %v6979_v37, %v14857_v16  ;;  %v9865_v11 = vpop.f32.mrb[46].mxu1 }
 0x4db   :  { %v7223_v20 = vadd.f32 %v10038_v36, %v14905_v44  ;;  %v10040_v56 = vadd.f32 %v9865_v11, %v14859_v7  ;;  %v6982_v5 = vpop.f32.mrb[47].mxu1 }
 0x4dc   :  { %v7221_v45 = vadd.f32 %v10039_v28, %v14905_v44  ;;  %v10041_v48 = vadd.f32 %v6982_v5, %v14861_v13 }
 0x4dd   :  { %v7224_v46 = vadd.f32 %v10040_v56, %v14905_v44  ;;  %9915 = vmatpush3.bf16.xpose.msk.msra.mxu0 %vm14966_vm3, %v14930_v31  ;;  %v7287_v16 = vmax.f32 %v7223_v20, 0.0 }
 0x4de   :  { %v7222_v18 = vadd.f32 %v10041_v48, %v14905_v44  ;;  %9918 = vmatprep.subr.msk.bf16.mxu0 %vm14966_vm3, %v9916_v58  ;;  %v7285_v4 = vmax.f32 %v7221_v45, 0.0 }
 0x4df   :  { %v7288_v35 = vmax.f32 %v7224_v46, 0.0 }
 0x4e0   :  { %v7286_v7 = vmax.f32 %v7222_v18, 0.0  ;;  %v9868_v61 = vpop.f32.mrb[48].mxu1 }
 0x4e1   :  { %v15013_v63 = vpack.c.bf16 %v7288_v35, %v7287_v16  ;;  %v10042_v13 = vadd.f32 %v9868_v61, %v14863_v25  ;;  %v6995_v24 = vpop.f32.mrb[49].mxu1 }
 0x4e2   :  { %v9934_v15 = vpack.c.bf16 %v7286_v7, %v7285_v4  ;;  %v10043_v30 = vadd.f32 %v6995_v24, %v14865_v60  ;;  %v9869_v32 = vpop.f32.mrb[50].mxu1 }
 0x4e3   :  { %v7227_v31 = vadd.f32 %v10042_v13, %v14905_v44  ;;  %v10044_v3 = vadd.f32 %v9869_v32, %v14867_v49  ;;  %v6998_v52 = vpop.f32.mrb[51].mxu1 }
 0x4e4   :  { %v7225_v58 = vadd.f32 %v10043_v30, %v14905_v44  ;;  %v10045_v39 = vadd.f32 %v6998_v52, %v14869_v9 }
 0x4e5   :  { %v7228_v17 = vadd.f32 %v10044_v3, %v14905_v44  ;;  %9921 = vmatpush3.bf16.xpose.msk.msra.mxu0 %vm14966_vm3, %v14927_v62  ;;  %v7291_v60 = vmax.f32 %v7227_v31, 0.0 }
 0x4e6   :  { %v7226_v25 = vadd.f32 %v10045_v39, %v14905_v44  ;;  %9924 = vmatprep.subr.msk.bf16.mxu0 %vm14966_vm3, %v9922_v14  ;;  %v7289_v33 = vmax.f32 %v7225_v58, 0.0 }
 0x4e7   :  { %v7292_v42 = vmax.f32 %v7228_v17, 0.0 }
 0x4e8   :  { %v7290_v49 = vmax.f32 %v7226_v25, 0.0  ;;  %v9872_v1 = vpop.f32.mrb[52].mxu1 }
 0x4e9   :  { %v15028_v55 = vpack.c.bf16 %v7292_v42, %v7291_v60  ;;  %v10046_v9 = vadd.f32 %v9872_v1, %v14871_v22  ;;  %v7011_v54 = vpop.f32.mrb[53].mxu1 }
 0x4ea   :  { %v15031_v2 = vpack.c.bf16 %v7290_v49, %v7289_v33  ;;  %v10047_v38 = vadd.f32 %v7011_v54, %v14873_v6  ;;  %v9873_v62 = vpop.f32.mrb[54].mxu1 }
 0x4eb   :  { %v7231_v19 = vadd.f32 %v10046_v9, %v14905_v44  ;;  %v10048_v12 = vadd.f32 %v9873_v62, %v14875_v21  ;;  %v7014_v10 = vpop.f32.mrb[55].mxu1  ;;  %v17753_v9 = vld [vmem:[#allocation50_spill] sm:$0xff]  ;;  %v17754_v62 = vld [vmem:[#allocation87_spill] sm:$0xff] }
 0x4ec   :  { %v7229_v43 = vadd.f32 %v10047_v38, %v14905_v44  ;;  %v10049_v36 = vadd.f32 %v7014_v10, %v14877_v47  ;;  %v17755_v10 = vld [vmem:[#allocation10_spill] sm:$0xff] }
 0x4ed   :  { %v7232_v37 = vadd.f32 %v10048_v12, %v14905_v44  ;;  %9927 = vmatpush3.bf16.xpose.msk.msra.mxu0 %vm14966_vm3, %v14942_v53  ;;  %v7295_v6 = vmax.f32 %v7231_v19, 0.0 }
 0x4ee   :  { %v7230_v22 = vadd.f32 %v10049_v36, %v14905_v44  ;;  %9930 = vmatprep.subr.msk.bf16.mxu0 %vm14966_vm3, %v9928_v57  ;;  %v7293_v28 = vmax.f32 %v7229_v43, 0.0 }
 0x4ef   :  { %v7296_v14 = vmax.f32 %v7232_v37, 0.0 }
 0x4f0   :  { %v7294_v21 = vmax.f32 %v7230_v22, 0.0  ;;  %v9876_v11 = vpop.f32.mrb[56].mxu1 }
 0x4f1   :  { %v15045_v20 = vpack.c.bf16 %v7296_v14, %v7295_v6  ;;  %v10050_v47 = vadd.f32 %v9876_v11, %v14879_v29  ;;  %v7027_v56 = vpop.f32.mrb[57].mxu1 }
 0x4f2   :  { %v15048_v5 = vpack.c.bf16 %v7294_v21, %v7293_v28  ;;  %v10051_v45 = vadd.f32 %v7027_v56, %v14881_v26  ;;  %v9877_v53 = vpop.f32.mrb[58].mxu1 }
 0x4f3   :  { %v7235_v48 = vadd.f32 %v10050_v47, %v14905_v44  ;;  %v10052_v46 = vadd.f32 %v9877_v53, %v14883_v0  ;;  %v7030_v57 = vpop.f32.mrb[59].mxu1  ;;  %v17756_v47 = vld [vmem:[#allocation86_spill] sm:$0xff] }
 0x4f4   :  { %v7233_v18 = vadd.f32 %v10051_v45, %v14905_v44  ;;  %v10053_v16 = vadd.f32 %v7030_v57, %v14885_v41 }
 0x4f5   :  { %v7236_v35 = vadd.f32 %v10052_v46, %v14905_v44  ;;  %9933 = vmatpush3.bf16.xpose.msk.msra.mxu0 %vm14966_vm3, %v14939_v8  ;;  %v7299_v26 = vmax.f32 %v7235_v48, 0.0  ;;  %v17757_v48 = vld [vmem:[#allocation53_spill] sm:$0xff] }
 0x4f6   :  { %v7234_v29 = vadd.f32 %v10053_v16, %v14905_v44  ;;  %9936 = vmatprep.subr.msk.bf16.mxu0 %vm14966_vm3, %v9934_v15  ;;  %v7297_v7 = vmax.f32 %v7233_v18, 0.0  ;;  %v17758_v16 = vld [vmem:[#allocation96_spill] sm:$0xff] }
 0x4f7   :  { %v7300_v4 = vmax.f32 %v7236_v35, 0.0 }
 0x4f8   :  { %v7298_v0 = vmax.f32 %v7234_v29, 0.0  ;;  %v9880_v61 = vpop.f32.mrb[60].mxu1 }
 0x4f9   :  { %v15062_v13 = vpack.c.bf16 %v7300_v4, %v7299_v26  ;;  %v10054_v41 = vadd.f32 %v9880_v61, %v14887_v27  ;;  %v7043_v24 = vpop.f32.mrb[61].mxu1  ;;  %v17759_v26 = vld [vmem:[#allocation67_spill] sm:$0xff] }
 0x4fa   :  { %v15065_v30 = vpack.c.bf16 %v7298_v0, %v7297_v7  ;;  %v10055_v32 = vadd.f32 %v7043_v24, %v14889_v34  ;;  %v9881_v8 = vpop.f32.mrb[62].mxu1  ;;  %v17760_v7 = vld [vmem:[#allocation22_spill] sm:$0xff] }
 0x4fb   :  { %v7239_v31 = vadd.f32 %v10054_v41, %v14905_v44  ;;  %v10056_v3 = vadd.f32 %v9881_v8, %v14891_v40  ;;  %v7046_v15 = vpop.f32.mrb[63].mxu1 }
 0x4fc   :  { %v7237_v52 = vadd.f32 %v10055_v32, %v14905_v44  ;;  %v10057_v58 = vadd.f32 %v7046_v15, %v14893_v59  ;;  %v17752_v59 = vld [vmem:[#allocation40_spill] sm:$0xff]  ;;  %v17761_v15 = vld [vmem:[#allocation102_spill] sm:$0xff] }
 0x4fd   :  { %v7240_v39 = vadd.f32 %v10056_v3, %v14905_v44  ;;  %9939 = vmatpush3.bf16.xpose.msk.msra.mxu0 %vm14966_vm3, %v14954_v50  ;;  %v7303_v34 = vmax.f32 %v7239_v31, 0.0 }
 0x4fe   :  { %v7238_v27 = vadd.f32 %v10057_v58, %v14905_v44  ;;  %9942 = vmatprep.subr.msk.bf16.mxu0 %vm14966_vm3, %v15013_v63  ;;  %v7301_v40 = vmax.f32 %v7237_v52, 0.0 }
 0x4ff   :  { %v7304_v17 = vmax.f32 %v7240_v39, 0.0 }
 0x500   :  { %v7302_v25 = vmax.f32 %v7238_v27, 0.0  ;;  %v9884_v60 = vpop.f32.mrb[0].mxu1  ;;  %v17762_v27 = vld [vmem:[#allocation114_spill] sm:$0xff] }
 0x501   :  { %v15080_v42 = vpack.c.bf16 %v7304_v17, %v7303_v34  ;;  %v10058_v33 = vadd.f32 %v9884_v60, %v17752_v59  ;;  %v7059_v49 = vpop.f32.mrb[1].mxu1 }
 0x502   :  { %v15083_v1 = vpack.c.bf16 %v7302_v25, %v7301_v40  ;;  %v10059_v50 = vadd.f32 %v7059_v49, %v17753_v9  ;;  %v9885_v54 = vpop.f32.mrb[2].mxu1  ;;  %v17763_v40 = vld [vmem:[#allocation16_spill] sm:$0xff] }
 0x503   :  { %v7243_v38 = vadd.f32 %v10058_v33, %v14905_v44  ;;  %v10060_v19 = vadd.f32 %v9885_v54, %v17754_v62  ;;  %v7062_v63 = vpop.f32.mrb[3].mxu1  ;;  %v17764_v33 = vld [vmem:[#allocation99_spill] sm:$0xff] }
 0x504   :  { %v7241_v12 = vadd.f32 %v10059_v50, %v14905_v44  ;;  %v10061_v43 = vadd.f32 %v7062_v63, %v17755_v10  ;;  %v17765_v10 = vld [vmem:[#allocation71_spill] sm:$0xff] }
 0x505   :  { %v7244_v36 = vadd.f32 %v10060_v19, %v14905_v44  ;;  %9945 = vmatpush3.bf16.xpose.msk.msra.mxu0 %vm14966_vm3, %v14951_v51  ;;  %v7307_v22 = vmax.f32 %v7243_v38, 0.0 }
 0x506   :  { %v7242_v37 = vadd.f32 %v10061_v43, %v14905_v44  ;;  %v7305_v14 = vmax.f32 %v7241_v12, 0.0 }
 0x507   :  { %v7308_v6 = vmax.f32 %v7244_v36, 0.0 }
 0x508   :  { %v7306_v28 = vmax.f32 %v7242_v37, 0.0  ;;  %v9888_v21 = vpop.f32.mrb[4].mxu1 }
 0x509   :  { %v9952_v11 = vpack.c.bf16 %v7308_v6, %v7307_v22  ;;  %v10062_v56 = vadd.f32 %v9888_v21, %v17756_v47  ;;  %v7075_v45 = vpop.f32.mrb[5].mxu1  ;;  %v17766_v22 = vld [vmem:[#allocation110_spill] sm:$0xff] }
 0x50a   :  { %v9946_v53 = vpack.c.bf16 %v7306_v28, %v7305_v14  ;;  %v10063_v46 = vadd.f32 %v7075_v45, %v17757_v48  ;;  %v9889_v57 = vpop.f32.mrb[6].mxu1  ;;  %v17767_v28 = vld [vmem:[#allocation79_spill] sm:$0xff] }
 0x50b   :  { %v7247_v18 = vadd.f32 %v10062_v56, %v14905_v44  ;;  %v10064_v35 = vadd.f32 %v9889_v57, %v17758_v16  ;;  %v7078_v51 = vpop.f32.mrb[7].mxu1  ;;  %v17768_v56 = vld [vmem:[#allocation116_spill] sm:$0xff] }
 0x50c   :  { %v7245_v29 = vadd.f32 %v10063_v46, %v14905_v44  ;;  %v10065_v4 = vadd.f32 %v7078_v51, %v17759_v26  ;;  %9948 = vmatprep.subr.msk.bf16.mxu0 %vm14966_vm3, %v9946_v53  ;;  %9063 = vmatmul.mubr.msk.f32.vlgmr.msra.gmra.mrb[128].mxu0 %vm7328_vm4, %v17760_v7 }
 0x50d   :  { %v7248_v0 = vadd.f32 %v10064_v35, %v14905_v44  ;;  %9951 = vmatpush3.bf16.xpose.msk.msra.mxu0 %vm14966_vm3, %v15031_v2  ;;  %9096 = vmatprep.mubr.msk.f32.mxu0 %vm7328_vm4, %v17760_v7  ;;  %v7311_v41 = vmax.f32 %v7247_v18, 0.0 }
 0x50e   :  { %v7246_v61 = vadd.f32 %v10065_v4, %v14905_v44  ;;  %9954 = vmatprep.subr.msk.bf16.mxu0 %vm14966_vm3, %v9952_v11  ;;  %v7309_v32 = vmax.f32 %v7245_v29, 0.0 }
 0x50f   :  { %v7312_v24 = vmax.f32 %v7248_v0, 0.0 }
 0x510   :  { %v7310_v8 = vmax.f32 %v7246_v61, 0.0  ;;  %v9892_v31 = vpop.f32.mrb[8].mxu1  ;;  %v7669_v61 = vld [vmem:[%s15196_s7 + $0x18] sm:$0xff] }
 0x511   :  { %v9964_v3 = vpack.c.bf16 %v7312_v24, %v7311_v41  ;;  %v10066_v52 = vadd.f32 %v9892_v31, %v17761_v15  ;;  %v7091_v58 = vpop.f32.mrb[9].mxu1 }
 0x512   :  { %v9958_v39 = vpack.c.bf16 %v7310_v8, %v7309_v32  ;;  %v10067_v2 = vadd.f32 %v7091_v58, %v17762_v27  ;;  %v9893_v34 = vpop.f32.mrb[10].mxu1 }
 0x513   :  { %v7251_v17 = vadd.f32 %v10066_v52, %v14905_v44  ;;  %v10068_v25 = vadd.f32 %v9893_v34, %v17763_v40  ;;  %v7094_v60 = vpop.f32.mrb[11].mxu1 }
 0x514   :  { %v7249_v59 = vadd.f32 %v10067_v2, %v14905_v44  ;;  %v10069_v49 = vadd.f32 %v7094_v60, %v17764_v33 }
 0x515   :  { %v7252_v9 = vadd.f32 %v10068_v25, %v14905_v44  ;;  %9957 = vmatpush3.bf16.xpose.msk.msra.mxu0 %vm14966_vm3, %v15028_v55  ;;  %v7315_v54 = vmax.f32 %v7251_v17, 0.0 }
 0x516   :  { %v7250_v50 = vadd.f32 %v10069_v49, %v14905_v44  ;;  %9960 = vmatprep.subr.msk.bf16.mxu0 %vm14966_vm3, %v9958_v39  ;;  %v7313_v62 = vmax.f32 %v7249_v59, 0.0 }
 0x517   :  { %v7316_v38 = vmax.f32 %v7252_v9, 0.0 }
 0x518   :  { %v7314_v19 = vmax.f32 %v7250_v50, 0.0  ;;  %v9896_v63 = vpop.f32.mrb[12].mxu1 }
 0x519   :  { %v9976_v12 = vpack.c.bf16 %v7316_v38, %v7315_v54  ;;  %v10070_v43 = vadd.f32 %v9896_v63, %v17765_v10  ;;  %v7107_v36 = vpop.f32.mrb[13].mxu1 }
 0x51a   :  { %v9970_v37 = vpack.c.bf16 %v7314_v19, %v7313_v62  ;;  %v10071_v6 = vadd.f32 %v7107_v36, %v17766_v22  ;;  %v9897_v14 = vpop.f32.mrb[14].mxu1 }
 0x51b   :  { %v7255_v55 = vadd.f32 %v10070_v43, %v14905_v44  ;;  %v10072_v21 = vadd.f32 %v9897_v14, %v17767_v28  ;;  %v7110_v11 = vpop.f32.mrb[15].mxu1 }
 0x51c   :  { %v7253_v47 = vadd.f32 %v10071_v6, %v14905_v44  ;;  %v10073_v45 = vadd.f32 %v7110_v11, %v17768_v56 }
 0x51d   :  { %v7256_v53 = vadd.f32 %v10072_v21, %v14905_v44  ;;  %9963 = vmatpush3.bf16.xpose.msk.msra.mxu0 %vm14966_vm3, %v15048_v5  ;;  %v7319_v46 = vmax.f32 %v7255_v55, 0.0  ;;  %v7666_v5 = vld [vmem:[%s15196_s7] sm:$0xff] }
 0x51e   :  { %v7254_v48 = vadd.f32 %v10073_v45, %v14905_v44  ;;  %9966 = vmatprep.subr.msk.bf16.mxu0 %vm14966_vm3, %v9964_v3  ;;  %v7317_v18 = vmax.f32 %v7253_v47, 0.0 }
 0x51f   :  { %v7320_v57 = vmax.f32 %v7256_v53, 0.0 }
 0x520   :  { %v7318_v16 = vmax.f32 %v7254_v48, 0.0 }
 0x521   :  { %v9988_v35 = vpack.c.bf16 %v7320_v57, %v7319_v46 }
 0x522   :  { %v9982_v51 = vpack.c.bf16 %v7318_v16, %v7317_v18 }
 0x525   :  { %9969 = vmatpush3.bf16.xpose.msk.msra.mxu0 %vm14966_vm3, %v15045_v20 }
 0x526   :  { %9972 = vmatprep.subr.msk.bf16.mxu0 %vm14966_vm3, %v9970_v37 }
 0x52d   :  { %9975 = vmatpush3.bf16.xpose.msk.msra.mxu0 %vm14966_vm3, %v15065_v30 }
 0x52e   :  { %9978 = vmatprep.subr.msk.bf16.mxu0 %vm14966_vm3, %v9976_v12 }
 0x535   :  { %9981 = vmatpush3.bf16.xpose.msk.msra.mxu0 %vm14966_vm3, %v15062_v13 }
 0x536   :  { %9984 = vmatprep.subr.msk.bf16.mxu0 %vm14966_vm3, %v9982_v51 }
 0x53d   :  { %9987 = vmatpush3.bf16.xpose.msk.msra.mxu0 %vm14966_vm3, %v15083_v1  ;;  %v7667_v1 = vld [vmem:[%s15196_s7 + $0x8] sm:$0xff] }
 0x53e   :  { %9990 = vmatprep.subr.msk.bf16.mxu0 %vm14966_vm3, %v9988_v35 }
 0x545   :  { %9993 = vmatpush3.bf16.xpose.msk.msra.mxu0 %vm14966_vm3, %v15080_v42  ;;  %v7668_v42 = vld [vmem:[%s15196_s7 + $0x10] sm:$0xff] }
 0x54b   :  { %v7326_v44 = vpop.permute.xlu0 %7325 }
 0x54c   :  { %9097 = vmatmul.mubr.msk.f32.vlgmr.msra.gmra.mrb[130].mxu0 %vm7328_vm4, %v17760_v7 }
 0x5df   :  { %v7590_v20 = vpop.f32.mrb[128].mxu0 }
 0x5e0   :  { %v7591_v13 = vadd.f32 %v7590_v20, %v7326_v44  ;;  %v7592_v30 = vpop.f32.mrb[129].mxu0 }
 0x5e1   :  { %v7593_v29 = vadd.f32 %v7592_v30, %v7326_v44 }
 0x5e2   :  { %v7670_v26 = vadd.f32 %v7666_v5, %v7591_v13 }
 0x5e3   :  { %v7671_v4 = vadd.f32 %v7667_v1, %v7593_v29 }
 0x5e4   :  { %7674 = vst [vmem:[%s15197_s8] sm:$0xff] %v7670_v26 }
 0x5e5   :  { %7675 = vst [vmem:[%s15197_s8 + $0x8] sm:$0xff] %v7671_v4 }
 0x61f   :  { %v7661_v23 = vpop.f32.mrb[130].mxu0 }
 0x620   :  { %v7662_v7 = vadd.f32 %v7661_v23, %v7326_v44  ;;  %v7663_v0 = vpop.f32.mrb[131].mxu0 }
 0x621   :  { %v7664_v41 = vadd.f32 %v7663_v0, %v7326_v44 }
 0x622   :  { %v7672_v24 = vadd.f32 %v7668_v42, %v7662_v7 }
 0x623   :  { %v7673_v32 = vadd.f32 %v7669_v61, %v7664_v41 }
 0x624   :  { %7676 = vst [vmem:[%s15197_s8 + $0x10] sm:$0xff] %v7672_v24 }
 0x625   :  { %7677 = vst [vmem:[%s15197_s8 + $0x18] sm:$0xff] %v7673_v32 }

</bundles_post_ra>
